<compile_context>
chip_gen: v7x
topology: tpu7x:2x2x1
jax: 0.10.0
libtpu: 0.0.40
codegen_flags: <defaults>
</compile_context>

<pallas_src>
import math
import functools

import jax
import jax.numpy as jnp
from jax.experimental import pallas as pl
from jax.experimental.pallas import tpu as pltpu

EPS = 1e-5  # PyTorch GroupNorm default eps
_CP = pltpu.CompilerParams(dimension_semantics=("parallel",))


# ----------------------------- in-kernel helpers ------------------------------
def _silu(x):
    return x * pl.reciprocal(1.0 + jnp.exp(-x), approx=True)


def _mish(z):
    # mish(z) = z * tanh(softplus(z)) = z * ((1+e^z)^2 - 1) / ((1+e^z)^2 + 1)
    # one EUP exp + one approximate reciprocal; clamp avoids overflow (ratio->1).
    e = jnp.exp(jnp.minimum(z, 20.0))
    n = (1.0 + e) * (1.0 + e)
    return z * (n - 1.0) * pl.reciprocal(n + 1.0, approx=True)


def _taps3(x3):
    """x3: (Bb, T, C) -> (Bb*T, 3C): [x[t-1] | x[t] | x[t+1]], zero padded at edges."""
    Bb, T, C = x3.shape
    z = jnp.zeros((Bb, 1, C), x3.dtype)
    prev = jnp.concatenate([z, x3[:, :T - 1, :]], axis=1)
    nxt = jnp.concatenate([x3[:, 1:, :], z], axis=1)
    return jnp.concatenate([prev, x3, nxt], axis=-1).reshape(Bb * T, 3 * C)


def _conv_k3(x3, w_ref):
    """K=3 'same' conv as ONE matmul. x3: (Bb, T, Cin) f32; w_ref: (3*Cin, Cout) bf16."""
    Bb, T, _ = x3.shape
    xcat = _taps3(x3).astype(w_ref.dtype)               # cast once per operand
    y = jnp.dot(xcat, w_ref[...], preferred_element_type=jnp.float32)
    return y.reshape(Bb, T, w_ref.shape[1])


def _dense(x3, w_ref):
    """1x1 conv / linear over channels. x3: (Bb, T, Cin); w_ref: (Cin, Cout) bf16."""
    Bb, T, Cin = x3.shape
    y = jnp.dot(x3.reshape(Bb * T, Cin).astype(w_ref.dtype), w_ref[...],
                preferred_element_type=jnp.float32)
    return y.reshape(Bb, T, w_ref.shape[1])


def _groupnorm(y3, mcg, mgc, gamma, beta):
    """GroupNorm on (Bb, T, C) slabs (channels on lanes), stats per (element, group).
    mcg: (C, G) group membership, mgc: (G, C) = mcg.T (factored group averaging)."""
    Bb, T, C = y3.shape
    G = mcg.shape[1]
    inv = 1.0 / float(T * (C // G))
    s = jnp.sum(y3, axis=1)                              # (Bb, C)
    sq = jnp.sum(y3 * y3, axis=1)                        # (Bb, C)
    mean = jnp.dot(jnp.dot(s, mcg, preferred_element_type=jnp.float32), mgc,
                   preferred_element_type=jnp.float32) * inv
    msq = jnp.dot(jnp.dot(sq, mcg, preferred_element_type=jnp.float32), mgc,
                  preferred_element_type=jnp.float32) * inv
    var = jnp.maximum(msq - mean * mean, 0.0)            # clamp f32 cancellation
    yn = (y3 - mean[:, None, :]) * jax.lax.rsqrt(var[:, None, :] + EPS)
    return yn * gamma + beta                             # gamma/beta: (1, C)


# --------------------------------- kernels ------------------------------------
def res_block_kernel(*refs, two_input, has_proj):
    """Fused ConditionalResidualBlock1D on a (Bb, T, *) batch block."""
    i = 0
    xa_ref = refs[i]; i += 1
    xr_ref = None
    if two_input:
        xr_ref = refs[i]; i += 1
    cond_ref = refs[i]; i += 1
    wc1a_ref = refs[i]; i += 1
    wc1r_ref = None
    if two_input:
        wc1r_ref = refs[i]; i += 1
    b1_ref, g1_ref, be1_ref, mcg_ref, mgc_ref = refs[i:i + 5]; i += 5
    wfs_ref, bfs_ref, wfb_ref, bfb_ref = refs[i:i + 4]; i += 4
    wc2_ref, b2_ref, g2_ref, be2_ref = refs[i:i + 4]; i += 4
    if has_proj:
        wra_ref = refs[i]; i += 1
        if two_input:
            wrr_ref = refs[i]; i += 1
        br_ref = refs[i]; i += 1
    o_ref = refs[i]

    xa = xa_ref[...]                                     # (Bb, T, Ca) f32
    xr = xr_ref[...] if two_input else None
    mcg = mcg_ref[...]
    mgc = mgc_ref[...]

    # Conv1dBlock #1: conv3 (single matmul, Cin-split when skip is a 2nd input),
    # GroupNorm, Mish.
    y = _conv_k3(xa, wc1a_ref)
    if two_input:
        y += _conv_k3(xr, wc1r_ref)
    y += b1_ref[...]
    h = _mish(_groupnorm(y, mcg, mgc, g1_ref[...], be1_ref[...]))

    # FiLM: cond is already SiLU-activated in the wrapper (hoisted out of blocks).
    cb = cond_ref[...].astype(wfs_ref.dtype)             # (Bb, cond_dim)
    scale = jnp.dot(cb, wfs_ref[...], preferred_element_type=jnp.float32) + bfs_ref[...]
    bias = jnp.dot(cb, wfb_ref[...], preferred_element_type=jnp.float32) + bfb_ref[...]
    h = h * (scale[:, None, :] + 1.0) + bias[:, None, :]

    # Conv1dBlock #2 (padding rows built in VMEM, no HBM round trip).
    y2 = _conv_k3(h, wc2_ref) + b2_ref[...]
    h2 = _mish(_groupnorm(y2, mcg, mgc, g2_ref[...], be2_ref[...]))

    # Residual: 1x1 conv projection (Cin-split) or identity.
    if has_proj:
        res = _dense(xa, wra_ref)
        if two_input:
            res += _dense(xr, wrr_ref)
        res += br_ref[...]
    else:
        res = jnp.concatenate([xa, xr], axis=-1) if two_input else xa
    o_ref[...] = h2 + res


def time_mlp_kernel(emb_ref, w1_ref, b1_ref, w2_ref, b2_ref, o_ref):
    """Linear -> SiLU -> Linear of the diffusion step encoder, fused."""
    h = jnp.dot(emb_ref[...].astype(w1_ref.dtype), w1_ref[...],
                preferred_element_type=jnp.float32) + b1_ref[...]
    h = _silu(h)
    o_ref[...] = jnp.dot(h.astype(w2_ref.dtype), w2_ref[...],
                         preferred_element_type=jnp.float32) + b2_ref[...]


def down_kernel(x_ref, w_ref, b_ref, o_ref):
    """Conv1d(C, C, 3, stride=2, pad=1).  x_ref: (Bb, Tout, 2, C) even/odd HBM view."""
    x = x_ref[...]
    Bb, Tout, _, C = x.shape
    xe = x[:, :, 0, :]                                   # x[2m]
    xo = x[:, :, 1, :]                                   # x[2m+1]
    z = jnp.zeros((Bb, 1, C), x.dtype)
    xm1 = jnp.concatenate([z, xo[:, :Tout - 1, :]], axis=1)      # x[2m-1], zero padded
    xcat = jnp.concatenate([xm1, xe, xo], axis=-1).reshape(Bb * Tout, 3 * C)
    y = jnp.dot(xcat.astype(w_ref.dtype), w_ref[...],
                preferred_element_type=jnp.float32) + b_ref[...]
    o_ref[...] = y.reshape(Bb, Tout, C)


def up_kernel(x_ref, w_ref, b_ref, o_ref):
    """ConvTranspose1d(C, C, 4, stride=2, pad=1), polyphase, one matmul.
    x_ref: (Bb, T, C); w_ref: (3C, 2C) [even | odd] phase columns;
    o_ref: (Bb, T, 2C), viewed by the caller as (B, 2T, C) for free."""
    x = x_ref[...]
    Bb, T, C = x.shape
    xcat = _taps3(x).astype(w_ref.dtype)                 # (Bb*T, 3C)
    y = jnp.dot(xcat, w_ref[...], preferred_element_type=jnp.float32) + b_ref[...]
    o_ref[...] = y.reshape(Bb, T, 2 * C)


def final_kernel(x_ref, wc_ref, bc_ref, g_ref, be_ref, mcg_ref, mgc_ref,
                 wo_ref, bo_ref, o_ref):
    """Final Conv1dBlock (conv3 + GN + Mish) + 1x1 output conv, fused."""
    x = x_ref[...]
    y = _conv_k3(x, wc_ref) + bc_ref[...]
    h = _mish(_groupnorm(y, mcg_ref[...], mgc_ref[...], g_ref[...], be_ref[...]))
    o_ref[...] = _dense(h, wo_ref) + bo_ref[...]


# ------------------------------- Pallas wrappers -------------------------------
def _wspec(a):
    return pl.BlockSpec(a.shape, lambda i, _n=a.ndim: (0,) * _n)


def res_block_apply(rp, x, cond_act, skip=None, batch_block=None):
    """x: (B, T, Ca) [+ skip: (B, T, Cr)], cond_act: (B, cond_dim) -> (B, T, Cout)."""
    B, T, Ca = x.shape
    Bb = B if batch_block is None else batch_block
    assert B % Bb == 0
    two_input = skip is not None
    has_proj = 'wra' in rp
    Cout = rp['b1'].shape[1]
    cond_dim = cond_act.shape[1]

    specs = [pl.BlockSpec((Bb, T, Ca), lambda i: (i, 0, 0))]
    args = [x]
    if two_input:
        Cr = skip.shape[2]
        specs.append(pl.BlockSpec((Bb, T, Cr), lambda i: (i, 0, 0)))
        args.append(skip)
    specs.append(pl.BlockSpec((Bb, cond_dim), lambda i: (i, 0)))
    args.append(cond_act)

    names = ['wc1a'] + (['wc1r'] if two_input else []) + \
            ['b1', 'g1', 'be1', 'mcg', 'mgc', 'wfs', 'bfs', 'wfb', 'bfb',
             'wc2', 'b2', 'g2', 'be2']
    if has_proj:
        names += ['wra'] + (['wrr'] if two_input else []) + ['br']
    for n in names:
        specs.append(_wspec(rp[n]))
        args.append(rp[n])

    kern = functools.partial(res_block_kernel, two_input=two_input, has_proj=has_proj)
    return pl.pallas_call(
        kern,
        out_shape=jax.ShapeDtypeStruct((B, T, Cout), jnp.float32),
        grid=(B // Bb,),
        in_specs=specs,
        out_specs=pl.BlockSpec((Bb, T, Cout), lambda i: (i, 0, 0)),
        compiler_params=_CP,
    )(*args)


def time_mlp(emb, tp):
    B, dsed = emb.shape
    return pl.pallas_call(
        time_mlp_kernel,
        out_shape=jax.ShapeDtypeStruct((B, dsed), jnp.float32),
        grid=(1,),
        in_specs=[_wspec(emb), _wspec(tp['w1']), _wspec(tp['b1']),
                  _wspec(tp['w2']), _wspec(tp['b2'])],
        out_specs=pl.BlockSpec((B, dsed), lambda i: (0, 0)),
    )(emb, tp['w1'], tp['b1'], tp['w2'], tp['b2'])


def downsample(x, w, b):
    """Conv1d(C, C, 3, stride=2, padding=1), channels-last; taps read in-kernel."""
    B, T, C = x.shape
    assert T % 2 == 0
    Tout = T // 2
    xv = x.reshape(B, Tout, 2, C)                        # free row-major HBM view
    return pl.pallas_call(
        down_kernel,
        out_shape=jax.ShapeDtypeStruct((B, Tout, C), jnp.float32),
        grid=(1,),
        in_specs=[pl.BlockSpec((B, Tout, 2, C), lambda i: (0, 0, 0, 0)),
                  _wspec(w), _wspec(b)],
        out_specs=pl.BlockSpec((B, Tout, C), lambda i: (0, 0, 0)),
        compiler_params=_CP,
    )(xv, w, b)


def upsample(x, w, b):
    """ConvTranspose1d(C, C, 4, stride=2, padding=1), polyphase, T -> 2T."""
    B, T, C = x.shape
    y = pl.pallas_call(
        up_kernel,
        out_shape=jax.ShapeDtypeStruct((B, T, 2 * C), jnp.float32),
        grid=(1,),
        in_specs=[pl.BlockSpec((B, T, C), lambda i: (0, 0, 0)), _wspec(w), _wspec(b)],
        out_specs=pl.BlockSpec((B, T, 2 * C), lambda i: (0, 0, 0)),
        compiler_params=_CP,
    )(x, w, b)
    return y.reshape(B, 2 * T, C)                        # free row-major view


def final_apply(x, fp):
    B, T, C = x.shape
    Dout = fp['bo'].shape[1]
    return pl.pallas_call(
        final_kernel,
        out_shape=jax.ShapeDtypeStruct((B, T, Dout), jnp.float32),
        grid=(1,),
        in_specs=[pl.BlockSpec((B, T, C), lambda i: (0, 0, 0)),
                  _wspec(fp['wc']), _wspec(fp['bc']), _wspec(fp['g']), _wspec(fp['be']),
                  _wspec(fp['mcg']), _wspec(fp['mgc']), _wspec(fp['wo']), _wspec(fp['bo'])],
        out_specs=pl.BlockSpec((B, T, Dout), lambda i: (0, 0, 0)),
        compiler_params=_CP,
    )(x, fp['wc'], fp['bc'], fp['g'], fp['be'], fp['mcg'], fp['mgc'],
      fp['wo'], fp['bo'])


# --------------------------- parameters (torch layout) -------------------------
class KeyGen:
    def __init__(self, key):
        self.key = key

    def __call__(self):
        self.key, sub = jax.random.split(self.key)
        return sub


def _init(kg, shape, scale=0.1):
    return (scale * jax.random.normal(kg(), shape)).astype(jnp.float32)


def make_res_params(kg, cin, cout, cond_dim):
    p = {
        'conv1_w': _init(kg, (cout, cin, 3)), 'conv1_b': _init(kg, (cout,)),
        'gn1_g': jnp.ones((cout,), jnp.float32), 'gn1_b': jnp.zeros((cout,), jnp.float32),
        'conv2_w': _init(kg, (cout, cout, 3)), 'conv2_b': _init(kg, (cout,)),
        'gn2_g': jnp.ones((cout,), jnp.float32), 'gn2_b': jnp.zeros((cout,), jnp.float32),
        'film_w': _init(kg, (2 * cout, cond_dim)), 'film_b': _init(kg, (2 * cout,)),
    }
    if cin != cout:
        p['res_w'] = _init(kg, (cout, cin, 1))
        p['res_b'] = _init(kg, (cout,))
    return p


def make_unet_params(key, input_dim, global_cond_dim, down_dims, dsed):
    kg = KeyGen(key)
    cond_dim = dsed + global_cond_dim
    all_dims = [input_dim] + list(down_dims)
    in_out = list(zip(all_dims[:-1], all_dims[1:]))
    P = {'t_lin1_w': _init(kg, (dsed * 4, dsed)), 't_lin1_b': _init(kg, (dsed * 4,)),
         't_lin2_w': _init(kg, (dsed, dsed * 4)), 't_lin2_b': _init(kg, (dsed,)),
         'down': [], 'up': []}
    for ci, co in in_out:
        P['down'].append({'res1': make_res_params(kg, ci, co, cond_dim),
                          'res2': make_res_params(kg, co, co, cond_dim),
                          'down_w': _init(kg, (co, co, 3)), 'down_b': _init(kg, (co,))})
    mid = all_dims[-1]
    P['mid'] = [make_res_params(kg, mid, mid, cond_dim),
                make_res_params(kg, mid, mid, cond_dim)]
    for ci, co in reversed(in_out):
        P['up'].append({'res1': make_res_params(kg, co * 2, ci, cond_dim),
                        'res2': make_res_params(kg, ci, ci, cond_dim),
                        'up_w': _init(kg, (ci, ci, 4)), 'up_b': _init(kg, (ci,))})
    d0 = down_dims[0]
    P['final_conv_w'] = _init(kg, (d0, d0, 3)); P['final_conv_b'] = _init(kg, (d0,))
    P['final_gn_g'] = jnp.ones((d0,), jnp.float32)
    P['final_gn_b'] = jnp.zeros((d0,), jnp.float32)
    P['final_out_w'] = _init(kg, (input_dim, d0, 1))
    P['final_out_b'] = _init(kg, (input_dim,))
    return P


# ----------------------- parameter prep (kernel-ready layout) ------------------
def _row(v):
    return v.reshape(1, -1).astype(jnp.float32)


def _prep_conv(w):
    """torch conv weight (Cout, Cin, K) -> (K*Cin, Cout) bf16, tap-major rows."""
    cout, cin, k = w.shape
    return jnp.transpose(w, (2, 1, 0)).reshape(k * cin, cout).astype(jnp.bfloat16)


def _group_mats(C, G):
    """Factored group-average operator: (C, G) membership and its transpose."""
    assert C % G == 0
    gid = jnp.arange(C) // (C // G)
    mcg = (gid[:, None] == jnp.arange(G)[None, :]).astype(jnp.float32)
    return mcg, mcg.T


def _prep_upsample(w, b):
    """ConvTranspose1d weight (Cin, Cout, 4), bias -> ((3C, 2C) bf16, (1, 2C)).
    Even outputs o[2m] = x[m-1] w3 + x[m] w1; odd o[2m+1] = x[m] w2 + x[m+1] w0."""
    C = w.shape[0]
    wk = [w[:, :, k].astype(jnp.float32) for k in range(4)]
    z = jnp.zeros((C, C), jnp.float32)
    W = jnp.concatenate([jnp.concatenate([wk[3], z], axis=1),      # rows for x[t-1]
                         jnp.concatenate([wk[1], wk[2]], axis=1),  # rows for x[t]
                         jnp.concatenate([z, wk[0]], axis=1)],     # rows for x[t+1]
                        axis=0)
    return W.astype(jnp.bfloat16), jnp.concatenate([b, b]).reshape(1, 2 * C).astype(jnp.float32)


def prep_res_params(p, n_groups, split_x=None):
    cout = p['conv1_b'].shape[0]
    mcg, mgc = _group_mats(cout, n_groups)
    r = {'b1': _row(p['conv1_b']), 'g1': _row(p['gn1_g']), 'be1': _row(p['gn1_b']),
         'wc2': _prep_conv(p['conv2_w']), 'b2': _row(p['conv2_b']),
         'g2': _row(p['gn2_g']), 'be2': _row(p['gn2_b']),
         'mcg': mcg, 'mgc': mgc,
         'wfs': p['film_w'][:cout].T.astype(jnp.bfloat16), 'bfs': _row(p['film_b'][:cout]),
         'wfb': p['film_w'][cout:].T.astype(jnp.bfloat16), 'bfb': _row(p['film_b'][cout:])}
    if split_x is None:
        r['wc1a'] = _prep_conv(p['conv1_w'])
    else:  # up path: conv1 weight split along Cin so [x | skip] never hits HBM
        r['wc1a'] = _prep_conv(p['conv1_w'][:, :split_x, :])
        r['wc1r'] = _prep_conv(p['conv1_w'][:, split_x:, :])
    if 'res_w' in p:
        rw = p['res_w'][:, :, 0]                          # (Cout, Cin)
        if split_x is None:
            r['wra'] = rw.T.astype(jnp.bfloat16)
        else:
            r['wra'] = rw[:, :split_x].T.astype(jnp.bfloat16)
            r['wrr'] = rw[:, split_x:].T.astype(jnp.bfloat16)
        r['br'] = _row(p['res_b'])
    return r


def prep_unet_params(P, n_groups):
    R = {'t': {'w1': P['t_lin1_w'].T.astype(jnp.bfloat16), 'b1': _row(P['t_lin1_b']),
               'w2': P['t_lin2_w'].T.astype(jnp.bfloat16), 'b2': _row(P['t_lin2_b'])},
         'down': [], 'up': []}
    for m in P['down']:
        R['down'].append({'res1': prep_res_params(m['res1'], n_groups),
                          'res2': prep_res_params(m['res2'], n_groups),
                          'down_w': _prep_conv(m['down_w']),
                          'down_b': _row(m['down_b'])})
    R['mid'] = [prep_res_params(m, n_groups) for m in P['mid']]
    for m in P['up']:
        cin_total = m['res1']['conv1_w'].shape[1]         # x and skip have equal width
        uw, ub = _prep_upsample(m['up_w'], m['up_b'])
        R['up'].append({'res1': prep_res_params(m['res1'], n_groups, split_x=cin_total // 2),
                        'res2': prep_res_params(m['res2'], n_groups),
                        'up_w': uw, 'up_b': ub})
    d0 = P['final_conv_b'].shape[0]
    mcg, mgc = _group_mats(d0, n_groups)
    R['final'] = {'wc': _prep_conv(P['final_conv_w']), 'bc': _row(P['final_conv_b']),
                  'g': _row(P['final_gn_g']), 'be': _row(P['final_gn_b']),
                  'mcg': mcg, 'mgc': mgc,
                  'wo': P['final_out_w'][:, :, 0].T.astype(jnp.bfloat16),
                  'bo': _row(P['final_out_b'])}
    return R


# ---------------------------------- forward ------------------------------------
def unet_forward(R, sample, timestep, global_cond, *, dsed):
    # activations stay channels-last (B, T, C); no transposes needed at I/O.
    x = sample
    B = x.shape[0]
    t = jnp.broadcast_to(jnp.asarray(timestep, jnp.float32).reshape(-1), (B,))
    # sinusoidal timestep embedding
    half = dsed // 2
    freqs = jnp.exp(jnp.arange(half, dtype=jnp.float32)
                    * -(math.log(10000.0) / (half - 1)))
    emb = t[:, None] * freqs[None, :]
    emb = jnp.concatenate([jnp.sin(emb), jnp.cos(emb)], axis=-1)
    te = time_mlp(emb, R['t'])                            # Linear+SiLU+Linear fused
    cond = te if global_cond is None else jnp.concatenate([te, global_cond], -1)
    cond_act = jax.nn.silu(cond)                          # FiLM SiLU hoisted, shared by all blocks

    residuals = []
    n_down = len(R['down'])
    for i, m in enumerate(R['down']):
        x = res_block_apply(m['res1'], x, cond_act)
        x = res_block_apply(m['res2'], x, cond_act)
        residuals.append(x)
        # TODO(synk): the provided forward downsamples at every level, which makes the
        # skip-connection concat shape-inconsistent; we follow the standard
        # diffusion_policy convention (identity on the last level) so the net runs.
        if i < n_down - 1:
            x = downsample(x, m['down_w'], m['down_b'])

    for m in R['mid']:
        x = res_block_apply(m, x, cond_act)

    n_up = len(R['up'])
    for i, m in enumerate(R['up']):
        res = residuals.pop()
        x = res_block_apply(m['res1'], x, cond_act, skip=res)   # no HBM channel concat
        x = res_block_apply(m['res2'], x, cond_act)
        if i < n_up - 1:
            x = upsample(x, m['up_w'], m['up_b'])

    return final_apply(x, R['final'])                      # (B, T, D_in)


# ------------------------------------ main --------------------------------------
if __name__ == "__main__":
    key = jax.random.PRNGKey(0)
    # NOTE: input_dim == down_dims[0] is required by the reference __init__
    # (the last up-block maps to input_dim while final_conv expects down_dims[0]).
    input_dim, global_cond_dim = 16, 8
    down_dims = [16, 32]
    dsed, n_groups = 16, 8
    B, T = 2, 8

    kp, kx, kc = jax.random.split(key, 3)
    P = make_unet_params(kp, input_dim, global_cond_dim, down_dims, dsed)
    R = prep_unet_params(P, n_groups)
    sample = jax.random.normal(kx, (B, T, input_dim), dtype=jnp.float32)
    global_cond = jax.random.normal(kc, (B, global_cond_dim), dtype=jnp.float32)
    timestep = 7

    fwd = jax.jit(functools.partial(unet_forward, dsed=dsed))
    out = jax.block_until_ready(fwd(R, sample, timestep, global_cond))
    assert out.shape == (B, T, input_dim)
    assert bool(jnp.all(jnp.isfinite(out)))
    print("KERNEL_OK")
</pallas_src>

<mosaic_0001>
module attributes {stable_mosaic.version = 11 : i64} {
  func.func @res_block_kernel(%arg0: i32, %arg1: memref<2x8x16xf32, #tpu.memory_space<vmem>>, %arg2: memref<2x24xf32, #tpu.memory_space<vmem>>, %arg3: memref<48x16xbf16, #tpu.memory_space<vmem>>, %arg4: memref<1x16xf32, #tpu.memory_space<vmem>>, %arg5: memref<1x16xf32, #tpu.memory_space<vmem>>, %arg6: memref<1x16xf32, #tpu.memory_space<vmem>>, %arg7: memref<16x8xf32, #tpu.memory_space<vmem>>, %arg8: memref<8x16xf32, #tpu.memory_space<vmem>>, %arg9: memref<24x16xbf16, #tpu.memory_space<vmem>>, %arg10: memref<1x16xf32, #tpu.memory_space<vmem>>, %arg11: memref<24x16xbf16, #tpu.memory_space<vmem>>, %arg12: memref<1x16xf32, #tpu.memory_space<vmem>>, %arg13: memref<48x16xbf16, #tpu.memory_space<vmem>>, %arg14: memref<1x16xf32, #tpu.memory_space<vmem>>, %arg15: memref<1x16xf32, #tpu.memory_space<vmem>>, %arg16: memref<1x16xf32, #tpu.memory_space<vmem>>, %arg17: memref<2x8x16xf32, #tpu.memory_space<vmem>>) attributes {dimension_semantics = [#tpu.dimension_semantics<parallel>], iteration_bounds = array<i64: 1>, scalar_prefetch = 0 : i64, scratch_operands = 0 : i64, tpu.core_type = #tpu.core_type<tc>, window_params = [{transform_indices = @transform_0, window_bounds = array<i64: 2, 8, 16>}, {transform_indices = @transform_1, window_bounds = array<i64: 2, 24>}, {pipeline_mode = #tpu.pipeline_mode<synchronous>, transform_indices = @transform_2, window_bounds = array<i64: 48, 16>}, {pipeline_mode = #tpu.pipeline_mode<synchronous>, transform_indices = @transform_3, window_bounds = array<i64: 1, 16>}, {pipeline_mode = #tpu.pipeline_mode<synchronous>, transform_indices = @transform_4, window_bounds = array<i64: 1, 16>}, {pipeline_mode = #tpu.pipeline_mode<synchronous>, transform_indices = @transform_5, window_bounds = array<i64: 1, 16>}, {pipeline_mode = #tpu.pipeline_mode<synchronous>, transform_indices = @transform_6, window_bounds = array<i64: 16, 8>}, {pipeline_mode = #tpu.pipeline_mode<synchronous>, transform_indices = @transform_7, window_bounds = array<i64: 8, 16>}, {pipeline_mode = #tpu.pipeline_mode<synchronous>, transform_indices = @transform_8, window_bounds = array<i64: 24, 16>}, {pipeline_mode = #tpu.pipeline_mode<synchronous>, transform_indices = @transform_9, window_bounds = array<i64: 1, 16>}, {pipeline_mode = #tpu.pipeline_mode<synchronous>, transform_indices = @transform_10, window_bounds = array<i64: 24, 16>}, {pipeline_mode = #tpu.pipeline_mode<synchronous>, transform_indices = @transform_11, window_bounds = array<i64: 1, 16>}, {pipeline_mode = #tpu.pipeline_mode<synchronous>, transform_indices = @transform_12, window_bounds = array<i64: 48, 16>}, {pipeline_mode = #tpu.pipeline_mode<synchronous>, transform_indices = @transform_13, window_bounds = array<i64: 1, 16>}, {pipeline_mode = #tpu.pipeline_mode<synchronous>, transform_indices = @transform_14, window_bounds = array<i64: 1, 16>}, {pipeline_mode = #tpu.pipeline_mode<synchronous>, transform_indices = @transform_15, window_bounds = array<i64: 1, 16>}, {transform_indices = @transform_16, window_bounds = array<i64: 2, 8, 16>}]} {
    %c0 = arith.constant 0 : index
    %c0_0 = arith.constant 0 : index
    %c0_1 = arith.constant 0 : index
    %0 = vector.load %arg1[%c0, %c0_0, %c0_1] : memref<2x8x16xf32, #tpu.memory_space<vmem>>, vector<2x8x16xf32>
    %c0_2 = arith.constant 0 : index
    %c0_3 = arith.constant 0 : index
    %1 = vector.load %arg7[%c0_2, %c0_3] : memref<16x8xf32, #tpu.memory_space<vmem>>, vector<16x8xf32>
    %c0_4 = arith.constant 0 : index
    %c0_5 = arith.constant 0 : index
    %2 = vector.load %arg8[%c0_4, %c0_5] : memref<8x16xf32, #tpu.memory_space<vmem>>, vector<8x16xf32>
    %cst = arith.constant 0.000000e+00 : f32
    %3 = vector.broadcast %cst : f32 to vector<2x1x16xf32>
    %4 = vector.extract_strided_slice %0 {offsets = [0, 0, 0], sizes = [2, 7, 16], strides = [1, 1, 1]} : vector<2x8x16xf32> to vector<2x7x16xf32>
    %5 = tpu.concatenate %3, %4 in 1 : vector<2x1x16xf32>, vector<2x7x16xf32> -> vector<2x8x16xf32>
    %6 = vector.extract_strided_slice %0 {offsets = [0, 1, 0], sizes = [2, 7, 16], strides = [1, 1, 1]} : vector<2x8x16xf32> to vector<2x7x16xf32>
    %7 = tpu.concatenate %6, %3 in 1 : vector<2x7x16xf32>, vector<2x1x16xf32> -> vector<2x8x16xf32>
    %8 = tpu.concatenate %5, %0, %7 in 2 : vector<2x8x16xf32>, vector<2x8x16xf32>, vector<2x8x16xf32> -> vector<2x8x48xf32>
    %9 = vector.shape_cast %8 : vector<2x8x48xf32> to vector<16x48xf32>
    %10 = arith.truncf %9 : vector<16x48xf32> to vector<16x48xbf16>
    %c0_6 = arith.constant 0 : index
    %c0_7 = arith.constant 0 : index
    %11 = vector.load %arg3[%c0_6, %c0_7] : memref<48x16xbf16, #tpu.memory_space<vmem>>, vector<48x16xbf16>
    %cst_8 = arith.constant dense<0.000000e+00> : vector<16x16xf32>
    %12 = tpu.matmul %10, %11, %cst_8 {dimension_numbers = #tpu.dot_dimension_numbers<[1], [0], [0], [1], [0, 0, 1, 1], [], []>} : vector<16x48xbf16>, vector<48x16xbf16>, vector<16x16xf32> -> vector<16x16xf32>
    %13 = vector.shape_cast %12 : vector<16x16xf32> to vector<2x8x16xf32>
    %c0_9 = arith.constant 0 : index
    %c0_10 = arith.constant 0 : index
    %14 = vector.load %arg4[%c0_9, %c0_10] : memref<1x16xf32, #tpu.memory_space<vmem>>, vector<1x16xf32>
    %15 = vector.shape_cast %14 : vector<1x16xf32> to vector<1x1x16xf32>
    %16 = vector.broadcast %15 : vector<1x1x16xf32> to vector<2x8x16xf32>
    %17 = arith.addf %13, %16 : vector<2x8x16xf32>
    %c0_11 = arith.constant 0 : index
    %c0_12 = arith.constant 0 : index
    %18 = vector.load %arg5[%c0_11, %c0_12] : memref<1x16xf32, #tpu.memory_space<vmem>>, vector<1x16xf32>
    %c0_13 = arith.constant 0 : index
    %c0_14 = arith.constant 0 : index
    %19 = vector.load %arg6[%c0_13, %c0_14] : memref<1x16xf32, #tpu.memory_space<vmem>>, vector<1x16xf32>
    %cst_15 = arith.constant dense<0.000000e+00> : vector<2x16xf32>
    %20 = vector.multi_reduction <add>, %17, %cst_15 [1] : vector<2x8x16xf32> to vector<2x16xf32>
    %21 = arith.mulf %17, %17 : vector<2x8x16xf32>
    %cst_16 = arith.constant dense<0.000000e+00> : vector<2x16xf32>
    %22 = vector.multi_reduction <add>, %21, %cst_16 [1] : vector<2x8x16xf32> to vector<2x16xf32>
    %cst_17 = arith.constant dense<0.000000e+00> : vector<2x8xf32>
    %23 = tpu.matmul %20, %1, %cst_17 {dimension_numbers = #tpu.dot_dimension_numbers<[1], [0], [0], [1], [0, 0, 1, 1], [], []>} : vector<2x16xf32>, vector<16x8xf32>, vector<2x8xf32> -> vector<2x8xf32>
    %cst_18 = arith.constant dense<0.000000e+00> : vector<2x16xf32>
    %24 = tpu.matmul %23, %2, %cst_18 {dimension_numbers = #tpu.dot_dimension_numbers<[1], [0], [0], [1], [0, 0, 1, 1], [], []>} : vector<2x8xf32>, vector<8x16xf32>, vector<2x16xf32> -> vector<2x16xf32>
    %cst_19 = arith.constant 6.250000e-02 : f32
    %25 = vector.broadcast %cst_19 : f32 to vector<2x16xf32>
    %26 = arith.mulf %24, %25 : vector<2x16xf32>
    %cst_20 = arith.constant dense<0.000000e+00> : vector<2x8xf32>
    %27 = tpu.matmul %22, %1, %cst_20 {dimension_numbers = #tpu.dot_dimension_numbers<[1], [0], [0], [1], [0, 0, 1, 1], [], []>} : vector<2x16xf32>, vector<16x8xf32>, vector<2x8xf32> -> vector<2x8xf32>
    %cst_21 = arith.constant dense<0.000000e+00> : vector<2x16xf32>
    %28 = tpu.matmul %27, %2, %cst_21 {dimension_numbers = #tpu.dot_dimension_numbers<[1], [0], [0], [1], [0, 0, 1, 1], [], []>} : vector<2x8xf32>, vector<8x16xf32>, vector<2x16xf32> -> vector<2x16xf32>
    %cst_22 = arith.constant 6.250000e-02 : f32
    %29 = vector.broadcast %cst_22 : f32 to vector<2x16xf32>
    %30 = arith.mulf %28, %29 : vector<2x16xf32>
    %31 = arith.mulf %26, %26 : vector<2x16xf32>
    %32 = arith.subf %30, %31 : vector<2x16xf32>
    %cst_23 = arith.constant 0.000000e+00 : f32
    %33 = vector.broadcast %cst_23 : f32 to vector<2x16xf32>
    %34 = arith.maximumf %32, %33 : vector<2x16xf32>
    %35 = vector.shape_cast %26 : vector<2x16xf32> to vector<2x1x16xf32>
    %36 = vector.broadcast %35 : vector<2x1x16xf32> to vector<2x8x16xf32>
    %37 = arith.subf %17, %36 : vector<2x8x16xf32>
    %38 = vector.shape_cast %34 : vector<2x16xf32> to vector<2x1x16xf32>
    %cst_24 = arith.constant 9.99999974E-6 : f32
    %39 = vector.broadcast %cst_24 : f32 to vector<2x1x16xf32>
    %40 = arith.addf %38, %39 : vector<2x1x16xf32>
    %41 = math.rsqrt %40 : vector<2x1x16xf32>
    %42 = vector.broadcast %41 : vector<2x1x16xf32> to vector<2x8x16xf32>
    %43 = arith.mulf %37, %42 : vector<2x8x16xf32>
    %44 = vector.shape_cast %18 : vector<1x16xf32> to vector<1x1x16xf32>
    %45 = vector.broadcast %44 : vector<1x1x16xf32> to vector<2x8x16xf32>
    %46 = arith.mulf %43, %45 : vector<2x8x16xf32>
    %47 = vector.shape_cast %19 : vector<1x16xf32> to vector<1x1x16xf32>
    %48 = vector.broadcast %47 : vector<1x1x16xf32> to vector<2x8x16xf32>
    %49 = arith.addf %46, %48 : vector<2x8x16xf32>
    %cst_25 = arith.constant 2.000000e+01 : f32
    %50 = vector.broadcast %cst_25 : f32 to vector<2x8x16xf32>
    %51 = arith.minimumf %49, %50 : vector<2x8x16xf32>
    %52 = math.exp %51 : vector<2x8x16xf32>
    %cst_26 = arith.constant 1.000000e+00 : f32
    %53 = vector.broadcast %cst_26 : f32 to vector<2x8x16xf32>
    %54 = arith.addf %53, %52 : vector<2x8x16xf32>
    %cst_27 = arith.constant 1.000000e+00 : f32
    %55 = vector.broadcast %cst_27 : f32 to vector<2x8x16xf32>
    %56 = arith.addf %55, %52 : vector<2x8x16xf32>
    %57 = arith.mulf %54, %56 : vector<2x8x16xf32>
    %cst_28 = arith.constant 1.000000e+00 : f32
    %58 = vector.broadcast %cst_28 : f32 to vector<2x8x16xf32>
    %59 = arith.subf %57, %58 : vector<2x8x16xf32>
    %60 = arith.mulf %49, %59 : vector<2x8x16xf32>
    %cst_29 = arith.constant 1.000000e+00 : f32
    %61 = vector.broadcast %cst_29 : f32 to vector<2x8x16xf32>
    %62 = arith.addf %57, %61 : vector<2x8x16xf32>
    %63 = tpu.reciprocal %62 {approx = true} : vector<2x8x16xf32> -> vector<2x8x16xf32>
    %64 = arith.mulf %60, %63 : vector<2x8x16xf32>
    %c0_30 = arith.constant 0 : index
    %c0_31 = arith.constant 0 : index
    %65 = vector.load %arg2[%c0_30, %c0_31] : memref<2x24xf32, #tpu.memory_space<vmem>>, vector<2x24xf32>
    %66 = arith.truncf %65 : vector<2x24xf32> to vector<2x24xbf16>
    %c0_32 = arith.constant 0 : index
    %c0_33 = arith.constant 0 : index
    %67 = vector.load %arg9[%c0_32, %c0_33] : memref<24x16xbf16, #tpu.memory_space<vmem>>, vector<24x16xbf16>
    %cst_34 = arith.constant dense<0.000000e+00> : vector<2x16xf32>
    %68 = tpu.matmul %66, %67, %cst_34 {dimension_numbers = #tpu.dot_dimension_numbers<[1], [0], [0], [1], [0, 0, 1, 1], [], []>} : vector<2x24xbf16>, vector<24x16xbf16>, vector<2x16xf32> -> vector<2x16xf32>
    %c0_35 = arith.constant 0 : index
    %c0_36 = arith.constant 0 : index
    %69 = vector.load %arg10[%c0_35, %c0_36] : memref<1x16xf32, #tpu.memory_space<vmem>>, vector<1x16xf32>
    %70 = vector.broadcast %69 : vector<1x16xf32> to vector<2x16xf32>
    %71 = arith.addf %68, %70 : vector<2x16xf32>
    %c0_37 = arith.constant 0 : index
    %c0_38 = arith.constant 0 : index
    %72 = vector.load %arg11[%c0_37, %c0_38] : memref<24x16xbf16, #tpu.memory_space<vmem>>, vector<24x16xbf16>
    %cst_39 = arith.constant dense<0.000000e+00> : vector<2x16xf32>
    %73 = tpu.matmul %66, %72, %cst_39 {dimension_numbers = #tpu.dot_dimension_numbers<[1], [0], [0], [1], [0, 0, 1, 1], [], []>} : vector<2x24xbf16>, vector<24x16xbf16>, vector<2x16xf32> -> vector<2x16xf32>
    %c0_40 = arith.constant 0 : index
    %c0_41 = arith.constant 0 : index
    %74 = vector.load %arg12[%c0_40, %c0_41] : memref<1x16xf32, #tpu.memory_space<vmem>>, vector<1x16xf32>
    %75 = vector.broadcast %74 : vector<1x16xf32> to vector<2x16xf32>
    %76 = arith.addf %73, %75 : vector<2x16xf32>
    %77 = vector.shape_cast %71 : vector<2x16xf32> to vector<2x1x16xf32>
    %cst_42 = arith.constant 1.000000e+00 : f32
    %78 = vector.broadcast %cst_42 : f32 to vector<2x1x16xf32>
    %79 = arith.addf %77, %78 : vector<2x1x16xf32>
    %80 = vector.broadcast %79 : vector<2x1x16xf32> to vector<2x8x16xf32>
    %81 = arith.mulf %64, %80 : vector<2x8x16xf32>
    %82 = vector.shape_cast %76 : vector<2x16xf32> to vector<2x1x16xf32>
    %83 = vector.broadcast %82 : vector<2x1x16xf32> to vector<2x8x16xf32>
    %84 = arith.addf %81, %83 : vector<2x8x16xf32>
    %cst_43 = arith.constant 0.000000e+00 : f32
    %85 = vector.broadcast %cst_43 : f32 to vector<2x1x16xf32>
    %86 = vector.extract_strided_slice %84 {offsets = [0, 0, 0], sizes = [2, 7, 16], strides = [1, 1, 1]} : vector<2x8x16xf32> to vector<2x7x16xf32>
    %87 = tpu.concatenate %85, %86 in 1 : vector<2x1x16xf32>, vector<2x7x16xf32> -> vector<2x8x16xf32>
    %88 = vector.extract_strided_slice %84 {offsets = [0, 1, 0], sizes = [2, 7, 16], strides = [1, 1, 1]} : vector<2x8x16xf32> to vector<2x7x16xf32>
    %89 = tpu.concatenate %88, %85 in 1 : vector<2x7x16xf32>, vector<2x1x16xf32> -> vector<2x8x16xf32>
    %90 = tpu.concatenate %87, %84, %89 in 2 : vector<2x8x16xf32>, vector<2x8x16xf32>, vector<2x8x16xf32> -> vector<2x8x48xf32>
    %91 = vector.shape_cast %90 : vector<2x8x48xf32> to vector<16x48xf32>
    %92 = arith.truncf %91 : vector<16x48xf32> to vector<16x48xbf16>
    %c0_44 = arith.constant 0 : index
    %c0_45 = arith.constant 0 : index
    %93 = vector.load %arg13[%c0_44, %c0_45] : memref<48x16xbf16, #tpu.memory_space<vmem>>, vector<48x16xbf16>
    %cst_46 = arith.constant dense<0.000000e+00> : vector<16x16xf32>
    %94 = tpu.matmul %92, %93, %cst_46 {dimension_numbers = #tpu.dot_dimension_numbers<[1], [0], [0], [1], [0, 0, 1, 1], [], []>} : vector<16x48xbf16>, vector<48x16xbf16>, vector<16x16xf32> -> vector<16x16xf32>
    %95 = vector.shape_cast %94 : vector<16x16xf32> to vector<2x8x16xf32>
    %c0_47 = arith.constant 0 : index
    %c0_48 = arith.constant 0 : index
    %96 = vector.load %arg14[%c0_47, %c0_48] : memref<1x16xf32, #tpu.memory_space<vmem>>, vector<1x16xf32>
    %97 = vector.shape_cast %96 : vector<1x16xf32> to vector<1x1x16xf32>
    %98 = vector.broadcast %97 : vector<1x1x16xf32> to vector<2x8x16xf32>
    %99 = arith.addf %95, %98 : vector<2x8x16xf32>
    %c0_49 = arith.constant 0 : index
    %c0_50 = arith.constant 0 : index
    %100 = vector.load %arg15[%c0_49, %c0_50] : memref<1x16xf32, #tpu.memory_space<vmem>>, vector<1x16xf32>
    %c0_51 = arith.constant 0 : index
    %c0_52 = arith.constant 0 : index
    %101 = vector.load %arg16[%c0_51, %c0_52] : memref<1x16xf32, #tpu.memory_space<vmem>>, vector<1x16xf32>
    %cst_53 = arith.constant dense<0.000000e+00> : vector<2x16xf32>
    %102 = vector.multi_reduction <add>, %99, %cst_53 [1] : vector<2x8x16xf32> to vector<2x16xf32>
    %103 = arith.mulf %99, %99 : vector<2x8x16xf32>
    %cst_54 = arith.constant dense<0.000000e+00> : vector<2x16xf32>
    %104 = vector.multi_reduction <add>, %103, %cst_54 [1] : vector<2x8x16xf32> to vector<2x16xf32>
    %cst_55 = arith.constant dense<0.000000e+00> : vector<2x8xf32>
    %105 = tpu.matmul %102, %1, %cst_55 {dimension_numbers = #tpu.dot_dimension_numbers<[1], [0], [0], [1], [0, 0, 1, 1], [], []>} : vector<2x16xf32>, vector<16x8xf32>, vector<2x8xf32> -> vector<2x8xf32>
    %cst_56 = arith.constant dense<0.000000e+00> : vector<2x16xf32>
    %106 = tpu.matmul %105, %2, %cst_56 {dimension_numbers = #tpu.dot_dimension_numbers<[1], [0], [0], [1], [0, 0, 1, 1], [], []>} : vector<2x8xf32>, vector<8x16xf32>, vector<2x16xf32> -> vector<2x16xf32>
    %cst_57 = arith.constant 6.250000e-02 : f32
    %107 = vector.broadcast %cst_57 : f32 to vector<2x16xf32>
    %108 = arith.mulf %106, %107 : vector<2x16xf32>
    %cst_58 = arith.constant dense<0.000000e+00> : vector<2x8xf32>
    %109 = tpu.matmul %104, %1, %cst_58 {dimension_numbers = #tpu.dot_dimension_numbers<[1], [0], [0], [1], [0, 0, 1, 1], [], []>} : vector<2x16xf32>, vector<16x8xf32>, vector<2x8xf32> -> vector<2x8xf32>
    %cst_59 = arith.constant dense<0.000000e+00> : vector<2x16xf32>
    %110 = tpu.matmul %109, %2, %cst_59 {dimension_numbers = #tpu.dot_dimension_numbers<[1], [0], [0], [1], [0, 0, 1, 1], [], []>} : vector<2x8xf32>, vector<8x16xf32>, vector<2x16xf32> -> vector<2x16xf32>
    %cst_60 = arith.constant 6.250000e-02 : f32
    %111 = vector.broadcast %cst_60 : f32 to vector<2x16xf32>
    %112 = arith.mulf %110, %111 : vector<2x16xf32>
    %113 = arith.mulf %108, %108 : vector<2x16xf32>
    %114 = arith.subf %112, %113 : vector<2x16xf32>
    %cst_61 = arith.constant 0.000000e+00 : f32
    %115 = vector.broadcast %cst_61 : f32 to vector<2x16xf32>
    %116 = arith.maximumf %114, %115 : vector<2x16xf32>
    %117 = vector.shape_cast %108 : vector<2x16xf32> to vector<2x1x16xf32>
    %118 = vector.broadcast %117 : vector<2x1x16xf32> to vector<2x8x16xf32>
    %119 = arith.subf %99, %118 : vector<2x8x16xf32>
    %120 = vector.shape_cast %116 : vector<2x16xf32> to vector<2x1x16xf32>
    %cst_62 = arith.constant 9.99999974E-6 : f32
    %121 = vector.broadcast %cst_62 : f32 to vector<2x1x16xf32>
    %122 = arith.addf %120, %121 : vector<2x1x16xf32>
    %123 = math.rsqrt %122 : vector<2x1x16xf32>
    %124 = vector.broadcast %123 : vector<2x1x16xf32> to vector<2x8x16xf32>
    %125 = arith.mulf %119, %124 : vector<2x8x16xf32>
    %126 = vector.shape_cast %100 : vector<1x16xf32> to vector<1x1x16xf32>
    %127 = vector.broadcast %126 : vector<1x1x16xf32> to vector<2x8x16xf32>
    %128 = arith.mulf %125, %127 : vector<2x8x16xf32>
    %129 = vector.shape_cast %101 : vector<1x16xf32> to vector<1x1x16xf32>
    %130 = vector.broadcast %129 : vector<1x1x16xf32> to vector<2x8x16xf32>
    %131 = arith.addf %128, %130 : vector<2x8x16xf32>
    %cst_63 = arith.constant 2.000000e+01 : f32
    %132 = vector.broadcast %cst_63 : f32 to vector<2x8x16xf32>
    %133 = arith.minimumf %131, %132 : vector<2x8x16xf32>
    %134 = math.exp %133 : vector<2x8x16xf32>
    %cst_64 = arith.constant 1.000000e+00 : f32
    %135 = vector.broadcast %cst_64 : f32 to vector<2x8x16xf32>
    %136 = arith.addf %135, %134 : vector<2x8x16xf32>
    %cst_65 = arith.constant 1.000000e+00 : f32
    %137 = vector.broadcast %cst_65 : f32 to vector<2x8x16xf32>
    %138 = arith.addf %137, %134 : vector<2x8x16xf32>
    %139 = arith.mulf %136, %138 : vector<2x8x16xf32>
    %cst_66 = arith.constant 1.000000e+00 : f32
    %140 = vector.broadcast %cst_66 : f32 to vector<2x8x16xf32>
    %141 = arith.subf %139, %140 : vector<2x8x16xf32>
    %142 = arith.mulf %131, %141 : vector<2x8x16xf32>
    %cst_67 = arith.constant 1.000000e+00 : f32
    %143 = vector.broadcast %cst_67 : f32 to vector<2x8x16xf32>
    %144 = arith.addf %139, %143 : vector<2x8x16xf32>
    %145 = tpu.reciprocal %144 {approx = true} : vector<2x8x16xf32> -> vector<2x8x16xf32>
    %146 = arith.mulf %142, %145 : vector<2x8x16xf32>
    %147 = arith.addf %146, %0 : vector<2x8x16xf32>
    %c0_68 = arith.constant 0 : index
    %c0_69 = arith.constant 0 : index
    %c0_70 = arith.constant 0 : index
    %148 = vector.load %arg17[%c0_68, %c0_69, %c0_70] : memref<2x8x16xf32, #tpu.memory_space<vmem>>, vector<2x8x16xf32>
    tpu.vector_store %arg17[%c0_68, %c0_69, %c0_70], %147 {strides = array<i32>} : memref<2x8x16xf32, #tpu.memory_space<vmem>>, vector<2x8x16xf32>,
    return
  }
  func.func @transform_0(%arg0: i32) -> (i32, i32, i32) {
    %c0_i32 = arith.constant 0 : i32
    %c0_i32_0 = arith.constant 0 : i32
    %c0_i32_1 = arith.constant 0 : i32
    return %arg0, %c0_i32, %c0_i32_0 : i32, i32, i32
  }
  func.func @transform_1(%arg0: i32) -> (i32, i32) {
    %c0_i32 = arith.constant 0 : i32
    %c0_i32_0 = arith.constant 0 : i32
    return %arg0, %c0_i32 : i32, i32
  }
  func.func @transform_2(%arg0: i32) -> (i32, i32) {
    %c0_i32 = arith.constant 0 : i32
    %c0_i32_0 = arith.constant 0 : i32
    %c0_i32_1 = arith.constant 0 : i32
    return %c0_i32, %c0_i32_0 : i32, i32
  }
  func.func @transform_3(%arg0: i32) -> (i32, i32) {
    %c0_i32 = arith.constant 0 : i32
    %c0_i32_0 = arith.constant 0 : i32
    %c0_i32_1 = arith.constant 0 : i32
    return %c0_i32, %c0_i32_0 : i32, i32
  }
  func.func @transform_4(%arg0: i32) -> (i32, i32) {
    %c0_i32 = arith.constant 0 : i32
    %c0_i32_0 = arith.constant 0 : i32
    %c0_i32_1 = arith.constant 0 : i32
    return %c0_i32, %c0_i32_0 : i32, i32
  }
  func.func @transform_5(%arg0: i32) -> (i32, i32) {
    %c0_i32 = arith.constant 0 : i32
    %c0_i32_0 = arith.constant 0 : i32
    %c0_i32_1 = arith.constant 0 : i32
    return %c0_i32, %c0_i32_0 : i32, i32
  }
  func.func @transform_6(%arg0: i32) -> (i32, i32) {
    %c0_i32 = arith.constant 0 : i32
    %c0_i32_0 = arith.constant 0 : i32
    %c0_i32_1 = arith.constant 0 : i32
    return %c0_i32, %c0_i32_0 : i32, i32
  }
  func.func @transform_7(%arg0: i32) -> (i32, i32) {
    %c0_i32 = arith.constant 0 : i32
    %c0_i32_0 = arith.constant 0 : i32
    %c0_i32_1 = arith.constant 0 : i32
    return %c0_i32, %c0_i32_0 : i32, i32
  }
  func.func @transform_8(%arg0: i32) -> (i32, i32) {
    %c0_i32 = arith.constant 0 : i32
    %c0_i32_0 = arith.constant 0 : i32
    %c0_i32_1 = arith.constant 0 : i32
    return %c0_i32, %c0_i32_0 : i32, i32
  }
  func.func @transform_9(%arg0: i32) -> (i32, i32) {
    %c0_i32 = arith.constant 0 : i32
    %c0_i32_0 = arith.constant 0 : i32
    %c0_i32_1 = arith.constant 0 : i32
    return %c0_i32, %c0_i32_0 : i32, i32
  }
  func.func @transform_10(%arg0: i32) -> (i32, i32) {
    %c0_i32 = arith.constant 0 : i32
    %c0_i32_0 = arith.constant 0 : i32
    %c0_i32_1 = arith.constant 0 : i32
    return %c0_i32, %c0_i32_0 : i32, i32
  }
  func.func @transform_11(%arg0: i32) -> (i32, i32) {
    %c0_i32 = arith.constant 0 : i32
    %c0_i32_0 = arith.constant 0 : i32
    %c0_i32_1 = arith.constant 0 : i32
    return %c0_i32, %c0_i32_0 : i32, i32
  }
  func.func @transform_12(%arg0: i32) -> (i32, i32) {
    %c0_i32 = arith.constant 0 : i32
    %c0_i32_0 = arith.constant 0 : i32
    %c0_i32_1 = arith.constant 0 : i32
    return %c0_i32, %c0_i32_0 : i32, i32
  }
  func.func @transform_13(%arg0: i32) -> (i32, i32) {
    %c0_i32 = arith.constant 0 : i32
    %c0_i32_0 = arith.constant 0 : i32
    %c0_i32_1 = arith.constant 0 : i32
    return %c0_i32, %c0_i32_0 : i32, i32
  }
  func.func @transform_14(%arg0: i32) -> (i32, i32) {
    %c0_i32 = arith.constant 0 : i32
    %c0_i32_0 = arith.constant 0 : i32
    %c0_i32_1 = arith.constant 0 : i32
    return %c0_i32, %c0_i32_0 : i32, i32
  }
  func.func @transform_15(%arg0: i32) -> (i32, i32) {
    %c0_i32 = arith.constant 0 : i32
    %c0_i32_0 = arith.constant 0 : i32
    %c0_i32_1 = arith.constant 0 : i32
    return %c0_i32, %c0_i32_0 : i32, i32
  }
  func.func @transform_16(%arg0: i32) -> (i32, i32, i32) {
    %c0_i32 = arith.constant 0 : i32
    %c0_i32_0 = arith.constant 0 : i32
    %c0_i32_1 = arith.constant 0 : i32
    return %arg0, %c0_i32, %c0_i32_0 : i32, i32, i32
  }
}

module attributes {stable_mosaic.version = 11 : i64} {
  func.func @time_mlp_kernel(%arg0: i32, %arg1: memref<2x16xf32, #tpu.memory_space<vmem>>, %arg2: memref<16x64xbf16, #tpu.memory_space<vmem>>, %arg3: memref<1x64xf32, #tpu.memory_space<vmem>>, %arg4: memref<64x16xbf16, #tpu.memory_space<vmem>>, %arg5: memref<1x16xf32, #tpu.memory_space<vmem>>, %arg6: memref<2x16xf32, #tpu.memory_space<vmem>>) attributes {dimension_semantics = [#tpu.dimension_semantics<arbitrary>], iteration_bounds = array<i64: 1>, scalar_prefetch = 0 : i64, scratch_operands = 0 : i64, tpu.core_type = #tpu.core_type<tc>, window_params = [{pipeline_mode = #tpu.pipeline_mode<synchronous>, transform_indices = @transform_0, window_bounds = array<i64: 2, 16>}, {pipeline_mode = #tpu.pipeline_mode<synchronous>, transform_indices = @transform_1, window_bounds = array<i64: 16, 64>}, {pipeline_mode = #tpu.pipeline_mode<synchronous>, transform_indices = @transform_2, window_bounds = array<i64: 1, 64>}, {pipeline_mode = #tpu.pipeline_mode<synchronous>, transform_indices = @transform_3, window_bounds = array<i64: 64, 16>}, {pipeline_mode = #tpu.pipeline_mode<synchronous>, transform_indices = @transform_4, window_bounds = array<i64: 1, 16>}, {pipeline_mode = #tpu.pipeline_mode<synchronous>, transform_indices = @transform_5, window_bounds = array<i64: 2, 16>}]} {
    %c0 = arith.constant 0 : index
    %c0_0 = arith.constant 0 : index
    %0 = vector.load %arg1[%c0, %c0_0] : memref<2x16xf32, #tpu.memory_space<vmem>>, vector<2x16xf32>
    %1 = arith.truncf %0 : vector<2x16xf32> to vector<2x16xbf16>
    %c0_1 = arith.constant 0 : index
    %c0_2 = arith.constant 0 : index
    %2 = vector.load %arg2[%c0_1, %c0_2] : memref<16x64xbf16, #tpu.memory_space<vmem>>, vector<16x64xbf16>
    %cst = arith.constant dense<0.000000e+00> : vector<2x64xf32>
    %3 = tpu.matmul %1, %2, %cst {dimension_numbers = #tpu.dot_dimension_numbers<[1], [0], [0], [1], [0, 0, 1, 1], [], []>} : vector<2x16xbf16>, vector<16x64xbf16>, vector<2x64xf32> -> vector<2x64xf32>
    %c0_3 = arith.constant 0 : index
    %c0_4 = arith.constant 0 : index
    %4 = vector.load %arg3[%c0_3, %c0_4] : memref<1x64xf32, #tpu.memory_space<vmem>>, vector<1x64xf32>
    %5 = vector.broadcast %4 : vector<1x64xf32> to vector<2x64xf32>
    %6 = arith.addf %3, %5 : vector<2x64xf32>
    %cst_5 = arith.constant 0.000000e+00 : f32
    %7 = vector.broadcast %cst_5 : f32 to vector<2x64xf32>
    %8 = arith.subf %7, %6 : vector<2x64xf32>
    %9 = math.exp %8 : vector<2x64xf32>
    %cst_6 = arith.constant 1.000000e+00 : f32
    %10 = vector.broadcast %cst_6 : f32 to vector<2x64xf32>
    %11 = arith.addf %10, %9 : vector<2x64xf32>
    %12 = tpu.reciprocal %11 {approx = true} : vector<2x64xf32> -> vector<2x64xf32>
    %13 = arith.mulf %6, %12 : vector<2x64xf32>
    %14 = arith.truncf %13 : vector<2x64xf32> to vector<2x64xbf16>
    %c0_7 = arith.constant 0 : index
    %c0_8 = arith.constant 0 : index
    %15 = vector.load %arg4[%c0_7, %c0_8] : memref<64x16xbf16, #tpu.memory_space<vmem>>, vector<64x16xbf16>
    %cst_9 = arith.constant dense<0.000000e+00> : vector<2x16xf32>
    %16 = tpu.matmul %14, %15, %cst_9 {dimension_numbers = #tpu.dot_dimension_numbers<[1], [0], [0], [1], [0, 0, 1, 1], [], []>} : vector<2x64xbf16>, vector<64x16xbf16>, vector<2x16xf32> -> vector<2x16xf32>
    %c0_10 = arith.constant 0 : index
    %c0_11 = arith.constant 0 : index
    %17 = vector.load %arg5[%c0_10, %c0_11] : memref<1x16xf32, #tpu.memory_space<vmem>>, vector<1x16xf32>
    %18 = vector.broadcast %17 : vector<1x16xf32> to vector<2x16xf32>
    %19 = arith.addf %16, %18 : vector<2x16xf32>
    %c0_12 = arith.constant 0 : index
    %c0_13 = arith.constant 0 : index
    %20 = vector.load %arg6[%c0_12, %c0_13] : memref<2x16xf32, #tpu.memory_space<vmem>>, vector<2x16xf32>
    tpu.vector_store %arg6[%c0_12, %c0_13], %19 {strides = array<i32>} : memref<2x16xf32, #tpu.memory_space<vmem>>, vector<2x16xf32>,
    return
  }
  func.func @transform_0(%arg0: i32) -> (i32, i32) {
    %c0_i32 = arith.constant 0 : i32
    %c0_i32_0 = arith.constant 0 : i32
    %c0_i32_1 = arith.constant 0 : i32
    return %c0_i32, %c0_i32_0 : i32, i32
  }
  func.func @transform_1(%arg0: i32) -> (i32, i32) {
    %c0_i32 = arith.constant 0 : i32
    %c0_i32_0 = arith.constant 0 : i32
    %c0_i32_1 = arith.constant 0 : i32
    return %c0_i32, %c0_i32_0 : i32, i32
  }
  func.func @transform_2(%arg0: i32) -> (i32, i32) {
    %c0_i32 = arith.constant 0 : i32
    %c0_i32_0 = arith.constant 0 : i32
    %c0_i32_1 = arith.constant 0 : i32
    return %c0_i32, %c0_i32_0 : i32, i32
  }
  func.func @transform_3(%arg0: i32) -> (i32, i32) {
    %c0_i32 = arith.constant 0 : i32
    %c0_i32_0 = arith.constant 0 : i32
    %c0_i32_1 = arith.constant 0 : i32
    return %c0_i32, %c0_i32_0 : i32, i32
  }
  func.func @transform_4(%arg0: i32) -> (i32, i32) {
    %c0_i32 = arith.constant 0 : i32
    %c0_i32_0 = arith.constant 0 : i32
    %c0_i32_1 = arith.constant 0 : i32
    return %c0_i32, %c0_i32_0 : i32, i32
  }
  func.func @transform_5(%arg0: i32) -> (i32, i32) {
    %c0_i32 = arith.constant 0 : i32
    %c0_i32_0 = arith.constant 0 : i32
    %c0_i32_1 = arith.constant 0 : i32
    return %c0_i32, %c0_i32_0 : i32, i32
  }
}

module attributes {stable_mosaic.version = 11 : i64} {
  func.func @down_kernel(%arg0: i32, %arg1: memref<2x4x2x16xf32, #tpu.memory_space<vmem>>, %arg2: memref<48x16xbf16, #tpu.memory_space<vmem>>, %arg3: memref<1x16xf32, #tpu.memory_space<vmem>>, %arg4: memref<2x4x16xf32, #tpu.memory_space<vmem>>) attributes {dimension_semantics = [#tpu.dimension_semantics<parallel>], iteration_bounds = array<i64: 1>, scalar_prefetch = 0 : i64, scratch_operands = 0 : i64, tpu.core_type = #tpu.core_type<tc>, window_params = [{pipeline_mode = #tpu.pipeline_mode<synchronous>, transform_indices = @transform_0, window_bounds = array<i64: 2, 4, 2, 16>}, {pipeline_mode = #tpu.pipeline_mode<synchronous>, transform_indices = @transform_1, window_bounds = array<i64: 48, 16>}, {pipeline_mode = #tpu.pipeline_mode<synchronous>, transform_indices = @transform_2, window_bounds = array<i64: 1, 16>}, {pipeline_mode = #tpu.pipeline_mode<synchronous>, transform_indices = @transform_3, window_bounds = array<i64: 2, 4, 16>}]} {
    %c0 = arith.constant 0 : index
    %c0_0 = arith.constant 0 : index
    %c0_1 = arith.constant 0 : index
    %c0_2 = arith.constant 0 : index
    %0 = vector.load %arg1[%c0, %c0_0, %c0_1, %c0_2] : memref<2x4x2x16xf32, #tpu.memory_space<vmem>>, vector<2x4x2x16xf32>
    %1 = vector.extract_strided_slice %0 {offsets = [0, 0, 0, 0], sizes = [2, 4, 1, 16], strides = [1, 1, 1, 1]} : vector<2x4x2x16xf32> to vector<2x4x1x16xf32>
    %2 = vector.shape_cast %1 : vector<2x4x1x16xf32> to vector<2x4x16xf32>
    %3 = vector.extract_strided_slice %0 {offsets = [0, 0, 1, 0], sizes = [2, 4, 1, 16], strides = [1, 1, 1, 1]} : vector<2x4x2x16xf32> to vector<2x4x1x16xf32>
    %4 = vector.shape_cast %3 : vector<2x4x1x16xf32> to vector<2x4x16xf32>
    %cst = arith.constant 0.000000e+00 : f32
    %5 = vector.broadcast %cst : f32 to vector<2x1x16xf32>
    %6 = vector.extract_strided_slice %4 {offsets = [0, 0, 0], sizes = [2, 3, 16], strides = [1, 1, 1]} : vector<2x4x16xf32> to vector<2x3x16xf32>
    %7 = tpu.concatenate %5, %6 in 1 : vector<2x1x16xf32>, vector<2x3x16xf32> -> vector<2x4x16xf32>
    %8 = tpu.concatenate %7, %2, %4 in 2 : vector<2x4x16xf32>, vector<2x4x16xf32>, vector<2x4x16xf32> -> vector<2x4x48xf32>
    %9 = vector.shape_cast %8 : vector<2x4x48xf32> to vector<8x48xf32>
    %10 = arith.truncf %9 : vector<8x48xf32> to vector<8x48xbf16>
    %c0_3 = arith.constant 0 : index
    %c0_4 = arith.constant 0 : index
    %11 = vector.load %arg2[%c0_3, %c0_4] : memref<48x16xbf16, #tpu.memory_space<vmem>>, vector<48x16xbf16>
    %cst_5 = arith.constant dense<0.000000e+00> : vector<8x16xf32>
    %12 = tpu.matmul %10, %11, %cst_5 {dimension_numbers = #tpu.dot_dimension_numbers<[1], [0], [0], [1], [0, 0, 1, 1], [], []>} : vector<8x48xbf16>, vector<48x16xbf16>, vector<8x16xf32> -> vector<8x16xf32>
    %c0_6 = arith.constant 0 : index
    %c0_7 = arith.constant 0 : index
    %13 = vector.load %arg3[%c0_6, %c0_7] : memref<1x16xf32, #tpu.memory_space<vmem>>, vector<1x16xf32>
    %14 = vector.broadcast %13 : vector<1x16xf32> to vector<8x16xf32>
    %15 = arith.addf %12, %14 : vector<8x16xf32>
    %16 = vector.shape_cast %15 : vector<8x16xf32> to vector<2x4x16xf32>
    %c0_8 = arith.constant 0 : index
    %c0_9 = arith.constant 0 : index
    %c0_10 = arith.constant 0 : index
    %17 = vector.load %arg4[%c0_8, %c0_9, %c0_10] : memref<2x4x16xf32, #tpu.memory_space<vmem>>, vector<2x4x16xf32>
    tpu.vector_store %arg4[%c0_8, %c0_9, %c0_10], %16 {strides = array<i32>} : memref<2x4x16xf32, #tpu.memory_space<vmem>>, vector<2x4x16xf32>,
    return
  }
  func.func @transform_0(%arg0: i32) -> (i32, i32, i32, i32) {
    %c0_i32 = arith.constant 0 : i32
    %c0_i32_0 = arith.constant 0 : i32
    %c0_i32_1 = arith.constant 0 : i32
    %c0_i32_2 = arith.constant 0 : i32
    %c0_i32_3 = arith.constant 0 : i32
    return %c0_i32, %c0_i32_0, %c0_i32_1, %c0_i32_2 : i32, i32, i32, i32
  }
  func.func @transform_1(%arg0: i32) -> (i32, i32) {
    %c0_i32 = arith.constant 0 : i32
    %c0_i32_0 = arith.constant 0 : i32
    %c0_i32_1 = arith.constant 0 : i32
    return %c0_i32, %c0_i32_0 : i32, i32
  }
  func.func @transform_2(%arg0: i32) -> (i32, i32) {
    %c0_i32 = arith.constant 0 : i32
    %c0_i32_0 = arith.constant 0 : i32
    %c0_i32_1 = arith.constant 0 : i32
    return %c0_i32, %c0_i32_0 : i32, i32
  }
  func.func @transform_3(%arg0: i32) -> (i32, i32, i32) {
    %c0_i32 = arith.constant 0 : i32
    %c0_i32_0 = arith.constant 0 : i32
    %c0_i32_1 = arith.constant 0 : i32
    %c0_i32_2 = arith.constant 0 : i32
    return %c0_i32, %c0_i32_0, %c0_i32_1 : i32, i32, i32
  }
}

module attributes {stable_mosaic.version = 11 : i64} {
  func.func @res_block_kernel(%arg0: i32, %arg1: memref<2x4x16xf32, #tpu.memory_space<vmem>>, %arg2: memref<2x24xf32, #tpu.memory_space<vmem>>, %arg3: memref<48x32xbf16, #tpu.memory_space<vmem>>, %arg4: memref<1x32xf32, #tpu.memory_space<vmem>>, %arg5: memref<1x32xf32, #tpu.memory_space<vmem>>, %arg6: memref<1x32xf32, #tpu.memory_space<vmem>>, %arg7: memref<32x8xf32, #tpu.memory_space<vmem>>, %arg8: memref<8x32xf32, #tpu.memory_space<vmem>>, %arg9: memref<24x32xbf16, #tpu.memory_space<vmem>>, %arg10: memref<1x32xf32, #tpu.memory_space<vmem>>, %arg11: memref<24x32xbf16, #tpu.memory_space<vmem>>, %arg12: memref<1x32xf32, #tpu.memory_space<vmem>>, %arg13: memref<96x32xbf16, #tpu.memory_space<vmem>>, %arg14: memref<1x32xf32, #tpu.memory_space<vmem>>, %arg15: memref<1x32xf32, #tpu.memory_space<vmem>>, %arg16: memref<1x32xf32, #tpu.memory_space<vmem>>, %arg17: memref<16x32xbf16, #tpu.memory_space<vmem>>, %arg18: memref<1x32xf32, #tpu.memory_space<vmem>>, %arg19: memref<2x4x32xf32, #tpu.memory_space<vmem>>) attributes {dimension_semantics = [#tpu.dimension_semantics<parallel>], iteration_bounds = array<i64: 1>, scalar_prefetch = 0 : i64, scratch_operands = 0 : i64, tpu.core_type = #tpu.core_type<tc>, window_params = [{transform_indices = @transform_0, window_bounds = array<i64: 2, 4, 16>}, {transform_indices = @transform_1, window_bounds = array<i64: 2, 24>}, {pipeline_mode = #tpu.pipeline_mode<synchronous>, transform_indices = @transform_2, window_bounds = array<i64: 48, 32>}, {pipeline_mode = #tpu.pipeline_mode<synchronous>, transform_indices = @transform_3, window_bounds = array<i64: 1, 32>}, {pipeline_mode = #tpu.pipeline_mode<synchronous>, transform_indices = @transform_4, window_bounds = array<i64: 1, 32>}, {pipeline_mode = #tpu.pipeline_mode<synchronous>, transform_indices = @transform_5, window_bounds = array<i64: 1, 32>}, {pipeline_mode = #tpu.pipeline_mode<synchronous>, transform_indices = @transform_6, window_bounds = array<i64: 32, 8>}, {pipeline_mode = #tpu.pipeline_mode<synchronous>, transform_indices = @transform_7, window_bounds = array<i64: 8, 32>}, {pipeline_mode = #tpu.pipeline_mode<synchronous>, transform_indices = @transform_8, window_bounds = array<i64: 24, 32>}, {pipeline_mode = #tpu.pipeline_mode<synchronous>, transform_indices = @transform_9, window_bounds = array<i64: 1, 32>}, {pipeline_mode = #tpu.pipeline_mode<synchronous>, transform_indices = @transform_10, window_bounds = array<i64: 24, 32>}, {pipeline_mode = #tpu.pipeline_mode<synchronous>, transform_indices = @transform_11, window_bounds = array<i64: 1, 32>}, {pipeline_mode = #tpu.pipeline_mode<synchronous>, transform_indices = @transform_12, window_bounds = array<i64: 96, 32>}, {pipeline_mode = #tpu.pipeline_mode<synchronous>, transform_indices = @transform_13, window_bounds = array<i64: 1, 32>}, {pipeline_mode = #tpu.pipeline_mode<synchronous>, transform_indices = @transform_14, window_bounds = array<i64: 1, 32>}, {pipeline_mode = #tpu.pipeline_mode<synchronous>, transform_indices = @transform_15, window_bounds = array<i64: 1, 32>}, {pipeline_mode = #tpu.pipeline_mode<synchronous>, transform_indices = @transform_16, window_bounds = array<i64: 16, 32>}, {pipeline_mode = #tpu.pipeline_mode<synchronous>, transform_indices = @transform_17, window_bounds = array<i64: 1, 32>}, {transform_indices = @transform_18, window_bounds = array<i64: 2, 4, 32>}]} {
    %c0 = arith.constant 0 : index
    %c0_0 = arith.constant 0 : index
    %c0_1 = arith.constant 0 : index
    %0 = vector.load %arg1[%c0, %c0_0, %c0_1] : memref<2x4x16xf32, #tpu.memory_space<vmem>>, vector<2x4x16xf32>
    %c0_2 = arith.constant 0 : index
    %c0_3 = arith.constant 0 : index
    %1 = vector.load %arg7[%c0_2, %c0_3] : memref<32x8xf32, #tpu.memory_space<vmem>>, vector<32x8xf32>
    %c0_4 = arith.constant 0 : index
    %c0_5 = arith.constant 0 : index
    %2 = vector.load %arg8[%c0_4, %c0_5] : memref<8x32xf32, #tpu.memory_space<vmem>>, vector<8x32xf32>
    %cst = arith.constant 0.000000e+00 : f32
    %3 = vector.broadcast %cst : f32 to vector<2x1x16xf32>
    %4 = vector.extract_strided_slice %0 {offsets = [0, 0, 0], sizes = [2, 3, 16], strides = [1, 1, 1]} : vector<2x4x16xf32> to vector<2x3x16xf32>
    %5 = tpu.concatenate %3, %4 in 1 : vector<2x1x16xf32>, vector<2x3x16xf32> -> vector<2x4x16xf32>
    %6 = vector.extract_strided_slice %0 {offsets = [0, 1, 0], sizes = [2, 3, 16], strides = [1, 1, 1]} : vector<2x4x16xf32> to vector<2x3x16xf32>
    %7 = tpu.concatenate %6, %3 in 1 : vector<2x3x16xf32>, vector<2x1x16xf32> -> vector<2x4x16xf32>
    %8 = tpu.concatenate %5, %0, %7 in 2 : vector<2x4x16xf32>, vector<2x4x16xf32>, vector<2x4x16xf32> -> vector<2x4x48xf32>
    %9 = vector.shape_cast %8 : vector<2x4x48xf32> to vector<8x48xf32>
    %10 = arith.truncf %9 : vector<8x48xf32> to vector<8x48xbf16>
    %c0_6 = arith.constant 0 : index
    %c0_7 = arith.constant 0 : index
    %11 = vector.load %arg3[%c0_6, %c0_7] : memref<48x32xbf16, #tpu.memory_space<vmem>>, vector<48x32xbf16>
    %cst_8 = arith.constant dense<0.000000e+00> : vector<8x32xf32>
    %12 = tpu.matmul %10, %11, %cst_8 {dimension_numbers = #tpu.dot_dimension_numbers<[1], [0], [0], [1], [0, 0, 1, 1], [], []>} : vector<8x48xbf16>, vector<48x32xbf16>, vector<8x32xf32> -> vector<8x32xf32>
    %13 = vector.shape_cast %12 : vector<8x32xf32> to vector<2x4x32xf32>
    %c0_9 = arith.constant 0 : index
    %c0_10 = arith.constant 0 : index
    %14 = vector.load %arg4[%c0_9, %c0_10] : memref<1x32xf32, #tpu.memory_space<vmem>>, vector<1x32xf32>
    %15 = vector.shape_cast %14 : vector<1x32xf32> to vector<1x1x32xf32>
    %16 = vector.broadcast %15 : vector<1x1x32xf32> to vector<2x4x32xf32>
    %17 = arith.addf %13, %16 : vector<2x4x32xf32>
    %c0_11 = arith.constant 0 : index
    %c0_12 = arith.constant 0 : index
    %18 = vector.load %arg5[%c0_11, %c0_12] : memref<1x32xf32, #tpu.memory_space<vmem>>, vector<1x32xf32>
    %c0_13 = arith.constant 0 : index
    %c0_14 = arith.constant 0 : index
    %19 = vector.load %arg6[%c0_13, %c0_14] : memref<1x32xf32, #tpu.memory_space<vmem>>, vector<1x32xf32>
    %cst_15 = arith.constant dense<0.000000e+00> : vector<2x32xf32>
    %20 = vector.multi_reduction <add>, %17, %cst_15 [1] : vector<2x4x32xf32> to vector<2x32xf32>
    %21 = arith.mulf %17, %17 : vector<2x4x32xf32>
    %cst_16 = arith.constant dense<0.000000e+00> : vector<2x32xf32>
    %22 = vector.multi_reduction <add>, %21, %cst_16 [1] : vector<2x4x32xf32> to vector<2x32xf32>
    %cst_17 = arith.constant dense<0.000000e+00> : vector<2x8xf32>
    %23 = tpu.matmul %20, %1, %cst_17 {dimension_numbers = #tpu.dot_dimension_numbers<[1], [0], [0], [1], [0, 0, 1, 1], [], []>} : vector<2x32xf32>, vector<32x8xf32>, vector<2x8xf32> -> vector<2x8xf32>
    %cst_18 = arith.constant dense<0.000000e+00> : vector<2x32xf32>
    %24 = tpu.matmul %23, %2, %cst_18 {dimension_numbers = #tpu.dot_dimension_numbers<[1], [0], [0], [1], [0, 0, 1, 1], [], []>} : vector<2x8xf32>, vector<8x32xf32>, vector<2x32xf32> -> vector<2x32xf32>
    %cst_19 = arith.constant 6.250000e-02 : f32
    %25 = vector.broadcast %cst_19 : f32 to vector<2x32xf32>
    %26 = arith.mulf %24, %25 : vector<2x32xf32>
    %cst_20 = arith.constant dense<0.000000e+00> : vector<2x8xf32>
    %27 = tpu.matmul %22, %1, %cst_20 {dimension_numbers = #tpu.dot_dimension_numbers<[1], [0], [0], [1], [0, 0, 1, 1], [], []>} : vector<2x32xf32>, vector<32x8xf32>, vector<2x8xf32> -> vector<2x8xf32>
    %cst_21 = arith.constant dense<0.000000e+00> : vector<2x32xf32>
    %28 = tpu.matmul %27, %2, %cst_21 {dimension_numbers = #tpu.dot_dimension_numbers<[1], [0], [0], [1], [0, 0, 1, 1], [], []>} : vector<2x8xf32>, vector<8x32xf32>, vector<2x32xf32> -> vector<2x32xf32>
    %cst_22 = arith.constant 6.250000e-02 : f32
    %29 = vector.broadcast %cst_22 : f32 to vector<2x32xf32>
    %30 = arith.mulf %28, %29 : vector<2x32xf32>
    %31 = arith.mulf %26, %26 : vector<2x32xf32>
    %32 = arith.subf %30, %31 : vector<2x32xf32>
    %cst_23 = arith.constant 0.000000e+00 : f32
    %33 = vector.broadcast %cst_23 : f32 to vector<2x32xf32>
    %34 = arith.maximumf %32, %33 : vector<2x32xf32>
    %35 = vector.shape_cast %26 : vector<2x32xf32> to vector<2x1x32xf32>
    %36 = vector.broadcast %35 : vector<2x1x32xf32> to vector<2x4x32xf32>
    %37 = arith.subf %17, %36 : vector<2x4x32xf32>
    %38 = vector.shape_cast %34 : vector<2x32xf32> to vector<2x1x32xf32>
    %cst_24 = arith.constant 9.99999974E-6 : f32
    %39 = vector.broadcast %cst_24 : f32 to vector<2x1x32xf32>
    %40 = arith.addf %38, %39 : vector<2x1x32xf32>
    %41 = math.rsqrt %40 : vector<2x1x32xf32>
    %42 = vector.broadcast %41 : vector<2x1x32xf32> to vector<2x4x32xf32>
    %43 = arith.mulf %37, %42 : vector<2x4x32xf32>
    %44 = vector.shape_cast %18 : vector<1x32xf32> to vector<1x1x32xf32>
    %45 = vector.broadcast %44 : vector<1x1x32xf32> to vector<2x4x32xf32>
    %46 = arith.mulf %43, %45 : vector<2x4x32xf32>
    %47 = vector.shape_cast %19 : vector<1x32xf32> to vector<1x1x32xf32>
    %48 = vector.broadcast %47 : vector<1x1x32xf32> to vector<2x4x32xf32>
    %49 = arith.addf %46, %48 : vector<2x4x32xf32>
    %cst_25 = arith.constant 2.000000e+01 : f32
    %50 = vector.broadcast %cst_25 : f32 to vector<2x4x32xf32>
    %51 = arith.minimumf %49, %50 : vector<2x4x32xf32>
    %52 = math.exp %51 : vector<2x4x32xf32>
    %cst_26 = arith.constant 1.000000e+00 : f32
    %53 = vector.broadcast %cst_26 : f32 to vector<2x4x32xf32>
    %54 = arith.addf %53, %52 : vector<2x4x32xf32>
    %cst_27 = arith.constant 1.000000e+00 : f32
    %55 = vector.broadcast %cst_27 : f32 to vector<2x4x32xf32>
    %56 = arith.addf %55, %52 : vector<2x4x32xf32>
    %57 = arith.mulf %54, %56 : vector<2x4x32xf32>
    %cst_28 = arith.constant 1.000000e+00 : f32
    %58 = vector.broadcast %cst_28 : f32 to vector<2x4x32xf32>
    %59 = arith.subf %57, %58 : vector<2x4x32xf32>
    %60 = arith.mulf %49, %59 : vector<2x4x32xf32>
    %cst_29 = arith.constant 1.000000e+00 : f32
    %61 = vector.broadcast %cst_29 : f32 to vector<2x4x32xf32>
    %62 = arith.addf %57, %61 : vector<2x4x32xf32>
    %63 = tpu.reciprocal %62 {approx = true} : vector<2x4x32xf32> -> vector<2x4x32xf32>
    %64 = arith.mulf %60, %63 : vector<2x4x32xf32>
    %c0_30 = arith.constant 0 : index
    %c0_31 = arith.constant 0 : index
    %65 = vector.load %arg2[%c0_30, %c0_31] : memref<2x24xf32, #tpu.memory_space<vmem>>, vector<2x24xf32>
    %66 = arith.truncf %65 : vector<2x24xf32> to vector<2x24xbf16>
    %c0_32 = arith.constant 0 : index
    %c0_33 = arith.constant 0 : index
    %67 = vector.load %arg9[%c0_32, %c0_33] : memref<24x32xbf16, #tpu.memory_space<vmem>>, vector<24x32xbf16>
    %cst_34 = arith.constant dense<0.000000e+00> : vector<2x32xf32>
    %68 = tpu.matmul %66, %67, %cst_34 {dimension_numbers = #tpu.dot_dimension_numbers<[1], [0], [0], [1], [0, 0, 1, 1], [], []>} : vector<2x24xbf16>, vector<24x32xbf16>, vector<2x32xf32> -> vector<2x32xf32>
    %c0_35 = arith.constant 0 : index
    %c0_36 = arith.constant 0 : index
    %69 = vector.load %arg10[%c0_35, %c0_36] : memref<1x32xf32, #tpu.memory_space<vmem>>, vector<1x32xf32>
    %70 = vector.broadcast %69 : vector<1x32xf32> to vector<2x32xf32>
    %71 = arith.addf %68, %70 : vector<2x32xf32>
    %c0_37 = arith.constant 0 : index
    %c0_38 = arith.constant 0 : index
    %72 = vector.load %arg11[%c0_37, %c0_38] : memref<24x32xbf16, #tpu.memory_space<vmem>>, vector<24x32xbf16>
    %cst_39 = arith.constant dense<0.000000e+00> : vector<2x32xf32>
    %73 = tpu.matmul %66, %72, %cst_39 {dimension_numbers = #tpu.dot_dimension_numbers<[1], [0], [0], [1], [0, 0, 1, 1], [], []>} : vector<2x24xbf16>, vector<24x32xbf16>, vector<2x32xf32> -> vector<2x32xf32>
    %c0_40 = arith.constant 0 : index
    %c0_41 = arith.constant 0 : index
    %74 = vector.load %arg12[%c0_40, %c0_41] : memref<1x32xf32, #tpu.memory_space<vmem>>, vector<1x32xf32>
    %75 = vector.broadcast %74 : vector<1x32xf32> to vector<2x32xf32>
    %76 = arith.addf %73, %75 : vector<2x32xf32>
    %77 = vector.shape_cast %71 : vector<2x32xf32> to vector<2x1x32xf32>
    %cst_42 = arith.constant 1.000000e+00 : f32
    %78 = vector.broadcast %cst_42 : f32 to vector<2x1x32xf32>
    %79 = arith.addf %77, %78 : vector<2x1x32xf32>
    %80 = vector.broadcast %79 : vector<2x1x32xf32> to vector<2x4x32xf32>
    %81 = arith.mulf %64, %80 : vector<2x4x32xf32>
    %82 = vector.shape_cast %76 : vector<2x32xf32> to vector<2x1x32xf32>
    %83 = vector.broadcast %82 : vector<2x1x32xf32> to vector<2x4x32xf32>
    %84 = arith.addf %81, %83 : vector<2x4x32xf32>
    %cst_43 = arith.constant 0.000000e+00 : f32
    %85 = vector.broadcast %cst_43 : f32 to vector<2x1x32xf32>
    %86 = vector.extract_strided_slice %84 {offsets = [0, 0, 0], sizes = [2, 3, 32], strides = [1, 1, 1]} : vector<2x4x32xf32> to vector<2x3x32xf32>
    %87 = tpu.concatenate %85, %86 in 1 : vector<2x1x32xf32>, vector<2x3x32xf32> -> vector<2x4x32xf32>
    %88 = vector.extract_strided_slice %84 {offsets = [0, 1, 0], sizes = [2, 3, 32], strides = [1, 1, 1]} : vector<2x4x32xf32> to vector<2x3x32xf32>
    %89 = tpu.concatenate %88, %85 in 1 : vector<2x3x32xf32>, vector<2x1x32xf32> -> vector<2x4x32xf32>
    %90 = tpu.concatenate %87, %84, %89 in 2 : vector<2x4x32xf32>, vector<2x4x32xf32>, vector<2x4x32xf32> -> vector<2x4x96xf32>
    %91 = vector.shape_cast %90 : vector<2x4x96xf32> to vector<8x96xf32>
    %92 = arith.truncf %91 : vector<8x96xf32> to vector<8x96xbf16>
    %c0_44 = arith.constant 0 : index
    %c0_45 = arith.constant 0 : index
    %93 = vector.load %arg13[%c0_44, %c0_45] : memref<96x32xbf16, #tpu.memory_space<vmem>>, vector<96x32xbf16>
    %cst_46 = arith.constant dense<0.000000e+00> : vector<8x32xf32>
    %94 = tpu.matmul %92, %93, %cst_46 {dimension_numbers = #tpu.dot_dimension_numbers<[1], [0], [0], [1], [0, 0, 1, 1], [], []>} : vector<8x96xbf16>, vector<96x32xbf16>, vector<8x32xf32> -> vector<8x32xf32>
    %95 = vector.shape_cast %94 : vector<8x32xf32> to vector<2x4x32xf32>
    %c0_47 = arith.constant 0 : index
    %c0_48 = arith.constant 0 : index
    %96 = vector.load %arg14[%c0_47, %c0_48] : memref<1x32xf32, #tpu.memory_space<vmem>>, vector<1x32xf32>
    %97 = vector.shape_cast %96 : vector<1x32xf32> to vector<1x1x32xf32>
    %98 = vector.broadcast %97 : vector<1x1x32xf32> to vector<2x4x32xf32>
    %99 = arith.addf %95, %98 : vector<2x4x32xf32>
    %c0_49 = arith.constant 0 : index
    %c0_50 = arith.constant 0 : index
    %100 = vector.load %arg15[%c0_49, %c0_50] : memref<1x32xf32, #tpu.memory_space<vmem>>, vector<1x32xf32>
    %c0_51 = arith.constant 0 : index
    %c0_52 = arith.constant 0 : index
    %101 = vector.load %arg16[%c0_51, %c0_52] : memref<1x32xf32, #tpu.memory_space<vmem>>, vector<1x32xf32>
    %cst_53 = arith.constant dense<0.000000e+00> : vector<2x32xf32>
    %102 = vector.multi_reduction <add>, %99, %cst_53 [1] : vector<2x4x32xf32> to vector<2x32xf32>
    %103 = arith.mulf %99, %99 : vector<2x4x32xf32>
    %cst_54 = arith.constant dense<0.000000e+00> : vector<2x32xf32>
    %104 = vector.multi_reduction <add>, %103, %cst_54 [1] : vector<2x4x32xf32> to vector<2x32xf32>
    %cst_55 = arith.constant dense<0.000000e+00> : vector<2x8xf32>
    %105 = tpu.matmul %102, %1, %cst_55 {dimension_numbers = #tpu.dot_dimension_numbers<[1], [0], [0], [1], [0, 0, 1, 1], [], []>} : vector<2x32xf32>, vector<32x8xf32>, vector<2x8xf32> -> vector<2x8xf32>
    %cst_56 = arith.constant dense<0.000000e+00> : vector<2x32xf32>
    %106 = tpu.matmul %105, %2, %cst_56 {dimension_numbers = #tpu.dot_dimension_numbers<[1], [0], [0], [1], [0, 0, 1, 1], [], []>} : vector<2x8xf32>, vector<8x32xf32>, vector<2x32xf32> -> vector<2x32xf32>
    %cst_57 = arith.constant 6.250000e-02 : f32
    %107 = vector.broadcast %cst_57 : f32 to vector<2x32xf32>
    %108 = arith.mulf %106, %107 : vector<2x32xf32>
    %cst_58 = arith.constant dense<0.000000e+00> : vector<2x8xf32>
    %109 = tpu.matmul %104, %1, %cst_58 {dimension_numbers = #tpu.dot_dimension_numbers<[1], [0], [0], [1], [0, 0, 1, 1], [], []>} : vector<2x32xf32>, vector<32x8xf32>, vector<2x8xf32> -> vector<2x8xf32>
    %cst_59 = arith.constant dense<0.000000e+00> : vector<2x32xf32>
    %110 = tpu.matmul %109, %2, %cst_59 {dimension_numbers = #tpu.dot_dimension_numbers<[1], [0], [0], [1], [0, 0, 1, 1], [], []>} : vector<2x8xf32>, vector<8x32xf32>, vector<2x32xf32> -> vector<2x32xf32>
    %cst_60 = arith.constant 6.250000e-02 : f32
    %111 = vector.broadcast %cst_60 : f32 to vector<2x32xf32>
    %112 = arith.mulf %110, %111 : vector<2x32xf32>
    %113 = arith.mulf %108, %108 : vector<2x32xf32>
    %114 = arith.subf %112, %113 : vector<2x32xf32>
    %cst_61 = arith.constant 0.000000e+00 : f32
    %115 = vector.broadcast %cst_61 : f32 to vector<2x32xf32>
    %116 = arith.maximumf %114, %115 : vector<2x32xf32>
    %117 = vector.shape_cast %108 : vector<2x32xf32> to vector<2x1x32xf32>
    %118 = vector.broadcast %117 : vector<2x1x32xf32> to vector<2x4x32xf32>
    %119 = arith.subf %99, %118 : vector<2x4x32xf32>
    %120 = vector.shape_cast %116 : vector<2x32xf32> to vector<2x1x32xf32>
    %cst_62 = arith.constant 9.99999974E-6 : f32
    %121 = vector.broadcast %cst_62 : f32 to vector<2x1x32xf32>
    %122 = arith.addf %120, %121 : vector<2x1x32xf32>
    %123 = math.rsqrt %122 : vector<2x1x32xf32>
    %124 = vector.broadcast %123 : vector<2x1x32xf32> to vector<2x4x32xf32>
    %125 = arith.mulf %119, %124 : vector<2x4x32xf32>
    %126 = vector.shape_cast %100 : vector<1x32xf32> to vector<1x1x32xf32>
    %127 = vector.broadcast %126 : vector<1x1x32xf32> to vector<2x4x32xf32>
    %128 = arith.mulf %125, %127 : vector<2x4x32xf32>
    %129 = vector.shape_cast %101 : vector<1x32xf32> to vector<1x1x32xf32>
    %130 = vector.broadcast %129 : vector<1x1x32xf32> to vector<2x4x32xf32>
    %131 = arith.addf %128, %130 : vector<2x4x32xf32>
    %cst_63 = arith.constant 2.000000e+01 : f32
    %132 = vector.broadcast %cst_63 : f32 to vector<2x4x32xf32>
    %133 = arith.minimumf %131, %132 : vector<2x4x32xf32>
    %134 = math.exp %133 : vector<2x4x32xf32>
    %cst_64 = arith.constant 1.000000e+00 : f32
    %135 = vector.broadcast %cst_64 : f32 to vector<2x4x32xf32>
    %136 = arith.addf %135, %134 : vector<2x4x32xf32>
    %cst_65 = arith.constant 1.000000e+00 : f32
    %137 = vector.broadcast %cst_65 : f32 to vector<2x4x32xf32>
    %138 = arith.addf %137, %134 : vector<2x4x32xf32>
    %139 = arith.mulf %136, %138 : vector<2x4x32xf32>
    %cst_66 = arith.constant 1.000000e+00 : f32
    %140 = vector.broadcast %cst_66 : f32 to vector<2x4x32xf32>
    %141 = arith.subf %139, %140 : vector<2x4x32xf32>
    %142 = arith.mulf %131, %141 : vector<2x4x32xf32>
    %cst_67 = arith.constant 1.000000e+00 : f32
    %143 = vector.broadcast %cst_67 : f32 to vector<2x4x32xf32>
    %144 = arith.addf %139, %143 : vector<2x4x32xf32>
    %145 = tpu.reciprocal %144 {approx = true} : vector<2x4x32xf32> -> vector<2x4x32xf32>
    %146 = arith.mulf %142, %145 : vector<2x4x32xf32>
    %147 = vector.shape_cast %0 : vector<2x4x16xf32> to vector<8x16xf32>
    %148 = arith.truncf %147 : vector<8x16xf32> to vector<8x16xbf16>
    %c0_68 = arith.constant 0 : index
    %c0_69 = arith.constant 0 : index
    %149 = vector.load %arg17[%c0_68, %c0_69] : memref<16x32xbf16, #tpu.memory_space<vmem>>, vector<16x32xbf16>
    %cst_70 = arith.constant dense<0.000000e+00> : vector<8x32xf32>
    %150 = tpu.matmul %148, %149, %cst_70 {dimension_numbers = #tpu.dot_dimension_numbers<[1], [0], [0], [1], [0, 0, 1, 1], [], []>} : vector<8x16xbf16>, vector<16x32xbf16>, vector<8x32xf32> -> vector<8x32xf32>
    %151 = vector.shape_cast %150 : vector<8x32xf32> to vector<2x4x32xf32>
    %c0_71 = arith.constant 0 : index
    %c0_72 = arith.constant 0 : index
    %152 = vector.load %arg18[%c0_71, %c0_72] : memref<1x32xf32, #tpu.memory_space<vmem>>, vector<1x32xf32>
    %153 = vector.shape_cast %152 : vector<1x32xf32> to vector<1x1x32xf32>
    %154 = vector.broadcast %153 : vector<1x1x32xf32> to vector<2x4x32xf32>
    %155 = arith.addf %151, %154 : vector<2x4x32xf32>
    %156 = arith.addf %146, %155 : vector<2x4x32xf32>
    %c0_73 = arith.constant 0 : index
    %c0_74 = arith.constant 0 : index
    %c0_75 = arith.constant 0 : index
    %157 = vector.load %arg19[%c0_73, %c0_74, %c0_75] : memref<2x4x32xf32, #tpu.memory_space<vmem>>, vector<2x4x32xf32>
    tpu.vector_store %arg19[%c0_73, %c0_74, %c0_75], %156 {strides = array<i32>} : memref<2x4x32xf32, #tpu.memory_space<vmem>>, vector<2x4x32xf32>,
    return
  }
  func.func @transform_0(%arg0: i32) -> (i32, i32, i32) {
    %c0_i32 = arith.constant 0 : i32
    %c0_i32_0 = arith.constant 0 : i32
    %c0_i32_1 = arith.constant 0 : i32
    return %arg0, %c0_i32, %c0_i32_0 : i32, i32, i32
  }
  func.func @transform_1(%arg0: i32) -> (i32, i32) {
    %c0_i32 = arith.constant 0 : i32
    %c0_i32_0 = arith.constant 0 : i32
    return %arg0, %c0_i32 : i32, i32
  }
  func.func @transform_2(%arg0: i32) -> (i32, i32) {
    %c0_i32 = arith.constant 0 : i32
    %c0_i32_0 = arith.constant 0 : i32
    %c0_i32_1 = arith.constant 0 : i32
    return %c0_i32, %c0_i32_0 : i32, i32
  }
  func.func @transform_3(%arg0: i32) -> (i32, i32) {
    %c0_i32 = arith.constant 0 : i32
    %c0_i32_0 = arith.constant 0 : i32
    %c0_i32_1 = arith.constant 0 : i32
    return %c0_i32, %c0_i32_0 : i32, i32
  }
  func.func @transform_4(%arg0: i32) -> (i32, i32) {
    %c0_i32 = arith.constant 0 : i32
    %c0_i32_0 = arith.constant 0 : i32
    %c0_i32_1 = arith.constant 0 : i32
    return %c0_i32, %c0_i32_0 : i32, i32
  }
  func.func @transform_5(%arg0: i32) -> (i32, i32) {
    %c0_i32 = arith.constant 0 : i32
    %c0_i32_0 = arith.constant 0 : i32
    %c0_i32_1 = arith.constant 0 : i32
    return %c0_i32, %c0_i32_0 : i32, i32
  }
  func.func @transform_6(%arg0: i32) -> (i32, i32) {
    %c0_i32 = arith.constant 0 : i32
    %c0_i32_0 = arith.constant 0 : i32
    %c0_i32_1 = arith.constant 0 : i32
    return %c0_i32, %c0_i32_0 : i32, i32
  }
  func.func @transform_7(%arg0: i32) -> (i32, i32) {
    %c0_i32 = arith.constant 0 : i32
    %c0_i32_0 = arith.constant 0 : i32
    %c0_i32_1 = arith.constant 0 : i32
    return %c0_i32, %c0_i32_0 : i32, i32
  }
  func.func @transform_8(%arg0: i32) -> (i32, i32) {
    %c0_i32 = arith.constant 0 : i32
    %c0_i32_0 = arith.constant 0 : i32
    %c0_i32_1 = arith.constant 0 : i32
    return %c0_i32, %c0_i32_0 : i32, i32
  }
  func.func @transform_9(%arg0: i32) -> (i32, i32) {
    %c0_i32 = arith.constant 0 : i32
    %c0_i32_0 = arith.constant 0 : i32
    %c0_i32_1 = arith.constant 0 : i32
    return %c0_i32, %c0_i32_0 : i32, i32
  }
  func.func @transform_10(%arg0: i32) -> (i32, i32) {
    %c0_i32 = arith.constant 0 : i32
    %c0_i32_0 = arith.constant 0 : i32
    %c0_i32_1 = arith.constant 0 : i32
    return %c0_i32, %c0_i32_0 : i32, i32
  }
  func.func @transform_11(%arg0: i32) -> (i32, i32) {
    %c0_i32 = arith.constant 0 : i32
    %c0_i32_0 = arith.constant 0 : i32
    %c0_i32_1 = arith.constant 0 : i32
    return %c0_i32, %c0_i32_0 : i32, i32
  }
  func.func @transform_12(%arg0: i32) -> (i32, i32) {
    %c0_i32 = arith.constant 0 : i32
    %c0_i32_0 = arith.constant 0 : i32
    %c0_i32_1 = arith.constant 0 : i32
    return %c0_i32, %c0_i32_0 : i32, i32
  }
  func.func @transform_13(%arg0: i32) -> (i32, i32) {
    %c0_i32 = arith.constant 0 : i32
    %c0_i32_0 = arith.constant 0 : i32
    %c0_i32_1 = arith.constant 0 : i32
    return %c0_i32, %c0_i32_0 : i32, i32
  }
  func.func @transform_14(%arg0: i32) -> (i32, i32) {
    %c0_i32 = arith.constant 0 : i32
    %c0_i32_0 = arith.constant 0 : i32
    %c0_i32_1 = arith.constant 0 : i32
    return %c0_i32, %c0_i32_0 : i32, i32
  }
  func.func @transform_15(%arg0: i32) -> (i32, i32) {
    %c0_i32 = arith.constant 0 : i32
    %c0_i32_0 = arith.constant 0 : i32
    %c0_i32_1 = arith.constant 0 : i32
    return %c0_i32, %c0_i32_0 : i32, i32
  }
  func.func @transform_16(%arg0: i32) -> (i32, i32) {
    %c0_i32 = arith.constant 0 : i32
    %c0_i32_0 = arith.constant 0 : i32
    %c0_i32_1 = arith.constant 0 : i32
    return %c0_i32, %c0_i32_0 : i32, i32
  }
  func.func @transform_17(%arg0: i32) -> (i32, i32) {
    %c0_i32 = arith.constant 0 : i32
    %c0_i32_0 = arith.constant 0 : i32
    %c0_i32_1 = arith.constant 0 : i32
    return %c0_i32, %c0_i32_0 : i32, i32
  }
  func.func @transform_18(%arg0: i32) -> (i32, i32, i32) {
    %c0_i32 = arith.constant 0 : i32
    %c0_i32_0 = arith.constant 0 : i32
    %c0_i32_1 = arith.constant 0 : i32
    return %arg0, %c0_i32, %c0_i32_0 : i32, i32, i32
  }
}

module attributes {stable_mosaic.version = 11 : i64} {
  func.func @res_block_kernel(%arg0: i32, %arg1: memref<2x4x32xf32, #tpu.memory_space<vmem>>, %arg2: memref<2x24xf32, #tpu.memory_space<vmem>>, %arg3: memref<96x32xbf16, #tpu.memory_space<vmem>>, %arg4: memref<1x32xf32, #tpu.memory_space<vmem>>, %arg5: memref<1x32xf32, #tpu.memory_space<vmem>>, %arg6: memref<1x32xf32, #tpu.memory_space<vmem>>, %arg7: memref<32x8xf32, #tpu.memory_space<vmem>>, %arg8: memref<8x32xf32, #tpu.memory_space<vmem>>, %arg9: memref<24x32xbf16, #tpu.memory_space<vmem>>, %arg10: memref<1x32xf32, #tpu.memory_space<vmem>>, %arg11: memref<24x32xbf16, #tpu.memory_space<vmem>>, %arg12: memref<1x32xf32, #tpu.memory_space<vmem>>, %arg13: memref<96x32xbf16, #tpu.memory_space<vmem>>, %arg14: memref<1x32xf32, #tpu.memory_space<vmem>>, %arg15: memref<1x32xf32, #tpu.memory_space<vmem>>, %arg16: memref<1x32xf32, #tpu.memory_space<vmem>>, %arg17: memref<2x4x32xf32, #tpu.memory_space<vmem>>) attributes {dimension_semantics = [#tpu.dimension_semantics<parallel>], iteration_bounds = array<i64: 1>, scalar_prefetch = 0 : i64, scratch_operands = 0 : i64, tpu.core_type = #tpu.core_type<tc>, window_params = [{transform_indices = @transform_0, window_bounds = array<i64: 2, 4, 32>}, {transform_indices = @transform_1, window_bounds = array<i64: 2, 24>}, {pipeline_mode = #tpu.pipeline_mode<synchronous>, transform_indices = @transform_2, window_bounds = array<i64: 96, 32>}, {pipeline_mode = #tpu.pipeline_mode<synchronous>, transform_indices = @transform_3, window_bounds = array<i64: 1, 32>}, {pipeline_mode = #tpu.pipeline_mode<synchronous>, transform_indices = @transform_4, window_bounds = array<i64: 1, 32>}, {pipeline_mode = #tpu.pipeline_mode<synchronous>, transform_indices = @transform_5, window_bounds = array<i64: 1, 32>}, {pipeline_mode = #tpu.pipeline_mode<synchronous>, transform_indices = @transform_6, window_bounds = array<i64: 32, 8>}, {pipeline_mode = #tpu.pipeline_mode<synchronous>, transform_indices = @transform_7, window_bounds = array<i64: 8, 32>}, {pipeline_mode = #tpu.pipeline_mode<synchronous>, transform_indices = @transform_8, window_bounds = array<i64: 24, 32>}, {pipeline_mode = #tpu.pipeline_mode<synchronous>, transform_indices = @transform_9, window_bounds = array<i64: 1, 32>}, {pipeline_mode = #tpu.pipeline_mode<synchronous>, transform_indices = @transform_10, window_bounds = array<i64: 24, 32>}, {pipeline_mode = #tpu.pipeline_mode<synchronous>, transform_indices = @transform_11, window_bounds = array<i64: 1, 32>}, {pipeline_mode = #tpu.pipeline_mode<synchronous>, transform_indices = @transform_12, window_bounds = array<i64: 96, 32>}, {pipeline_mode = #tpu.pipeline_mode<synchronous>, transform_indices = @transform_13, window_bounds = array<i64: 1, 32>}, {pipeline_mode = #tpu.pipeline_mode<synchronous>, transform_indices = @transform_14, window_bounds = array<i64: 1, 32>}, {pipeline_mode = #tpu.pipeline_mode<synchronous>, transform_indices = @transform_15, window_bounds = array<i64: 1, 32>}, {transform_indices = @transform_16, window_bounds = array<i64: 2, 4, 32>}]} {
    %c0 = arith.constant 0 : index
    %c0_0 = arith.constant 0 : index
    %c0_1 = arith.constant 0 : index
    %0 = vector.load %arg1[%c0, %c0_0, %c0_1] : memref<2x4x32xf32, #tpu.memory_space<vmem>>, vector<2x4x32xf32>
    %c0_2 = arith.constant 0 : index
    %c0_3 = arith.constant 0 : index
    %1 = vector.load %arg7[%c0_2, %c0_3] : memref<32x8xf32, #tpu.memory_space<vmem>>, vector<32x8xf32>
    %c0_4 = arith.constant 0 : index
    %c0_5 = arith.constant 0 : index
    %2 = vector.load %arg8[%c0_4, %c0_5] : memref<8x32xf32, #tpu.memory_space<vmem>>, vector<8x32xf32>
    %cst = arith.constant 0.000000e+00 : f32
    %3 = vector.broadcast %cst : f32 to vector<2x1x32xf32>
    %4 = vector.extract_strided_slice %0 {offsets = [0, 0, 0], sizes = [2, 3, 32], strides = [1, 1, 1]} : vector<2x4x32xf32> to vector<2x3x32xf32>
    %5 = tpu.concatenate %3, %4 in 1 : vector<2x1x32xf32>, vector<2x3x32xf32> -> vector<2x4x32xf32>
    %6 = vector.extract_strided_slice %0 {offsets = [0, 1, 0], sizes = [2, 3, 32], strides = [1, 1, 1]} : vector<2x4x32xf32> to vector<2x3x32xf32>
    %7 = tpu.concatenate %6, %3 in 1 : vector<2x3x32xf32>, vector<2x1x32xf32> -> vector<2x4x32xf32>
    %8 = tpu.concatenate %5, %0, %7 in 2 : vector<2x4x32xf32>, vector<2x4x32xf32>, vector<2x4x32xf32> -> vector<2x4x96xf32>
    %9 = vector.shape_cast %8 : vector<2x4x96xf32> to vector<8x96xf32>
    %10 = arith.truncf %9 : vector<8x96xf32> to vector<8x96xbf16>
    %c0_6 = arith.constant 0 : index
    %c0_7 = arith.constant 0 : index
    %11 = vector.load %arg3[%c0_6, %c0_7] : memref<96x32xbf16, #tpu.memory_space<vmem>>, vector<96x32xbf16>
    %cst_8 = arith.constant dense<0.000000e+00> : vector<8x32xf32>
    %12 = tpu.matmul %10, %11, %cst_8 {dimension_numbers = #tpu.dot_dimension_numbers<[1], [0], [0], [1], [0, 0, 1, 1], [], []>} : vector<8x96xbf16>, vector<96x32xbf16>, vector<8x32xf32> -> vector<8x32xf32>
    %13 = vector.shape_cast %12 : vector<8x32xf32> to vector<2x4x32xf32>
    %c0_9 = arith.constant 0 : index
    %c0_10 = arith.constant 0 : index
    %14 = vector.load %arg4[%c0_9, %c0_10] : memref<1x32xf32, #tpu.memory_space<vmem>>, vector<1x32xf32>
    %15 = vector.shape_cast %14 : vector<1x32xf32> to vector<1x1x32xf32>
    %16 = vector.broadcast %15 : vector<1x1x32xf32> to vector<2x4x32xf32>
    %17 = arith.addf %13, %16 : vector<2x4x32xf32>
    %c0_11 = arith.constant 0 : index
    %c0_12 = arith.constant 0 : index
    %18 = vector.load %arg5[%c0_11, %c0_12] : memref<1x32xf32, #tpu.memory_space<vmem>>, vector<1x32xf32>
    %c0_13 = arith.constant 0 : index
    %c0_14 = arith.constant 0 : index
    %19 = vector.load %arg6[%c0_13, %c0_14] : memref<1x32xf32, #tpu.memory_space<vmem>>, vector<1x32xf32>
    %cst_15 = arith.constant dense<0.000000e+00> : vector<2x32xf32>
    %20 = vector.multi_reduction <add>, %17, %cst_15 [1] : vector<2x4x32xf32> to vector<2x32xf32>
    %21 = arith.mulf %17, %17 : vector<2x4x32xf32>
    %cst_16 = arith.constant dense<0.000000e+00> : vector<2x32xf32>
    %22 = vector.multi_reduction <add>, %21, %cst_16 [1] : vector<2x4x32xf32> to vector<2x32xf32>
    %cst_17 = arith.constant dense<0.000000e+00> : vector<2x8xf32>
    %23 = tpu.matmul %20, %1, %cst_17 {dimension_numbers = #tpu.dot_dimension_numbers<[1], [0], [0], [1], [0, 0, 1, 1], [], []>} : vector<2x32xf32>, vector<32x8xf32>, vector<2x8xf32> -> vector<2x8xf32>
    %cst_18 = arith.constant dense<0.000000e+00> : vector<2x32xf32>
    %24 = tpu.matmul %23, %2, %cst_18 {dimension_numbers = #tpu.dot_dimension_numbers<[1], [0], [0], [1], [0, 0, 1, 1], [], []>} : vector<2x8xf32>, vector<8x32xf32>, vector<2x32xf32> -> vector<2x32xf32>
    %cst_19 = arith.constant 6.250000e-02 : f32
    %25 = vector.broadcast %cst_19 : f32 to vector<2x32xf32>
    %26 = arith.mulf %24, %25 : vector<2x32xf32>
    %cst_20 = arith.constant dense<0.000000e+00> : vector<2x8xf32>
    %27 = tpu.matmul %22, %1, %cst_20 {dimension_numbers = #tpu.dot_dimension_numbers<[1], [0], [0], [1], [0, 0, 1, 1], [], []>} : vector<2x32xf32>, vector<32x8xf32>, vector<2x8xf32> -> vector<2x8xf32>
    %cst_21 = arith.constant dense<0.000000e+00> : vector<2x32xf32>
    %28 = tpu.matmul %27, %2, %cst_21 {dimension_numbers = #tpu.dot_dimension_numbers<[1], [0], [0], [1], [0, 0, 1, 1], [], []>} : vector<2x8xf32>, vector<8x32xf32>, vector<2x32xf32> -> vector<2x32xf32>
    %cst_22 = arith.constant 6.250000e-02 : f32
    %29 = vector.broadcast %cst_22 : f32 to vector<2x32xf32>
    %30 = arith.mulf %28, %29 : vector<2x32xf32>
    %31 = arith.mulf %26, %26 : vector<2x32xf32>
    %32 = arith.subf %30, %31 : vector<2x32xf32>
    %cst_23 = arith.constant 0.000000e+00 : f32
    %33 = vector.broadcast %cst_23 : f32 to vector<2x32xf32>
    %34 = arith.maximumf %32, %33 : vector<2x32xf32>
    %35 = vector.shape_cast %26 : vector<2x32xf32> to vector<2x1x32xf32>
    %36 = vector.broadcast %35 : vector<2x1x32xf32> to vector<2x4x32xf32>
    %37 = arith.subf %17, %36 : vector<2x4x32xf32>
    %38 = vector.shape_cast %34 : vector<2x32xf32> to vector<2x1x32xf32>
    %cst_24 = arith.constant 9.99999974E-6 : f32
    %39 = vector.broadcast %cst_24 : f32 to vector<2x1x32xf32>
    %40 = arith.addf %38, %39 : vector<2x1x32xf32>
    %41 = math.rsqrt %40 : vector<2x1x32xf32>
    %42 = vector.broadcast %41 : vector<2x1x32xf32> to vector<2x4x32xf32>
    %43 = arith.mulf %37, %42 : vector<2x4x32xf32>
    %44 = vector.shape_cast %18 : vector<1x32xf32> to vector<1x1x32xf32>
    %45 = vector.broadcast %44 : vector<1x1x32xf32> to vector<2x4x32xf32>
    %46 = arith.mulf %43, %45 : vector<2x4x32xf32>
    %47 = vector.shape_cast %19 : vector<1x32xf32> to vector<1x1x32xf32>
    %48 = vector.broadcast %47 : vector<1x1x32xf32> to vector<2x4x32xf32>
    %49 = arith.addf %46, %48 : vector<2x4x32xf32>
    %cst_25 = arith.constant 2.000000e+01 : f32
    %50 = vector.broadcast %cst_25 : f32 to vector<2x4x32xf32>
    %51 = arith.minimumf %49, %50 : vector<2x4x32xf32>
    %52 = math.exp %51 : vector<2x4x32xf32>
    %cst_26 = arith.constant 1.000000e+00 : f32
    %53 = vector.broadcast %cst_26 : f32 to vector<2x4x32xf32>
    %54 = arith.addf %53, %52 : vector<2x4x32xf32>
    %cst_27 = arith.constant 1.000000e+00 : f32
    %55 = vector.broadcast %cst_27 : f32 to vector<2x4x32xf32>
    %56 = arith.addf %55, %52 : vector<2x4x32xf32>
    %57 = arith.mulf %54, %56 : vector<2x4x32xf32>
    %cst_28 = arith.constant 1.000000e+00 : f32
    %58 = vector.broadcast %cst_28 : f32 to vector<2x4x32xf32>
    %59 = arith.subf %57, %58 : vector<2x4x32xf32>
    %60 = arith.mulf %49, %59 : vector<2x4x32xf32>
    %cst_29 = arith.constant 1.000000e+00 : f32
    %61 = vector.broadcast %cst_29 : f32 to vector<2x4x32xf32>
    %62 = arith.addf %57, %61 : vector<2x4x32xf32>
    %63 = tpu.reciprocal %62 {approx = true} : vector<2x4x32xf32> -> vector<2x4x32xf32>
    %64 = arith.mulf %60, %63 : vector<2x4x32xf32>
    %c0_30 = arith.constant 0 : index
    %c0_31 = arith.constant 0 : index
    %65 = vector.load %arg2[%c0_30, %c0_31] : memref<2x24xf32, #tpu.memory_space<vmem>>, vector<2x24xf32>
    %66 = arith.truncf %65 : vector<2x24xf32> to vector<2x24xbf16>
    %c0_32 = arith.constant 0 : index
    %c0_33 = arith.constant 0 : index
    %67 = vector.load %arg9[%c0_32, %c0_33] : memref<24x32xbf16, #tpu.memory_space<vmem>>, vector<24x32xbf16>
    %cst_34 = arith.constant dense<0.000000e+00> : vector<2x32xf32>
    %68 = tpu.matmul %66, %67, %cst_34 {dimension_numbers = #tpu.dot_dimension_numbers<[1], [0], [0], [1], [0, 0, 1, 1], [], []>} : vector<2x24xbf16>, vector<24x32xbf16>, vector<2x32xf32> -> vector<2x32xf32>
    %c0_35 = arith.constant 0 : index
    %c0_36 = arith.constant 0 : index
    %69 = vector.load %arg10[%c0_35, %c0_36] : memref<1x32xf32, #tpu.memory_space<vmem>>, vector<1x32xf32>
    %70 = vector.broadcast %69 : vector<1x32xf32> to vector<2x32xf32>
    %71 = arith.addf %68, %70 : vector<2x32xf32>
    %c0_37 = arith.constant 0 : index
    %c0_38 = arith.constant 0 : index
    %72 = vector.load %arg11[%c0_37, %c0_38] : memref<24x32xbf16, #tpu.memory_space<vmem>>, vector<24x32xbf16>
    %cst_39 = arith.constant dense<0.000000e+00> : vector<2x32xf32>
    %73 = tpu.matmul %66, %72, %cst_39 {dimension_numbers = #tpu.dot_dimension_numbers<[1], [0], [0], [1], [0, 0, 1, 1], [], []>} : vector<2x24xbf16>, vector<24x32xbf16>, vector<2x32xf32> -> vector<2x32xf32>
    %c0_40 = arith.constant 0 : index
    %c0_41 = arith.constant 0 : index
    %74 = vector.load %arg12[%c0_40, %c0_41] : memref<1x32xf32, #tpu.memory_space<vmem>>, vector<1x32xf32>
    %75 = vector.broadcast %74 : vector<1x32xf32> to vector<2x32xf32>
    %76 = arith.addf %73, %75 : vector<2x32xf32>
    %77 = vector.shape_cast %71 : vector<2x32xf32> to vector<2x1x32xf32>
    %cst_42 = arith.constant 1.000000e+00 : f32
    %78 = vector.broadcast %cst_42 : f32 to vector<2x1x32xf32>
    %79 = arith.addf %77, %78 : vector<2x1x32xf32>
    %80 = vector.broadcast %79 : vector<2x1x32xf32> to vector<2x4x32xf32>
    %81 = arith.mulf %64, %80 : vector<2x4x32xf32>
    %82 = vector.shape_cast %76 : vector<2x32xf32> to vector<2x1x32xf32>
    %83 = vector.broadcast %82 : vector<2x1x32xf32> to vector<2x4x32xf32>
    %84 = arith.addf %81, %83 : vector<2x4x32xf32>
    %cst_43 = arith.constant 0.000000e+00 : f32
    %85 = vector.broadcast %cst_43 : f32 to vector<2x1x32xf32>
    %86 = vector.extract_strided_slice %84 {offsets = [0, 0, 0], sizes = [2, 3, 32], strides = [1, 1, 1]} : vector<2x4x32xf32> to vector<2x3x32xf32>
    %87 = tpu.concatenate %85, %86 in 1 : vector<2x1x32xf32>, vector<2x3x32xf32> -> vector<2x4x32xf32>
    %88 = vector.extract_strided_slice %84 {offsets = [0, 1, 0], sizes = [2, 3, 32], strides = [1, 1, 1]} : vector<2x4x32xf32> to vector<2x3x32xf32>
    %89 = tpu.concatenate %88, %85 in 1 : vector<2x3x32xf32>, vector<2x1x32xf32> -> vector<2x4x32xf32>
    %90 = tpu.concatenate %87, %84, %89 in 2 : vector<2x4x32xf32>, vector<2x4x32xf32>, vector<2x4x32xf32> -> vector<2x4x96xf32>
    %91 = vector.shape_cast %90 : vector<2x4x96xf32> to vector<8x96xf32>
    %92 = arith.truncf %91 : vector<8x96xf32> to vector<8x96xbf16>
    %c0_44 = arith.constant 0 : index
    %c0_45 = arith.constant 0 : index
    %93 = vector.load %arg13[%c0_44, %c0_45] : memref<96x32xbf16, #tpu.memory_space<vmem>>, vector<96x32xbf16>
    %cst_46 = arith.constant dense<0.000000e+00> : vector<8x32xf32>
    %94 = tpu.matmul %92, %93, %cst_46 {dimension_numbers = #tpu.dot_dimension_numbers<[1], [0], [0], [1], [0, 0, 1, 1], [], []>} : vector<8x96xbf16>, vector<96x32xbf16>, vector<8x32xf32> -> vector<8x32xf32>
    %95 = vector.shape_cast %94 : vector<8x32xf32> to vector<2x4x32xf32>
    %c0_47 = arith.constant 0 : index
    %c0_48 = arith.constant 0 : index
    %96 = vector.load %arg14[%c0_47, %c0_48] : memref<1x32xf32, #tpu.memory_space<vmem>>, vector<1x32xf32>
    %97 = vector.shape_cast %96 : vector<1x32xf32> to vector<1x1x32xf32>
    %98 = vector.broadcast %97 : vector<1x1x32xf32> to vector<2x4x32xf32>
    %99 = arith.addf %95, %98 : vector<2x4x32xf32>
    %c0_49 = arith.constant 0 : index
    %c0_50 = arith.constant 0 : index
    %100 = vector.load %arg15[%c0_49, %c0_50] : memref<1x32xf32, #tpu.memory_space<vmem>>, vector<1x32xf32>
    %c0_51 = arith.constant 0 : index
    %c0_52 = arith.constant 0 : index
    %101 = vector.load %arg16[%c0_51, %c0_52] : memref<1x32xf32, #tpu.memory_space<vmem>>, vector<1x32xf32>
    %cst_53 = arith.constant dense<0.000000e+00> : vector<2x32xf32>
    %102 = vector.multi_reduction <add>, %99, %cst_53 [1] : vector<2x4x32xf32> to vector<2x32xf32>
    %103 = arith.mulf %99, %99 : vector<2x4x32xf32>
    %cst_54 = arith.constant dense<0.000000e+00> : vector<2x32xf32>
    %104 = vector.multi_reduction <add>, %103, %cst_54 [1] : vector<2x4x32xf32> to vector<2x32xf32>
    %cst_55 = arith.constant dense<0.000000e+00> : vector<2x8xf32>
    %105 = tpu.matmul %102, %1, %cst_55 {dimension_numbers = #tpu.dot_dimension_numbers<[1], [0], [0], [1], [0, 0, 1, 1], [], []>} : vector<2x32xf32>, vector<32x8xf32>, vector<2x8xf32> -> vector<2x8xf32>
    %cst_56 = arith.constant dense<0.000000e+00> : vector<2x32xf32>
    %106 = tpu.matmul %105, %2, %cst_56 {dimension_numbers = #tpu.dot_dimension_numbers<[1], [0], [0], [1], [0, 0, 1, 1], [], []>} : vector<2x8xf32>, vector<8x32xf32>, vector<2x32xf32> -> vector<2x32xf32>
    %cst_57 = arith.constant 6.250000e-02 : f32
    %107 = vector.broadcast %cst_57 : f32 to vector<2x32xf32>
    %108 = arith.mulf %106, %107 : vector<2x32xf32>
    %cst_58 = arith.constant dense<0.000000e+00> : vector<2x8xf32>
    %109 = tpu.matmul %104, %1, %cst_58 {dimension_numbers = #tpu.dot_dimension_numbers<[1], [0], [0], [1], [0, 0, 1, 1], [], []>} : vector<2x32xf32>, vector<32x8xf32>, vector<2x8xf32> -> vector<2x8xf32>
    %cst_59 = arith.constant dense<0.000000e+00> : vector<2x32xf32>
    %110 = tpu.matmul %109, %2, %cst_59 {dimension_numbers = #tpu.dot_dimension_numbers<[1], [0], [0], [1], [0, 0, 1, 1], [], []>} : vector<2x8xf32>, vector<8x32xf32>, vector<2x32xf32> -> vector<2x32xf32>
    %cst_60 = arith.constant 6.250000e-02 : f32
    %111 = vector.broadcast %cst_60 : f32 to vector<2x32xf32>
    %112 = arith.mulf %110, %111 : vector<2x32xf32>
    %113 = arith.mulf %108, %108 : vector<2x32xf32>
    %114 = arith.subf %112, %113 : vector<2x32xf32>
    %cst_61 = arith.constant 0.000000e+00 : f32
    %115 = vector.broadcast %cst_61 : f32 to vector<2x32xf32>
    %116 = arith.maximumf %114, %115 : vector<2x32xf32>
    %117 = vector.shape_cast %108 : vector<2x32xf32> to vector<2x1x32xf32>
    %118 = vector.broadcast %117 : vector<2x1x32xf32> to vector<2x4x32xf32>
    %119 = arith.subf %99, %118 : vector<2x4x32xf32>
    %120 = vector.shape_cast %116 : vector<2x32xf32> to vector<2x1x32xf32>
    %cst_62 = arith.constant 9.99999974E-6 : f32
    %121 = vector.broadcast %cst_62 : f32 to vector<2x1x32xf32>
    %122 = arith.addf %120, %121 : vector<2x1x32xf32>
    %123 = math.rsqrt %122 : vector<2x1x32xf32>
    %124 = vector.broadcast %123 : vector<2x1x32xf32> to vector<2x4x32xf32>
    %125 = arith.mulf %119, %124 : vector<2x4x32xf32>
    %126 = vector.shape_cast %100 : vector<1x32xf32> to vector<1x1x32xf32>
    %127 = vector.broadcast %126 : vector<1x1x32xf32> to vector<2x4x32xf32>
    %128 = arith.mulf %125, %127 : vector<2x4x32xf32>
    %129 = vector.shape_cast %101 : vector<1x32xf32> to vector<1x1x32xf32>
    %130 = vector.broadcast %129 : vector<1x1x32xf32> to vector<2x4x32xf32>
    %131 = arith.addf %128, %130 : vector<2x4x32xf32>
    %cst_63 = arith.constant 2.000000e+01 : f32
    %132 = vector.broadcast %cst_63 : f32 to vector<2x4x32xf32>
    %133 = arith.minimumf %131, %132 : vector<2x4x32xf32>
    %134 = math.exp %133 : vector<2x4x32xf32>
    %cst_64 = arith.constant 1.000000e+00 : f32
    %135 = vector.broadcast %cst_64 : f32 to vector<2x4x32xf32>
    %136 = arith.addf %135, %134 : vector<2x4x32xf32>
    %cst_65 = arith.constant 1.000000e+00 : f32
    %137 = vector.broadcast %cst_65 : f32 to vector<2x4x32xf32>
    %138 = arith.addf %137, %134 : vector<2x4x32xf32>
    %139 = arith.mulf %136, %138 : vector<2x4x32xf32>
    %cst_66 = arith.constant 1.000000e+00 : f32
    %140 = vector.broadcast %cst_66 : f32 to vector<2x4x32xf32>
    %141 = arith.subf %139, %140 : vector<2x4x32xf32>
    %142 = arith.mulf %131, %141 : vector<2x4x32xf32>
    %cst_67 = arith.constant 1.000000e+00 : f32
    %143 = vector.broadcast %cst_67 : f32 to vector<2x4x32xf32>
    %144 = arith.addf %139, %143 : vector<2x4x32xf32>
    %145 = tpu.reciprocal %144 {approx = true} : vector<2x4x32xf32> -> vector<2x4x32xf32>
    %146 = arith.mulf %142, %145 : vector<2x4x32xf32>
    %147 = arith.addf %146, %0 : vector<2x4x32xf32>
    %c0_68 = arith.constant 0 : index
    %c0_69 = arith.constant 0 : index
    %c0_70 = arith.constant 0 : index
    %148 = vector.load %arg17[%c0_68, %c0_69, %c0_70] : memref<2x4x32xf32, #tpu.memory_space<vmem>>, vector<2x4x32xf32>
    tpu.vector_store %arg17[%c0_68, %c0_69, %c0_70], %147 {strides = array<i32>} : memref<2x4x32xf32, #tpu.memory_space<vmem>>, vector<2x4x32xf32>,
    return
  }
  func.func @transform_0(%arg0: i32) -> (i32, i32, i32) {
    %c0_i32 = arith.constant 0 : i32
    %c0_i32_0 = arith.constant 0 : i32
    %c0_i32_1 = arith.constant 0 : i32
    return %arg0, %c0_i32, %c0_i32_0 : i32, i32, i32
  }
  func.func @transform_1(%arg0: i32) -> (i32, i32) {
    %c0_i32 = arith.constant 0 : i32
    %c0_i32_0 = arith.constant 0 : i32
    return %arg0, %c0_i32 : i32, i32
  }
  func.func @transform_2(%arg0: i32) -> (i32, i32) {
    %c0_i32 = arith.constant 0 : i32
    %c0_i32_0 = arith.constant 0 : i32
    %c0_i32_1 = arith.constant 0 : i32
    return %c0_i32, %c0_i32_0 : i32, i32
  }
  func.func @transform_3(%arg0: i32) -> (i32, i32) {
    %c0_i32 = arith.constant 0 : i32
    %c0_i32_0 = arith.constant 0 : i32
    %c0_i32_1 = arith.constant 0 : i32
    return %c0_i32, %c0_i32_0 : i32, i32
  }
  func.func @transform_4(%arg0: i32) -> (i32, i32) {
    %c0_i32 = arith.constant 0 : i32
    %c0_i32_0 = arith.constant 0 : i32
    %c0_i32_1 = arith.constant 0 : i32
    return %c0_i32, %c0_i32_0 : i32, i32
  }
  func.func @transform_5(%arg0: i32) -> (i32, i32) {
    %c0_i32 = arith.constant 0 : i32
    %c0_i32_0 = arith.constant 0 : i32
    %c0_i32_1 = arith.constant 0 : i32
    return %c0_i32, %c0_i32_0 : i32, i32
  }
  func.func @transform_6(%arg0: i32) -> (i32, i32) {
    %c0_i32 = arith.constant 0 : i32
    %c0_i32_0 = arith.constant 0 : i32
    %c0_i32_1 = arith.constant 0 : i32
    return %c0_i32, %c0_i32_0 : i32, i32
  }
  func.func @transform_7(%arg0: i32) -> (i32, i32) {
    %c0_i32 = arith.constant 0 : i32
    %c0_i32_0 = arith.constant 0 : i32
    %c0_i32_1 = arith.constant 0 : i32
    return %c0_i32, %c0_i32_0 : i32, i32
  }
  func.func @transform_8(%arg0: i32) -> (i32, i32) {
    %c0_i32 = arith.constant 0 : i32
    %c0_i32_0 = arith.constant 0 : i32
    %c0_i32_1 = arith.constant 0 : i32
    return %c0_i32, %c0_i32_0 : i32, i32
  }
  func.func @transform_9(%arg0: i32) -> (i32, i32) {
    %c0_i32 = arith.constant 0 : i32
    %c0_i32_0 = arith.constant 0 : i32
    %c0_i32_1 = arith.constant 0 : i32
    return %c0_i32, %c0_i32_0 : i32, i32
  }
  func.func @transform_10(%arg0: i32) -> (i32, i32) {
    %c0_i32 = arith.constant 0 : i32
    %c0_i32_0 = arith.constant 0 : i32
    %c0_i32_1 = arith.constant 0 : i32
    return %c0_i32, %c0_i32_0 : i32, i32
  }
  func.func @transform_11(%arg0: i32) -> (i32, i32) {
    %c0_i32 = arith.constant 0 : i32
    %c0_i32_0 = arith.constant 0 : i32
    %c0_i32_1 = arith.constant 0 : i32
    return %c0_i32, %c0_i32_0 : i32, i32
  }
  func.func @transform_12(%arg0: i32) -> (i32, i32) {
    %c0_i32 = arith.constant 0 : i32
    %c0_i32_0 = arith.constant 0 : i32
    %c0_i32_1 = arith.constant 0 : i32
    return %c0_i32, %c0_i32_0 : i32, i32
  }
  func.func @transform_13(%arg0: i32) -> (i32, i32) {
    %c0_i32 = arith.constant 0 : i32
    %c0_i32_0 = arith.constant 0 : i32
    %c0_i32_1 = arith.constant 0 : i32
    return %c0_i32, %c0_i32_0 : i32, i32
  }
  func.func @transform_14(%arg0: i32) -> (i32, i32) {
    %c0_i32 = arith.constant 0 : i32
    %c0_i32_0 = arith.constant 0 : i32
    %c0_i32_1 = arith.constant 0 : i32
    return %c0_i32, %c0_i32_0 : i32, i32
  }
  func.func @transform_15(%arg0: i32) -> (i32, i32) {
    %c0_i32 = arith.constant 0 : i32
    %c0_i32_0 = arith.constant 0 : i32
    %c0_i32_1 = arith.constant 0 : i32
    return %c0_i32, %c0_i32_0 : i32, i32
  }
  func.func @transform_16(%arg0: i32) -> (i32, i32, i32) {
    %c0_i32 = arith.constant 0 : i32
    %c0_i32_0 = arith.constant 0 : i32
    %c0_i32_1 = arith.constant 0 : i32
    return %arg0, %c0_i32, %c0_i32_0 : i32, i32, i32
  }
}

module attributes {stable_mosaic.version = 11 : i64} {
  func.func @res_block_kernel(%arg0: i32, %arg1: memref<2x4x32xf32, #tpu.memory_space<vmem>>, %arg2: memref<2x4x32xf32, #tpu.memory_space<vmem>>, %arg3: memref<2x24xf32, #tpu.memory_space<vmem>>, %arg4: memref<96x16xbf16, #tpu.memory_space<vmem>>, %arg5: memref<96x16xbf16, #tpu.memory_space<vmem>>, %arg6: memref<1x16xf32, #tpu.memory_space<vmem>>, %arg7: memref<1x16xf32, #tpu.memory_space<vmem>>, %arg8: memref<1x16xf32, #tpu.memory_space<vmem>>, %arg9: memref<16x8xf32, #tpu.memory_space<vmem>>, %arg10: memref<8x16xf32, #tpu.memory_space<vmem>>, %arg11: memref<24x16xbf16, #tpu.memory_space<vmem>>, %arg12: memref<1x16xf32, #tpu.memory_space<vmem>>, %arg13: memref<24x16xbf16, #tpu.memory_space<vmem>>, %arg14: memref<1x16xf32, #tpu.memory_space<vmem>>, %arg15: memref<48x16xbf16, #tpu.memory_space<vmem>>, %arg16: memref<1x16xf32, #tpu.memory_space<vmem>>, %arg17: memref<1x16xf32, #tpu.memory_space<vmem>>, %arg18: memref<1x16xf32, #tpu.memory_space<vmem>>, %arg19: memref<32x16xbf16, #tpu.memory_space<vmem>>, %arg20: memref<32x16xbf16, #tpu.memory_space<vmem>>, %arg21: memref<1x16xf32, #tpu.memory_space<vmem>>, %arg22: memref<2x4x16xf32, #tpu.memory_space<vmem>>) attributes {dimension_semantics = [#tpu.dimension_semantics<parallel>], iteration_bounds = array<i64: 1>, scalar_prefetch = 0 : i64, scratch_operands = 0 : i64, tpu.core_type = #tpu.core_type<tc>, window_params = [{transform_indices = @transform_0, window_bounds = array<i64: 2, 4, 32>}, {transform_indices = @transform_1, window_bounds = array<i64: 2, 4, 32>}, {transform_indices = @transform_2, window_bounds = array<i64: 2, 24>}, {pipeline_mode = #tpu.pipeline_mode<synchronous>, transform_indices = @transform_3, window_bounds = array<i64: 96, 16>}, {pipeline_mode = #tpu.pipeline_mode<synchronous>, transform_indices = @transform_4, window_bounds = array<i64: 96, 16>}, {pipeline_mode = #tpu.pipeline_mode<synchronous>, transform_indices = @transform_5, window_bounds = array<i64: 1, 16>}, {pipeline_mode = #tpu.pipeline_mode<synchronous>, transform_indices = @transform_6, window_bounds = array<i64: 1, 16>}, {pipeline_mode = #tpu.pipeline_mode<synchronous>, transform_indices = @transform_7, window_bounds = array<i64: 1, 16>}, {pipeline_mode = #tpu.pipeline_mode<synchronous>, transform_indices = @transform_8, window_bounds = array<i64: 16, 8>}, {pipeline_mode = #tpu.pipeline_mode<synchronous>, transform_indices = @transform_9, window_bounds = array<i64: 8, 16>}, {pipeline_mode = #tpu.pipeline_mode<synchronous>, transform_indices = @transform_10, window_bounds = array<i64: 24, 16>}, {pipeline_mode = #tpu.pipeline_mode<synchronous>, transform_indices = @transform_11, window_bounds = array<i64: 1, 16>}, {pipeline_mode = #tpu.pipeline_mode<synchronous>, transform_indices = @transform_12, window_bounds = array<i64: 24, 16>}, {pipeline_mode = #tpu.pipeline_mode<synchronous>, transform_indices = @transform_13, window_bounds = array<i64: 1, 16>}, {pipeline_mode = #tpu.pipeline_mode<synchronous>, transform_indices = @transform_14, window_bounds = array<i64: 48, 16>}, {pipeline_mode = #tpu.pipeline_mode<synchronous>, transform_indices = @transform_15, window_bounds = array<i64: 1, 16>}, {pipeline_mode = #tpu.pipeline_mode<synchronous>, transform_indices = @transform_16, window_bounds = array<i64: 1, 16>}, {pipeline_mode = #tpu.pipeline_mode<synchronous>, transform_indices = @transform_17, window_bounds = array<i64: 1, 16>}, {pipeline_mode = #tpu.pipeline_mode<synchronous>, transform_indices = @transform_18, window_bounds = array<i64: 32, 16>}, {pipeline_mode = #tpu.pipeline_mode<synchronous>, transform_indices = @transform_19, window_bounds = array<i64: 32, 16>}, {pipeline_mode = #tpu.pipeline_mode<synchronous>, transform_indices = @transform_20, window_bounds = array<i64: 1, 16>}, {transform_indices = @transform_21, window_bounds = array<i64: 2, 4, 16>}]} {
    %c0 = arith.constant 0 : index
    %c0_0 = arith.constant 0 : index
    %c0_1 = arith.constant 0 : index
    %0 = vector.load %arg1[%c0, %c0_0, %c0_1] : memref<2x4x32xf32, #tpu.memory_space<vmem>>, vector<2x4x32xf32>
    %c0_2 = arith.constant 0 : index
    %c0_3 = arith.constant 0 : index
    %c0_4 = arith.constant 0 : index
    %1 = vector.load %arg2[%c0_2, %c0_3, %c0_4] : memref<2x4x32xf32, #tpu.memory_space<vmem>>, vector<2x4x32xf32>
    %c0_5 = arith.constant 0 : index
    %c0_6 = arith.constant 0 : index
    %2 = vector.load %arg9[%c0_5, %c0_6] : memref<16x8xf32, #tpu.memory_space<vmem>>, vector<16x8xf32>
    %c0_7 = arith.constant 0 : index
    %c0_8 = arith.constant 0 : index
    %3 = vector.load %arg10[%c0_7, %c0_8] : memref<8x16xf32, #tpu.memory_space<vmem>>, vector<8x16xf32>
    %cst = arith.constant 0.000000e+00 : f32
    %4 = vector.broadcast %cst : f32 to vector<2x1x32xf32>
    %5 = vector.extract_strided_slice %0 {offsets = [0, 0, 0], sizes = [2, 3, 32], strides = [1, 1, 1]} : vector<2x4x32xf32> to vector<2x3x32xf32>
    %6 = tpu.concatenate %4, %5 in 1 : vector<2x1x32xf32>, vector<2x3x32xf32> -> vector<2x4x32xf32>
    %7 = vector.extract_strided_slice %0 {offsets = [0, 1, 0], sizes = [2, 3, 32], strides = [1, 1, 1]} : vector<2x4x32xf32> to vector<2x3x32xf32>
    %8 = tpu.concatenate %7, %4 in 1 : vector<2x3x32xf32>, vector<2x1x32xf32> -> vector<2x4x32xf32>
    %9 = tpu.concatenate %6, %0, %8 in 2 : vector<2x4x32xf32>, vector<2x4x32xf32>, vector<2x4x32xf32> -> vector<2x4x96xf32>
    %10 = vector.shape_cast %9 : vector<2x4x96xf32> to vector<8x96xf32>
    %11 = arith.truncf %10 : vector<8x96xf32> to vector<8x96xbf16>
    %c0_9 = arith.constant 0 : index
    %c0_10 = arith.constant 0 : index
    %12 = vector.load %arg4[%c0_9, %c0_10] : memref<96x16xbf16, #tpu.memory_space<vmem>>, vector<96x16xbf16>
    %cst_11 = arith.constant dense<0.000000e+00> : vector<8x16xf32>
    %13 = tpu.matmul %11, %12, %cst_11 {dimension_numbers = #tpu.dot_dimension_numbers<[1], [0], [0], [1], [0, 0, 1, 1], [], []>} : vector<8x96xbf16>, vector<96x16xbf16>, vector<8x16xf32> -> vector<8x16xf32>
    %14 = vector.shape_cast %13 : vector<8x16xf32> to vector<2x4x16xf32>
    %cst_12 = arith.constant 0.000000e+00 : f32
    %15 = vector.broadcast %cst_12 : f32 to vector<2x1x32xf32>
    %16 = vector.extract_strided_slice %1 {offsets = [0, 0, 0], sizes = [2, 3, 32], strides = [1, 1, 1]} : vector<2x4x32xf32> to vector<2x3x32xf32>
    %17 = tpu.concatenate %15, %16 in 1 : vector<2x1x32xf32>, vector<2x3x32xf32> -> vector<2x4x32xf32>
    %18 = vector.extract_strided_slice %1 {offsets = [0, 1, 0], sizes = [2, 3, 32], strides = [1, 1, 1]} : vector<2x4x32xf32> to vector<2x3x32xf32>
    %19 = tpu.concatenate %18, %15 in 1 : vector<2x3x32xf32>, vector<2x1x32xf32> -> vector<2x4x32xf32>
    %20 = tpu.concatenate %17, %1, %19 in 2 : vector<2x4x32xf32>, vector<2x4x32xf32>, vector<2x4x32xf32> -> vector<2x4x96xf32>
    %21 = vector.shape_cast %20 : vector<2x4x96xf32> to vector<8x96xf32>
    %22 = arith.truncf %21 : vector<8x96xf32> to vector<8x96xbf16>
    %c0_13 = arith.constant 0 : index
    %c0_14 = arith.constant 0 : index
    %23 = vector.load %arg5[%c0_13, %c0_14] : memref<96x16xbf16, #tpu.memory_space<vmem>>, vector<96x16xbf16>
    %cst_15 = arith.constant dense<0.000000e+00> : vector<8x16xf32>
    %24 = tpu.matmul %22, %23, %cst_15 {dimension_numbers = #tpu.dot_dimension_numbers<[1], [0], [0], [1], [0, 0, 1, 1], [], []>} : vector<8x96xbf16>, vector<96x16xbf16>, vector<8x16xf32> -> vector<8x16xf32>
    %25 = vector.shape_cast %24 : vector<8x16xf32> to vector<2x4x16xf32>
    %26 = arith.addf %14, %25 : vector<2x4x16xf32>
    %c0_16 = arith.constant 0 : index
    %c0_17 = arith.constant 0 : index
    %27 = vector.load %arg6[%c0_16, %c0_17] : memref<1x16xf32, #tpu.memory_space<vmem>>, vector<1x16xf32>
    %28 = vector.shape_cast %27 : vector<1x16xf32> to vector<1x1x16xf32>
    %29 = vector.broadcast %28 : vector<1x1x16xf32> to vector<2x4x16xf32>
    %30 = arith.addf %26, %29 : vector<2x4x16xf32>
    %c0_18 = arith.constant 0 : index
    %c0_19 = arith.constant 0 : index
    %31 = vector.load %arg7[%c0_18, %c0_19] : memref<1x16xf32, #tpu.memory_space<vmem>>, vector<1x16xf32>
    %c0_20 = arith.constant 0 : index
    %c0_21 = arith.constant 0 : index
    %32 = vector.load %arg8[%c0_20, %c0_21] : memref<1x16xf32, #tpu.memory_space<vmem>>, vector<1x16xf32>
    %cst_22 = arith.constant dense<0.000000e+00> : vector<2x16xf32>
    %33 = vector.multi_reduction <add>, %30, %cst_22 [1] : vector<2x4x16xf32> to vector<2x16xf32>
    %34 = arith.mulf %30, %30 : vector<2x4x16xf32>
    %cst_23 = arith.constant dense<0.000000e+00> : vector<2x16xf32>
    %35 = vector.multi_reduction <add>, %34, %cst_23 [1] : vector<2x4x16xf32> to vector<2x16xf32>
    %cst_24 = arith.constant dense<0.000000e+00> : vector<2x8xf32>
    %36 = tpu.matmul %33, %2, %cst_24 {dimension_numbers = #tpu.dot_dimension_numbers<[1], [0], [0], [1], [0, 0, 1, 1], [], []>} : vector<2x16xf32>, vector<16x8xf32>, vector<2x8xf32> -> vector<2x8xf32>
    %cst_25 = arith.constant dense<0.000000e+00> : vector<2x16xf32>
    %37 = tpu.matmul %36, %3, %cst_25 {dimension_numbers = #tpu.dot_dimension_numbers<[1], [0], [0], [1], [0, 0, 1, 1], [], []>} : vector<2x8xf32>, vector<8x16xf32>, vector<2x16xf32> -> vector<2x16xf32>
    %cst_26 = arith.constant 1.250000e-01 : f32
    %38 = vector.broadcast %cst_26 : f32 to vector<2x16xf32>
    %39 = arith.mulf %37, %38 : vector<2x16xf32>
    %cst_27 = arith.constant dense<0.000000e+00> : vector<2x8xf32>
    %40 = tpu.matmul %35, %2, %cst_27 {dimension_numbers = #tpu.dot_dimension_numbers<[1], [0], [0], [1], [0, 0, 1, 1], [], []>} : vector<2x16xf32>, vector<16x8xf32>, vector<2x8xf32> -> vector<2x8xf32>
    %cst_28 = arith.constant dense<0.000000e+00> : vector<2x16xf32>
    %41 = tpu.matmul %40, %3, %cst_28 {dimension_numbers = #tpu.dot_dimension_numbers<[1], [0], [0], [1], [0, 0, 1, 1], [], []>} : vector<2x8xf32>, vector<8x16xf32>, vector<2x16xf32> -> vector<2x16xf32>
    %cst_29 = arith.constant 1.250000e-01 : f32
    %42 = vector.broadcast %cst_29 : f32 to vector<2x16xf32>
    %43 = arith.mulf %41, %42 : vector<2x16xf32>
    %44 = arith.mulf %39, %39 : vector<2x16xf32>
    %45 = arith.subf %43, %44 : vector<2x16xf32>
    %cst_30 = arith.constant 0.000000e+00 : f32
    %46 = vector.broadcast %cst_30 : f32 to vector<2x16xf32>
    %47 = arith.maximumf %45, %46 : vector<2x16xf32>
    %48 = vector.shape_cast %39 : vector<2x16xf32> to vector<2x1x16xf32>
    %49 = vector.broadcast %48 : vector<2x1x16xf32> to vector<2x4x16xf32>
    %50 = arith.subf %30, %49 : vector<2x4x16xf32>
    %51 = vector.shape_cast %47 : vector<2x16xf32> to vector<2x1x16xf32>
    %cst_31 = arith.constant 9.99999974E-6 : f32
    %52 = vector.broadcast %cst_31 : f32 to vector<2x1x16xf32>
    %53 = arith.addf %51, %52 : vector<2x1x16xf32>
    %54 = math.rsqrt %53 : vector<2x1x16xf32>
    %55 = vector.broadcast %54 : vector<2x1x16xf32> to vector<2x4x16xf32>
    %56 = arith.mulf %50, %55 : vector<2x4x16xf32>
    %57 = vector.shape_cast %31 : vector<1x16xf32> to vector<1x1x16xf32>
    %58 = vector.broadcast %57 : vector<1x1x16xf32> to vector<2x4x16xf32>
    %59 = arith.mulf %56, %58 : vector<2x4x16xf32>
    %60 = vector.shape_cast %32 : vector<1x16xf32> to vector<1x1x16xf32>
    %61 = vector.broadcast %60 : vector<1x1x16xf32> to vector<2x4x16xf32>
    %62 = arith.addf %59, %61 : vector<2x4x16xf32>
    %cst_32 = arith.constant 2.000000e+01 : f32
    %63 = vector.broadcast %cst_32 : f32 to vector<2x4x16xf32>
    %64 = arith.minimumf %62, %63 : vector<2x4x16xf32>
    %65 = math.exp %64 : vector<2x4x16xf32>
    %cst_33 = arith.constant 1.000000e+00 : f32
    %66 = vector.broadcast %cst_33 : f32 to vector<2x4x16xf32>
    %67 = arith.addf %66, %65 : vector<2x4x16xf32>
    %cst_34 = arith.constant 1.000000e+00 : f32
    %68 = vector.broadcast %cst_34 : f32 to vector<2x4x16xf32>
    %69 = arith.addf %68, %65 : vector<2x4x16xf32>
    %70 = arith.mulf %67, %69 : vector<2x4x16xf32>
    %cst_35 = arith.constant 1.000000e+00 : f32
    %71 = vector.broadcast %cst_35 : f32 to vector<2x4x16xf32>
    %72 = arith.subf %70, %71 : vector<2x4x16xf32>
    %73 = arith.mulf %62, %72 : vector<2x4x16xf32>
    %cst_36 = arith.constant 1.000000e+00 : f32
    %74 = vector.broadcast %cst_36 : f32 to vector<2x4x16xf32>
    %75 = arith.addf %70, %74 : vector<2x4x16xf32>
    %76 = tpu.reciprocal %75 {approx = true} : vector<2x4x16xf32> -> vector<2x4x16xf32>
    %77 = arith.mulf %73, %76 : vector<2x4x16xf32>
    %c0_37 = arith.constant 0 : index
    %c0_38 = arith.constant 0 : index
    %78 = vector.load %arg3[%c0_37, %c0_38] : memref<2x24xf32, #tpu.memory_space<vmem>>, vector<2x24xf32>
    %79 = arith.truncf %78 : vector<2x24xf32> to vector<2x24xbf16>
    %c0_39 = arith.constant 0 : index
    %c0_40 = arith.constant 0 : index
    %80 = vector.load %arg11[%c0_39, %c0_40] : memref<24x16xbf16, #tpu.memory_space<vmem>>, vector<24x16xbf16>
    %cst_41 = arith.constant dense<0.000000e+00> : vector<2x16xf32>
    %81 = tpu.matmul %79, %80, %cst_41 {dimension_numbers = #tpu.dot_dimension_numbers<[1], [0], [0], [1], [0, 0, 1, 1], [], []>} : vector<2x24xbf16>, vector<24x16xbf16>, vector<2x16xf32> -> vector<2x16xf32>
    %c0_42 = arith.constant 0 : index
    %c0_43 = arith.constant 0 : index
    %82 = vector.load %arg12[%c0_42, %c0_43] : memref<1x16xf32, #tpu.memory_space<vmem>>, vector<1x16xf32>
    %83 = vector.broadcast %82 : vector<1x16xf32> to vector<2x16xf32>
    %84 = arith.addf %81, %83 : vector<2x16xf32>
    %c0_44 = arith.constant 0 : index
    %c0_45 = arith.constant 0 : index
    %85 = vector.load %arg13[%c0_44, %c0_45] : memref<24x16xbf16, #tpu.memory_space<vmem>>, vector<24x16xbf16>
    %cst_46 = arith.constant dense<0.000000e+00> : vector<2x16xf32>
    %86 = tpu.matmul %79, %85, %cst_46 {dimension_numbers = #tpu.dot_dimension_numbers<[1], [0], [0], [1], [0, 0, 1, 1], [], []>} : vector<2x24xbf16>, vector<24x16xbf16>, vector<2x16xf32> -> vector<2x16xf32>
    %c0_47 = arith.constant 0 : index
    %c0_48 = arith.constant 0 : index
    %87 = vector.load %arg14[%c0_47, %c0_48] : memref<1x16xf32, #tpu.memory_space<vmem>>, vector<1x16xf32>
    %88 = vector.broadcast %87 : vector<1x16xf32> to vector<2x16xf32>
    %89 = arith.addf %86, %88 : vector<2x16xf32>
    %90 = vector.shape_cast %84 : vector<2x16xf32> to vector<2x1x16xf32>
    %cst_49 = arith.constant 1.000000e+00 : f32
    %91 = vector.broadcast %cst_49 : f32 to vector<2x1x16xf32>
    %92 = arith.addf %90, %91 : vector<2x1x16xf32>
    %93 = vector.broadcast %92 : vector<2x1x16xf32> to vector<2x4x16xf32>
    %94 = arith.mulf %77, %93 : vector<2x4x16xf32>
    %95 = vector.shape_cast %89 : vector<2x16xf32> to vector<2x1x16xf32>
    %96 = vector.broadcast %95 : vector<2x1x16xf32> to vector<2x4x16xf32>
    %97 = arith.addf %94, %96 : vector<2x4x16xf32>
    %cst_50 = arith.constant 0.000000e+00 : f32
    %98 = vector.broadcast %cst_50 : f32 to vector<2x1x16xf32>
    %99 = vector.extract_strided_slice %97 {offsets = [0, 0, 0], sizes = [2, 3, 16], strides = [1, 1, 1]} : vector<2x4x16xf32> to vector<2x3x16xf32>
    %100 = tpu.concatenate %98, %99 in 1 : vector<2x1x16xf32>, vector<2x3x16xf32> -> vector<2x4x16xf32>
    %101 = vector.extract_strided_slice %97 {offsets = [0, 1, 0], sizes = [2, 3, 16], strides = [1, 1, 1]} : vector<2x4x16xf32> to vector<2x3x16xf32>
    %102 = tpu.concatenate %101, %98 in 1 : vector<2x3x16xf32>, vector<2x1x16xf32> -> vector<2x4x16xf32>
    %103 = tpu.concatenate %100, %97, %102 in 2 : vector<2x4x16xf32>, vector<2x4x16xf32>, vector<2x4x16xf32> -> vector<2x4x48xf32>
    %104 = vector.shape_cast %103 : vector<2x4x48xf32> to vector<8x48xf32>
    %105 = arith.truncf %104 : vector<8x48xf32> to vector<8x48xbf16>
    %c0_51 = arith.constant 0 : index
    %c0_52 = arith.constant 0 : index
    %106 = vector.load %arg15[%c0_51, %c0_52] : memref<48x16xbf16, #tpu.memory_space<vmem>>, vector<48x16xbf16>
    %cst_53 = arith.constant dense<0.000000e+00> : vector<8x16xf32>
    %107 = tpu.matmul %105, %106, %cst_53 {dimension_numbers = #tpu.dot_dimension_numbers<[1], [0], [0], [1], [0, 0, 1, 1], [], []>} : vector<8x48xbf16>, vector<48x16xbf16>, vector<8x16xf32> -> vector<8x16xf32>
    %108 = vector.shape_cast %107 : vector<8x16xf32> to vector<2x4x16xf32>
    %c0_54 = arith.constant 0 : index
    %c0_55 = arith.constant 0 : index
    %109 = vector.load %arg16[%c0_54, %c0_55] : memref<1x16xf32, #tpu.memory_space<vmem>>, vector<1x16xf32>
    %110 = vector.shape_cast %109 : vector<1x16xf32> to vector<1x1x16xf32>
    %111 = vector.broadcast %110 : vector<1x1x16xf32> to vector<2x4x16xf32>
    %112 = arith.addf %108, %111 : vector<2x4x16xf32>
    %c0_56 = arith.constant 0 : index
    %c0_57 = arith.constant 0 : index
    %113 = vector.load %arg17[%c0_56, %c0_57] : memref<1x16xf32, #tpu.memory_space<vmem>>, vector<1x16xf32>
    %c0_58 = arith.constant 0 : index
    %c0_59 = arith.constant 0 : index
    %114 = vector.load %arg18[%c0_58, %c0_59] : memref<1x16xf32, #tpu.memory_space<vmem>>, vector<1x16xf32>
    %cst_60 = arith.constant dense<0.000000e+00> : vector<2x16xf32>
    %115 = vector.multi_reduction <add>, %112, %cst_60 [1] : vector<2x4x16xf32> to vector<2x16xf32>
    %116 = arith.mulf %112, %112 : vector<2x4x16xf32>
    %cst_61 = arith.constant dense<0.000000e+00> : vector<2x16xf32>
    %117 = vector.multi_reduction <add>, %116, %cst_61 [1] : vector<2x4x16xf32> to vector<2x16xf32>
    %cst_62 = arith.constant dense<0.000000e+00> : vector<2x8xf32>
    %118 = tpu.matmul %115, %2, %cst_62 {dimension_numbers = #tpu.dot_dimension_numbers<[1], [0], [0], [1], [0, 0, 1, 1], [], []>} : vector<2x16xf32>, vector<16x8xf32>, vector<2x8xf32> -> vector<2x8xf32>
    %cst_63 = arith.constant dense<0.000000e+00> : vector<2x16xf32>
    %119 = tpu.matmul %118, %3, %cst_63 {dimension_numbers = #tpu.dot_dimension_numbers<[1], [0], [0], [1], [0, 0, 1, 1], [], []>} : vector<2x8xf32>, vector<8x16xf32>, vector<2x16xf32> -> vector<2x16xf32>
    %cst_64 = arith.constant 1.250000e-01 : f32
    %120 = vector.broadcast %cst_64 : f32 to vector<2x16xf32>
    %121 = arith.mulf %119, %120 : vector<2x16xf32>
    %cst_65 = arith.constant dense<0.000000e+00> : vector<2x8xf32>
    %122 = tpu.matmul %117, %2, %cst_65 {dimension_numbers = #tpu.dot_dimension_numbers<[1], [0], [0], [1], [0, 0, 1, 1], [], []>} : vector<2x16xf32>, vector<16x8xf32>, vector<2x8xf32> -> vector<2x8xf32>
    %cst_66 = arith.constant dense<0.000000e+00> : vector<2x16xf32>
    %123 = tpu.matmul %122, %3, %cst_66 {dimension_numbers = #tpu.dot_dimension_numbers<[1], [0], [0], [1], [0, 0, 1, 1], [], []>} : vector<2x8xf32>, vector<8x16xf32>, vector<2x16xf32> -> vector<2x16xf32>
    %cst_67 = arith.constant 1.250000e-01 : f32
    %124 = vector.broadcast %cst_67 : f32 to vector<2x16xf32>
    %125 = arith.mulf %123, %124 : vector<2x16xf32>
    %126 = arith.mulf %121, %121 : vector<2x16xf32>
    %127 = arith.subf %125, %126 : vector<2x16xf32>
    %cst_68 = arith.constant 0.000000e+00 : f32
    %128 = vector.broadcast %cst_68 : f32 to vector<2x16xf32>
    %129 = arith.maximumf %127, %128 : vector<2x16xf32>
    %130 = vector.shape_cast %121 : vector<2x16xf32> to vector<2x1x16xf32>
    %131 = vector.broadcast %130 : vector<2x1x16xf32> to vector<2x4x16xf32>
    %132 = arith.subf %112, %131 : vector<2x4x16xf32>
    %133 = vector.shape_cast %129 : vector<2x16xf32> to vector<2x1x16xf32>
    %cst_69 = arith.constant 9.99999974E-6 : f32
    %134 = vector.broadcast %cst_69 : f32 to vector<2x1x16xf32>
    %135 = arith.addf %133, %134 : vector<2x1x16xf32>
    %136 = math.rsqrt %135 : vector<2x1x16xf32>
    %137 = vector.broadcast %136 : vector<2x1x16xf32> to vector<2x4x16xf32>
    %138 = arith.mulf %132, %137 : vector<2x4x16xf32>
    %139 = vector.shape_cast %113 : vector<1x16xf32> to vector<1x1x16xf32>
    %140 = vector.broadcast %139 : vector<1x1x16xf32> to vector<2x4x16xf32>
    %141 = arith.mulf %138, %140 : vector<2x4x16xf32>
    %142 = vector.shape_cast %114 : vector<1x16xf32> to vector<1x1x16xf32>
    %143 = vector.broadcast %142 : vector<1x1x16xf32> to vector<2x4x16xf32>
    %144 = arith.addf %141, %143 : vector<2x4x16xf32>
    %cst_70 = arith.constant 2.000000e+01 : f32
    %145 = vector.broadcast %cst_70 : f32 to vector<2x4x16xf32>
    %146 = arith.minimumf %144, %145 : vector<2x4x16xf32>
    %147 = math.exp %146 : vector<2x4x16xf32>
    %cst_71 = arith.constant 1.000000e+00 : f32
    %148 = vector.broadcast %cst_71 : f32 to vector<2x4x16xf32>
    %149 = arith.addf %148, %147 : vector<2x4x16xf32>
    %cst_72 = arith.constant 1.000000e+00 : f32
    %150 = vector.broadcast %cst_72 : f32 to vector<2x4x16xf32>
    %151 = arith.addf %150, %147 : vector<2x4x16xf32>
    %152 = arith.mulf %149, %151 : vector<2x4x16xf32>
    %cst_73 = arith.constant 1.000000e+00 : f32
    %153 = vector.broadcast %cst_73 : f32 to vector<2x4x16xf32>
    %154 = arith.subf %152, %153 : vector<2x4x16xf32>
    %155 = arith.mulf %144, %154 : vector<2x4x16xf32>
    %cst_74 = arith.constant 1.000000e+00 : f32
    %156 = vector.broadcast %cst_74 : f32 to vector<2x4x16xf32>
    %157 = arith.addf %152, %156 : vector<2x4x16xf32>
    %158 = tpu.reciprocal %157 {approx = true} : vector<2x4x16xf32> -> vector<2x4x16xf32>
    %159 = arith.mulf %155, %158 : vector<2x4x16xf32>
    %160 = vector.shape_cast %0 : vector<2x4x32xf32> to vector<8x32xf32>
    %161 = arith.truncf %160 : vector<8x32xf32> to vector<8x32xbf16>
    %c0_75 = arith.constant 0 : index
    %c0_76 = arith.constant 0 : index
    %162 = vector.load %arg19[%c0_75, %c0_76] : memref<32x16xbf16, #tpu.memory_space<vmem>>, vector<32x16xbf16>
    %cst_77 = arith.constant dense<0.000000e+00> : vector<8x16xf32>
    %163 = tpu.matmul %161, %162, %cst_77 {dimension_numbers = #tpu.dot_dimension_numbers<[1], [0], [0], [1], [0, 0, 1, 1], [], []>} : vector<8x32xbf16>, vector<32x16xbf16>, vector<8x16xf32> -> vector<8x16xf32>
    %164 = vector.shape_cast %163 : vector<8x16xf32> to vector<2x4x16xf32>
    %165 = vector.shape_cast %1 : vector<2x4x32xf32> to vector<8x32xf32>
    %166 = arith.truncf %165 : vector<8x32xf32> to vector<8x32xbf16>
    %c0_78 = arith.constant 0 : index
    %c0_79 = arith.constant 0 : index
    %167 = vector.load %arg20[%c0_78, %c0_79] : memref<32x16xbf16, #tpu.memory_space<vmem>>, vector<32x16xbf16>
    %cst_80 = arith.constant dense<0.000000e+00> : vector<8x16xf32>
    %168 = tpu.matmul %166, %167, %cst_80 {dimension_numbers = #tpu.dot_dimension_numbers<[1], [0], [0], [1], [0, 0, 1, 1], [], []>} : vector<8x32xbf16>, vector<32x16xbf16>, vector<8x16xf32> -> vector<8x16xf32>
    %169 = vector.shape_cast %168 : vector<8x16xf32> to vector<2x4x16xf32>
    %170 = arith.addf %164, %169 : vector<2x4x16xf32>
    %c0_81 = arith.constant 0 : index
    %c0_82 = arith.constant 0 : index
    %171 = vector.load %arg21[%c0_81, %c0_82] : memref<1x16xf32, #tpu.memory_space<vmem>>, vector<1x16xf32>
    %172 = vector.shape_cast %171 : vector<1x16xf32> to vector<1x1x16xf32>
    %173 = vector.broadcast %172 : vector<1x1x16xf32> to vector<2x4x16xf32>
    %174 = arith.addf %170, %173 : vector<2x4x16xf32>
    %175 = arith.addf %159, %174 : vector<2x4x16xf32>
    %c0_83 = arith.constant 0 : index
    %c0_84 = arith.constant 0 : index
    %c0_85 = arith.constant 0 : index
    %176 = vector.load %arg22[%c0_83, %c0_84, %c0_85] : memref<2x4x16xf32, #tpu.memory_space<vmem>>, vector<2x4x16xf32>
    tpu.vector_store %arg22[%c0_83, %c0_84, %c0_85], %175 {strides = array<i32>} : memref<2x4x16xf32, #tpu.memory_space<vmem>>, vector<2x4x16xf32>,
    return
  }
  func.func @transform_0(%arg0: i32) -> (i32, i32, i32) {
    %c0_i32 = arith.constant 0 : i32
    %c0_i32_0 = arith.constant 0 : i32
    %c0_i32_1 = arith.constant 0 : i32
    return %arg0, %c0_i32, %c0_i32_0 : i32, i32, i32
  }
  func.func @transform_1(%arg0: i32) -> (i32, i32, i32) {
    %c0_i32 = arith.constant 0 : i32
    %c0_i32_0 = arith.constant 0 : i32
    %c0_i32_1 = arith.constant 0 : i32
    return %arg0, %c0_i32, %c0_i32_0 : i32, i32, i32
  }
  func.func @transform_2(%arg0: i32) -> (i32, i32) {
    %c0_i32 = arith.constant 0 : i32
    %c0_i32_0 = arith.constant 0 : i32
    return %arg0, %c0_i32 : i32, i32
  }
  func.func @transform_3(%arg0: i32) -> (i32, i32) {
    %c0_i32 = arith.constant 0 : i32
    %c0_i32_0 = arith.constant 0 : i32
    %c0_i32_1 = arith.constant 0 : i32
    return %c0_i32, %c0_i32_0 : i32, i32
  }
  func.func @transform_4(%arg0: i32) -> (i32, i32) {
    %c0_i32 = arith.constant 0 : i32
    %c0_i32_0 = arith.constant 0 : i32
    %c0_i32_1 = arith.constant 0 : i32
    return %c0_i32, %c0_i32_0 : i32, i32
  }
  func.func @transform_5(%arg0: i32) -> (i32, i32) {
    %c0_i32 = arith.constant 0 : i32
    %c0_i32_0 = arith.constant 0 : i32
    %c0_i32_1 = arith.constant 0 : i32
    return %c0_i32, %c0_i32_0 : i32, i32
  }
  func.func @transform_6(%arg0: i32) -> (i32, i32) {
    %c0_i32 = arith.constant 0 : i32
    %c0_i32_0 = arith.constant 0 : i32
    %c0_i32_1 = arith.constant 0 : i32
    return %c0_i32, %c0_i32_0 : i32, i32
  }
  func.func @transform_7(%arg0: i32) -> (i32, i32) {
    %c0_i32 = arith.constant 0 : i32
    %c0_i32_0 = arith.constant 0 : i32
    %c0_i32_1 = arith.constant 0 : i32
    return %c0_i32, %c0_i32_0 : i32, i32
  }
  func.func @transform_8(%arg0: i32) -> (i32, i32) {
    %c0_i32 = arith.constant 0 : i32
    %c0_i32_0 = arith.constant 0 : i32
    %c0_i32_1 = arith.constant 0 : i32
    return %c0_i32, %c0_i32_0 : i32, i32
  }
  func.func @transform_9(%arg0: i32) -> (i32, i32) {
    %c0_i32 = arith.constant 0 : i32
    %c0_i32_0 = arith.constant 0 : i32
    %c0_i32_1 = arith.constant 0 : i32
    return %c0_i32, %c0_i32_0 : i32, i32
  }
  func.func @transform_10(%arg0: i32) -> (i32, i32) {
    %c0_i32 = arith.constant 0 : i32
    %c0_i32_0 = arith.constant 0 : i32
    %c0_i32_1 = arith.constant 0 : i32
    return %c0_i32, %c0_i32_0 : i32, i32
  }
  func.func @transform_11(%arg0: i32) -> (i32, i32) {
    %c0_i32 = arith.constant 0 : i32
    %c0_i32_0 = arith.constant 0 : i32
    %c0_i32_1 = arith.constant 0 : i32
    return %c0_i32, %c0_i32_0 : i32, i32
  }
  func.func @transform_12(%arg0: i32) -> (i32, i32) {
    %c0_i32 = arith.constant 0 : i32
    %c0_i32_0 = arith.constant 0 : i32
    %c0_i32_1 = arith.constant 0 : i32
    return %c0_i32, %c0_i32_0 : i32, i32
  }
  func.func @transform_13(%arg0: i32) -> (i32, i32) {
    %c0_i32 = arith.constant 0 : i32
    %c0_i32_0 = arith.constant 0 : i32
    %c0_i32_1 = arith.constant 0 : i32
    return %c0_i32, %c0_i32_0 : i32, i32
  }
  func.func @transform_14(%arg0: i32) -> (i32, i32) {
    %c0_i32 = arith.constant 0 : i32
    %c0_i32_0 = arith.constant 0 : i32
    %c0_i32_1 = arith.constant 0 : i32
    return %c0_i32, %c0_i32_0 : i32, i32
  }
  func.func @transform_15(%arg0: i32) -> (i32, i32) {
    %c0_i32 = arith.constant 0 : i32
    %c0_i32_0 = arith.constant 0 : i32
    %c0_i32_1 = arith.constant 0 : i32
    return %c0_i32, %c0_i32_0 : i32, i32
  }
  func.func @transform_16(%arg0: i32) -> (i32, i32) {
    %c0_i32 = arith.constant 0 : i32
    %c0_i32_0 = arith.constant 0 : i32
    %c0_i32_1 = arith.constant 0 : i32
    return %c0_i32, %c0_i32_0 : i32, i32
  }
  func.func @transform_17(%arg0: i32) -> (i32, i32) {
    %c0_i32 = arith.constant 0 : i32
    %c0_i32_0 = arith.constant 0 : i32
    %c0_i32_1 = arith.constant 0 : i32
    return %c0_i32, %c0_i32_0 : i32, i32
  }
  func.func @transform_18(%arg0: i32) -> (i32, i32) {
    %c0_i32 = arith.constant 0 : i32
    %c0_i32_0 = arith.constant 0 : i32
    %c0_i32_1 = arith.constant 0 : i32
    return %c0_i32, %c0_i32_0 : i32, i32
  }
  func.func @transform_19(%arg0: i32) -> (i32, i32) {
    %c0_i32 = arith.constant 0 : i32
    %c0_i32_0 = arith.constant 0 : i32
    %c0_i32_1 = arith.constant 0 : i32
    return %c0_i32, %c0_i32_0 : i32, i32
  }
  func.func @transform_20(%arg0: i32) -> (i32, i32) {
    %c0_i32 = arith.constant 0 : i32
    %c0_i32_0 = arith.constant 0 : i32
    %c0_i32_1 = arith.constant 0 : i32
    return %c0_i32, %c0_i32_0 : i32, i32
  }
  func.func @transform_21(%arg0: i32) -> (i32, i32, i32) {
    %c0_i32 = arith.constant 0 : i32
    %c0_i32_0 = arith.constant 0 : i32
    %c0_i32_1 = arith.constant 0 : i32
    return %arg0, %c0_i32, %c0_i32_0 : i32, i32, i32
  }
}

module attributes {stable_mosaic.version = 11 : i64} {
  func.func @res_block_kernel(%arg0: i32, %arg1: memref<2x4x16xf32, #tpu.memory_space<vmem>>, %arg2: memref<2x24xf32, #tpu.memory_space<vmem>>, %arg3: memref<48x16xbf16, #tpu.memory_space<vmem>>, %arg4: memref<1x16xf32, #tpu.memory_space<vmem>>, %arg5: memref<1x16xf32, #tpu.memory_space<vmem>>, %arg6: memref<1x16xf32, #tpu.memory_space<vmem>>, %arg7: memref<16x8xf32, #tpu.memory_space<vmem>>, %arg8: memref<8x16xf32, #tpu.memory_space<vmem>>, %arg9: memref<24x16xbf16, #tpu.memory_space<vmem>>, %arg10: memref<1x16xf32, #tpu.memory_space<vmem>>, %arg11: memref<24x16xbf16, #tpu.memory_space<vmem>>, %arg12: memref<1x16xf32, #tpu.memory_space<vmem>>, %arg13: memref<48x16xbf16, #tpu.memory_space<vmem>>, %arg14: memref<1x16xf32, #tpu.memory_space<vmem>>, %arg15: memref<1x16xf32, #tpu.memory_space<vmem>>, %arg16: memref<1x16xf32, #tpu.memory_space<vmem>>, %arg17: memref<2x4x16xf32, #tpu.memory_space<vmem>>) attributes {dimension_semantics = [#tpu.dimension_semantics<parallel>], iteration_bounds = array<i64: 1>, scalar_prefetch = 0 : i64, scratch_operands = 0 : i64, tpu.core_type = #tpu.core_type<tc>, window_params = [{transform_indices = @transform_0, window_bounds = array<i64: 2, 4, 16>}, {transform_indices = @transform_1, window_bounds = array<i64: 2, 24>}, {pipeline_mode = #tpu.pipeline_mode<synchronous>, transform_indices = @transform_2, window_bounds = array<i64: 48, 16>}, {pipeline_mode = #tpu.pipeline_mode<synchronous>, transform_indices = @transform_3, window_bounds = array<i64: 1, 16>}, {pipeline_mode = #tpu.pipeline_mode<synchronous>, transform_indices = @transform_4, window_bounds = array<i64: 1, 16>}, {pipeline_mode = #tpu.pipeline_mode<synchronous>, transform_indices = @transform_5, window_bounds = array<i64: 1, 16>}, {pipeline_mode = #tpu.pipeline_mode<synchronous>, transform_indices = @transform_6, window_bounds = array<i64: 16, 8>}, {pipeline_mode = #tpu.pipeline_mode<synchronous>, transform_indices = @transform_7, window_bounds = array<i64: 8, 16>}, {pipeline_mode = #tpu.pipeline_mode<synchronous>, transform_indices = @transform_8, window_bounds = array<i64: 24, 16>}, {pipeline_mode = #tpu.pipeline_mode<synchronous>, transform_indices = @transform_9, window_bounds = array<i64: 1, 16>}, {pipeline_mode = #tpu.pipeline_mode<synchronous>, transform_indices = @transform_10, window_bounds = array<i64: 24, 16>}, {pipeline_mode = #tpu.pipeline_mode<synchronous>, transform_indices = @transform_11, window_bounds = array<i64: 1, 16>}, {pipeline_mode = #tpu.pipeline_mode<synchronous>, transform_indices = @transform_12, window_bounds = array<i64: 48, 16>}, {pipeline_mode = #tpu.pipeline_mode<synchronous>, transform_indices = @transform_13, window_bounds = array<i64: 1, 16>}, {pipeline_mode = #tpu.pipeline_mode<synchronous>, transform_indices = @transform_14, window_bounds = array<i64: 1, 16>}, {pipeline_mode = #tpu.pipeline_mode<synchronous>, transform_indices = @transform_15, window_bounds = array<i64: 1, 16>}, {transform_indices = @transform_16, window_bounds = array<i64: 2, 4, 16>}]} {
    %c0 = arith.constant 0 : index
    %c0_0 = arith.constant 0 : index
    %c0_1 = arith.constant 0 : index
    %0 = vector.load %arg1[%c0, %c0_0, %c0_1] : memref<2x4x16xf32, #tpu.memory_space<vmem>>, vector<2x4x16xf32>
    %c0_2 = arith.constant 0 : index
    %c0_3 = arith.constant 0 : index
    %1 = vector.load %arg7[%c0_2, %c0_3] : memref<16x8xf32, #tpu.memory_space<vmem>>, vector<16x8xf32>
    %c0_4 = arith.constant 0 : index
    %c0_5 = arith.constant 0 : index
    %2 = vector.load %arg8[%c0_4, %c0_5] : memref<8x16xf32, #tpu.memory_space<vmem>>, vector<8x16xf32>
    %cst = arith.constant 0.000000e+00 : f32
    %3 = vector.broadcast %cst : f32 to vector<2x1x16xf32>
    %4 = vector.extract_strided_slice %0 {offsets = [0, 0, 0], sizes = [2, 3, 16], strides = [1, 1, 1]} : vector<2x4x16xf32> to vector<2x3x16xf32>
    %5 = tpu.concatenate %3, %4 in 1 : vector<2x1x16xf32>, vector<2x3x16xf32> -> vector<2x4x16xf32>
    %6 = vector.extract_strided_slice %0 {offsets = [0, 1, 0], sizes = [2, 3, 16], strides = [1, 1, 1]} : vector<2x4x16xf32> to vector<2x3x16xf32>
    %7 = tpu.concatenate %6, %3 in 1 : vector<2x3x16xf32>, vector<2x1x16xf32> -> vector<2x4x16xf32>
    %8 = tpu.concatenate %5, %0, %7 in 2 : vector<2x4x16xf32>, vector<2x4x16xf32>, vector<2x4x16xf32> -> vector<2x4x48xf32>
    %9 = vector.shape_cast %8 : vector<2x4x48xf32> to vector<8x48xf32>
    %10 = arith.truncf %9 : vector<8x48xf32> to vector<8x48xbf16>
    %c0_6 = arith.constant 0 : index
    %c0_7 = arith.constant 0 : index
    %11 = vector.load %arg3[%c0_6, %c0_7] : memref<48x16xbf16, #tpu.memory_space<vmem>>, vector<48x16xbf16>
    %cst_8 = arith.constant dense<0.000000e+00> : vector<8x16xf32>
    %12 = tpu.matmul %10, %11, %cst_8 {dimension_numbers = #tpu.dot_dimension_numbers<[1], [0], [0], [1], [0, 0, 1, 1], [], []>} : vector<8x48xbf16>, vector<48x16xbf16>, vector<8x16xf32> -> vector<8x16xf32>
    %13 = vector.shape_cast %12 : vector<8x16xf32> to vector<2x4x16xf32>
    %c0_9 = arith.constant 0 : index
    %c0_10 = arith.constant 0 : index
    %14 = vector.load %arg4[%c0_9, %c0_10] : memref<1x16xf32, #tpu.memory_space<vmem>>, vector<1x16xf32>
    %15 = vector.shape_cast %14 : vector<1x16xf32> to vector<1x1x16xf32>
    %16 = vector.broadcast %15 : vector<1x1x16xf32> to vector<2x4x16xf32>
    %17 = arith.addf %13, %16 : vector<2x4x16xf32>
    %c0_11 = arith.constant 0 : index
    %c0_12 = arith.constant 0 : index
    %18 = vector.load %arg5[%c0_11, %c0_12] : memref<1x16xf32, #tpu.memory_space<vmem>>, vector<1x16xf32>
    %c0_13 = arith.constant 0 : index
    %c0_14 = arith.constant 0 : index
    %19 = vector.load %arg6[%c0_13, %c0_14] : memref<1x16xf32, #tpu.memory_space<vmem>>, vector<1x16xf32>
    %cst_15 = arith.constant dense<0.000000e+00> : vector<2x16xf32>
    %20 = vector.multi_reduction <add>, %17, %cst_15 [1] : vector<2x4x16xf32> to vector<2x16xf32>
    %21 = arith.mulf %17, %17 : vector<2x4x16xf32>
    %cst_16 = arith.constant dense<0.000000e+00> : vector<2x16xf32>
    %22 = vector.multi_reduction <add>, %21, %cst_16 [1] : vector<2x4x16xf32> to vector<2x16xf32>
    %cst_17 = arith.constant dense<0.000000e+00> : vector<2x8xf32>
    %23 = tpu.matmul %20, %1, %cst_17 {dimension_numbers = #tpu.dot_dimension_numbers<[1], [0], [0], [1], [0, 0, 1, 1], [], []>} : vector<2x16xf32>, vector<16x8xf32>, vector<2x8xf32> -> vector<2x8xf32>
    %cst_18 = arith.constant dense<0.000000e+00> : vector<2x16xf32>
    %24 = tpu.matmul %23, %2, %cst_18 {dimension_numbers = #tpu.dot_dimension_numbers<[1], [0], [0], [1], [0, 0, 1, 1], [], []>} : vector<2x8xf32>, vector<8x16xf32>, vector<2x16xf32> -> vector<2x16xf32>
    %cst_19 = arith.constant 1.250000e-01 : f32
    %25 = vector.broadcast %cst_19 : f32 to vector<2x16xf32>
    %26 = arith.mulf %24, %25 : vector<2x16xf32>
    %cst_20 = arith.constant dense<0.000000e+00> : vector<2x8xf32>
    %27 = tpu.matmul %22, %1, %cst_20 {dimension_numbers = #tpu.dot_dimension_numbers<[1], [0], [0], [1], [0, 0, 1, 1], [], []>} : vector<2x16xf32>, vector<16x8xf32>, vector<2x8xf32> -> vector<2x8xf32>
    %cst_21 = arith.constant dense<0.000000e+00> : vector<2x16xf32>
    %28 = tpu.matmul %27, %2, %cst_21 {dimension_numbers = #tpu.dot_dimension_numbers<[1], [0], [0], [1], [0, 0, 1, 1], [], []>} : vector<2x8xf32>, vector<8x16xf32>, vector<2x16xf32> -> vector<2x16xf32>
    %cst_22 = arith.constant 1.250000e-01 : f32
    %29 = vector.broadcast %cst_22 : f32 to vector<2x16xf32>
    %30 = arith.mulf %28, %29 : vector<2x16xf32>
    %31 = arith.mulf %26, %26 : vector<2x16xf32>
    %32 = arith.subf %30, %31 : vector<2x16xf32>
    %cst_23 = arith.constant 0.000000e+00 : f32
    %33 = vector.broadcast %cst_23 : f32 to vector<2x16xf32>
    %34 = arith.maximumf %32, %33 : vector<2x16xf32>
    %35 = vector.shape_cast %26 : vector<2x16xf32> to vector<2x1x16xf32>
    %36 = vector.broadcast %35 : vector<2x1x16xf32> to vector<2x4x16xf32>
    %37 = arith.subf %17, %36 : vector<2x4x16xf32>
    %38 = vector.shape_cast %34 : vector<2x16xf32> to vector<2x1x16xf32>
    %cst_24 = arith.constant 9.99999974E-6 : f32
    %39 = vector.broadcast %cst_24 : f32 to vector<2x1x16xf32>
    %40 = arith.addf %38, %39 : vector<2x1x16xf32>
    %41 = math.rsqrt %40 : vector<2x1x16xf32>
    %42 = vector.broadcast %41 : vector<2x1x16xf32> to vector<2x4x16xf32>
    %43 = arith.mulf %37, %42 : vector<2x4x16xf32>
    %44 = vector.shape_cast %18 : vector<1x16xf32> to vector<1x1x16xf32>
    %45 = vector.broadcast %44 : vector<1x1x16xf32> to vector<2x4x16xf32>
    %46 = arith.mulf %43, %45 : vector<2x4x16xf32>
    %47 = vector.shape_cast %19 : vector<1x16xf32> to vector<1x1x16xf32>
    %48 = vector.broadcast %47 : vector<1x1x16xf32> to vector<2x4x16xf32>
    %49 = arith.addf %46, %48 : vector<2x4x16xf32>
    %cst_25 = arith.constant 2.000000e+01 : f32
    %50 = vector.broadcast %cst_25 : f32 to vector<2x4x16xf32>
    %51 = arith.minimumf %49, %50 : vector<2x4x16xf32>
    %52 = math.exp %51 : vector<2x4x16xf32>
    %cst_26 = arith.constant 1.000000e+00 : f32
    %53 = vector.broadcast %cst_26 : f32 to vector<2x4x16xf32>
    %54 = arith.addf %53, %52 : vector<2x4x16xf32>
    %cst_27 = arith.constant 1.000000e+00 : f32
    %55 = vector.broadcast %cst_27 : f32 to vector<2x4x16xf32>
    %56 = arith.addf %55, %52 : vector<2x4x16xf32>
    %57 = arith.mulf %54, %56 : vector<2x4x16xf32>
    %cst_28 = arith.constant 1.000000e+00 : f32
    %58 = vector.broadcast %cst_28 : f32 to vector<2x4x16xf32>
    %59 = arith.subf %57, %58 : vector<2x4x16xf32>
    %60 = arith.mulf %49, %59 : vector<2x4x16xf32>
    %cst_29 = arith.constant 1.000000e+00 : f32
    %61 = vector.broadcast %cst_29 : f32 to vector<2x4x16xf32>
    %62 = arith.addf %57, %61 : vector<2x4x16xf32>
    %63 = tpu.reciprocal %62 {approx = true} : vector<2x4x16xf32> -> vector<2x4x16xf32>
    %64 = arith.mulf %60, %63 : vector<2x4x16xf32>
    %c0_30 = arith.constant 0 : index
    %c0_31 = arith.constant 0 : index
    %65 = vector.load %arg2[%c0_30, %c0_31] : memref<2x24xf32, #tpu.memory_space<vmem>>, vector<2x24xf32>
    %66 = arith.truncf %65 : vector<2x24xf32> to vector<2x24xbf16>
    %c0_32 = arith.constant 0 : index
    %c0_33 = arith.constant 0 : index
    %67 = vector.load %arg9[%c0_32, %c0_33] : memref<24x16xbf16, #tpu.memory_space<vmem>>, vector<24x16xbf16>
    %cst_34 = arith.constant dense<0.000000e+00> : vector<2x16xf32>
    %68 = tpu.matmul %66, %67, %cst_34 {dimension_numbers = #tpu.dot_dimension_numbers<[1], [0], [0], [1], [0, 0, 1, 1], [], []>} : vector<2x24xbf16>, vector<24x16xbf16>, vector<2x16xf32> -> vector<2x16xf32>
    %c0_35 = arith.constant 0 : index
    %c0_36 = arith.constant 0 : index
    %69 = vector.load %arg10[%c0_35, %c0_36] : memref<1x16xf32, #tpu.memory_space<vmem>>, vector<1x16xf32>
    %70 = vector.broadcast %69 : vector<1x16xf32> to vector<2x16xf32>
    %71 = arith.addf %68, %70 : vector<2x16xf32>
    %c0_37 = arith.constant 0 : index
    %c0_38 = arith.constant 0 : index
    %72 = vector.load %arg11[%c0_37, %c0_38] : memref<24x16xbf16, #tpu.memory_space<vmem>>, vector<24x16xbf16>
    %cst_39 = arith.constant dense<0.000000e+00> : vector<2x16xf32>
    %73 = tpu.matmul %66, %72, %cst_39 {dimension_numbers = #tpu.dot_dimension_numbers<[1], [0], [0], [1], [0, 0, 1, 1], [], []>} : vector<2x24xbf16>, vector<24x16xbf16>, vector<2x16xf32> -> vector<2x16xf32>
    %c0_40 = arith.constant 0 : index
    %c0_41 = arith.constant 0 : index
    %74 = vector.load %arg12[%c0_40, %c0_41] : memref<1x16xf32, #tpu.memory_space<vmem>>, vector<1x16xf32>
    %75 = vector.broadcast %74 : vector<1x16xf32> to vector<2x16xf32>
    %76 = arith.addf %73, %75 : vector<2x16xf32>
    %77 = vector.shape_cast %71 : vector<2x16xf32> to vector<2x1x16xf32>
    %cst_42 = arith.constant 1.000000e+00 : f32
    %78 = vector.broadcast %cst_42 : f32 to vector<2x1x16xf32>
    %79 = arith.addf %77, %78 : vector<2x1x16xf32>
    %80 = vector.broadcast %79 : vector<2x1x16xf32> to vector<2x4x16xf32>
    %81 = arith.mulf %64, %80 : vector<2x4x16xf32>
    %82 = vector.shape_cast %76 : vector<2x16xf32> to vector<2x1x16xf32>
    %83 = vector.broadcast %82 : vector<2x1x16xf32> to vector<2x4x16xf32>
    %84 = arith.addf %81, %83 : vector<2x4x16xf32>
    %cst_43 = arith.constant 0.000000e+00 : f32
    %85 = vector.broadcast %cst_43 : f32 to vector<2x1x16xf32>
    %86 = vector.extract_strided_slice %84 {offsets = [0, 0, 0], sizes = [2, 3, 16], strides = [1, 1, 1]} : vector<2x4x16xf32> to vector<2x3x16xf32>
    %87 = tpu.concatenate %85, %86 in 1 : vector<2x1x16xf32>, vector<2x3x16xf32> -> vector<2x4x16xf32>
    %88 = vector.extract_strided_slice %84 {offsets = [0, 1, 0], sizes = [2, 3, 16], strides = [1, 1, 1]} : vector<2x4x16xf32> to vector<2x3x16xf32>
    %89 = tpu.concatenate %88, %85 in 1 : vector<2x3x16xf32>, vector<2x1x16xf32> -> vector<2x4x16xf32>
    %90 = tpu.concatenate %87, %84, %89 in 2 : vector<2x4x16xf32>, vector<2x4x16xf32>, vector<2x4x16xf32> -> vector<2x4x48xf32>
    %91 = vector.shape_cast %90 : vector<2x4x48xf32> to vector<8x48xf32>
    %92 = arith.truncf %91 : vector<8x48xf32> to vector<8x48xbf16>
    %c0_44 = arith.constant 0 : index
    %c0_45 = arith.constant 0 : index
    %93 = vector.load %arg13[%c0_44, %c0_45] : memref<48x16xbf16, #tpu.memory_space<vmem>>, vector<48x16xbf16>
    %cst_46 = arith.constant dense<0.000000e+00> : vector<8x16xf32>
    %94 = tpu.matmul %92, %93, %cst_46 {dimension_numbers = #tpu.dot_dimension_numbers<[1], [0], [0], [1], [0, 0, 1, 1], [], []>} : vector<8x48xbf16>, vector<48x16xbf16>, vector<8x16xf32> -> vector<8x16xf32>
    %95 = vector.shape_cast %94 : vector<8x16xf32> to vector<2x4x16xf32>
    %c0_47 = arith.constant 0 : index
    %c0_48 = arith.constant 0 : index
    %96 = vector.load %arg14[%c0_47, %c0_48] : memref<1x16xf32, #tpu.memory_space<vmem>>, vector<1x16xf32>
    %97 = vector.shape_cast %96 : vector<1x16xf32> to vector<1x1x16xf32>
    %98 = vector.broadcast %97 : vector<1x1x16xf32> to vector<2x4x16xf32>
    %99 = arith.addf %95, %98 : vector<2x4x16xf32>
    %c0_49 = arith.constant 0 : index
    %c0_50 = arith.constant 0 : index
    %100 = vector.load %arg15[%c0_49, %c0_50] : memref<1x16xf32, #tpu.memory_space<vmem>>, vector<1x16xf32>
    %c0_51 = arith.constant 0 : index
    %c0_52 = arith.constant 0 : index
    %101 = vector.load %arg16[%c0_51, %c0_52] : memref<1x16xf32, #tpu.memory_space<vmem>>, vector<1x16xf32>
    %cst_53 = arith.constant dense<0.000000e+00> : vector<2x16xf32>
    %102 = vector.multi_reduction <add>, %99, %cst_53 [1] : vector<2x4x16xf32> to vector<2x16xf32>
    %103 = arith.mulf %99, %99 : vector<2x4x16xf32>
    %cst_54 = arith.constant dense<0.000000e+00> : vector<2x16xf32>
    %104 = vector.multi_reduction <add>, %103, %cst_54 [1] : vector<2x4x16xf32> to vector<2x16xf32>
    %cst_55 = arith.constant dense<0.000000e+00> : vector<2x8xf32>
    %105 = tpu.matmul %102, %1, %cst_55 {dimension_numbers = #tpu.dot_dimension_numbers<[1], [0], [0], [1], [0, 0, 1, 1], [], []>} : vector<2x16xf32>, vector<16x8xf32>, vector<2x8xf32> -> vector<2x8xf32>
    %cst_56 = arith.constant dense<0.000000e+00> : vector<2x16xf32>
    %106 = tpu.matmul %105, %2, %cst_56 {dimension_numbers = #tpu.dot_dimension_numbers<[1], [0], [0], [1], [0, 0, 1, 1], [], []>} : vector<2x8xf32>, vector<8x16xf32>, vector<2x16xf32> -> vector<2x16xf32>
    %cst_57 = arith.constant 1.250000e-01 : f32
    %107 = vector.broadcast %cst_57 : f32 to vector<2x16xf32>
    %108 = arith.mulf %106, %107 : vector<2x16xf32>
    %cst_58 = arith.constant dense<0.000000e+00> : vector<2x8xf32>
    %109 = tpu.matmul %104, %1, %cst_58 {dimension_numbers = #tpu.dot_dimension_numbers<[1], [0], [0], [1], [0, 0, 1, 1], [], []>} : vector<2x16xf32>, vector<16x8xf32>, vector<2x8xf32> -> vector<2x8xf32>
    %cst_59 = arith.constant dense<0.000000e+00> : vector<2x16xf32>
    %110 = tpu.matmul %109, %2, %cst_59 {dimension_numbers = #tpu.dot_dimension_numbers<[1], [0], [0], [1], [0, 0, 1, 1], [], []>} : vector<2x8xf32>, vector<8x16xf32>, vector<2x16xf32> -> vector<2x16xf32>
    %cst_60 = arith.constant 1.250000e-01 : f32
    %111 = vector.broadcast %cst_60 : f32 to vector<2x16xf32>
    %112 = arith.mulf %110, %111 : vector<2x16xf32>
    %113 = arith.mulf %108, %108 : vector<2x16xf32>
    %114 = arith.subf %112, %113 : vector<2x16xf32>
    %cst_61 = arith.constant 0.000000e+00 : f32
    %115 = vector.broadcast %cst_61 : f32 to vector<2x16xf32>
    %116 = arith.maximumf %114, %115 : vector<2x16xf32>
    %117 = vector.shape_cast %108 : vector<2x16xf32> to vector<2x1x16xf32>
    %118 = vector.broadcast %117 : vector<2x1x16xf32> to vector<2x4x16xf32>
    %119 = arith.subf %99, %118 : vector<2x4x16xf32>
    %120 = vector.shape_cast %116 : vector<2x16xf32> to vector<2x1x16xf32>
    %cst_62 = arith.constant 9.99999974E-6 : f32
    %121 = vector.broadcast %cst_62 : f32 to vector<2x1x16xf32>
    %122 = arith.addf %120, %121 : vector<2x1x16xf32>
    %123 = math.rsqrt %122 : vector<2x1x16xf32>
    %124 = vector.broadcast %123 : vector<2x1x16xf32> to vector<2x4x16xf32>
    %125 = arith.mulf %119, %124 : vector<2x4x16xf32>
    %126 = vector.shape_cast %100 : vector<1x16xf32> to vector<1x1x16xf32>
    %127 = vector.broadcast %126 : vector<1x1x16xf32> to vector<2x4x16xf32>
    %128 = arith.mulf %125, %127 : vector<2x4x16xf32>
    %129 = vector.shape_cast %101 : vector<1x16xf32> to vector<1x1x16xf32>
    %130 = vector.broadcast %129 : vector<1x1x16xf32> to vector<2x4x16xf32>
    %131 = arith.addf %128, %130 : vector<2x4x16xf32>
    %cst_63 = arith.constant 2.000000e+01 : f32
    %132 = vector.broadcast %cst_63 : f32 to vector<2x4x16xf32>
    %133 = arith.minimumf %131, %132 : vector<2x4x16xf32>
    %134 = math.exp %133 : vector<2x4x16xf32>
    %cst_64 = arith.constant 1.000000e+00 : f32
    %135 = vector.broadcast %cst_64 : f32 to vector<2x4x16xf32>
    %136 = arith.addf %135, %134 : vector<2x4x16xf32>
    %cst_65 = arith.constant 1.000000e+00 : f32
    %137 = vector.broadcast %cst_65 : f32 to vector<2x4x16xf32>
    %138 = arith.addf %137, %134 : vector<2x4x16xf32>
    %139 = arith.mulf %136, %138 : vector<2x4x16xf32>
    %cst_66 = arith.constant 1.000000e+00 : f32
    %140 = vector.broadcast %cst_66 : f32 to vector<2x4x16xf32>
    %141 = arith.subf %139, %140 : vector<2x4x16xf32>
    %142 = arith.mulf %131, %141 : vector<2x4x16xf32>
    %cst_67 = arith.constant 1.000000e+00 : f32
    %143 = vector.broadcast %cst_67 : f32 to vector<2x4x16xf32>
    %144 = arith.addf %139, %143 : vector<2x4x16xf32>
    %145 = tpu.reciprocal %144 {approx = true} : vector<2x4x16xf32> -> vector<2x4x16xf32>
    %146 = arith.mulf %142, %145 : vector<2x4x16xf32>
    %147 = arith.addf %146, %0 : vector<2x4x16xf32>
    %c0_68 = arith.constant 0 : index
    %c0_69 = arith.constant 0 : index
    %c0_70 = arith.constant 0 : index
    %148 = vector.load %arg17[%c0_68, %c0_69, %c0_70] : memref<2x4x16xf32, #tpu.memory_space<vmem>>, vector<2x4x16xf32>
    tpu.vector_store %arg17[%c0_68, %c0_69, %c0_70], %147 {strides = array<i32>} : memref<2x4x16xf32, #tpu.memory_space<vmem>>, vector<2x4x16xf32>,
    return
  }
  func.func @transform_0(%arg0: i32) -> (i32, i32, i32) {
    %c0_i32 = arith.constant 0 : i32
    %c0_i32_0 = arith.constant 0 : i32
    %c0_i32_1 = arith.constant 0 : i32
    return %arg0, %c0_i32, %c0_i32_0 : i32, i32, i32
  }
  func.func @transform_1(%arg0: i32) -> (i32, i32) {
    %c0_i32 = arith.constant 0 : i32
    %c0_i32_0 = arith.constant 0 : i32
    return %arg0, %c0_i32 : i32, i32
  }
  func.func @transform_2(%arg0: i32) -> (i32, i32) {
    %c0_i32 = arith.constant 0 : i32
    %c0_i32_0 = arith.constant 0 : i32
    %c0_i32_1 = arith.constant 0 : i32
    return %c0_i32, %c0_i32_0 : i32, i32
  }
  func.func @transform_3(%arg0: i32) -> (i32, i32) {
    %c0_i32 = arith.constant 0 : i32
    %c0_i32_0 = arith.constant 0 : i32
    %c0_i32_1 = arith.constant 0 : i32
    return %c0_i32, %c0_i32_0 : i32, i32
  }
  func.func @transform_4(%arg0: i32) -> (i32, i32) {
    %c0_i32 = arith.constant 0 : i32
    %c0_i32_0 = arith.constant 0 : i32
    %c0_i32_1 = arith.constant 0 : i32
    return %c0_i32, %c0_i32_0 : i32, i32
  }
  func.func @transform_5(%arg0: i32) -> (i32, i32) {
    %c0_i32 = arith.constant 0 : i32
    %c0_i32_0 = arith.constant 0 : i32
    %c0_i32_1 = arith.constant 0 : i32
    return %c0_i32, %c0_i32_0 : i32, i32
  }
  func.func @transform_6(%arg0: i32) -> (i32, i32) {
    %c0_i32 = arith.constant 0 : i32
    %c0_i32_0 = arith.constant 0 : i32
    %c0_i32_1 = arith.constant 0 : i32
    return %c0_i32, %c0_i32_0 : i32, i32
  }
  func.func @transform_7(%arg0: i32) -> (i32, i32) {
    %c0_i32 = arith.constant 0 : i32
    %c0_i32_0 = arith.constant 0 : i32
    %c0_i32_1 = arith.constant 0 : i32
    return %c0_i32, %c0_i32_0 : i32, i32
  }
  func.func @transform_8(%arg0: i32) -> (i32, i32) {
    %c0_i32 = arith.constant 0 : i32
    %c0_i32_0 = arith.constant 0 : i32
    %c0_i32_1 = arith.constant 0 : i32
    return %c0_i32, %c0_i32_0 : i32, i32
  }
  func.func @transform_9(%arg0: i32) -> (i32, i32) {
    %c0_i32 = arith.constant 0 : i32
    %c0_i32_0 = arith.constant 0 : i32
    %c0_i32_1 = arith.constant 0 : i32
    return %c0_i32, %c0_i32_0 : i32, i32
  }
  func.func @transform_10(%arg0: i32) -> (i32, i32) {
    %c0_i32 = arith.constant 0 : i32
    %c0_i32_0 = arith.constant 0 : i32
    %c0_i32_1 = arith.constant 0 : i32
    return %c0_i32, %c0_i32_0 : i32, i32
  }
  func.func @transform_11(%arg0: i32) -> (i32, i32) {
    %c0_i32 = arith.constant 0 : i32
    %c0_i32_0 = arith.constant 0 : i32
    %c0_i32_1 = arith.constant 0 : i32
    return %c0_i32, %c0_i32_0 : i32, i32
  }
  func.func @transform_12(%arg0: i32) -> (i32, i32) {
    %c0_i32 = arith.constant 0 : i32
    %c0_i32_0 = arith.constant 0 : i32
    %c0_i32_1 = arith.constant 0 : i32
    return %c0_i32, %c0_i32_0 : i32, i32
  }
  func.func @transform_13(%arg0: i32) -> (i32, i32) {
    %c0_i32 = arith.constant 0 : i32
    %c0_i32_0 = arith.constant 0 : i32
    %c0_i32_1 = arith.constant 0 : i32
    return %c0_i32, %c0_i32_0 : i32, i32
  }
  func.func @transform_14(%arg0: i32) -> (i32, i32) {
    %c0_i32 = arith.constant 0 : i32
    %c0_i32_0 = arith.constant 0 : i32
    %c0_i32_1 = arith.constant 0 : i32
    return %c0_i32, %c0_i32_0 : i32, i32
  }
  func.func @transform_15(%arg0: i32) -> (i32, i32) {
    %c0_i32 = arith.constant 0 : i32
    %c0_i32_0 = arith.constant 0 : i32
    %c0_i32_1 = arith.constant 0 : i32
    return %c0_i32, %c0_i32_0 : i32, i32
  }
  func.func @transform_16(%arg0: i32) -> (i32, i32, i32) {
    %c0_i32 = arith.constant 0 : i32
    %c0_i32_0 = arith.constant 0 : i32
    %c0_i32_1 = arith.constant 0 : i32
    return %arg0, %c0_i32, %c0_i32_0 : i32, i32, i32
  }
}

module attributes {stable_mosaic.version = 11 : i64} {
  func.func @up_kernel(%arg0: i32, %arg1: memref<2x4x16xf32, #tpu.memory_space<vmem>>, %arg2: memref<48x32xbf16, #tpu.memory_space<vmem>>, %arg3: memref<1x32xf32, #tpu.memory_space<vmem>>, %arg4: memref<2x4x32xf32, #tpu.memory_space<vmem>>) attributes {dimension_semantics = [#tpu.dimension_semantics<parallel>], iteration_bounds = array<i64: 1>, scalar_prefetch = 0 : i64, scratch_operands = 0 : i64, tpu.core_type = #tpu.core_type<tc>, window_params = [{pipeline_mode = #tpu.pipeline_mode<synchronous>, transform_indices = @transform_0, window_bounds = array<i64: 2, 4, 16>}, {pipeline_mode = #tpu.pipeline_mode<synchronous>, transform_indices = @transform_1, window_bounds = array<i64: 48, 32>}, {pipeline_mode = #tpu.pipeline_mode<synchronous>, transform_indices = @transform_2, window_bounds = array<i64: 1, 32>}, {pipeline_mode = #tpu.pipeline_mode<synchronous>, transform_indices = @transform_3, window_bounds = array<i64: 2, 4, 32>}]} {
    %c0 = arith.constant 0 : index
    %c0_0 = arith.constant 0 : index
    %c0_1 = arith.constant 0 : index
    %0 = vector.load %arg1[%c0, %c0_0, %c0_1] : memref<2x4x16xf32, #tpu.memory_space<vmem>>, vector<2x4x16xf32>
    %cst = arith.constant 0.000000e+00 : f32
    %1 = vector.broadcast %cst : f32 to vector<2x1x16xf32>
    %2 = vector.extract_strided_slice %0 {offsets = [0, 0, 0], sizes = [2, 3, 16], strides = [1, 1, 1]} : vector<2x4x16xf32> to vector<2x3x16xf32>
    %3 = tpu.concatenate %1, %2 in 1 : vector<2x1x16xf32>, vector<2x3x16xf32> -> vector<2x4x16xf32>
    %4 = vector.extract_strided_slice %0 {offsets = [0, 1, 0], sizes = [2, 3, 16], strides = [1, 1, 1]} : vector<2x4x16xf32> to vector<2x3x16xf32>
    %5 = tpu.concatenate %4, %1 in 1 : vector<2x3x16xf32>, vector<2x1x16xf32> -> vector<2x4x16xf32>
    %6 = tpu.concatenate %3, %0, %5 in 2 : vector<2x4x16xf32>, vector<2x4x16xf32>, vector<2x4x16xf32> -> vector<2x4x48xf32>
    %7 = vector.shape_cast %6 : vector<2x4x48xf32> to vector<8x48xf32>
    %8 = arith.truncf %7 : vector<8x48xf32> to vector<8x48xbf16>
    %c0_2 = arith.constant 0 : index
    %c0_3 = arith.constant 0 : index
    %9 = vector.load %arg2[%c0_2, %c0_3] : memref<48x32xbf16, #tpu.memory_space<vmem>>, vector<48x32xbf16>
    %cst_4 = arith.constant dense<0.000000e+00> : vector<8x32xf32>
    %10 = tpu.matmul %8, %9, %cst_4 {dimension_numbers = #tpu.dot_dimension_numbers<[1], [0], [0], [1], [0, 0, 1, 1], [], []>} : vector<8x48xbf16>, vector<48x32xbf16>, vector<8x32xf32> -> vector<8x32xf32>
    %c0_5 = arith.constant 0 : index
    %c0_6 = arith.constant 0 : index
    %11 = vector.load %arg3[%c0_5, %c0_6] : memref<1x32xf32, #tpu.memory_space<vmem>>, vector<1x32xf32>
    %12 = vector.broadcast %11 : vector<1x32xf32> to vector<8x32xf32>
    %13 = arith.addf %10, %12 : vector<8x32xf32>
    %14 = vector.shape_cast %13 : vector<8x32xf32> to vector<2x4x32xf32>
    %c0_7 = arith.constant 0 : index
    %c0_8 = arith.constant 0 : index
    %c0_9 = arith.constant 0 : index
    %15 = vector.load %arg4[%c0_7, %c0_8, %c0_9] : memref<2x4x32xf32, #tpu.memory_space<vmem>>, vector<2x4x32xf32>
    tpu.vector_store %arg4[%c0_7, %c0_8, %c0_9], %14 {strides = array<i32>} : memref<2x4x32xf32, #tpu.memory_space<vmem>>, vector<2x4x32xf32>,
    return
  }
  func.func @transform_0(%arg0: i32) -> (i32, i32, i32) {
    %c0_i32 = arith.constant 0 : i32
    %c0_i32_0 = arith.constant 0 : i32
    %c0_i32_1 = arith.constant 0 : i32
    %c0_i32_2 = arith.constant 0 : i32
    return %c0_i32, %c0_i32_0, %c0_i32_1 : i32, i32, i32
  }
  func.func @transform_1(%arg0: i32) -> (i32, i32) {
    %c0_i32 = arith.constant 0 : i32
    %c0_i32_0 = arith.constant 0 : i32
    %c0_i32_1 = arith.constant 0 : i32
    return %c0_i32, %c0_i32_0 : i32, i32
  }
  func.func @transform_2(%arg0: i32) -> (i32, i32) {
    %c0_i32 = arith.constant 0 : i32
    %c0_i32_0 = arith.constant 0 : i32
    %c0_i32_1 = arith.constant 0 : i32
    return %c0_i32, %c0_i32_0 : i32, i32
  }
  func.func @transform_3(%arg0: i32) -> (i32, i32, i32) {
    %c0_i32 = arith.constant 0 : i32
    %c0_i32_0 = arith.constant 0 : i32
    %c0_i32_1 = arith.constant 0 : i32
    %c0_i32_2 = arith.constant 0 : i32
    return %c0_i32, %c0_i32_0, %c0_i32_1 : i32, i32, i32
  }
}

module attributes {stable_mosaic.version = 11 : i64} {
  func.func @res_block_kernel(%arg0: i32, %arg1: memref<2x8x16xf32, #tpu.memory_space<vmem>>, %arg2: memref<2x8x16xf32, #tpu.memory_space<vmem>>, %arg3: memref<2x24xf32, #tpu.memory_space<vmem>>, %arg4: memref<48x16xbf16, #tpu.memory_space<vmem>>, %arg5: memref<48x16xbf16, #tpu.memory_space<vmem>>, %arg6: memref<1x16xf32, #tpu.memory_space<vmem>>, %arg7: memref<1x16xf32, #tpu.memory_space<vmem>>, %arg8: memref<1x16xf32, #tpu.memory_space<vmem>>, %arg9: memref<16x8xf32, #tpu.memory_space<vmem>>, %arg10: memref<8x16xf32, #tpu.memory_space<vmem>>, %arg11: memref<24x16xbf16, #tpu.memory_space<vmem>>, %arg12: memref<1x16xf32, #tpu.memory_space<vmem>>, %arg13: memref<24x16xbf16, #tpu.memory_space<vmem>>, %arg14: memref<1x16xf32, #tpu.memory_space<vmem>>, %arg15: memref<48x16xbf16, #tpu.memory_space<vmem>>, %arg16: memref<1x16xf32, #tpu.memory_space<vmem>>, %arg17: memref<1x16xf32, #tpu.memory_space<vmem>>, %arg18: memref<1x16xf32, #tpu.memory_space<vmem>>, %arg19: memref<16x16xbf16, #tpu.memory_space<vmem>>, %arg20: memref<16x16xbf16, #tpu.memory_space<vmem>>, %arg21: memref<1x16xf32, #tpu.memory_space<vmem>>, %arg22: memref<2x8x16xf32, #tpu.memory_space<vmem>>) attributes {dimension_semantics = [#tpu.dimension_semantics<parallel>], iteration_bounds = array<i64: 1>, scalar_prefetch = 0 : i64, scratch_operands = 0 : i64, tpu.core_type = #tpu.core_type<tc>, window_params = [{transform_indices = @transform_0, window_bounds = array<i64: 2, 8, 16>}, {transform_indices = @transform_1, window_bounds = array<i64: 2, 8, 16>}, {transform_indices = @transform_2, window_bounds = array<i64: 2, 24>}, {pipeline_mode = #tpu.pipeline_mode<synchronous>, transform_indices = @transform_3, window_bounds = array<i64: 48, 16>}, {pipeline_mode = #tpu.pipeline_mode<synchronous>, transform_indices = @transform_4, window_bounds = array<i64: 48, 16>}, {pipeline_mode = #tpu.pipeline_mode<synchronous>, transform_indices = @transform_5, window_bounds = array<i64: 1, 16>}, {pipeline_mode = #tpu.pipeline_mode<synchronous>, transform_indices = @transform_6, window_bounds = array<i64: 1, 16>}, {pipeline_mode = #tpu.pipeline_mode<synchronous>, transform_indices = @transform_7, window_bounds = array<i64: 1, 16>}, {pipeline_mode = #tpu.pipeline_mode<synchronous>, transform_indices = @transform_8, window_bounds = array<i64: 16, 8>}, {pipeline_mode = #tpu.pipeline_mode<synchronous>, transform_indices = @transform_9, window_bounds = array<i64: 8, 16>}, {pipeline_mode = #tpu.pipeline_mode<synchronous>, transform_indices = @transform_10, window_bounds = array<i64: 24, 16>}, {pipeline_mode = #tpu.pipeline_mode<synchronous>, transform_indices = @transform_11, window_bounds = array<i64: 1, 16>}, {pipeline_mode = #tpu.pipeline_mode<synchronous>, transform_indices = @transform_12, window_bounds = array<i64: 24, 16>}, {pipeline_mode = #tpu.pipeline_mode<synchronous>, transform_indices = @transform_13, window_bounds = array<i64: 1, 16>}, {pipeline_mode = #tpu.pipeline_mode<synchronous>, transform_indices = @transform_14, window_bounds = array<i64: 48, 16>}, {pipeline_mode = #tpu.pipeline_mode<synchronous>, transform_indices = @transform_15, window_bounds = array<i64: 1, 16>}, {pipeline_mode = #tpu.pipeline_mode<synchronous>, transform_indices = @transform_16, window_bounds = array<i64: 1, 16>}, {pipeline_mode = #tpu.pipeline_mode<synchronous>, transform_indices = @transform_17, window_bounds = array<i64: 1, 16>}, {pipeline_mode = #tpu.pipeline_mode<synchronous>, transform_indices = @transform_18, window_bounds = array<i64: 16, 16>}, {pipeline_mode = #tpu.pipeline_mode<synchronous>, transform_indices = @transform_19, window_bounds = array<i64: 16, 16>}, {pipeline_mode = #tpu.pipeline_mode<synchronous>, transform_indices = @transform_20, window_bounds = array<i64: 1, 16>}, {transform_indices = @transform_21, window_bounds = array<i64: 2, 8, 16>}]} {
    %c0 = arith.constant 0 : index
    %c0_0 = arith.constant 0 : index
    %c0_1 = arith.constant 0 : index
    %0 = vector.load %arg1[%c0, %c0_0, %c0_1] : memref<2x8x16xf32, #tpu.memory_space<vmem>>, vector<2x8x16xf32>
    %c0_2 = arith.constant 0 : index
    %c0_3 = arith.constant 0 : index
    %c0_4 = arith.constant 0 : index
    %1 = vector.load %arg2[%c0_2, %c0_3, %c0_4] : memref<2x8x16xf32, #tpu.memory_space<vmem>>, vector<2x8x16xf32>
    %c0_5 = arith.constant 0 : index
    %c0_6 = arith.constant 0 : index
    %2 = vector.load %arg9[%c0_5, %c0_6] : memref<16x8xf32, #tpu.memory_space<vmem>>, vector<16x8xf32>
    %c0_7 = arith.constant 0 : index
    %c0_8 = arith.constant 0 : index
    %3 = vector.load %arg10[%c0_7, %c0_8] : memref<8x16xf32, #tpu.memory_space<vmem>>, vector<8x16xf32>
    %cst = arith.constant 0.000000e+00 : f32
    %4 = vector.broadcast %cst : f32 to vector<2x1x16xf32>
    %5 = vector.extract_strided_slice %0 {offsets = [0, 0, 0], sizes = [2, 7, 16], strides = [1, 1, 1]} : vector<2x8x16xf32> to vector<2x7x16xf32>
    %6 = tpu.concatenate %4, %5 in 1 : vector<2x1x16xf32>, vector<2x7x16xf32> -> vector<2x8x16xf32>
    %7 = vector.extract_strided_slice %0 {offsets = [0, 1, 0], sizes = [2, 7, 16], strides = [1, 1, 1]} : vector<2x8x16xf32> to vector<2x7x16xf32>
    %8 = tpu.concatenate %7, %4 in 1 : vector<2x7x16xf32>, vector<2x1x16xf32> -> vector<2x8x16xf32>
    %9 = tpu.concatenate %6, %0, %8 in 2 : vector<2x8x16xf32>, vector<2x8x16xf32>, vector<2x8x16xf32> -> vector<2x8x48xf32>
    %10 = vector.shape_cast %9 : vector<2x8x48xf32> to vector<16x48xf32>
    %11 = arith.truncf %10 : vector<16x48xf32> to vector<16x48xbf16>
    %c0_9 = arith.constant 0 : index
    %c0_10 = arith.constant 0 : index
    %12 = vector.load %arg4[%c0_9, %c0_10] : memref<48x16xbf16, #tpu.memory_space<vmem>>, vector<48x16xbf16>
    %cst_11 = arith.constant dense<0.000000e+00> : vector<16x16xf32>
    %13 = tpu.matmul %11, %12, %cst_11 {dimension_numbers = #tpu.dot_dimension_numbers<[1], [0], [0], [1], [0, 0, 1, 1], [], []>} : vector<16x48xbf16>, vector<48x16xbf16>, vector<16x16xf32> -> vector<16x16xf32>
    %14 = vector.shape_cast %13 : vector<16x16xf32> to vector<2x8x16xf32>
    %cst_12 = arith.constant 0.000000e+00 : f32
    %15 = vector.broadcast %cst_12 : f32 to vector<2x1x16xf32>
    %16 = vector.extract_strided_slice %1 {offsets = [0, 0, 0], sizes = [2, 7, 16], strides = [1, 1, 1]} : vector<2x8x16xf32> to vector<2x7x16xf32>
    %17 = tpu.concatenate %15, %16 in 1 : vector<2x1x16xf32>, vector<2x7x16xf32> -> vector<2x8x16xf32>
    %18 = vector.extract_strided_slice %1 {offsets = [0, 1, 0], sizes = [2, 7, 16], strides = [1, 1, 1]} : vector<2x8x16xf32> to vector<2x7x16xf32>
    %19 = tpu.concatenate %18, %15 in 1 : vector<2x7x16xf32>, vector<2x1x16xf32> -> vector<2x8x16xf32>
    %20 = tpu.concatenate %17, %1, %19 in 2 : vector<2x8x16xf32>, vector<2x8x16xf32>, vector<2x8x16xf32> -> vector<2x8x48xf32>
    %21 = vector.shape_cast %20 : vector<2x8x48xf32> to vector<16x48xf32>
    %22 = arith.truncf %21 : vector<16x48xf32> to vector<16x48xbf16>
    %c0_13 = arith.constant 0 : index
    %c0_14 = arith.constant 0 : index
    %23 = vector.load %arg5[%c0_13, %c0_14] : memref<48x16xbf16, #tpu.memory_space<vmem>>, vector<48x16xbf16>
    %cst_15 = arith.constant dense<0.000000e+00> : vector<16x16xf32>
    %24 = tpu.matmul %22, %23, %cst_15 {dimension_numbers = #tpu.dot_dimension_numbers<[1], [0], [0], [1], [0, 0, 1, 1], [], []>} : vector<16x48xbf16>, vector<48x16xbf16>, vector<16x16xf32> -> vector<16x16xf32>
    %25 = vector.shape_cast %24 : vector<16x16xf32> to vector<2x8x16xf32>
    %26 = arith.addf %14, %25 : vector<2x8x16xf32>
    %c0_16 = arith.constant 0 : index
    %c0_17 = arith.constant 0 : index
    %27 = vector.load %arg6[%c0_16, %c0_17] : memref<1x16xf32, #tpu.memory_space<vmem>>, vector<1x16xf32>
    %28 = vector.shape_cast %27 : vector<1x16xf32> to vector<1x1x16xf32>
    %29 = vector.broadcast %28 : vector<1x1x16xf32> to vector<2x8x16xf32>
    %30 = arith.addf %26, %29 : vector<2x8x16xf32>
    %c0_18 = arith.constant 0 : index
    %c0_19 = arith.constant 0 : index
    %31 = vector.load %arg7[%c0_18, %c0_19] : memref<1x16xf32, #tpu.memory_space<vmem>>, vector<1x16xf32>
    %c0_20 = arith.constant 0 : index
    %c0_21 = arith.constant 0 : index
    %32 = vector.load %arg8[%c0_20, %c0_21] : memref<1x16xf32, #tpu.memory_space<vmem>>, vector<1x16xf32>
    %cst_22 = arith.constant dense<0.000000e+00> : vector<2x16xf32>
    %33 = vector.multi_reduction <add>, %30, %cst_22 [1] : vector<2x8x16xf32> to vector<2x16xf32>
    %34 = arith.mulf %30, %30 : vector<2x8x16xf32>
    %cst_23 = arith.constant dense<0.000000e+00> : vector<2x16xf32>
    %35 = vector.multi_reduction <add>, %34, %cst_23 [1] : vector<2x8x16xf32> to vector<2x16xf32>
    %cst_24 = arith.constant dense<0.000000e+00> : vector<2x8xf32>
    %36 = tpu.matmul %33, %2, %cst_24 {dimension_numbers = #tpu.dot_dimension_numbers<[1], [0], [0], [1], [0, 0, 1, 1], [], []>} : vector<2x16xf32>, vector<16x8xf32>, vector<2x8xf32> -> vector<2x8xf32>
    %cst_25 = arith.constant dense<0.000000e+00> : vector<2x16xf32>
    %37 = tpu.matmul %36, %3, %cst_25 {dimension_numbers = #tpu.dot_dimension_numbers<[1], [0], [0], [1], [0, 0, 1, 1], [], []>} : vector<2x8xf32>, vector<8x16xf32>, vector<2x16xf32> -> vector<2x16xf32>
    %cst_26 = arith.constant 6.250000e-02 : f32
    %38 = vector.broadcast %cst_26 : f32 to vector<2x16xf32>
    %39 = arith.mulf %37, %38 : vector<2x16xf32>
    %cst_27 = arith.constant dense<0.000000e+00> : vector<2x8xf32>
    %40 = tpu.matmul %35, %2, %cst_27 {dimension_numbers = #tpu.dot_dimension_numbers<[1], [0], [0], [1], [0, 0, 1, 1], [], []>} : vector<2x16xf32>, vector<16x8xf32>, vector<2x8xf32> -> vector<2x8xf32>
    %cst_28 = arith.constant dense<0.000000e+00> : vector<2x16xf32>
    %41 = tpu.matmul %40, %3, %cst_28 {dimension_numbers = #tpu.dot_dimension_numbers<[1], [0], [0], [1], [0, 0, 1, 1], [], []>} : vector<2x8xf32>, vector<8x16xf32>, vector<2x16xf32> -> vector<2x16xf32>
    %cst_29 = arith.constant 6.250000e-02 : f32
    %42 = vector.broadcast %cst_29 : f32 to vector<2x16xf32>
    %43 = arith.mulf %41, %42 : vector<2x16xf32>
    %44 = arith.mulf %39, %39 : vector<2x16xf32>
    %45 = arith.subf %43, %44 : vector<2x16xf32>
    %cst_30 = arith.constant 0.000000e+00 : f32
    %46 = vector.broadcast %cst_30 : f32 to vector<2x16xf32>
    %47 = arith.maximumf %45, %46 : vector<2x16xf32>
    %48 = vector.shape_cast %39 : vector<2x16xf32> to vector<2x1x16xf32>
    %49 = vector.broadcast %48 : vector<2x1x16xf32> to vector<2x8x16xf32>
    %50 = arith.subf %30, %49 : vector<2x8x16xf32>
    %51 = vector.shape_cast %47 : vector<2x16xf32> to vector<2x1x16xf32>
    %cst_31 = arith.constant 9.99999974E-6 : f32
    %52 = vector.broadcast %cst_31 : f32 to vector<2x1x16xf32>
    %53 = arith.addf %51, %52 : vector<2x1x16xf32>
    %54 = math.rsqrt %53 : vector<2x1x16xf32>
    %55 = vector.broadcast %54 : vector<2x1x16xf32> to vector<2x8x16xf32>
    %56 = arith.mulf %50, %55 : vector<2x8x16xf32>
    %57 = vector.shape_cast %31 : vector<1x16xf32> to vector<1x1x16xf32>
    %58 = vector.broadcast %57 : vector<1x1x16xf32> to vector<2x8x16xf32>
    %59 = arith.mulf %56, %58 : vector<2x8x16xf32>
    %60 = vector.shape_cast %32 : vector<1x16xf32> to vector<1x1x16xf32>
    %61 = vector.broadcast %60 : vector<1x1x16xf32> to vector<2x8x16xf32>
    %62 = arith.addf %59, %61 : vector<2x8x16xf32>
    %cst_32 = arith.constant 2.000000e+01 : f32
    %63 = vector.broadcast %cst_32 : f32 to vector<2x8x16xf32>
    %64 = arith.minimumf %62, %63 : vector<2x8x16xf32>
    %65 = math.exp %64 : vector<2x8x16xf32>
    %cst_33 = arith.constant 1.000000e+00 : f32
    %66 = vector.broadcast %cst_33 : f32 to vector<2x8x16xf32>
    %67 = arith.addf %66, %65 : vector<2x8x16xf32>
    %cst_34 = arith.constant 1.000000e+00 : f32
    %68 = vector.broadcast %cst_34 : f32 to vector<2x8x16xf32>
    %69 = arith.addf %68, %65 : vector<2x8x16xf32>
    %70 = arith.mulf %67, %69 : vector<2x8x16xf32>
    %cst_35 = arith.constant 1.000000e+00 : f32
    %71 = vector.broadcast %cst_35 : f32 to vector<2x8x16xf32>
    %72 = arith.subf %70, %71 : vector<2x8x16xf32>
    %73 = arith.mulf %62, %72 : vector<2x8x16xf32>
    %cst_36 = arith.constant 1.000000e+00 : f32
    %74 = vector.broadcast %cst_36 : f32 to vector<2x8x16xf32>
    %75 = arith.addf %70, %74 : vector<2x8x16xf32>
    %76 = tpu.reciprocal %75 {approx = true} : vector<2x8x16xf32> -> vector<2x8x16xf32>
    %77 = arith.mulf %73, %76 : vector<2x8x16xf32>
    %c0_37 = arith.constant 0 : index
    %c0_38 = arith.constant 0 : index
    %78 = vector.load %arg3[%c0_37, %c0_38] : memref<2x24xf32, #tpu.memory_space<vmem>>, vector<2x24xf32>
    %79 = arith.truncf %78 : vector<2x24xf32> to vector<2x24xbf16>
    %c0_39 = arith.constant 0 : index
    %c0_40 = arith.constant 0 : index
    %80 = vector.load %arg11[%c0_39, %c0_40] : memref<24x16xbf16, #tpu.memory_space<vmem>>, vector<24x16xbf16>
    %cst_41 = arith.constant dense<0.000000e+00> : vector<2x16xf32>
    %81 = tpu.matmul %79, %80, %cst_41 {dimension_numbers = #tpu.dot_dimension_numbers<[1], [0], [0], [1], [0, 0, 1, 1], [], []>} : vector<2x24xbf16>, vector<24x16xbf16>, vector<2x16xf32> -> vector<2x16xf32>
    %c0_42 = arith.constant 0 : index
    %c0_43 = arith.constant 0 : index
    %82 = vector.load %arg12[%c0_42, %c0_43] : memref<1x16xf32, #tpu.memory_space<vmem>>, vector<1x16xf32>
    %83 = vector.broadcast %82 : vector<1x16xf32> to vector<2x16xf32>
    %84 = arith.addf %81, %83 : vector<2x16xf32>
    %c0_44 = arith.constant 0 : index
    %c0_45 = arith.constant 0 : index
    %85 = vector.load %arg13[%c0_44, %c0_45] : memref<24x16xbf16, #tpu.memory_space<vmem>>, vector<24x16xbf16>
    %cst_46 = arith.constant dense<0.000000e+00> : vector<2x16xf32>
    %86 = tpu.matmul %79, %85, %cst_46 {dimension_numbers = #tpu.dot_dimension_numbers<[1], [0], [0], [1], [0, 0, 1, 1], [], []>} : vector<2x24xbf16>, vector<24x16xbf16>, vector<2x16xf32> -> vector<2x16xf32>
    %c0_47 = arith.constant 0 : index
    %c0_48 = arith.constant 0 : index
    %87 = vector.load %arg14[%c0_47, %c0_48] : memref<1x16xf32, #tpu.memory_space<vmem>>, vector<1x16xf32>
    %88 = vector.broadcast %87 : vector<1x16xf32> to vector<2x16xf32>
    %89 = arith.addf %86, %88 : vector<2x16xf32>
    %90 = vector.shape_cast %84 : vector<2x16xf32> to vector<2x1x16xf32>
    %cst_49 = arith.constant 1.000000e+00 : f32
    %91 = vector.broadcast %cst_49 : f32 to vector<2x1x16xf32>
    %92 = arith.addf %90, %91 : vector<2x1x16xf32>
    %93 = vector.broadcast %92 : vector<2x1x16xf32> to vector<2x8x16xf32>
    %94 = arith.mulf %77, %93 : vector<2x8x16xf32>
    %95 = vector.shape_cast %89 : vector<2x16xf32> to vector<2x1x16xf32>
    %96 = vector.broadcast %95 : vector<2x1x16xf32> to vector<2x8x16xf32>
    %97 = arith.addf %94, %96 : vector<2x8x16xf32>
    %cst_50 = arith.constant 0.000000e+00 : f32
    %98 = vector.broadcast %cst_50 : f32 to vector<2x1x16xf32>
    %99 = vector.extract_strided_slice %97 {offsets = [0, 0, 0], sizes = [2, 7, 16], strides = [1, 1, 1]} : vector<2x8x16xf32> to vector<2x7x16xf32>
    %100 = tpu.concatenate %98, %99 in 1 : vector<2x1x16xf32>, vector<2x7x16xf32> -> vector<2x8x16xf32>
    %101 = vector.extract_strided_slice %97 {offsets = [0, 1, 0], sizes = [2, 7, 16], strides = [1, 1, 1]} : vector<2x8x16xf32> to vector<2x7x16xf32>
    %102 = tpu.concatenate %101, %98 in 1 : vector<2x7x16xf32>, vector<2x1x16xf32> -> vector<2x8x16xf32>
    %103 = tpu.concatenate %100, %97, %102 in 2 : vector<2x8x16xf32>, vector<2x8x16xf32>, vector<2x8x16xf32> -> vector<2x8x48xf32>
    %104 = vector.shape_cast %103 : vector<2x8x48xf32> to vector<16x48xf32>
    %105 = arith.truncf %104 : vector<16x48xf32> to vector<16x48xbf16>
    %c0_51 = arith.constant 0 : index
    %c0_52 = arith.constant 0 : index
    %106 = vector.load %arg15[%c0_51, %c0_52] : memref<48x16xbf16, #tpu.memory_space<vmem>>, vector<48x16xbf16>
    %cst_53 = arith.constant dense<0.000000e+00> : vector<16x16xf32>
    %107 = tpu.matmul %105, %106, %cst_53 {dimension_numbers = #tpu.dot_dimension_numbers<[1], [0], [0], [1], [0, 0, 1, 1], [], []>} : vector<16x48xbf16>, vector<48x16xbf16>, vector<16x16xf32> -> vector<16x16xf32>
    %108 = vector.shape_cast %107 : vector<16x16xf32> to vector<2x8x16xf32>
    %c0_54 = arith.constant 0 : index
    %c0_55 = arith.constant 0 : index
    %109 = vector.load %arg16[%c0_54, %c0_55] : memref<1x16xf32, #tpu.memory_space<vmem>>, vector<1x16xf32>
    %110 = vector.shape_cast %109 : vector<1x16xf32> to vector<1x1x16xf32>
    %111 = vector.broadcast %110 : vector<1x1x16xf32> to vector<2x8x16xf32>
    %112 = arith.addf %108, %111 : vector<2x8x16xf32>
    %c0_56 = arith.constant 0 : index
    %c0_57 = arith.constant 0 : index
    %113 = vector.load %arg17[%c0_56, %c0_57] : memref<1x16xf32, #tpu.memory_space<vmem>>, vector<1x16xf32>
    %c0_58 = arith.constant 0 : index
    %c0_59 = arith.constant 0 : index
    %114 = vector.load %arg18[%c0_58, %c0_59] : memref<1x16xf32, #tpu.memory_space<vmem>>, vector<1x16xf32>
    %cst_60 = arith.constant dense<0.000000e+00> : vector<2x16xf32>
    %115 = vector.multi_reduction <add>, %112, %cst_60 [1] : vector<2x8x16xf32> to vector<2x16xf32>
    %116 = arith.mulf %112, %112 : vector<2x8x16xf32>
    %cst_61 = arith.constant dense<0.000000e+00> : vector<2x16xf32>
    %117 = vector.multi_reduction <add>, %116, %cst_61 [1] : vector<2x8x16xf32> to vector<2x16xf32>
    %cst_62 = arith.constant dense<0.000000e+00> : vector<2x8xf32>
    %118 = tpu.matmul %115, %2, %cst_62 {dimension_numbers = #tpu.dot_dimension_numbers<[1], [0], [0], [1], [0, 0, 1, 1], [], []>} : vector<2x16xf32>, vector<16x8xf32>, vector<2x8xf32> -> vector<2x8xf32>
    %cst_63 = arith.constant dense<0.000000e+00> : vector<2x16xf32>
    %119 = tpu.matmul %118, %3, %cst_63 {dimension_numbers = #tpu.dot_dimension_numbers<[1], [0], [0], [1], [0, 0, 1, 1], [], []>} : vector<2x8xf32>, vector<8x16xf32>, vector<2x16xf32> -> vector<2x16xf32>
    %cst_64 = arith.constant 6.250000e-02 : f32
    %120 = vector.broadcast %cst_64 : f32 to vector<2x16xf32>
    %121 = arith.mulf %119, %120 : vector<2x16xf32>
    %cst_65 = arith.constant dense<0.000000e+00> : vector<2x8xf32>
    %122 = tpu.matmul %117, %2, %cst_65 {dimension_numbers = #tpu.dot_dimension_numbers<[1], [0], [0], [1], [0, 0, 1, 1], [], []>} : vector<2x16xf32>, vector<16x8xf32>, vector<2x8xf32> -> vector<2x8xf32>
    %cst_66 = arith.constant dense<0.000000e+00> : vector<2x16xf32>
    %123 = tpu.matmul %122, %3, %cst_66 {dimension_numbers = #tpu.dot_dimension_numbers<[1], [0], [0], [1], [0, 0, 1, 1], [], []>} : vector<2x8xf32>, vector<8x16xf32>, vector<2x16xf32> -> vector<2x16xf32>
    %cst_67 = arith.constant 6.250000e-02 : f32
    %124 = vector.broadcast %cst_67 : f32 to vector<2x16xf32>
    %125 = arith.mulf %123, %124 : vector<2x16xf32>
    %126 = arith.mulf %121, %121 : vector<2x16xf32>
    %127 = arith.subf %125, %126 : vector<2x16xf32>
    %cst_68 = arith.constant 0.000000e+00 : f32
    %128 = vector.broadcast %cst_68 : f32 to vector<2x16xf32>
    %129 = arith.maximumf %127, %128 : vector<2x16xf32>
    %130 = vector.shape_cast %121 : vector<2x16xf32> to vector<2x1x16xf32>
    %131 = vector.broadcast %130 : vector<2x1x16xf32> to vector<2x8x16xf32>
    %132 = arith.subf %112, %131 : vector<2x8x16xf32>
    %133 = vector.shape_cast %129 : vector<2x16xf32> to vector<2x1x16xf32>
    %cst_69 = arith.constant 9.99999974E-6 : f32
    %134 = vector.broadcast %cst_69 : f32 to vector<2x1x16xf32>
    %135 = arith.addf %133, %134 : vector<2x1x16xf32>
    %136 = math.rsqrt %135 : vector<2x1x16xf32>
    %137 = vector.broadcast %136 : vector<2x1x16xf32> to vector<2x8x16xf32>
    %138 = arith.mulf %132, %137 : vector<2x8x16xf32>
    %139 = vector.shape_cast %113 : vector<1x16xf32> to vector<1x1x16xf32>
    %140 = vector.broadcast %139 : vector<1x1x16xf32> to vector<2x8x16xf32>
    %141 = arith.mulf %138, %140 : vector<2x8x16xf32>
    %142 = vector.shape_cast %114 : vector<1x16xf32> to vector<1x1x16xf32>
    %143 = vector.broadcast %142 : vector<1x1x16xf32> to vector<2x8x16xf32>
    %144 = arith.addf %141, %143 : vector<2x8x16xf32>
    %cst_70 = arith.constant 2.000000e+01 : f32
    %145 = vector.broadcast %cst_70 : f32 to vector<2x8x16xf32>
    %146 = arith.minimumf %144, %145 : vector<2x8x16xf32>
    %147 = math.exp %146 : vector<2x8x16xf32>
    %cst_71 = arith.constant 1.000000e+00 : f32
    %148 = vector.broadcast %cst_71 : f32 to vector<2x8x16xf32>
    %149 = arith.addf %148, %147 : vector<2x8x16xf32>
    %cst_72 = arith.constant 1.000000e+00 : f32
    %150 = vector.broadcast %cst_72 : f32 to vector<2x8x16xf32>
    %151 = arith.addf %150, %147 : vector<2x8x16xf32>
    %152 = arith.mulf %149, %151 : vector<2x8x16xf32>
    %cst_73 = arith.constant 1.000000e+00 : f32
    %153 = vector.broadcast %cst_73 : f32 to vector<2x8x16xf32>
    %154 = arith.subf %152, %153 : vector<2x8x16xf32>
    %155 = arith.mulf %144, %154 : vector<2x8x16xf32>
    %cst_74 = arith.constant 1.000000e+00 : f32
    %156 = vector.broadcast %cst_74 : f32 to vector<2x8x16xf32>
    %157 = arith.addf %152, %156 : vector<2x8x16xf32>
    %158 = tpu.reciprocal %157 {approx = true} : vector<2x8x16xf32> -> vector<2x8x16xf32>
    %159 = arith.mulf %155, %158 : vector<2x8x16xf32>
    %160 = vector.shape_cast %0 : vector<2x8x16xf32> to vector<16x16xf32>
    %161 = arith.truncf %160 : vector<16x16xf32> to vector<16x16xbf16>
    %c0_75 = arith.constant 0 : index
    %c0_76 = arith.constant 0 : index
    %162 = vector.load %arg19[%c0_75, %c0_76] : memref<16x16xbf16, #tpu.memory_space<vmem>>, vector<16x16xbf16>
    %cst_77 = arith.constant dense<0.000000e+00> : vector<16x16xf32>
    %163 = tpu.matmul %161, %162, %cst_77 {dimension_numbers = #tpu.dot_dimension_numbers<[1], [0], [0], [1], [0, 0, 1, 1], [], []>} : vector<16x16xbf16>, vector<16x16xbf16>, vector<16x16xf32> -> vector<16x16xf32>
    %164 = vector.shape_cast %163 : vector<16x16xf32> to vector<2x8x16xf32>
    %165 = vector.shape_cast %1 : vector<2x8x16xf32> to vector<16x16xf32>
    %166 = arith.truncf %165 : vector<16x16xf32> to vector<16x16xbf16>
    %c0_78 = arith.constant 0 : index
    %c0_79 = arith.constant 0 : index
    %167 = vector.load %arg20[%c0_78, %c0_79] : memref<16x16xbf16, #tpu.memory_space<vmem>>, vector<16x16xbf16>
    %cst_80 = arith.constant dense<0.000000e+00> : vector<16x16xf32>
    %168 = tpu.matmul %166, %167, %cst_80 {dimension_numbers = #tpu.dot_dimension_numbers<[1], [0], [0], [1], [0, 0, 1, 1], [], []>} : vector<16x16xbf16>, vector<16x16xbf16>, vector<16x16xf32> -> vector<16x16xf32>
    %169 = vector.shape_cast %168 : vector<16x16xf32> to vector<2x8x16xf32>
    %170 = arith.addf %164, %169 : vector<2x8x16xf32>
    %c0_81 = arith.constant 0 : index
    %c0_82 = arith.constant 0 : index
    %171 = vector.load %arg21[%c0_81, %c0_82] : memref<1x16xf32, #tpu.memory_space<vmem>>, vector<1x16xf32>
    %172 = vector.shape_cast %171 : vector<1x16xf32> to vector<1x1x16xf32>
    %173 = vector.broadcast %172 : vector<1x1x16xf32> to vector<2x8x16xf32>
    %174 = arith.addf %170, %173 : vector<2x8x16xf32>
    %175 = arith.addf %159, %174 : vector<2x8x16xf32>
    %c0_83 = arith.constant 0 : index
    %c0_84 = arith.constant 0 : index
    %c0_85 = arith.constant 0 : index
    %176 = vector.load %arg22[%c0_83, %c0_84, %c0_85] : memref<2x8x16xf32, #tpu.memory_space<vmem>>, vector<2x8x16xf32>
    tpu.vector_store %arg22[%c0_83, %c0_84, %c0_85], %175 {strides = array<i32>} : memref<2x8x16xf32, #tpu.memory_space<vmem>>, vector<2x8x16xf32>,
    return
  }
  func.func @transform_0(%arg0: i32) -> (i32, i32, i32) {
    %c0_i32 = arith.constant 0 : i32
    %c0_i32_0 = arith.constant 0 : i32
    %c0_i32_1 = arith.constant 0 : i32
    return %arg0, %c0_i32, %c0_i32_0 : i32, i32, i32
  }
  func.func @transform_1(%arg0: i32) -> (i32, i32, i32) {
    %c0_i32 = arith.constant 0 : i32
    %c0_i32_0 = arith.constant 0 : i32
    %c0_i32_1 = arith.constant 0 : i32
    return %arg0, %c0_i32, %c0_i32_0 : i32, i32, i32
  }
  func.func @transform_2(%arg0: i32) -> (i32, i32) {
    %c0_i32 = arith.constant 0 : i32
    %c0_i32_0 = arith.constant 0 : i32
    return %arg0, %c0_i32 : i32, i32
  }
  func.func @transform_3(%arg0: i32) -> (i32, i32) {
    %c0_i32 = arith.constant 0 : i32
    %c0_i32_0 = arith.constant 0 : i32
    %c0_i32_1 = arith.constant 0 : i32
    return %c0_i32, %c0_i32_0 : i32, i32
  }
  func.func @transform_4(%arg0: i32) -> (i32, i32) {
    %c0_i32 = arith.constant 0 : i32
    %c0_i32_0 = arith.constant 0 : i32
    %c0_i32_1 = arith.constant 0 : i32
    return %c0_i32, %c0_i32_0 : i32, i32
  }
  func.func @transform_5(%arg0: i32) -> (i32, i32) {
    %c0_i32 = arith.constant 0 : i32
    %c0_i32_0 = arith.constant 0 : i32
    %c0_i32_1 = arith.constant 0 : i32
    return %c0_i32, %c0_i32_0 : i32, i32
  }
  func.func @transform_6(%arg0: i32) -> (i32, i32) {
    %c0_i32 = arith.constant 0 : i32
    %c0_i32_0 = arith.constant 0 : i32
    %c0_i32_1 = arith.constant 0 : i32
    return %c0_i32, %c0_i32_0 : i32, i32
  }
  func.func @transform_7(%arg0: i32) -> (i32, i32) {
    %c0_i32 = arith.constant 0 : i32
    %c0_i32_0 = arith.constant 0 : i32
    %c0_i32_1 = arith.constant 0 : i32
    return %c0_i32, %c0_i32_0 : i32, i32
  }
  func.func @transform_8(%arg0: i32) -> (i32, i32) {
    %c0_i32 = arith.constant 0 : i32
    %c0_i32_0 = arith.constant 0 : i32
    %c0_i32_1 = arith.constant 0 : i32
    return %c0_i32, %c0_i32_0 : i32, i32
  }
  func.func @transform_9(%arg0: i32) -> (i32, i32) {
    %c0_i32 = arith.constant 0 : i32
    %c0_i32_0 = arith.constant 0 : i32
    %c0_i32_1 = arith.constant 0 : i32
    return %c0_i32, %c0_i32_0 : i32, i32
  }
  func.func @transform_10(%arg0: i32) -> (i32, i32) {
    %c0_i32 = arith.constant 0 : i32
    %c0_i32_0 = arith.constant 0 : i32
    %c0_i32_1 = arith.constant 0 : i32
    return %c0_i32, %c0_i32_0 : i32, i32
  }
  func.func @transform_11(%arg0: i32) -> (i32, i32) {
    %c0_i32 = arith.constant 0 : i32
    %c0_i32_0 = arith.constant 0 : i32
    %c0_i32_1 = arith.constant 0 : i32
    return %c0_i32, %c0_i32_0 : i32, i32
  }
  func.func @transform_12(%arg0: i32) -> (i32, i32) {
    %c0_i32 = arith.constant 0 : i32
    %c0_i32_0 = arith.constant 0 : i32
    %c0_i32_1 = arith.constant 0 : i32
    return %c0_i32, %c0_i32_0 : i32, i32
  }
  func.func @transform_13(%arg0: i32) -> (i32, i32) {
    %c0_i32 = arith.constant 0 : i32
    %c0_i32_0 = arith.constant 0 : i32
    %c0_i32_1 = arith.constant 0 : i32
    return %c0_i32, %c0_i32_0 : i32, i32
  }
  func.func @transform_14(%arg0: i32) -> (i32, i32) {
    %c0_i32 = arith.constant 0 : i32
    %c0_i32_0 = arith.constant 0 : i32
    %c0_i32_1 = arith.constant 0 : i32
    return %c0_i32, %c0_i32_0 : i32, i32
  }
  func.func @transform_15(%arg0: i32) -> (i32, i32) {
    %c0_i32 = arith.constant 0 : i32
    %c0_i32_0 = arith.constant 0 : i32
    %c0_i32_1 = arith.constant 0 : i32
    return %c0_i32, %c0_i32_0 : i32, i32
  }
  func.func @transform_16(%arg0: i32) -> (i32, i32) {
    %c0_i32 = arith.constant 0 : i32
    %c0_i32_0 = arith.constant 0 : i32
    %c0_i32_1 = arith.constant 0 : i32
    return %c0_i32, %c0_i32_0 : i32, i32
  }
  func.func @transform_17(%arg0: i32) -> (i32, i32) {
    %c0_i32 = arith.constant 0 : i32
    %c0_i32_0 = arith.constant 0 : i32
    %c0_i32_1 = arith.constant 0 : i32
    return %c0_i32, %c0_i32_0 : i32, i32
  }
  func.func @transform_18(%arg0: i32) -> (i32, i32) {
    %c0_i32 = arith.constant 0 : i32
    %c0_i32_0 = arith.constant 0 : i32
    %c0_i32_1 = arith.constant 0 : i32
    return %c0_i32, %c0_i32_0 : i32, i32
  }
  func.func @transform_19(%arg0: i32) -> (i32, i32) {
    %c0_i32 = arith.constant 0 : i32
    %c0_i32_0 = arith.constant 0 : i32
    %c0_i32_1 = arith.constant 0 : i32
    return %c0_i32, %c0_i32_0 : i32, i32
  }
  func.func @transform_20(%arg0: i32) -> (i32, i32) {
    %c0_i32 = arith.constant 0 : i32
    %c0_i32_0 = arith.constant 0 : i32
    %c0_i32_1 = arith.constant 0 : i32
    return %c0_i32, %c0_i32_0 : i32, i32
  }
  func.func @transform_21(%arg0: i32) -> (i32, i32, i32) {
    %c0_i32 = arith.constant 0 : i32
    %c0_i32_0 = arith.constant 0 : i32
    %c0_i32_1 = arith.constant 0 : i32
    return %arg0, %c0_i32, %c0_i32_0 : i32, i32, i32
  }
}

module attributes {stable_mosaic.version = 11 : i64} {
  func.func @final_kernel(%arg0: i32, %arg1: memref<2x8x16xf32, #tpu.memory_space<vmem>>, %arg2: memref<48x16xbf16, #tpu.memory_space<vmem>>, %arg3: memref<1x16xf32, #tpu.memory_space<vmem>>, %arg4: memref<1x16xf32, #tpu.memory_space<vmem>>, %arg5: memref<1x16xf32, #tpu.memory_space<vmem>>, %arg6: memref<16x8xf32, #tpu.memory_space<vmem>>, %arg7: memref<8x16xf32, #tpu.memory_space<vmem>>, %arg8: memref<16x16xbf16, #tpu.memory_space<vmem>>, %arg9: memref<1x16xf32, #tpu.memory_space<vmem>>, %arg10: memref<2x8x16xf32, #tpu.memory_space<vmem>>) attributes {dimension_semantics = [#tpu.dimension_semantics<parallel>], iteration_bounds = array<i64: 1>, scalar_prefetch = 0 : i64, scratch_operands = 0 : i64, tpu.core_type = #tpu.core_type<tc>, window_params = [{pipeline_mode = #tpu.pipeline_mode<synchronous>, transform_indices = @transform_0, window_bounds = array<i64: 2, 8, 16>}, {pipeline_mode = #tpu.pipeline_mode<synchronous>, transform_indices = @transform_1, window_bounds = array<i64: 48, 16>}, {pipeline_mode = #tpu.pipeline_mode<synchronous>, transform_indices = @transform_2, window_bounds = array<i64: 1, 16>}, {pipeline_mode = #tpu.pipeline_mode<synchronous>, transform_indices = @transform_3, window_bounds = array<i64: 1, 16>}, {pipeline_mode = #tpu.pipeline_mode<synchronous>, transform_indices = @transform_4, window_bounds = array<i64: 1, 16>}, {pipeline_mode = #tpu.pipeline_mode<synchronous>, transform_indices = @transform_5, window_bounds = array<i64: 16, 8>}, {pipeline_mode = #tpu.pipeline_mode<synchronous>, transform_indices = @transform_6, window_bounds = array<i64: 8, 16>}, {pipeline_mode = #tpu.pipeline_mode<synchronous>, transform_indices = @transform_7, window_bounds = array<i64: 16, 16>}, {pipeline_mode = #tpu.pipeline_mode<synchronous>, transform_indices = @transform_8, window_bounds = array<i64: 1, 16>}, {pipeline_mode = #tpu.pipeline_mode<synchronous>, transform_indices = @transform_9, window_bounds = array<i64: 2, 8, 16>}]} {
    %c0 = arith.constant 0 : index
    %c0_0 = arith.constant 0 : index
    %c0_1 = arith.constant 0 : index
    %0 = vector.load %arg1[%c0, %c0_0, %c0_1] : memref<2x8x16xf32, #tpu.memory_space<vmem>>, vector<2x8x16xf32>
    %cst = arith.constant 0.000000e+00 : f32
    %1 = vector.broadcast %cst : f32 to vector<2x1x16xf32>
    %2 = vector.extract_strided_slice %0 {offsets = [0, 0, 0], sizes = [2, 7, 16], strides = [1, 1, 1]} : vector<2x8x16xf32> to vector<2x7x16xf32>
    %3 = tpu.concatenate %1, %2 in 1 : vector<2x1x16xf32>, vector<2x7x16xf32> -> vector<2x8x16xf32>
    %4 = vector.extract_strided_slice %0 {offsets = [0, 1, 0], sizes = [2, 7, 16], strides = [1, 1, 1]} : vector<2x8x16xf32> to vector<2x7x16xf32>
    %5 = tpu.concatenate %4, %1 in 1 : vector<2x7x16xf32>, vector<2x1x16xf32> -> vector<2x8x16xf32>
    %6 = tpu.concatenate %3, %0, %5 in 2 : vector<2x8x16xf32>, vector<2x8x16xf32>, vector<2x8x16xf32> -> vector<2x8x48xf32>
    %7 = vector.shape_cast %6 : vector<2x8x48xf32> to vector<16x48xf32>
    %8 = arith.truncf %7 : vector<16x48xf32> to vector<16x48xbf16>
    %c0_2 = arith.constant 0 : index
    %c0_3 = arith.constant 0 : index
    %9 = vector.load %arg2[%c0_2, %c0_3] : memref<48x16xbf16, #tpu.memory_space<vmem>>, vector<48x16xbf16>
    %cst_4 = arith.constant dense<0.000000e+00> : vector<16x16xf32>
    %10 = tpu.matmul %8, %9, %cst_4 {dimension_numbers = #tpu.dot_dimension_numbers<[1], [0], [0], [1], [0, 0, 1, 1], [], []>} : vector<16x48xbf16>, vector<48x16xbf16>, vector<16x16xf32> -> vector<16x16xf32>
    %11 = vector.shape_cast %10 : vector<16x16xf32> to vector<2x8x16xf32>
    %c0_5 = arith.constant 0 : index
    %c0_6 = arith.constant 0 : index
    %12 = vector.load %arg3[%c0_5, %c0_6] : memref<1x16xf32, #tpu.memory_space<vmem>>, vector<1x16xf32>
    %13 = vector.shape_cast %12 : vector<1x16xf32> to vector<1x1x16xf32>
    %14 = vector.broadcast %13 : vector<1x1x16xf32> to vector<2x8x16xf32>
    %15 = arith.addf %11, %14 : vector<2x8x16xf32>
    %c0_7 = arith.constant 0 : index
    %c0_8 = arith.constant 0 : index
    %16 = vector.load %arg6[%c0_7, %c0_8] : memref<16x8xf32, #tpu.memory_space<vmem>>, vector<16x8xf32>
    %c0_9 = arith.constant 0 : index
    %c0_10 = arith.constant 0 : index
    %17 = vector.load %arg7[%c0_9, %c0_10] : memref<8x16xf32, #tpu.memory_space<vmem>>, vector<8x16xf32>
    %c0_11 = arith.constant 0 : index
    %c0_12 = arith.constant 0 : index
    %18 = vector.load %arg4[%c0_11, %c0_12] : memref<1x16xf32, #tpu.memory_space<vmem>>, vector<1x16xf32>
    %c0_13 = arith.constant 0 : index
    %c0_14 = arith.constant 0 : index
    %19 = vector.load %arg5[%c0_13, %c0_14] : memref<1x16xf32, #tpu.memory_space<vmem>>, vector<1x16xf32>
    %cst_15 = arith.constant dense<0.000000e+00> : vector<2x16xf32>
    %20 = vector.multi_reduction <add>, %15, %cst_15 [1] : vector<2x8x16xf32> to vector<2x16xf32>
    %21 = arith.mulf %15, %15 : vector<2x8x16xf32>
    %cst_16 = arith.constant dense<0.000000e+00> : vector<2x16xf32>
    %22 = vector.multi_reduction <add>, %21, %cst_16 [1] : vector<2x8x16xf32> to vector<2x16xf32>
    %cst_17 = arith.constant dense<0.000000e+00> : vector<2x8xf32>
    %23 = tpu.matmul %20, %16, %cst_17 {dimension_numbers = #tpu.dot_dimension_numbers<[1], [0], [0], [1], [0, 0, 1, 1], [], []>} : vector<2x16xf32>, vector<16x8xf32>, vector<2x8xf32> -> vector<2x8xf32>
    %cst_18 = arith.constant dense<0.000000e+00> : vector<2x16xf32>
    %24 = tpu.matmul %23, %17, %cst_18 {dimension_numbers = #tpu.dot_dimension_numbers<[1], [0], [0], [1], [0, 0, 1, 1], [], []>} : vector<2x8xf32>, vector<8x16xf32>, vector<2x16xf32> -> vector<2x16xf32>
    %cst_19 = arith.constant 6.250000e-02 : f32
    %25 = vector.broadcast %cst_19 : f32 to vector<2x16xf32>
    %26 = arith.mulf %24, %25 : vector<2x16xf32>
    %cst_20 = arith.constant dense<0.000000e+00> : vector<2x8xf32>
    %27 = tpu.matmul %22, %16, %cst_20 {dimension_numbers = #tpu.dot_dimension_numbers<[1], [0], [0], [1], [0, 0, 1, 1], [], []>} : vector<2x16xf32>, vector<16x8xf32>, vector<2x8xf32> -> vector<2x8xf32>
    %cst_21 = arith.constant dense<0.000000e+00> : vector<2x16xf32>
    %28 = tpu.matmul %27, %17, %cst_21 {dimension_numbers = #tpu.dot_dimension_numbers<[1], [0], [0], [1], [0, 0, 1, 1], [], []>} : vector<2x8xf32>, vector<8x16xf32>, vector<2x16xf32> -> vector<2x16xf32>
    %cst_22 = arith.constant 6.250000e-02 : f32
    %29 = vector.broadcast %cst_22 : f32 to vector<2x16xf32>
    %30 = arith.mulf %28, %29 : vector<2x16xf32>
    %31 = arith.mulf %26, %26 : vector<2x16xf32>
    %32 = arith.subf %30, %31 : vector<2x16xf32>
    %cst_23 = arith.constant 0.000000e+00 : f32
    %33 = vector.broadcast %cst_23 : f32 to vector<2x16xf32>
    %34 = arith.maximumf %32, %33 : vector<2x16xf32>
    %35 = vector.shape_cast %26 : vector<2x16xf32> to vector<2x1x16xf32>
    %36 = vector.broadcast %35 : vector<2x1x16xf32> to vector<2x8x16xf32>
    %37 = arith.subf %15, %36 : vector<2x8x16xf32>
    %38 = vector.shape_cast %34 : vector<2x16xf32> to vector<2x1x16xf32>
    %cst_24 = arith.constant 9.99999974E-6 : f32
    %39 = vector.broadcast %cst_24 : f32 to vector<2x1x16xf32>
    %40 = arith.addf %38, %39 : vector<2x1x16xf32>
    %41 = math.rsqrt %40 : vector<2x1x16xf32>
    %42 = vector.broadcast %41 : vector<2x1x16xf32> to vector<2x8x16xf32>
    %43 = arith.mulf %37, %42 : vector<2x8x16xf32>
    %44 = vector.shape_cast %18 : vector<1x16xf32> to vector<1x1x16xf32>
    %45 = vector.broadcast %44 : vector<1x1x16xf32> to vector<2x8x16xf32>
    %46 = arith.mulf %43, %45 : vector<2x8x16xf32>
    %47 = vector.shape_cast %19 : vector<1x16xf32> to vector<1x1x16xf32>
    %48 = vector.broadcast %47 : vector<1x1x16xf32> to vector<2x8x16xf32>
    %49 = arith.addf %46, %48 : vector<2x8x16xf32>
    %cst_25 = arith.constant 2.000000e+01 : f32
    %50 = vector.broadcast %cst_25 : f32 to vector<2x8x16xf32>
    %51 = arith.minimumf %49, %50 : vector<2x8x16xf32>
    %52 = math.exp %51 : vector<2x8x16xf32>
    %cst_26 = arith.constant 1.000000e+00 : f32
    %53 = vector.broadcast %cst_26 : f32 to vector<2x8x16xf32>
    %54 = arith.addf %53, %52 : vector<2x8x16xf32>
    %cst_27 = arith.constant 1.000000e+00 : f32
    %55 = vector.broadcast %cst_27 : f32 to vector<2x8x16xf32>
    %56 = arith.addf %55, %52 : vector<2x8x16xf32>
    %57 = arith.mulf %54, %56 : vector<2x8x16xf32>
    %cst_28 = arith.constant 1.000000e+00 : f32
    %58 = vector.broadcast %cst_28 : f32 to vector<2x8x16xf32>
    %59 = arith.subf %57, %58 : vector<2x8x16xf32>
    %60 = arith.mulf %49, %59 : vector<2x8x16xf32>
    %cst_29 = arith.constant 1.000000e+00 : f32
    %61 = vector.broadcast %cst_29 : f32 to vector<2x8x16xf32>
    %62 = arith.addf %57, %61 : vector<2x8x16xf32>
    %63 = tpu.reciprocal %62 {approx = true} : vector<2x8x16xf32> -> vector<2x8x16xf32>
    %64 = arith.mulf %60, %63 : vector<2x8x16xf32>
    %65 = vector.shape_cast %64 : vector<2x8x16xf32> to vector<16x16xf32>
    %66 = arith.truncf %65 : vector<16x16xf32> to vector<16x16xbf16>
    %c0_30 = arith.constant 0 : index
    %c0_31 = arith.constant 0 : index
    %67 = vector.load %arg8[%c0_30, %c0_31] : memref<16x16xbf16, #tpu.memory_space<vmem>>, vector<16x16xbf16>
    %cst_32 = arith.constant dense<0.000000e+00> : vector<16x16xf32>
    %68 = tpu.matmul %66, %67, %cst_32 {dimension_numbers = #tpu.dot_dimension_numbers<[1], [0], [0], [1], [0, 0, 1, 1], [], []>} : vector<16x16xbf16>, vector<16x16xbf16>, vector<16x16xf32> -> vector<16x16xf32>
    %69 = vector.shape_cast %68 : vector<16x16xf32> to vector<2x8x16xf32>
    %c0_33 = arith.constant 0 : index
    %c0_34 = arith.constant 0 : index
    %70 = vector.load %arg9[%c0_33, %c0_34] : memref<1x16xf32, #tpu.memory_space<vmem>>, vector<1x16xf32>
    %71 = vector.shape_cast %70 : vector<1x16xf32> to vector<1x1x16xf32>
    %72 = vector.broadcast %71 : vector<1x1x16xf32> to vector<2x8x16xf32>
    %73 = arith.addf %69, %72 : vector<2x8x16xf32>
    %c0_35 = arith.constant 0 : index
    %c0_36 = arith.constant 0 : index
    %c0_37 = arith.constant 0 : index
    %74 = vector.load %arg10[%c0_35, %c0_36, %c0_37] : memref<2x8x16xf32, #tpu.memory_space<vmem>>, vector<2x8x16xf32>
    tpu.vector_store %arg10[%c0_35, %c0_36, %c0_37], %73 {strides = array<i32>} : memref<2x8x16xf32, #tpu.memory_space<vmem>>, vector<2x8x16xf32>,
    return
  }
  func.func @transform_0(%arg0: i32) -> (i32, i32, i32) {
    %c0_i32 = arith.constant 0 : i32
    %c0_i32_0 = arith.constant 0 : i32
    %c0_i32_1 = arith.constant 0 : i32
    %c0_i32_2 = arith.constant 0 : i32
    return %c0_i32, %c0_i32_0, %c0_i32_1 : i32, i32, i32
  }
  func.func @transform_1(%arg0: i32) -> (i32, i32) {
    %c0_i32 = arith.constant 0 : i32
    %c0_i32_0 = arith.constant 0 : i32
    %c0_i32_1 = arith.constant 0 : i32
    return %c0_i32, %c0_i32_0 : i32, i32
  }
  func.func @transform_2(%arg0: i32) -> (i32, i32) {
    %c0_i32 = arith.constant 0 : i32
    %c0_i32_0 = arith.constant 0 : i32
    %c0_i32_1 = arith.constant 0 : i32
    return %c0_i32, %c0_i32_0 : i32, i32
  }
  func.func @transform_3(%arg0: i32) -> (i32, i32) {
    %c0_i32 = arith.constant 0 : i32
    %c0_i32_0 = arith.constant 0 : i32
    %c0_i32_1 = arith.constant 0 : i32
    return %c0_i32, %c0_i32_0 : i32, i32
  }
  func.func @transform_4(%arg0: i32) -> (i32, i32) {
    %c0_i32 = arith.constant 0 : i32
    %c0_i32_0 = arith.constant 0 : i32
    %c0_i32_1 = arith.constant 0 : i32
    return %c0_i32, %c0_i32_0 : i32, i32
  }
  func.func @transform_5(%arg0: i32) -> (i32, i32) {
    %c0_i32 = arith.constant 0 : i32
    %c0_i32_0 = arith.constant 0 : i32
    %c0_i32_1 = arith.constant 0 : i32
    return %c0_i32, %c0_i32_0 : i32, i32
  }
  func.func @transform_6(%arg0: i32) -> (i32, i32) {
    %c0_i32 = arith.constant 0 : i32
    %c0_i32_0 = arith.constant 0 : i32
    %c0_i32_1 = arith.constant 0 : i32
    return %c0_i32, %c0_i32_0 : i32, i32
  }
  func.func @transform_7(%arg0: i32) -> (i32, i32) {
    %c0_i32 = arith.constant 0 : i32
    %c0_i32_0 = arith.constant 0 : i32
    %c0_i32_1 = arith.constant 0 : i32
    return %c0_i32, %c0_i32_0 : i32, i32
  }
  func.func @transform_8(%arg0: i32) -> (i32, i32) {
    %c0_i32 = arith.constant 0 : i32
    %c0_i32_0 = arith.constant 0 : i32
    %c0_i32_1 = arith.constant 0 : i32
    return %c0_i32, %c0_i32_0 : i32, i32
  }
  func.func @transform_9(%arg0: i32) -> (i32, i32, i32) {
    %c0_i32 = arith.constant 0 : i32
    %c0_i32_0 = arith.constant 0 : i32
    %c0_i32_1 = arith.constant 0 : i32
    %c0_i32_2 = arith.constant 0 : i32
    return %c0_i32, %c0_i32_0, %c0_i32_1 : i32, i32, i32
  }
}

</mosaic_0001>

<bundles_post_ra>
// kernel: unet_forward.17
= control target key start
LH: loop header
LB: loop body
LE: loop exit
PB: predicated region body
PF: predicated region fallthrough
CT: control target
= control target key end

     0   :  { %vm30_vm0 = vcmask 1042434   ;;  %vm33_vm1 = vcmask 1043459   ;;  %vm46_vm2 = vcmask 1041409   ;;  %v201_v3 = vmov 0.0   ;;  %s203_s30 = smov 32   ;;  %s283_s0 = inlined_call_operand.vmem [shape: f32[2,4,2,16], index: 0, kind: input, shape index: {}]   ;;  %s284_s1 = inlined_call_operand.vmem [shape: bf16[48,16], index: 1, kind: input, shape index: {}]   ;;  %s285_s2 = inlined_call_operand.vmem [shape: f32[1,16], index: 2, kind: input, shape index: {}]   ;;  %s286_s3 = inlined_call_operand.vmem [shape: f32[2,4,16], index: 3, kind: output, shape index: {}]  }
   0x1   :  { %v15_v0 = vld [vmem:[%s283_s0] sm:$0x3]  ;;  %v16_v1 = vld [vmem:[%s283_s0 + $0x2] sm:$0x3]  ;;  %v17_v2 = vld [vmem:[%s283_s0 + $0x4] sm:$0x3]  ;;  %184 = vmatprep.subr.bf16.mxu0 %v201_v3 }
   0x2   :  { %v18_v4 = vld [vmem:[%s283_s0 + $0x6] sm:$0x3]  ;;  %v29_v5 = vrot.slane %v16_v1, 7  ;;  %v32_v6 = vrot.slane %v17_v2, 6  ;;  %v61_v7 = vrot.slane %v15_v0, 1  ;;  %v63_v8 = vrot.slane %v17_v2, 7 }
   0x3   :  { %v49_v9 = vrot.slane %v18_v4, 5  ;;  %v65_v10 = vrot.slane %v18_v4, 6  ;;  %v19_v11 = vld [vmem:[%s283_s0 + $0x8] sm:$0x3]  ;;  %v20_v12 = vld [vmem:[%s283_s0 + $0xa] sm:$0x3] }
   0x4   :  { %v47_v13 = vsel %vm46_vm2, %v29_v5, %v15_v0  ;;  %v62_v14 = vsel %vm46_vm2, %v16_v1, %v61_v7  ;;  %v21_v15 = vld [vmem:[%s283_s0 + $0xc] sm:$0x3]  ;;  %v22_v16 = vld [vmem:[%s283_s0 + $0xe] sm:$0x3]  ;;  %v35_v17 = vrot.slane %v20_v12, 7  ;;  %v67_v18 = vrot.slane %v19_v11, 1 }
   0x5   :  { %v48_v19 = vsel %vm30_vm0, %v32_v6, %v47_v13  ;;  %v64_v20 = vsel %vm30_vm0, %v63_v8, %v62_v14  ;;  %v37_v21 = vrot.slane %v21_v15, 6  ;;  %v53_v22 = vrot.slane %v22_v16, 5  ;;  %v198_v27 = vld [vmem:[%s284_s1] sm:$0xff]   ;;  %s202_s0 = smov 16   ;;  %v199_v33 = vld [vmem:[%s284_s1 + $0x8] sm:$0xff]   ;;  %v200_v39 = vld [vmem:[%s284_s1 + $0x10] sm:$0xff]  }
   0x6   :  { %v50_v23 = vsel %vm33_vm1, %v49_v9, %v48_v19  ;;  %v66_v24 = vsel %vm33_vm1, %v65_v10, %v64_v20  ;;  %v51_v25 = vsel %vm46_vm2, %v35_v17, %v19_v11  ;;  %v68_v26 = vsel %vm46_vm2, %v20_v12, %v67_v18  ;;  %185 = vmatpush3.bf16.msra.mxu0 %v198_v27  ;;  %v175_v52 = vld [vmem:[%s285_s2] ss:$0 sm:$0xff] }
   0x7   :  { %55 = vrot.lane.b32.xlu0 %v50_v23, %s202_s0  ;;  %73 = vrot.lane.b32.xlu1 %v66_v24, %s203_s30  ;;  %v52_v28 = vsel %vm30_vm0, %v37_v21, %v51_v25  ;;  %v69_v29 = vrot.slane %v21_v15, 7  ;;  %v71_v30 = vrot.slane %v22_v16, 6  ;;  %v31_v32 = vsel %vm30_vm0, %v29_v5, %v15_v0 }
   0x8   :  { %v54_v31 = vsel %vm33_vm1, %v53_v22, %v52_v28  ;;  %v34_v35 = vsel %vm33_vm1, %v32_v6, %v31_v32  ;;  %186 = vmatprep.subr.bf16.mxu0 %v201_v3  ;;  %v36_v36 = vsel %vm30_vm0, %v35_v17, %v19_v11  ;;  %vm204_vm3 = vmmov 0  }
   0x9   :  { %v70_v34 = vsel %vm30_vm0, %v69_v29, %v68_v26  ;;  %v38_v38 = vsel %vm33_vm1, %v37_v21, %v36_v36  ;;  %190 = vmatprep.mubr.msk.bf16.mxu0 %vm204_vm3, %v201_v3  ;;  %vm41_vm4 = vcmask 1040384   ;;  %vm79_vm5 = vcmask 130048  }
   0xa   :  { %v72_v37 = vsel %vm33_vm1, %v71_v30, %v70_v34  ;;  %187 = vmatpush3.bf16.msra.mxu0 %v199_v33  ;;  %v42_v41 = vsel %vm41_vm4, 0.0, %v34_v35  ;;  %v43_v43 = vsel %vm41_vm4, 0.0, %v38_v38  ;;  %vm82_vm6 = vcmask 261120  }
   0xb   :  { %57 = vrot.lane.b32.xlu0 %v54_v31, %s202_s0  ;;  %75 = vrot.lane.b32.xlu1 %v72_v37, %s203_s30  ;;  %vm121_vm7 = vcmask 392192   ;;  %vm168_vm8 = vcmask 125952  }
   0xc   :  { %188 = vmatprep.subr.bf16.mxu0 %v201_v3 }
   0xe   :  { %189 = vmatpush3.bf16.msra.mxu0 %v200_v39 }
  0x79   :  { %v56_v40 = vpop.permute.xlu0 %55  ;;  %v74_v42 = vpop.permute.xlu1 %73 }
  0x7a   :  { %v80_v44 = vsel %vm79_vm5, %v42_v41, %v56_v40 }
  0x7b   :  { %v83_v48 = vsel %vm82_vm6, %v80_v44, %v74_v42 }
  0x7d   :  { %v58_v45 = vpop.permute.xlu0 %57  ;;  %v76_v46 = vpop.permute.xlu1 %75 }
  0x7e   :  { %v81_v47 = vsel %vm79_vm5, %v43_v43, %v58_v45 }
  0x7f   :  { %v84_v49 = vsel %vm82_vm6, %v81_v47, %v76_v46 }
  0x80   :  { %v87_v50 = vcombine.low %v83_v48, %v84_v49 }
  0x82   :  { %v89_v51 = vpack.c.bf16 %v87_v50, %v87_v50 }
  0x84   :  { %191 = vmatmul.mubr.msk.bf16.vlgmr.msra.gmra.mrb[0].mxu0 %vm121_vm7, %v89_v51 }
 0x157   :  { %v159_v53 = vpop.f32.mrb[0].mxu0 }
 0x158   :  { %v160_v54 = vadd.f32 %v175_v52, %v159_v53  ;;  %v192_v55 = vpop.f32.mrb[1].mxu0 }
 0x159   :  { %v162_v56 = vpop.f32.mrb[2].mxu0 }
 0x15a   :  { %v166_v57 = vcombine.high %v160_v54, %v160_v54  ;;  %169 = vst.msk [vmem:[%s286_s3] sm:$0xf] %vm168_vm8, %v160_v54  ;;  %v193_v58 = vpop.f32.mrb[3].mxu0 }
 0x15c   :  { %170 = vst.msk [vmem:[%s286_s3 + $0x4] sm:$0xf] %vm168_vm8, %v166_v57 }

// kernel: unet_forward.14
= control target key start
LH: loop header
LB: loop body
LE: loop exit
PB: predicated region body
PF: predicated region fallthrough
CT: control target
= control target key end

     0   :  { %v223_v0 = vmov 0.0   ;;  %vm224_vm0 = vmmov 0   ;;  %vm38_vm1 = vcmask 130048   ;;  %vm128_vm2 = vcmask 523264   ;;  %s282_s1 = inlined_call_operand.vmem [shape: bf16[16,64], index: 1, kind: input, shape index: {}]   ;;  %s283_s0 = inlined_call_operand.vmem [shape: f32[2,16], index: 0, kind: input, shape index: {}]   ;;  %s284_s3 = inlined_call_operand.vmem [shape: bf16[64,16], index: 3, kind: input, shape index: {}]   ;;  %s285_s2 = inlined_call_operand.vmem [shape: f32[1,64], index: 2, kind: input, shape index: {}]   ;;  %s286_s4 = inlined_call_operand.vmem [shape: f32[1,16], index: 4, kind: input, shape index: {}]   ;;  %s287_s5 = inlined_call_operand.vmem [shape: f32[2,16], index: 5, kind: output, shape index: {}]  }
   0x1   :  { %194 = vmatprep.subr.bf16.mxu0 %v223_v0  ;;  %v214_v1 = vld [vmem:[%s282_s1] sm:$0xff]   ;;  %196 = vmatprep.mubr.msk.bf16.mxu0 %vm224_vm0, %v223_v0  ;;  %v216_v5 = vld [vmem:[%s284_s3 + $0x8] sm:$0xff]   ;;  %v217_v6 = vld [vmem:[%s284_s3 + $0x10] sm:$0xff]   ;;  %vm172_vm3 = vcmask 123904  }
   0x2   :  { %v21_v2 = vld [vmem:[%s283_s0] sm:$0x3]  ;;  %200 = vmatprep.subr.bf16.mxu1 %v223_v0  ;;  %208 = vmatprep.mubr.msk.bf16.mxu1 %vm224_vm0, %v223_v0  ;;  %v218_v7 = vld [vmem:[%s284_s3 + $0x18] sm:$0xff]  }
   0x3   :  { %195 = vmatpush3.bf16.msra.mxu0 %v214_v1  ;;  %v22_v3 = vpack.c.bf16 %v21_v2, %v21_v2  ;;  %v215_v4 = vld [vmem:[%s284_s3] sm:$0xff]  }
   0x4   :  { %201 = vmatpush3.bf16.msra.mxu1 %v215_v4  ;;  %v178_v8 = vld [vmem:[%s285_s2] ss:$0 sm:$0xff] }
   0x5   :  { %202 = vmatprep.subr.bf16.mxu1 %v223_v0  ;;  %v181_v21 = vld [vmem:[%s286_s4] ss:$0 sm:$0xff] }
   0x6   :  { %197 = vmatmul.mubr.msk.bf16.vlgmr.msra.gmra.mrb[0].mxu0 %vm38_vm1, %v22_v3 }
   0x8   :  { %203 = vmatpush3.bf16.msra.mxu1 %v216_v5 }
   0x9   :  { %204 = vmatprep.subr.bf16.mxu1 %v223_v0 }
   0xc   :  { %205 = vmatpush3.bf16.msra.mxu1 %v217_v6 }
   0xd   :  { %206 = vmatprep.subr.bf16.mxu1 %v223_v0 }
  0x10   :  { %207 = vmatpush3.bf16.msra.mxu1 %v218_v7 }
  0xd9   :  { %v76_v9 = vpop.f32.mrb[0].mxu0 }
  0xda   :  { %v77_v10 = vadd.f32 %v178_v8, %v76_v9  ;;  %v198_v11 = vpop.f32.mrb[1].mxu0 }
  0xdb   :  { %v79_v12 = vpop.f32.mrb[2].mxu0 }
  0xdc   :  { %v82_v13 = vsub.f32 0.0, %v77_v10  ;;  %v199_v14 = vpop.f32.mrb[3].mxu0 }
  0xde   :  { %v83_v15 = vmul.f32 1.442695, %v82_v13 }
  0xe0   :  { %219 = vpow2.f32 %v83_v15 }
  0xea   :  { %v220_v16 = vpop.eup %219 }
  0xeb   :  { %v85_v17 = vadd.f32 1.0, %v220_v16 }
  0xed   :  { %221 = vrcp.f32 %v85_v17 }
  0xf7   :  { %v222_v18 = vpop.eup %221 }
  0xf8   :  { %v87_v19 = vmul.f32 %v222_v18, %v77_v10 }
  0xfa   :  { %v88_v20 = vpack.c.bf16 %v87_v19, %v87_v19 }
  0xfc   :  { %209 = vmatmul.mubr.msk.bf16.vlgmr.msra.gmra.mrb[0].mxu1 %vm128_vm2, %v88_v20 }
 0x1cf   :  { %v166_v22 = vpop.f32.mrb[0].mxu1 }
 0x1d0   :  { %v167_v23 = vadd.f32 %v181_v21, %v166_v22  ;;  %v210_v24 = vpop.f32.mrb[1].mxu1 }
 0x1d1   :  { %v169_v25 = vpop.f32.mrb[2].mxu1 }
 0x1d2   :  { %173 = vst.msk [vmem:[%s287_s5] sm:$0x3] %vm172_vm3, %v167_v23  ;;  %v211_v26 = vpop.f32.mrb[3].mxu1 }

// kernel: unet_forward.15
= control target key start
LH: loop header
LB: loop body
LE: loop exit
PB: predicated region body
PF: predicated region fallthrough
CT: control target
= control target key end

     0   :  { %vm72_vm0 = vcmask 1046528   ;;  %v1619_v2 = vmov 0.0   ;;  %vm1620_vm1 = vmmov 0   ;;  %s1621_s28 = smov 16   ;;  %vm65_vm2 = vcmask 1040384   ;;  %s1959_s0 = inlined_call_operand.vmem [shape: f32[2,8,16], index: 0, kind: input, shape index: {}]   ;;  %s1960_s2 = inlined_call_operand.vmem [shape: bf16[48,16], index: 2, kind: input, shape index: {}]   ;;  %s1961_s6 = inlined_call_operand.vmem [shape: f32[16,8], index: 6, kind: input, shape index: {}]   ;;  %s1962_s3 = inlined_call_operand.vmem [shape: f32[1,16], index: 3, kind: input, shape index: {}]   ;;  %s1963_s7 = inlined_call_operand.vmem [shape: f32[8,16], index: 7, kind: input, shape index: {}]   ;;  %s1964_s8 = inlined_call_operand.vmem [shape: bf16[24,16], index: 8, kind: input, shape index: {}]   ;;  %s1965_s1 = inlined_call_operand.vmem [shape: f32[2,24], index: 1, kind: input, shape index: {}]   ;;  %s1966_s10 = inlined_call_operand.vmem [shape: bf16[24,16], index: 10, kind: input, shape index: {}]   ;;  %s1967_s12 = inlined_call_operand.vmem [shape: bf16[48,16], index: 12, kind: input, shape index: {}]   ;;  %s1968_s4 = inlined_call_operand.vmem [shape: f32[1,16], index: 4, kind: input, shape index: {}]   ;;  %s1969_s5 = inlined_call_operand.vmem [shape: f32[1,16], index: 5, kind: input, shape index: {}]   ;;  %s1970_s9 = inlined_call_operand.vmem [shape: f32[1,16], index: 9, kind: input, shape index: {}]   ;;  %s1971_s11 = inlined_call_operand.vmem [shape: f32[1,16], index: 11, kind: input, shape index: {}]   ;;  %s1972_s13 = inlined_call_operand.vmem [shape: f32[1,16], index: 13, kind: input, shape index: {}]   ;;  %s1973_s14 = inlined_call_operand.vmem [shape: f32[1,16], index: 14, kind: input, shape index: {}]   ;;  %s1974_s15 = inlined_call_operand.vmem [shape: f32[1,16], index: 15, kind: input, shape index: {}]   ;;  %s1975_s16 = inlined_call_operand.vmem [shape: f32[2,8,16], index: 16, kind: output, shape index: {}]  }
   0x1   :  { %1977 = sst [smem:[#allocation2_spill]] %s1959_s0  ;;  %1463 = vmatprep.subr.bf16.mxu0 %v1619_v2  ;;  %v1585_v5 = vld [vmem:[%s1960_s2] sm:$0xff]   ;;  %1469 = vmatprep.mubr.msk.bf16.mxu0 %vm1620_vm1, %v1619_v2  ;;  %v1586_v8 = vld [vmem:[%s1960_s2 + $0x8] sm:$0xff]   ;;  %s1622_s0 = smov 32   ;;  %v1587_v11 = vld [vmem:[%s1960_s2 + $0x10] sm:$0xff]   ;;  %vm89_vm3 = vcmask 130048  }
   0x2   :  { %s1978_s23 = sld [smem:[#allocation2_spill]]  ;;  %1477 = vmatprep.mubr.msk.f32.mxu1 %vm1620_vm1, %v1619_v2  ;;  %1464 = vmatpush3.bf16.msra.mxu0 %v1585_v5  ;;  %vm92_vm4 = vcmask 261120   ;;  %vm120_vm5 = vcmask 392192   ;;  %v56_v27 = vld [vmem:[%s1961_s6] sm:$0xff]  ;;  %v57_v28 = vld [vmem:[%s1961_s6 + $0x8] sm:$0xff]  ;;  %v1623_v30 = vmov 0.0|0.0  }
   0x3   :  { %1465 = vmatprep.subr.bf16.mxu0 %v1619_v2  ;;  %v1762_v29 = vpack.c.bf16 %v57_v28, %v56_v27  ;;  %1547 = vmatprep.subr.bf16.mxu1 %v1623_v30  ;;  %v1399_v31 = vld [vmem:[%s1962_s3] ss:$0 sm:$0xff]  ;;  %vm208_vm6 = vcmask 1041409   ;;  %vm282_vm7 = vcmask 64512   ;;  %vm648_vm8 = vcmask 1043456  }
   0x4   :  { %v1781_v52 = vld [vmem:[%s1963_s7] sm:$0xff]  ;;  %vm644_vm9 = vcmask 195584  }
   0x5   :  { %1549 = vmatpush3.bf16.msra.mxu1 %v1762_v29  ;;  %v1592_v28 = vld [vmem:[%s1967_s12] sm:$0xff]  }
   0x6   :  { %1466 = vmatpush3.bf16.msra.mxu0 %v1586_v8  ;;  %1480 = vmatprep.subr.mxu1 %v1619_v2 }
   0x7   :  { %1467 = vmatprep.subr.bf16.mxu0 %v1619_v2 }
   0x8   :  { %v1713_v0 = vld [vmem:[%s1978_s23] sm:$0xff]  ;;  %v1718_v1 = vld [vmem:[%s1978_s23 + $0x8] sm:$0xff] }
   0x9   :  { %v1565_v3 = vpack.i.bf16 %v1718_v1, %v1713_v0  ;;  %v68_v4 = vrot.slane %v1713_v0, 1  ;;  %v69_v6 = vrot.slane %v1718_v1, 1  ;;  %v62_v12 = vrot.slane %v1718_v1, 7 }
   0xa   :  { %1468 = vmatpush3.bf16.msra.mxu0 %v1587_v11  ;;  %v61_v13 = vrot.slane %v1713_v0, 7 }
   0xb   :  { %1566 = vrot.lane.b32.xlu0 %v1565_v3, %s1621_s28  ;;  %v73_v7 = vsel %vm72_vm0, %v68_v4, 0.0  ;;  %v74_v9 = vsel %vm72_vm0, %v69_v6, 0.0  ;;  %1497 = vmatprep.subr.bf16.mxu0 %v1619_v2  ;;  %v67_v17 = vsel %vm65_vm2, 0.0, %v62_v12  ;;  %v1588_v12 = vld [vmem:[%s1964_s8] sm:$0xff]  }
   0xc   :  { %v1570_v10 = vpack.i.bf16 %v74_v9, %v73_v7  ;;  %v66_v18 = vsel %vm65_vm2, 0.0, %v61_v13  ;;  %v1589_v13 = vld [vmem:[%s1964_s8 + $0x8] ss:$0 sps:$4 sm:$0xff]  }
   0xf   :  { %1571 = vrot.lane.b32.xlu0 %v1570_v10, %s1622_s0 }
  0x7d   :  { %v1567_v14 = vpop.permute.xlu0 %1566 }
  0x7e   :  { %v1569_v15 = vunpack.i.h.bf16 %v1567_v14  ;;  %v1568_v16 = vunpack.i.l.bf16 %v1567_v14  ;;  %v623_v14 = vld [vmem:[%s1965_s1] sm:$0x3] }
  0x80   :  { %v91_v22 = vsel %vm89_vm3, %v67_v17, %v1569_v15  ;;  %v90_v23 = vsel %vm89_vm3, %v66_v18, %v1568_v16  ;;  %v650_v15 = vsel %vm648_vm8, %v1589_v13, 0  ;;  %v1591_v16 = vld [vmem:[%s1966_s10 + $0x8] ss:$0 sps:$4 sm:$0xff]   ;;  %v624_v17 = vpack.c.bf16 %v623_v14, %v623_v14 }
  0x81   :  { %v1572_v19 = vpop.permute.xlu0 %1571  ;;  %v712_v18 = vsel %vm648_vm8, %v1591_v16, 0 }
  0x82   :  { %v1574_v20 = vunpack.i.h.bf16 %v1572_v19  ;;  %v1573_v21 = vunpack.i.l.bf16 %v1572_v19 }
  0x84   :  { %v94_v24 = vsel %vm92_vm4, %v91_v22, %v1574_v20  ;;  %v93_v25 = vsel %vm92_vm4, %v90_v23, %v1573_v21  ;;  %v1590_v21 = vld [vmem:[%s1966_s10] sm:$0xff]  }
  0x85   :  { %v95_v26 = vpack.c.bf16 %v94_v24, %v93_v25 }
  0x87   :  { %1470 = vmatmul.mubr.msk.bf16.vlgmr.msra.gmra.mrb[0].mxu0 %vm120_vm5, %v95_v26 }
  0x88   :  { %1501 = vmatprep.mubr.msk.bf16.mxu0 %vm1620_vm1, %v1619_v2  ;;  %1498 = vmatpush3.bf16.msra.mxu0 %v1588_v12 }
  0x89   :  { %1499 = vmatprep.subr.bf16.mxu0 %v1619_v2 }
  0x8c   :  { %1500 = vmatpush3.bf16.msra.mxu0 %v650_v15 }
  0x8d   :  { %1513 = vmatprep.subr.bf16.mxu0 %v1619_v2 }
  0x8f   :  { %1502 = vmatmul.mubr.msk.bf16.vlgmr.msra.gmra.mrb[4].mxu0 %vm644_vm9, %v624_v17 }
  0x90   :  { %1519 = vmatprep.mubr.msk.bf16.mxu0 %vm1620_vm1, %v1619_v2  ;;  %1514 = vmatpush3.bf16.msra.mxu0 %v1592_v28 }
  0x91   :  { %1515 = vmatprep.subr.bf16.mxu0 %v1619_v2 }
 0x15a   :  { %v158_v32 = vpop.f32.mrb[0].mxu0 }
 0x15b   :  { %v1770_v33 = vadd.f32 %v1399_v31, %v158_v32  ;;  %v1471_v34 = vpop.f32.mrb[1].mxu0  ;;  %v1624_v32 = vmov 1966171168  }
 0x15c   :  { %v161_v35 = vpop.f32.mrb[2].mxu0  ;;  %v511_v34 = vunpack.c.l.s4 %v1624_v32 }
 0x15d   :  { %v176_v36 = vsel %vm89_vm3, %v1770_v33, 0.0  ;;  %v1774_v37 = vadd.f32 %v1399_v31, %v161_v35  ;;  %v1472_v38 = vpop.f32.mrb[3].mxu0  ;;  %v190_v55 = vmul.f32 %v1770_v33, %v1770_v33  ;;  %v513_v35 = vlaneseq }
 0x15e   :  { %v177_v39 = vrot.slane %v176_v36, 4 }
 0x15f   :  { %v183_v40 = vsel %vm89_vm3, %v1774_v37, 0.0  ;;  %v191_v54 = vmul.f32 %v1774_v37, %v1774_v37  ;;  %v192_v57 = vsel %vm89_vm3, %v190_v55, 0.0 }
 0x160   :  { %v178_v41 = vadd.f32 %v177_v39, %v176_v36  ;;  %v184_v42 = vrot.slane %v183_v40, 4  ;;  %v193_v59 = vrot.slane %v192_v57, 4  ;;  %v512_v39 = vunpack.c.0.s8 %v511_v34 }
 0x161   :  { %v199_v56 = vsel %vm89_vm3, %v191_v54, 0.0 }
 0x162   :  { %v179_v43 = vrot.slane %v178_v41, 2  ;;  %v185_v44 = vadd.f32 %v184_v42, %v183_v40  ;;  %v200_v58 = vrot.slane %v199_v56, 4  ;;  %v194_v61 = vadd.f32 %v193_v59, %v192_v57  ;;  %v1834_v24 = vpop.f32.mrb[4].mxu0 }
 0x163   :  { %v1503_v25 = vpop.f32.mrb[5].mxu0  ;;  %v514_v40 = vshrl.u32 %v513_v35, 7 }
 0x164   :  { %v180_v45 = vadd.f32 %v179_v43, %v178_v41  ;;  %v186_v46 = vrot.slane %v185_v44, 2  ;;  %v201_v60 = vadd.f32 %v200_v58, %v199_v56  ;;  %v195_v63 = vrot.slane %v194_v61, 2  ;;  %v689_v26 = vpop.f32.mrb[6].mxu0 }
 0x165   :  { %v1504_v27 = vpop.f32.mrb[7].mxu0 }
 0x166   :  { %v187_v47 = vadd.f32 %v186_v46, %v185_v44  ;;  %v181_v48 = vrot.slane %v180_v45, 1  ;;  %v202_v62 = vrot.slane %v201_v60, 2  ;;  %v196_v4 = vadd.f32 %v195_v63, %v194_v61 }
 0x167   :  { %v1840_v44 = vsub.s32 %v512_v39, %v514_v40 }
 0x168   :  { %v188_v49 = vrot.slane %v187_v47, 1  ;;  %v182_v50 = vadd.f32 %v181_v48, %v180_v45  ;;  %v203_v3 = vadd.f32 %v202_v62, %v201_v60  ;;  %v197_v6 = vrot.slane %v196_v4, 1 }
 0x169   :  { %v1847_v60 = vsub.s32 0, %v514_v40 }
 0x16a   :  { %v189_v51 = vadd.f32 %v188_v49, %v187_v47  ;;  %v204_v5 = vrot.slane %v203_v3, 1  ;;  %v198_v10 = vadd.f32 %v197_v6, %v196_v4 }
 0x16c   :  { %v209_v53 = vsel %vm208_vm6, %v189_v51, %v182_v50  ;;  %v205_v8 = vadd.f32 %v204_v5, %v203_v3 }
 0x16d   :  { %1478 = vmatmul.mubr.msk.f32.vlgmr.msra.gmra.mrb[0].mxu1 %vm89_vm3, %v209_v53 }
 0x16e   :  { %1481 = vmatpush3.msra.mxu1 %v1781_v52  ;;  %1482 = vmatprep.mubr.msk.f32.mxu1 %vm1620_vm1, %v1619_v2  ;;  %v359_v11 = vsel %vm208_vm6, %v205_v8, %v198_v10 }
 0x16f   :  { %1550 = vmatprep.subr.bf16.mxu1 %v1623_v30 }
 0x240   :  { %v278_v7 = vpop.f32.mrb[0].mxu1 }
 0x241   :  { %v1479_v9 = vpop.f32.mrb[1].mxu1  ;;  %1483 = vmatmul.mubr.msk.f32.vlgmr.msra.gmra.mrb[2].mxu1 %vm282_vm7, %v278_v7  ;;  %v1404_v7 = vld [vmem:[%s1968_s4] ss:$0 sm:$0xff] }
 0x242   :  { %1552 = vmatpush3.bf16.msra.mxu1 %v1762_v29  ;;  %1489 = vmatprep.mubr.msk.f32.mxu1 %vm1620_vm1, %v1619_v2 }
 0x243   :  { %1492 = vmatprep.subr.mxu1 %v1619_v2 }
 0x245   :  { %1490 = vmatmul.mubr.msk.f32.vlgmr.msra.gmra.mrb[4].mxu1 %vm89_vm3, %v359_v11  ;;  %v1405_v11 = vld [vmem:[%s1969_s5] ss:$0 sm:$0xff] }
 0x246   :  { %1493 = vmatpush3.msra.mxu1 %v1781_v52  ;;  %1494 = vmatprep.mubr.msk.f32.mxu1 %vm1620_vm1, %v1619_v2 }
 0x247   :  { %1505 = vmatprep.subr.bf16.mxu1 %v1619_v2 }
 0x314   :  { %v352_v19 = vpop.f32.mrb[2].mxu1 }
 0x315   :  { %v1484_v20 = vpop.f32.mrb[3].mxu1  ;;  %v356_v31 = vmul.f32 0.0625, %v352_v19 }
 0x317   :  { %v506_v38 = vmul.f32 %v356_v31, %v356_v31  ;;  %v516_v51 = vrot.slane %v356_v31, %v1840_v44 }
 0x318   :  { %v428_v22 = vpop.f32.mrb[4].mxu1 }
 0x319   :  { %v1491_v23 = vpop.f32.mrb[5].mxu1  ;;  %1495 = vmatmul.mubr.msk.f32.vlgmr.msra.gmra.mrb[6].mxu1 %vm282_vm7, %v428_v22  ;;  %v517_v58 = vcombine.high %v516_v51, %v516_v51  ;;  %v524_v59 = vrot.slane %v516_v51, %v1840_v44  ;;  %v1412_v22 = vld [vmem:[%s1971_s11] ss:$0 sm:$0xff] }
 0x31a   :  { %1506 = vmatpush3.bf16.msra.mxu1 %v1590_v21  ;;  %1509 = vmatprep.mubr.msk.bf16.mxu1 %vm1620_vm1, %v1619_v2 }
 0x31b   :  { %1507 = vmatprep.subr.bf16.mxu1 %v1619_v2  ;;  %v531_v61 = vrot.slane %v517_v58, %v1840_v44  ;;  %v535_v62 = vrot.slane %v524_v59, %v1847_v60 }
 0x31d   :  { %v539_v63 = vrot.slane %v531_v61, %v1847_v60  ;;  %v542_v4 = vsub.f32 %v1770_v33, %v535_v62  ;;  %v1594_v62 = vld [vmem:[%s1967_s12 + $0x10] sm:$0xff]  }
 0x31e   :  { %1508 = vmatpush3.bf16.msra.mxu1 %v712_v18 }
 0x31f   :  { %1553 = vmatprep.subr.bf16.mxu1 %v1623_v30  ;;  %v543_v8 = vsub.f32 %v1774_v37, %v539_v63  ;;  %v1408_v37 = vld [vmem:[%s1970_s9] ss:$0 sm:$0xff] }
 0x320   :  { %v687_v20 = vadd.f32 %v1408_v37, %v1834_v24 }
 0x321   :  { %1510 = vmatmul.mubr.msk.bf16.vlgmr.msra.gmra.mrb[8].mxu1 %vm644_vm9, %v624_v17 }
 0x322   :  { %1555 = vmatpush3.bf16.msra.mxu1 %v1762_v29  ;;  %1527 = vmatprep.mubr.msk.f32.mxu1 %vm1620_vm1, %v1619_v2  ;;  %v761_v26 = vrot.slane %v687_v20, %v1840_v44 }
 0x323   :  { %1530 = vmatprep.subr.mxu1 %v1619_v2 }
 0x324   :  { %v762_v35 = vcombine.high %v761_v26, %v761_v26 }
 0x326   :  { %v776_v39 = vrot.slane %v762_v35, %v1840_v44 }
 0x3ec   :  { %v501_v36 = vpop.f32.mrb[6].mxu1 }
 0x3ed   :  { %v505_v41 = vmul.f32 0.0625, %v501_v36  ;;  %v1496_v42 = vpop.f32.mrb[7].mxu1 }
 0x3ef   :  { %v507_v43 = vsub.f32 %v505_v41, %v506_v38  ;;  %v769_v38 = vrot.slane %v761_v26, %v1840_v44 }
 0x3f1   :  { %v508_v45 = vmax.f32 %v507_v43, 0.0  ;;  %v779_v40 = vadd.f32 1.0, %v769_v38  ;;  %v780_v43 = vadd.f32 1.0, %v776_v39 }
 0x3f3   :  { %v551_v46 = vrot.slane %v508_v45, %v1840_v44 }
 0x3f4   :  { %v748_v47 = vpop.f32.mrb[8].mxu1 }
 0x3f5   :  { %v552_v48 = vcombine.high %v551_v46, %v551_v46  ;;  %v559_v49 = vrot.slane %v551_v46, %v1840_v44  ;;  %v1511_v50 = vpop.f32.mrb[9].mxu1  ;;  %v749_v31 = vadd.f32 %v1412_v22, %v748_v47  ;;  %v786_v47 = vrot.slane %v779_v40, %v1847_v60 }
 0x3f6   :  { %v751_v53 = vpop.f32.mrb[10].mxu1  ;;  %v1593_v50 = vld [vmem:[%s1967_s12 + $0x8] sm:$0xff]  }
 0x3f7   :  { %v566_v54 = vrot.slane %v552_v48, %v1840_v44  ;;  %v569_v55 = vadd.f32 1e-05, %v559_v49  ;;  %v1512_v56 = vpop.f32.mrb[11].mxu1  ;;  %v802_v24 = vrot.slane %v749_v31, %v1840_v44  ;;  %v790_v53 = vrot.slane %v780_v43, %v1847_v60  ;;  %1516 = vmatpush3.bf16.msra.mxu0 %v1593_v50 }
 0x3f8   :  { %1517 = vmatprep.subr.bf16.mxu0 %v1619_v2 }
 0x3f9   :  { %v570_v57 = vadd.f32 1e-05, %v566_v54  ;;  %1595 = vrsqrt.f32 %v569_v55  ;;  %v803_v41 = vcombine.high %v802_v24, %v802_v24  ;;  %v810_v45 = vrot.slane %v802_v24, %v1840_v44 }
 0x3fb   :  { %1597 = vrsqrt.f32 %v570_v57  ;;  %v817_v48 = vrot.slane %v803_v41, %v1840_v44  ;;  %v821_v54 = vrot.slane %v810_v45, %v1847_v60  ;;  %1518 = vmatpush3.bf16.msra.mxu0 %v1594_v62 }
 0x3fc   :  { %1556 = vmatprep.subr.bf16.mxu0 %v1623_v30 }
 0x3fd   :  { %v825_v61 = vrot.slane %v817_v48, %v1847_v60 }
 0x403   :  { %v1596_v3 = vpop.eup %1595 }
 0x404   :  { %v578_v5 = vrot.slane %v1596_v3, %v1847_v60 }
 0x405   :  { %v1598_v6 = vpop.eup %1597 }
 0x406   :  { %v582_v9 = vrot.slane %v1598_v6, %v1847_v60  ;;  %v585_v10 = vmul.f32 %v578_v5, %v542_v4 }
 0x408   :  { %v586_v12 = vmul.f32 %v582_v9, %v543_v8  ;;  %v593_v13 = vmul.f32 %v1404_v7, %v585_v10 }
 0x40a   :  { %v594_v14 = vmul.f32 %v1404_v7, %v586_v12  ;;  %v601_v33 = vadd.f32 %v1405_v11, %v593_v13 }
 0x40c   :  { %v602_v15 = vadd.f32 %v1405_v11, %v594_v14  ;;  %v603_v16 = vmin.f32 %v601_v33, 20.0 }
 0x40e   :  { %v604_v17 = vmin.f32 %v602_v15, 20.0  ;;  %v605_v18 = vmul.f32 1.442695, %v603_v16 }
 0x410   :  { %1599 = vpow2.f32 %v605_v18  ;;  %v607_v19 = vmul.f32 1.442695, %v604_v17 }
 0x412   :  { %1601 = vpow2.f32 %v607_v19 }
 0x41a   :  { %v1600_v21 = vpop.eup %1599 }
 0x41b   :  { %v609_v23 = vadd.f32 1.0, %v1600_v21 }
 0x41c   :  { %v1602_v25 = vpop.eup %1601 }
 0x41d   :  { %v610_v27 = vadd.f32 1.0, %v1602_v25  ;;  %v611_v28 = vmul.f32 %v609_v23, %v609_v23  ;;  %v1420_v23 = vld [vmem:[%s1972_s13] ss:$0 sm:$0xff] }
 0x41f   :  { %v612_v32 = vmul.f32 %v610_v27, %v610_v27  ;;  %v617_v34 = vadd.f32 1.0, %v611_v28  ;;  %v1406_v42 = vadd.f32 -1.0, %v611_v28 }
 0x421   :  { %v618_v36 = vadd.f32 1.0, %v612_v32  ;;  %1603 = vrcp.f32 %v617_v34  ;;  %v1407_v46 = vadd.f32 -1.0, %v612_v32  ;;  %v615_v49 = vmul.f32 %v1406_v42, %v601_v33 }
 0x423   :  { %1605 = vrcp.f32 %v618_v36  ;;  %v616_v55 = vmul.f32 %v1407_v46, %v602_v15 }
 0x42b   :  { %v1604_v51 = vpop.eup %1603 }
 0x42c   :  { %v621_v56 = vmul.f32 %v1604_v51, %v615_v49 }
 0x42d   :  { %v1606_v57 = vpop.eup %1605 }
 0x42e   :  { %v622_v58 = vmul.f32 %v1606_v57, %v616_v55  ;;  %v793_v59 = vmul.f32 %v786_v47, %v621_v56 }
 0x430   :  { %v794_v63 = vmul.f32 %v790_v53, %v622_v58  ;;  %v828_v3 = vadd.f32 %v821_v54, %v793_v59 }
 0x432   :  { %v829_v4 = vadd.f32 %v825_v61, %v794_v63  ;;  %v838_v5 = vrot.slane %v828_v3, 1  ;;  %v832_v12 = vrot.slane %v828_v3, 7 }
 0x434   :  { %v1575_v6 = vpack.i.bf16 %v829_v4, %v828_v3  ;;  %v839_v7 = vrot.slane %v829_v4, 1  ;;  %v842_v8 = vsel %vm72_vm0, %v838_v5, 0.0  ;;  %v833_v13 = vrot.slane %v829_v4, 7 }
 0x435   :  { %v836_v30 = vsel %vm65_vm2, 0.0, %v832_v12 }
 0x436   :  { %1576 = vrot.lane.b32.xlu1 %v1575_v6, %s1621_s28  ;;  %v843_v9 = vsel %vm72_vm0, %v839_v7, 0.0  ;;  %v837_v16 = vsel %vm65_vm2, 0.0, %v833_v13 }
 0x437   :  { %v1580_v10 = vpack.i.bf16 %v843_v9, %v842_v8 }
 0x43a   :  { %1581 = vrot.lane.b32.xlu1 %v1580_v10, %s1622_s0 }
 0x4a8   :  { %v1577_v11 = vpop.permute.xlu1 %1576 }
 0x4a9   :  { %v1579_v14 = vunpack.i.h.bf16 %v1577_v11  ;;  %v1578_v33 = vunpack.i.l.bf16 %v1577_v11 }
 0x4ab   :  { %v858_v19 = vsel %vm89_vm3, %v836_v30, %v1578_v33  ;;  %v859_v37 = vsel %vm89_vm3, %v837_v16, %v1579_v14 }
 0x4ac   :  { %v1582_v15 = vpop.permute.xlu1 %1581 }
 0x4ad   :  { %v1584_v17 = vunpack.i.h.bf16 %v1582_v15  ;;  %v1583_v18 = vunpack.i.l.bf16 %v1582_v15 }
 0x4af   :  { %v860_v20 = vsel %vm92_vm4, %v858_v19, %v1583_v18  ;;  %v861_v21 = vsel %vm92_vm4, %v859_v37, %v1584_v17 }
 0x4b0   :  { %v862_v22 = vpack.c.bf16 %v861_v21, %v860_v20 }
 0x4b2   :  { %1520 = vmatmul.mubr.msk.bf16.vlgmr.msra.gmra.mrb[8].mxu0 %vm120_vm5, %v862_v22 }
 0x4b3   :  { %1558 = vmatpush3.bf16.msra.mxu0 %v1762_v29  ;;  %1539 = vmatprep.mubr.msk.f32.mxu0 %vm1620_vm1, %v1619_v2 }
 0x585   :  { %v924_v25 = vpop.f32.mrb[8].mxu0 }
 0x586   :  { %v1904_v26 = vadd.f32 %v1420_v23, %v924_v25  ;;  %v1521_v27 = vpop.f32.mrb[9].mxu0 }
 0x587   :  { %v927_v28 = vpop.f32.mrb[10].mxu0 }
 0x588   :  { %v942_v31 = vsel %vm89_vm3, %v1904_v26, 0.0  ;;  %v956_v32 = vmul.f32 %v1904_v26, %v1904_v26  ;;  %v1910_v34 = vadd.f32 %v1420_v23, %v927_v28  ;;  %v1522_v29 = vpop.f32.mrb[11].mxu0 }
 0x589   :  { %v943_v35 = vrot.slane %v942_v31, 4 }
 0x58a   :  { %v958_v36 = vsel %vm89_vm3, %v956_v32, 0.0  ;;  %v949_v38 = vsel %vm89_vm3, %v1910_v34, 0.0  ;;  %v957_v24 = vmul.f32 %v1910_v34, %v1910_v34 }
 0x58b   :  { %v944_v39 = vadd.f32 %v943_v35, %v942_v31  ;;  %v959_v40 = vrot.slane %v958_v36, 4  ;;  %v950_v41 = vrot.slane %v949_v38, 4 }
 0x58c   :  { %v965_v42 = vsel %vm89_vm3, %v957_v24, 0.0 }
 0x58d   :  { %v945_v43 = vrot.slane %v944_v39, 2  ;;  %v960_v45 = vadd.f32 %v959_v40, %v958_v36  ;;  %v951_v46 = vadd.f32 %v950_v41, %v949_v38  ;;  %v966_v47 = vrot.slane %v965_v42, 4  ;;  %v1425_v36 = vld [vmem:[%s1973_s14] ss:$0 sm:$0xff] }
 0x58f   :  { %v946_v48 = vadd.f32 %v945_v43, %v944_v39  ;;  %v961_v49 = vrot.slane %v960_v45, 2  ;;  %v952_v50 = vrot.slane %v951_v46, 2  ;;  %v967_v51 = vadd.f32 %v966_v47, %v965_v42 }
 0x591   :  { %v947_v53 = vrot.slane %v946_v48, 1  ;;  %v962_v54 = vadd.f32 %v961_v49, %v960_v45  ;;  %v953_v55 = vadd.f32 %v952_v50, %v951_v46  ;;  %v968_v56 = vrot.slane %v967_v51, 2 }
 0x593   :  { %v963_v57 = vrot.slane %v962_v54, 1  ;;  %v954_v58 = vrot.slane %v953_v55, 1  ;;  %v969_v59 = vadd.f32 %v968_v56, %v967_v51  ;;  %v948_v61 = vadd.f32 %v947_v53, %v946_v48 }
 0x595   :  { %v955_v62 = vadd.f32 %v954_v58, %v953_v55  ;;  %v970_v63 = vrot.slane %v969_v59, 1  ;;  %v964_v4 = vadd.f32 %v963_v57, %v962_v54 }
 0x597   :  { %v974_v3 = vsel %vm208_vm6, %v955_v62, %v948_v61  ;;  %v971_v5 = vadd.f32 %v970_v63, %v969_v59 }
 0x598   :  { %1528 = vmatmul.mubr.msk.f32.vlgmr.msra.gmra.mrb[12].mxu1 %vm89_vm3, %v974_v3 }
 0x599   :  { %v1123_v6 = vsel %vm208_vm6, %v971_v5, %v964_v4  ;;  %1531 = vmatpush3.msra.mxu1 %v1781_v52  ;;  %1532 = vmatprep.mubr.msk.f32.mxu1 %vm1620_vm1, %v1619_v2 }
 0x59a   :  { %1540 = vmatmul.mubr.msk.f32.vlgmr.msra.gmra.mrb[12].mxu0 %vm89_vm3, %v1123_v6  ;;  %1542 = vmatprep.subr.mxu1 %v1619_v2 }
 0x66b   :  { %v1043_v7 = vpop.f32.mrb[12].mxu1 }
 0x66c   :  { %v1529_v8 = vpop.f32.mrb[13].mxu1  ;;  %1533 = vmatmul.mubr.msk.f32.vlgmr.msra.gmra.mrb[14].mxu1 %vm282_vm7, %v1043_v7 }
 0x66d   :  { %1543 = vmatpush3.msra.mxu1 %v1781_v52  ;;  %v1192_v9 = vpop.f32.mrb[12].mxu0  ;;  %1544 = vmatprep.mubr.msk.f32.mxu1 %vm1620_vm1, %v1619_v2 }
 0x66e   :  { %v1541_v10 = vpop.f32.mrb[13].mxu0 }
 0x670   :  { %1545 = vmatmul.mubr.msk.f32.vlgmr.msra.gmra.mrb[16].mxu1 %vm282_vm7, %v1192_v9 }
 0x73f   :  { %v1116_v11 = vpop.f32.mrb[14].mxu1 }
 0x740   :  { %v1120_v12 = vmul.f32 0.0625, %v1116_v11  ;;  %v1534_v13 = vpop.f32.mrb[15].mxu1 }
 0x742   :  { %v1270_v33 = vmul.f32 %v1120_v12, %v1120_v12  ;;  %v1280_v37 = vrot.slane %v1120_v12, %v1840_v44 }
 0x743   :  { %v1265_v14 = vpop.f32.mrb[16].mxu1 }
 0x744   :  { %v1269_v15 = vmul.f32 0.0625, %v1265_v14  ;;  %v1546_v30 = vpop.f32.mrb[17].mxu1  ;;  %v1281_v22 = vcombine.high %v1280_v37, %v1280_v37  ;;  %v1288_v23 = vrot.slane %v1280_v37, %v1840_v44 }
 0x746   :  { %v1271_v16 = vsub.f32 %v1269_v15, %v1270_v33  ;;  %v1295_v25 = vrot.slane %v1281_v22, %v1840_v44  ;;  %v1299_v27 = vrot.slane %v1288_v23, %v1847_v60 }
 0x748   :  { %v1272_v17 = vmax.f32 %v1271_v16, 0.0  ;;  %v1303_v28 = vrot.slane %v1295_v25, %v1847_v60  ;;  %v1306_v32 = vsub.f32 %v1904_v26, %v1299_v27 }
 0x74a   :  { %v1315_v18 = vrot.slane %v1272_v17, %v1840_v44  ;;  %v1307_v38 = vsub.f32 %v1910_v34, %v1303_v28 }
 0x74c   :  { %v1316_v19 = vcombine.high %v1315_v18, %v1315_v18  ;;  %v1323_v52 = vrot.slane %v1315_v18, %v1840_v44 }
 0x74e   :  { %v1330_v2 = vrot.slane %v1316_v19, %v1840_v44  ;;  %v1333_v20 = vadd.f32 1e-05, %v1323_v52  ;;  %v1426_v44 = vld [vmem:[%s1974_s15] ss:$0 sm:$0xff] }
 0x750   :  { %v1334_v21 = vadd.f32 1e-05, %v1330_v2  ;;  %1607 = vrsqrt.f32 %v1333_v20 }
 0x752   :  { %1609 = vrsqrt.f32 %v1334_v21 }
 0x75a   :  { %v1608_v31 = vpop.eup %1607 }
 0x75b   :  { %v1342_v29 = vrot.slane %v1608_v31, %v1847_v60 }
 0x75c   :  { %v1610_v35 = vpop.eup %1609 }
 0x75d   :  { %v1346_v24 = vrot.slane %v1610_v35, %v1847_v60  ;;  %v1349_v39 = vmul.f32 %v1342_v29, %v1306_v32 }
 0x75f   :  { %v1350_v40 = vmul.f32 %v1346_v24, %v1307_v38  ;;  %v1357_v41 = vmul.f32 %v1425_v36, %v1349_v39 }
 0x761   :  { %v1358_v42 = vmul.f32 %v1425_v36, %v1350_v40  ;;  %v1365_v26 = vadd.f32 %v1426_v44, %v1357_v41 }
 0x763   :  { %v1366_v43 = vadd.f32 %v1426_v44, %v1358_v42  ;;  %v1367_v45 = vmin.f32 %v1365_v26, 20.0 }
 0x765   :  { %v1368_v46 = vmin.f32 %v1366_v43, 20.0  ;;  %v1369_v47 = vmul.f32 1.442695, %v1367_v45 }
 0x767   :  { %1611 = vpow2.f32 %v1369_v47  ;;  %v1371_v48 = vmul.f32 1.442695, %v1368_v46 }
 0x769   :  { %1613 = vpow2.f32 %v1371_v48 }
 0x771   :  { %v1612_v49 = vpop.eup %1611 }
 0x772   :  { %v1373_v34 = vadd.f32 1.0, %v1612_v49 }
 0x773   :  { %v1614_v50 = vpop.eup %1613 }
 0x774   :  { %v1374_v60 = vadd.f32 1.0, %v1614_v50  ;;  %v1375_v51 = vmul.f32 %v1373_v34, %v1373_v34 }
 0x776   :  { %v1376_v53 = vmul.f32 %v1374_v60, %v1374_v60  ;;  %v1381_v54 = vadd.f32 1.0, %v1375_v51  ;;  %v1427_v56 = vadd.f32 -1.0, %v1375_v51 }
 0x778   :  { %v1382_v55 = vadd.f32 1.0, %v1376_v53  ;;  %1615 = vrcp.f32 %v1381_v54  ;;  %v1428_v57 = vadd.f32 -1.0, %v1376_v53  ;;  %v1379_v58 = vmul.f32 %v1427_v56, %v1365_v26 }
 0x77a   :  { %1617 = vrcp.f32 %v1382_v55  ;;  %v1380_v61 = vmul.f32 %v1428_v57, %v1366_v43 }
 0x782   :  { %v1616_v59 = vpop.eup %1615 }
 0x783   :  { %v1385_v62 = vmul.f32 %v1616_v59, %v1379_v58 }
 0x784   :  { %v1618_v63 = vpop.eup %1617 }
 0x785   :  { %v1386_v3 = vmul.f32 %v1618_v63, %v1380_v61  ;;  %v1387_v4 = vadd.f32 %v1385_v62, %v1713_v0 }
 0x787   :  { %v1388_v5 = vadd.f32 %v1386_v3, %v1718_v1  ;;  %1389 = vst.msk [vmem:[%s1975_s16] sm:$0xff] %vm89_vm3, %v1387_v4 }
 0x789   :  { %1390 = vst.msk [vmem:[%s1975_s16 + $0x8] sm:$0xff] %vm89_vm3, %v1388_v5 }

// kernel: unet_forward.18
= control target key start
LH: loop header
LB: loop body
LE: loop exit
PB: predicated region body
PF: predicated region fallthrough
CT: control target
= control target key end

     0   :  { %vm80_vm0 = vcmask 1042432   ;;  %v1777_v2 = vmov 0.0   ;;  %s1778_s19 = smov 16   ;;  %s1779_s23 = smov 32   ;;  %vm1780_vm1 = vmmov 0   ;;  %vm73_vm2 = vcmask 1040384   ;;  %s2156_s0 = inlined_call_operand.vmem [shape: f32[2,4,16], index: 0, kind: input, shape index: {}]   ;;  %s2157_s2 = inlined_call_operand.vmem [shape: bf16[48,32], index: 2, kind: input, shape index: {}]   ;;  %s2158_s6 = inlined_call_operand.vmem [shape: f32[32,8], index: 6, kind: input, shape index: {}]   ;;  %s2159_s3 = inlined_call_operand.vmem [shape: f32[1,32], index: 3, kind: input, shape index: {}]   ;;  %s2160_s7 = inlined_call_operand.vmem [shape: f32[8,32], index: 7, kind: input, shape index: {}]   ;;  %s2161_s8 = inlined_call_operand.vmem [shape: bf16[24,32], index: 8, kind: input, shape index: {}]   ;;  %s2162_s10 = inlined_call_operand.vmem [shape: bf16[24,32], index: 10, kind: input, shape index: {}]   ;;  %s2163_s1 = inlined_call_operand.vmem [shape: f32[2,24], index: 1, kind: input, shape index: {}]   ;;  %s2164_s12 = inlined_call_operand.vmem [shape: bf16[96,32], index: 12, kind: input, shape index: {}]   ;;  %s2165_s4 = inlined_call_operand.vmem [shape: f32[1,32], index: 4, kind: input, shape index: {}]   ;;  %s2166_s5 = inlined_call_operand.vmem [shape: f32[1,32], index: 5, kind: input, shape index: {}]   ;;  %s2167_s9 = inlined_call_operand.vmem [shape: f32[1,32], index: 9, kind: input, shape index: {}]   ;;  %s2168_s11 = inlined_call_operand.vmem [shape: f32[1,32], index: 11, kind: input, shape index: {}]   ;;  %s2169_s13 = inlined_call_operand.vmem [shape: f32[1,32], index: 13, kind: input, shape index: {}]   ;;  %s2170_s16 = inlined_call_operand.vmem [shape: bf16[16,32], index: 16, kind: input, shape index: {}]   ;;  %s2171_s14 = inlined_call_operand.vmem [shape: f32[1,32], index: 14, kind: input, shape index: {}]   ;;  %s2172_s15 = inlined_call_operand.vmem [shape: f32[1,32], index: 15, kind: input, shape index: {}]   ;;  %s2173_s17 = inlined_call_operand.vmem [shape: f32[1,32], index: 17, kind: input, shape index: {}]   ;;  %s2174_s18 = inlined_call_operand.vmem [shape: f32[2,4,32], index: 18, kind: output, shape index: {}]  }
   0x1   :  { %2178 = sst [smem:[#allocation2_spill]] %s2156_s0  ;;  %1595 = vmatprep.subr.bf16.mxu0 %v1777_v2  ;;  %1601 = vmatprep.mubr.msk.bf16.mxu0 %vm1780_vm1, %v1777_v2  ;;  %vm97_vm3 = vcmask 130048   ;;  %vm100_vm4 = vcmask 261120   ;;  %vm132_vm5 = vcmask 392192   ;;  %v1781_v28 = vmov 0.0|0.0  }
   0x2   :  { %2179 = sst [smem:[#allocation3_spill]] %s2157_s2  ;;  %s2181_s29 = sld [smem:[#allocation2_spill]]  ;;  %1613 = vmatprep.mubr.msk.f32.mxu1 %vm1780_vm1, %v1777_v2  ;;  %1707 = vmatprep.subr.bf16.mxu1 %v1781_v28  ;;  %v1512_v32 = vld [vmem:[%s2159_s3] ss:$0 sm:$0xff]  ;;  %vm190_vm6 = vcmask 257024   ;;  %vm223_vm7 = vcmask 1041409  }
   0x3   :  { %2180 = sst [smem:[#allocation4_spill]] %s2158_s6  ;;  %s2182_s21 = sld [smem:[#allocation3_spill]]  ;;  %vm663_vm8 = vcmask 1043456   ;;  %vm659_vm9 = vcmask 195584   ;;  %vm297_vm10 = vcmask 64512   ;;  %vm875_vm11 = vcmask 523264  }
   0x4   :  { %s2183_s28 = sld [smem:[#allocation4_spill]]  ;;  %vm931_vm12 = vcmask 785408  }
   0x8   :  { %v60_v0 = vld [vmem:[%s2181_s29] sm:$0xf]  ;;  %v61_v1 = vld [vmem:[%s2181_s29 + $0x4] sm:$0xf] }
   0x9   :  { %83 = vrot.lane.b32.xlu0 %v60_v0, %s1778_s19  ;;  %v76_v3 = vrot.slane %v60_v0, 1  ;;  %v1886_v4 = vcombine.low %v60_v0, %v61_v1  ;;  %v77_v5 = vrot.slane %v61_v1, 1  ;;  %v1739_v6 = vld [vmem:[%s2182_s21] sm:$0xff]   ;;  %v1740_v8 = vld [vmem:[%s2182_s21 + $0x8] sm:$0xff]   ;;  %v1741_v10 = vld [vmem:[%s2182_s21 + $0x10] sm:$0xff]   ;;  %v69_v11 = vrot.slane %v60_v0, 7 }
   0xa   :  { %1596 = vmatpush3.bf16.msra.mxu0 %v1739_v6  ;;  %v70_v12 = vrot.slane %v61_v1, 7  ;;  %v62_v25 = vld [vmem:[%s2183_s28] sm:$0xff]  ;;  %v63_v26 = vld [vmem:[%s2183_s28 + $0x8] sm:$0xff]  ;;  %v64_v29 = vld [vmem:[%s2183_s28 + $0x10] sm:$0xff] }
   0xb   :  { %v81_v7 = vsel %vm80_vm0, %v76_v3, 0.0  ;;  %1597 = vmatprep.subr.bf16.mxu0 %v1777_v2  ;;  %v82_v9 = vsel %vm80_vm0, %v77_v5, 0.0  ;;  %v74_v14 = vsel %vm73_vm2, 0.0, %v69_v11  ;;  %v1921_v27 = vpack.c.bf16 %v63_v26, %v62_v25  ;;  %v65_v30 = vld [vmem:[%s2183_s28 + $0x18] sm:$0xff]  ;;  %v1961_v6 = vld [vmem:[%s2160_s7] sm:$0xff] }
   0xc   :  { %91 = vrot.lane.b32.xlu1 %v81_v7, %s1779_s23  ;;  %v75_v15 = vsel %vm73_vm2, 0.0, %v70_v12  ;;  %v1934_v31 = vpack.c.bf16 %v65_v30, %v64_v29  ;;  %v1743_v11 = vld [vmem:[%s2161_s8 + $0x8] ss:$0 sps:$4 sm:$0xff]   ;;  %v1746_v29 = vld [vmem:[%s2164_s12] sm:$0xff]  }
   0xd   :  { %85 = vrot.lane.b32.xlu0 %v61_v1, %s1778_s19  ;;  %1709 = vmatpush3.bf16.msra.mxu1 %v1921_v27  ;;  %v665_v12 = vsel %vm663_vm8, %v1743_v11, 0  ;;  %v1747_v30 = vld [vmem:[%s2164_s12 + $0x8] sm:$0xff]  }
   0xe   :  { %1598 = vmatpush3.bf16.msra.mxu0 %v1740_v8  ;;  %1710 = vmatprep.subr.bf16.mxu1 %v1781_v28 }
   0xf   :  { %1599 = vmatprep.subr.bf16.mxu0 %v1777_v2 }
  0x10   :  { %93 = vrot.lane.b32.xlu1 %v82_v9, %s1779_s23 }
  0x11   :  { %1712 = vmatpush3.bf16.msra.mxu1 %v1934_v31 }
  0x12   :  { %1600 = vmatpush3.bf16.msra.mxu0 %v1741_v10  ;;  %1616 = vmatprep.subr.mxu1 %v1777_v2 }
  0x13   :  { %1713 = vmatprep.subr.bf16.mxu0 %v1781_v28 }
  0x7b   :  { %v84_v13 = vpop.permute.xlu0 %83 }
  0x7c   :  { %v98_v18 = vsel %vm97_vm3, %v74_v14, %v84_v13  ;;  %v1744_v13 = vld [vmem:[%s2162_s10] sm:$0xff]   ;;  %v1745_v14 = vld [vmem:[%s2162_s10 + $0x8] ss:$0 sps:$4 sm:$0xff]  }
  0x7e   :  { %v92_v16 = vpop.permute.xlu1 %91 }
  0x7f   :  { %v86_v17 = vpop.permute.xlu0 %85  ;;  %v101_v21 = vsel %vm100_vm4, %v98_v18, %v92_v16  ;;  %v727_v16 = vsel %vm663_vm8, %v1745_v14, 0  ;;  %v1518_v14 = vld [vmem:[%s2166_s5] ss:$0 sm:$0xff] }
  0x80   :  { %v99_v19 = vsel %vm97_vm3, %v75_v15, %v86_v17  ;;  %v638_v15 = vld [vmem:[%s2163_s1] sm:$0x3] }
  0x81   :  { %v639_v17 = vpack.c.bf16 %v638_v15, %v638_v15 }
  0x82   :  { %v94_v20 = vpop.permute.xlu1 %93 }
  0x83   :  { %v102_v22 = vsel %vm100_vm4, %v99_v19, %v94_v20 }
  0x84   :  { %v105_v23 = vcombine.low %v101_v21, %v102_v22  ;;  %v1742_v21 = vld [vmem:[%s2161_s8] sm:$0xff]  }
  0x86   :  { %v107_v24 = vpack.c.bf16 %v105_v23, %v105_v23 }
  0x88   :  { %1602 = vmatmul.mubr.msk.bf16.vlgmr.msra.gmra.mrb[0].mxu0 %vm132_vm5, %v107_v24 }
  0x89   :  { %1629 = vmatprep.mubr.msk.f32.mxu0 %vm1780_vm1, %v1777_v2  ;;  %1715 = vmatpush3.bf16.msra.mxu0 %v1921_v27 }
  0x8a   :  { %1716 = vmatprep.subr.bf16.mxu0 %v1781_v28 }
  0x8d   :  { %1718 = vmatpush3.bf16.msra.mxu0 %v1934_v31 }
  0x8e   :  { %1645 = vmatprep.subr.bf16.mxu0 %v1777_v2 }
 0x15b   :  { %v170_v33 = vpop.f32.mrb[0].mxu0 }
 0x15c   :  { %v177_v34 = vcombine.high %v170_v33, %v170_v33  ;;  %v1944_v35 = vadd.f32 %v1512_v32, %v170_v33  ;;  %v1603_v36 = vpop.f32.mrb[1].mxu0 }
 0x15d   :  { %v173_v37 = vpop.f32.mrb[2].mxu0  ;;  %v1782_v36 = vmov 1966171168  }
 0x15e   :  { %v1946_v38 = vadd.f32 %v1512_v32, %v177_v34  ;;  %v191_v39 = vsel %vm190_vm6, %v1944_v35, 0.0  ;;  %v205_v40 = vmul.f32 %v1944_v35, %v1944_v35  ;;  %v1604_v41 = vpop.f32.mrb[3].mxu0  ;;  %v1748_v32 = vld [vmem:[%s2164_s12 + $0x10] sm:$0xff]   ;;  %v526_v37 = vunpack.c.l.s4 %v1782_v36 }
 0x15f   :  { %v192_v42 = vrot.slane %v191_v39, 4 }
 0x160   :  { %v198_v43 = vsel %vm190_vm6, %v1946_v38, 0.0  ;;  %v206_v44 = vmul.f32 %v1946_v38, %v1946_v38  ;;  %v207_v45 = vsel %vm190_vm6, %v205_v40, 0.0 }
 0x161   :  { %v193_v46 = vadd.f32 %v192_v42, %v191_v39  ;;  %v199_v47 = vrot.slane %v198_v43, 4  ;;  %v208_v48 = vrot.slane %v207_v45, 4  ;;  %v528_v39 = vlaneseq }
 0x162   :  { %v214_v49 = vsel %vm190_vm6, %v206_v44, 0.0 }
 0x163   :  { %v194_v50 = vrot.slane %v193_v46, 2  ;;  %v200_v51 = vadd.f32 %v199_v47, %v198_v43  ;;  %v209_v52 = vadd.f32 %v208_v48, %v207_v45  ;;  %v215_v53 = vrot.slane %v214_v49, 4 }
 0x164   :  { %v527_v43 = vunpack.c.0.s8 %v526_v37  ;;  %v529_v44 = vshrl.u32 %v528_v39, 7 }
 0x165   :  { %v195_v54 = vadd.f32 %v194_v50, %v193_v46  ;;  %v201_v55 = vrot.slane %v200_v51, 2  ;;  %v210_v56 = vrot.slane %v209_v52, 2  ;;  %v216_v57 = vadd.f32 %v215_v53, %v214_v49 }
 0x166   :  { %v2022_v48 = vsub.s32 %v527_v43, %v529_v44 }
 0x167   :  { %v211_v58 = vadd.f32 %v210_v56, %v209_v52  ;;  %v217_v59 = vrot.slane %v216_v57, 2  ;;  %v196_v60 = vrot.slane %v195_v54, 1  ;;  %v202_v61 = vadd.f32 %v201_v55, %v200_v51 }
 0x169   :  { %v203_v62 = vrot.slane %v202_v61, 1  ;;  %v212_v63 = vrot.slane %v211_v58, 1  ;;  %v218_v0 = vadd.f32 %v217_v59, %v216_v57  ;;  %v197_v1 = vadd.f32 %v196_v60, %v195_v54 }
 0x16b   :  { %v204_v3 = vadd.f32 %v203_v62, %v202_v61  ;;  %v219_v5 = vrot.slane %v218_v0, 1  ;;  %v213_v8 = vadd.f32 %v212_v63, %v211_v58  ;;  %v2029_v63 = vsub.s32 0, %v529_v44  ;;  %v1749_v44 = vld [vmem:[%s2164_s12 + $0x18] sm:$0xff]  }
 0x16d   :  { %v224_v7 = vsel %vm223_vm7, %v204_v3, %v197_v1  ;;  %v220_v9 = vadd.f32 %v219_v5, %v218_v0 }
 0x16e   :  { %1614 = vmatmul.mubr.msk.f32.vlgmr.msra.gmra.mrb[0].mxu1 %vm100_vm4, %v224_v7 }
 0x16f   :  { %v374_v10 = vsel %vm223_vm7, %v220_v9, %v213_v8  ;;  %1617 = vmatpush3.msra.mxu1 %v1961_v6  ;;  %1618 = vmatprep.mubr.msk.f32.mxu1 %vm1780_vm1, %v1777_v2 }
 0x170   :  { %1630 = vmatmul.mubr.msk.f32.vlgmr.msra.gmra.mrb[4].mxu0 %vm100_vm4, %v374_v10  ;;  %1632 = vmatprep.subr.mxu1 %v1777_v2  ;;  %v1517_v10 = vld [vmem:[%s2165_s4] ss:$0 sm:$0xff] }
 0x171   :  { %1649 = vmatprep.mubr.msk.bf16.mxu0 %vm1780_vm1, %v1777_v2  ;;  %1646 = vmatpush3.bf16.msra.mxu0 %v1744_v13 }
 0x172   :  { %1647 = vmatprep.subr.bf16.mxu0 %v1777_v2 }
 0x175   :  { %1648 = vmatpush3.bf16.msra.mxu0 %v727_v16 }
 0x176   :  { %1680 = vmatprep.subr.mxu0 %v1777_v2 }
 0x178   :  { %1650 = vmatmul.mubr.msk.bf16.vlgmr.msra.gmra.mrb[8].mxu0 %vm659_vm9, %v639_v17 }
 0x179   :  { %1681 = vmatpush3.msra.mxu0 %v1961_v6  ;;  %1682 = vmatprep.mubr.msk.f32.mxu0 %vm1780_vm1, %v1777_v2 }
 0x17a   :  { %1725 = vmatprep.subr.bf16.mxu0 %v1781_v28 }
 0x241   :  { %v293_v18 = vpop.f32.mrb[0].mxu1 }
 0x242   :  { %v1615_v19 = vpop.f32.mrb[1].mxu1  ;;  %1619 = vmatmul.mubr.msk.f32.vlgmr.msra.gmra.mrb[2].mxu1 %vm297_vm10, %v293_v18 }
 0x243   :  { %1633 = vmatpush3.msra.mxu1 %v1961_v6  ;;  %v443_v20 = vpop.f32.mrb[4].mxu0  ;;  %1634 = vmatprep.mubr.msk.f32.mxu1 %vm1780_vm1, %v1777_v2 }
 0x244   :  { %v1631_v22 = vpop.f32.mrb[5].mxu0  ;;  %1637 = vmatprep.subr.bf16.mxu1 %v1777_v2 }
 0x246   :  { %1635 = vmatmul.mubr.msk.f32.vlgmr.msra.gmra.mrb[4].mxu1 %vm297_vm10, %v443_v20 }
 0x247   :  { %1638 = vmatpush3.bf16.msra.mxu1 %v1742_v21  ;;  %1641 = vmatprep.mubr.msk.bf16.mxu1 %vm1780_vm1, %v1777_v2 }
 0x248   :  { %1639 = vmatprep.subr.bf16.mxu1 %v1777_v2 }
 0x24b   :  { %1640 = vmatpush3.bf16.msra.mxu1 %v665_v12  ;;  %v2008_v23 = vpop.f32.mrb[8].mxu0 }
 0x24c   :  { %1653 = vmatprep.subr.bf16.mxu1 %v1777_v2  ;;  %v1651_v24 = vpop.f32.mrb[9].mxu0 }
 0x24d   :  { %v766_v25 = vpop.f32.mrb[10].mxu0 }
 0x24e   :  { %1642 = vmatmul.mubr.msk.bf16.vlgmr.msra.gmra.mrb[8].mxu1 %vm659_vm9, %v639_v17  ;;  %v1652_v26 = vpop.f32.mrb[11].mxu0 }
 0x24f   :  { %1665 = vmatprep.mubr.msk.bf16.mxu1 %vm1780_vm1, %v1777_v2  ;;  %1654 = vmatpush3.bf16.msra.mxu1 %v1746_v29  ;;  %v1525_v26 = vld [vmem:[%s2168_s11] ss:$0 sm:$0xff] }
 0x250   :  { %1655 = vmatprep.subr.bf16.mxu1 %v1777_v2  ;;  %v764_v36 = vadd.f32 %v1525_v26, %v2008_v23  ;;  %v1536_v26 = vld [vmem:[%s2169_s13] ss:$0 sm:$0xff] }
 0x252   :  { %v817_v43 = vrot.slane %v764_v36, %v2022_v48 }
 0x253   :  { %1656 = vmatpush3.bf16.msra.mxu1 %v1747_v30 }
 0x254   :  { %1657 = vmatprep.subr.bf16.mxu1 %v1777_v2 }
 0x257   :  { %1658 = vmatpush3.bf16.msra.mxu1 %v1748_v32 }
 0x258   :  { %1659 = vmatprep.subr.bf16.mxu1 %v1777_v2 }
 0x25b   :  { %1660 = vmatpush3.bf16.msra.mxu1 %v1749_v44 }
 0x25c   :  { %1661 = vmatprep.subr.bf16.mxu1 %v1777_v2 }
 0x315   :  { %v367_v33 = vpop.f32.mrb[2].mxu1 }
 0x316   :  { %v371_v34 = vmul.f32 0.0625, %v367_v33  ;;  %v1620_v40 = vpop.f32.mrb[3].mxu1 }
 0x318   :  { %v521_v42 = vmul.f32 %v371_v34, %v371_v34  ;;  %v531_v55 = vrot.slane %v371_v34, %v2022_v48 }
 0x319   :  { %v516_v41 = vpop.f32.mrb[4].mxu1 }
 0x31a   :  { %v520_v45 = vmul.f32 0.0625, %v516_v41  ;;  %v1636_v46 = vpop.f32.mrb[5].mxu1  ;;  %v532_v61 = vcombine.high %v531_v55, %v531_v55  ;;  %v539_v62 = vrot.slane %v531_v55, %v2022_v48 }
 0x31c   :  { %v522_v47 = vsub.f32 %v520_v45, %v521_v42  ;;  %v546_v0 = vrot.slane %v532_v61, %v2022_v48  ;;  %v550_v1 = vrot.slane %v539_v62, %v2029_v63 }
 0x31e   :  { %v523_v49 = vmax.f32 %v522_v47, 0.0  ;;  %v554_v3 = vrot.slane %v546_v0, %v2029_v63  ;;  %v557_v7 = vsub.f32 %v1944_v35, %v550_v1  ;;  %v818_v47 = vcombine.high %v817_v43, %v817_v43 }
 0x320   :  { %v566_v50 = vrot.slane %v523_v49, %v2022_v48  ;;  %v558_v11 = vsub.f32 %v1946_v38, %v554_v3  ;;  %v1521_v38 = vld [vmem:[%s2167_s9] ss:$0 sm:$0xff] }
 0x321   :  { %v701_v51 = vpop.f32.mrb[8].mxu1  ;;  %v1750_v49 = vld [vmem:[%s2164_s12 + $0x20] sm:$0xff]  }
 0x322   :  { %v567_v52 = vcombine.high %v566_v50, %v566_v50  ;;  %v574_v53 = vrot.slane %v566_v50, %v2022_v48  ;;  %v1643_v54 = vpop.f32.mrb[9].mxu1  ;;  %v702_v24 = vadd.f32 %v1521_v38, %v701_v51  ;;  %v825_v51 = vrot.slane %v817_v43, %v2022_v48  ;;  %1662 = vmatpush3.bf16.msra.mxu1 %v1750_v49 }
 0x323   :  { %v704_v56 = vpop.f32.mrb[10].mxu1  ;;  %v832_v54 = vrot.slane %v818_v47, %v2022_v48  ;;  %1663 = vmatprep.subr.bf16.mxu1 %v1777_v2 }
 0x324   :  { %v581_v57 = vrot.slane %v567_v52, %v2022_v48  ;;  %v584_v58 = vadd.f32 1e-05, %v574_v53  ;;  %v1644_v59 = vpop.f32.mrb[11].mxu1  ;;  %v776_v32 = vrot.slane %v702_v24, %v2022_v48 }
 0x325   :  { %v836_v59 = vrot.slane %v825_v51, %v2029_v63  ;;  %v840_v3 = vrot.slane %v832_v54, %v2029_v63 }
 0x326   :  { %v585_v60 = vadd.f32 1e-05, %v581_v57  ;;  %1753 = vrsqrt.f32 %v584_v58  ;;  %v777_v40 = vcombine.high %v776_v32, %v776_v32  ;;  %v784_v42 = vrot.slane %v776_v32, %v2022_v48  ;;  %v1751_v57 = vld [vmem:[%s2164_s12 + $0x28] sm:$0xff]   ;;  %s1783_s12 = smov 64  }
 0x327   :  { %1664 = vmatpush3.bf16.msra.mxu1 %v1751_v57 }
 0x328   :  { %1755 = vrsqrt.f32 %v585_v60  ;;  %v791_v45 = vrot.slane %v777_v40, %v2022_v48  ;;  %v794_v46 = vadd.f32 1.0, %v784_v42  ;;  %1719 = vmatprep.subr.bf16.mxu1 %v1781_v28 }
 0x32a   :  { %v795_v50 = vadd.f32 1.0, %v791_v45  ;;  %v801_v53 = vrot.slane %v794_v46, %v2029_v63 }
 0x32c   :  { %v805_v61 = vrot.slane %v795_v50, %v2029_v63 }
 0x330   :  { %v1754_v5 = vpop.eup %1753 }
 0x331   :  { %v593_v8 = vrot.slane %v1754_v5, %v2029_v63 }
 0x332   :  { %v1756_v9 = vpop.eup %1755 }
 0x333   :  { %v600_v12 = vmul.f32 %v593_v8, %v557_v7  ;;  %v597_v13 = vrot.slane %v1756_v9, %v2029_v63 }
 0x335   :  { %v608_v15 = vmul.f32 %v1517_v10, %v600_v12  ;;  %v601_v16 = vmul.f32 %v597_v13, %v558_v11 }
 0x337   :  { %v616_v17 = vadd.f32 %v1518_v14, %v608_v15  ;;  %v609_v35 = vmul.f32 %v1517_v10, %v601_v16 }
 0x339   :  { %v618_v18 = vmin.f32 %v616_v17, 20.0  ;;  %v617_v19 = vadd.f32 %v1518_v14, %v609_v35 }
 0x33b   :  { %v620_v20 = vmul.f32 1.442695, %v618_v18  ;;  %v619_v21 = vmin.f32 %v617_v19, 20.0 }
 0x33d   :  { %1757 = vpow2.f32 %v620_v20  ;;  %v622_v22 = vmul.f32 1.442695, %v619_v21 }
 0x33f   :  { %1759 = vpow2.f32 %v622_v22 }
 0x347   :  { %v1758_v25 = vpop.eup %1757 }
 0x348   :  { %v624_v29 = vadd.f32 1.0, %v1758_v25 }
 0x349   :  { %v1760_v30 = vpop.eup %1759 }
 0x34a   :  { %v626_v33 = vmul.f32 %v624_v29, %v624_v29  ;;  %v625_v34 = vadd.f32 1.0, %v1760_v30 }
 0x34c   :  { %v632_v37 = vadd.f32 1.0, %v626_v33  ;;  %v627_v39 = vmul.f32 %v625_v34, %v625_v34  ;;  %v1519_v23 = vadd.f32 -1.0, %v626_v33 }
 0x34e   :  { %1761 = vrcp.f32 %v632_v37  ;;  %v633_v41 = vadd.f32 1.0, %v627_v39  ;;  %v1520_v52 = vadd.f32 -1.0, %v627_v39  ;;  %v630_v55 = vmul.f32 %v1519_v23, %v616_v17 }
 0x350   :  { %1763 = vrcp.f32 %v633_v41  ;;  %v631_v60 = vmul.f32 %v1520_v52, %v617_v19 }
 0x358   :  { %v1762_v56 = vpop.eup %1761 }
 0x359   :  { %v636_v58 = vmul.f32 %v1762_v56, %v630_v55 }
 0x35a   :  { %v1764_v62 = vpop.eup %1763 }
 0x35b   :  { %v808_v0 = vmul.f32 %v801_v53, %v636_v58  ;;  %v637_v1 = vmul.f32 %v1764_v62, %v631_v60 }
 0x35d   :  { %v843_v5 = vadd.f32 %v836_v59, %v808_v0  ;;  %v809_v7 = vmul.f32 %v805_v61, %v637_v1 }
 0x35f   :  { %859 = vrot.lane.b32.xlu0 %v843_v5, %s1779_s23  ;;  %v844_v8 = vadd.f32 %v840_v3, %v809_v7  ;;  %v853_v9 = vrot.slane %v843_v5, 1  ;;  %v847_v14 = vrot.slane %v843_v5, 7 }
 0x361   :  { %861 = vrot.lane.b32.xlu1 %v844_v8, %s1779_s23  ;;  %v857_v10 = vsel %vm80_vm0, %v853_v9, 0.0  ;;  %v854_v11 = vrot.slane %v844_v8, 1  ;;  %v848_v15 = vrot.slane %v844_v8, 7  ;;  %v851_v35 = vsel %vm73_vm2, 0.0, %v847_v14 }
 0x362   :  { %v1436_v14 = vpack.c.bf16 %v1886_v4, %v1886_v4 }
 0x363   :  { %867 = vrot.lane.b32.xlu0 %v857_v10, %s1783_s12  ;;  %v858_v12 = vsel %vm80_vm0, %v854_v11, 0.0  ;;  %v852_v18 = vsel %vm73_vm2, 0.0, %v848_v15 }
 0x365   :  { %869 = vrot.lane.b32.xlu1 %v858_v12, %s1783_s12 }
 0x3d1   :  { %v860_v13 = vpop.permute.xlu0 %859 }
 0x3d2   :  { %v873_v19 = vsel %vm100_vm4, %v851_v35, %v860_v13 }
 0x3d3   :  { %v862_v16 = vpop.permute.xlu1 %861 }
 0x3d4   :  { %v874_v20 = vsel %vm100_vm4, %v852_v18, %v862_v16 }
 0x3d5   :  { %v868_v17 = vpop.permute.xlu0 %867 }
 0x3d6   :  { %v876_v22 = vsel %vm875_vm11, %v873_v19, %v868_v17 }
 0x3d7   :  { %v870_v21 = vpop.permute.xlu1 %869 }
 0x3d8   :  { %v877_v38 = vsel %vm875_vm11, %v874_v20, %v870_v21 }
 0x3d9   :  { %v880_v24 = vcombine.low %v876_v22, %v877_v38 }
 0x3db   :  { %v882_v25 = vpack.c.bf16 %v880_v24, %v880_v24 }
 0x3dd   :  { %1666 = vmatmul.mubr.msk.bf16.vlgmr.msra.gmra.mrb[12].mxu1 %vm931_vm12, %v882_v25 }
 0x3de   :  { %1721 = vmatpush3.bf16.msra.mxu1 %v1921_v27  ;;  %1677 = vmatprep.mubr.msk.f32.mxu1 %vm1780_vm1, %v1777_v2 }
 0x3df   :  { %1722 = vmatprep.subr.bf16.mxu1 %v1781_v28 }
 0x3e2   :  { %1724 = vmatpush3.bf16.msra.mxu1 %v1934_v31 }
 0x4b0   :  { %v969_v29 = vpop.f32.mrb[12].mxu1 }
 0x4b1   :  { %v976_v30 = vcombine.high %v969_v29, %v969_v29  ;;  %v2089_v32 = vadd.f32 %v1536_v26, %v969_v29  ;;  %v1667_v33 = vpop.f32.mrb[13].mxu1 }
 0x4b2   :  { %v972_v34 = vpop.f32.mrb[14].mxu1 }
 0x4b3   :  { %v2091_v36 = vadd.f32 %v1536_v26, %v976_v30  ;;  %v989_v37 = vsel %vm190_vm6, %v2089_v32, 0.0  ;;  %v1668_v39 = vpop.f32.mrb[15].mxu1  ;;  %v1003_v55 = vmul.f32 %v2089_v32, %v2089_v32 }
 0x4b4   :  { %v990_v40 = vrot.slane %v989_v37, 4 }
 0x4b5   :  { %v996_v41 = vsel %vm190_vm6, %v2091_v36, 0.0  ;;  %v1004_v54 = vmul.f32 %v2091_v36, %v2091_v36  ;;  %v1005_v57 = vsel %vm190_vm6, %v1003_v55, 0.0 }
 0x4b6   :  { %v991_v42 = vadd.f32 %v990_v40, %v989_v37  ;;  %v997_v43 = vrot.slane %v996_v41, 4  ;;  %v1006_v59 = vrot.slane %v1005_v57, 4 }
 0x4b7   :  { %v1012_v56 = vsel %vm190_vm6, %v1004_v54, 0.0 }
 0x4b8   :  { %v992_v44 = vrot.slane %v991_v42, 2  ;;  %v998_v45 = vadd.f32 %v997_v43, %v996_v41  ;;  %v1013_v58 = vrot.slane %v1012_v56, 4  ;;  %v1007_v61 = vadd.f32 %v1006_v59, %v1005_v57 }
 0x4ba   :  { %v993_v46 = vadd.f32 %v992_v44, %v991_v42  ;;  %v999_v47 = vrot.slane %v998_v45, 2  ;;  %v1014_v60 = vadd.f32 %v1013_v58, %v1012_v56  ;;  %v1008_v0 = vrot.slane %v1007_v61, 2 }
 0x4bc   :  { %v994_v23 = vrot.slane %v993_v46, 1  ;;  %v1000_v49 = vadd.f32 %v999_v47, %v998_v45  ;;  %v1015_v62 = vrot.slane %v1014_v60, 2  ;;  %v1009_v3 = vadd.f32 %v1008_v0, %v1007_v61 }
 0x4be   :  { %v1001_v50 = vrot.slane %v1000_v49, 1  ;;  %v995_v51 = vadd.f32 %v994_v23, %v993_v46  ;;  %v1016_v1 = vadd.f32 %v1015_v62, %v1014_v60  ;;  %v1010_v9 = vrot.slane %v1009_v3, 1  ;;  %v1541_v46 = vld [vmem:[%s2171_s14] ss:$0 sm:$0xff] }
 0x4c0   :  { %v1002_v52 = vadd.f32 %v1001_v50, %v1000_v49  ;;  %v1017_v7 = vrot.slane %v1016_v1, 1  ;;  %v1011_v11 = vadd.f32 %v1010_v9, %v1009_v3  ;;  %v1547_v3 = vld [vmem:[%s2173_s17] ss:$0 sm:$0xff] }
 0x4c2   :  { %v1021_v53 = vsel %vm223_vm7, %v1002_v52, %v995_v51  ;;  %v1018_v10 = vadd.f32 %v1017_v7, %v1016_v1 }
 0x4c3   :  { %1678 = vmatmul.mubr.msk.f32.vlgmr.msra.gmra.mrb[6].mxu1 %vm100_vm4, %v1021_v53 }
 0x4c4   :  { %v1170_v12 = vsel %vm223_vm7, %v1018_v10, %v1011_v11 }
 0x596   :  { %v1090_v5 = vpop.f32.mrb[6].mxu1 }
 0x597   :  { %v1679_v8 = vpop.f32.mrb[7].mxu1  ;;  %1683 = vmatmul.mubr.msk.f32.vlgmr.msra.gmra.mrb[6].mxu0 %vm297_vm10, %v1090_v5 }
 0x598   :  { %1727 = vmatpush3.bf16.msra.mxu0 %v1921_v27  ;;  %1693 = vmatprep.mubr.msk.f32.mxu0 %vm1780_vm1, %v1777_v2 }
 0x599   :  { %1728 = vmatprep.subr.bf16.mxu0 %v1781_v28  ;;  %v1752_v28 = vld [vmem:[%s2170_s16] sm:$0xff]  }
 0x59c   :  { %1730 = vmatpush3.bf16.msra.mxu0 %v1934_v31 }
 0x59d   :  { %1696 = vmatprep.subr.mxu0 %v1777_v2 }
 0x59f   :  { %1694 = vmatmul.mubr.msk.f32.vlgmr.msra.gmra.mrb[12].mxu0 %vm100_vm4, %v1170_v12 }
 0x5a0   :  { %1697 = vmatpush3.msra.mxu0 %v1961_v6  ;;  %1698 = vmatprep.mubr.msk.f32.mxu0 %vm1780_vm1, %v1777_v2 }
 0x5a1   :  { %1701 = vmatprep.subr.bf16.mxu0 %v1777_v2 }
 0x66a   :  { %v1163_v27 = vpop.f32.mrb[6].mxu0 }
 0x66b   :  { %v1684_v13 = vpop.f32.mrb[7].mxu0  ;;  %v1167_v6 = vmul.f32 0.0625, %v1163_v27 }
 0x66d   :  { %v1317_v17 = vmul.f32 %v1167_v6, %v1167_v6 }
 0x672   :  { %v1239_v31 = vpop.f32.mrb[12].mxu0 }
 0x673   :  { %v1695_v15 = vpop.f32.mrb[13].mxu0  ;;  %1699 = vmatmul.mubr.msk.f32.vlgmr.msra.gmra.mrb[14].mxu0 %vm297_vm10, %v1239_v31 }
 0x674   :  { %1702 = vmatpush3.bf16.msra.mxu0 %v1752_v28  ;;  %1703 = vmatprep.mubr.msk.bf16.mxu0 %vm1780_vm1, %v1777_v2  ;;  %v1327_v2 = vrot.slane %v1167_v6, %v2022_v48 }
 0x676   :  { %v1328_v34 = vcombine.high %v1327_v2, %v1327_v2  ;;  %v1335_v37 = vrot.slane %v1327_v2, %v2022_v48 }
 0x677   :  { %1704 = vmatmul.mubr.msk.bf16.vlgmr.msra.gmra.mrb[16].mxu0 %vm97_vm3, %v1436_v14 }
 0x678   :  { %v1342_v39 = vrot.slane %v1328_v34, %v2022_v48  ;;  %v1346_v40 = vrot.slane %v1335_v37, %v2029_v63 }
 0x67a   :  { %v1350_v41 = vrot.slane %v1342_v39, %v2029_v63  ;;  %v1353_v43 = vsub.f32 %v2089_v32, %v1346_v40 }
 0x67c   :  { %v1354_v47 = vsub.f32 %v2091_v36, %v1350_v41 }
 0x746   :  { %v1312_v16 = vpop.f32.mrb[14].mxu0 }
 0x747   :  { %v1316_v35 = vmul.f32 0.0625, %v1312_v16  ;;  %v1700_v18 = vpop.f32.mrb[15].mxu0 }
 0x749   :  { %v1318_v19 = vsub.f32 %v1316_v35, %v1317_v17 }
 0x74a   :  { %v1482_v20 = vpop.f32.mrb[16].mxu0 }
 0x74b   :  { %v1319_v21 = vmax.f32 %v1318_v19, 0.0  ;;  %v1705_v22 = vpop.f32.mrb[17].mxu0  ;;  %v1489_v7 = vcombine.high %v1482_v20, %v1482_v20  ;;  %v1498_v9 = vadd.f32 %v1547_v3, %v1482_v20 }
 0x74c   :  { %v1485_v38 = vpop.f32.mrb[18].mxu0 }
 0x74d   :  { %v1362_v4 = vrot.slane %v1319_v21, %v2022_v48  ;;  %v1706_v24 = vpop.f32.mrb[19].mxu0  ;;  %v1499_v27 = vadd.f32 %v1547_v3, %v1489_v7 }
 0x74f   :  { %v1363_v25 = vcombine.high %v1362_v4, %v1362_v4  ;;  %v1370_v26 = vrot.slane %v1362_v4, %v2022_v48 }
 0x751   :  { %v1377_v29 = vrot.slane %v1363_v25, %v2022_v48  ;;  %v1380_v30 = vadd.f32 1e-05, %v1370_v26  ;;  %v1542_v48 = vld [vmem:[%s2172_s15] ss:$0 sm:$0xff] }
 0x753   :  { %v1381_v33 = vadd.f32 1e-05, %v1377_v29  ;;  %1765 = vrsqrt.f32 %v1380_v30 }
 0x755   :  { %1767 = vrsqrt.f32 %v1381_v33 }
 0x75d   :  { %v1766_v42 = vpop.eup %1765 }
 0x75e   :  { %v1389_v44 = vrot.slane %v1766_v42, %v2029_v63 }
 0x75f   :  { %v1768_v45 = vpop.eup %1767 }
 0x760   :  { %v1393_v23 = vrot.slane %v1768_v45, %v2029_v63  ;;  %v1396_v49 = vmul.f32 %v1389_v44, %v1353_v43 }
 0x762   :  { %v1397_v50 = vmul.f32 %v1393_v23, %v1354_v47  ;;  %v1404_v51 = vmul.f32 %v1541_v46, %v1396_v49 }
 0x764   :  { %v1405_v52 = vmul.f32 %v1541_v46, %v1397_v50  ;;  %v1412_v32 = vadd.f32 %v1542_v48, %v1404_v51 }
 0x766   :  { %v1413_v53 = vadd.f32 %v1542_v48, %v1405_v52  ;;  %v1414_v54 = vmin.f32 %v1412_v32, 20.0 }
 0x768   :  { %v1415_v55 = vmin.f32 %v1413_v53, 20.0  ;;  %v1416_v56 = vmul.f32 1.442695, %v1414_v54 }
 0x76a   :  { %1769 = vpow2.f32 %v1416_v56  ;;  %v1418_v57 = vmul.f32 1.442695, %v1415_v55 }
 0x76c   :  { %1771 = vpow2.f32 %v1418_v57 }
 0x774   :  { %v1770_v58 = vpop.eup %1769 }
 0x775   :  { %v1420_v36 = vadd.f32 1.0, %v1770_v58 }
 0x776   :  { %v1772_v59 = vpop.eup %1771 }
 0x777   :  { %v1421_v63 = vadd.f32 1.0, %v1772_v59  ;;  %v1422_v60 = vmul.f32 %v1420_v36, %v1420_v36 }
 0x779   :  { %v1423_v61 = vmul.f32 %v1421_v63, %v1421_v63  ;;  %v1428_v62 = vadd.f32 1.0, %v1422_v60  ;;  %v1543_v1 = vadd.f32 -1.0, %v1422_v60 }
 0x77b   :  { %v1429_v0 = vadd.f32 1.0, %v1423_v61  ;;  %1773 = vrcp.f32 %v1428_v62  ;;  %v1544_v5 = vadd.f32 -1.0, %v1423_v61  ;;  %v1426_v8 = vmul.f32 %v1543_v1, %v1412_v32 }
 0x77d   :  { %1775 = vrcp.f32 %v1429_v0  ;;  %v1427_v11 = vmul.f32 %v1544_v5, %v1413_v53 }
 0x785   :  { %v1774_v10 = vpop.eup %1773 }
 0x786   :  { %v1432_v12 = vmul.f32 %v1774_v10, %v1426_v8 }
 0x787   :  { %v1776_v13 = vpop.eup %1775 }
 0x788   :  { %v1433_v28 = vmul.f32 %v1776_v13, %v1427_v11  ;;  %v1500_v31 = vadd.f32 %v1498_v9, %v1432_v12 }
 0x78a   :  { %v1501_v14 = vadd.f32 %v1499_v27, %v1433_v28  ;;  %1502 = vst.msk [vmem:[%s2174_s18] sm:$0xf] %vm190_vm6, %v1500_v31 }
 0x78c   :  { %1503 = vst.msk [vmem:[%s2174_s18 + $0x4] sm:$0xf] %vm190_vm6, %v1501_v14 }

// kernel: unet_forward.19
= control target key start
LH: loop header
LB: loop body
LE: loop exit
PB: predicated region body
PF: predicated region fallthrough
CT: control target
= control target key end

     0   :  { %vm74_vm0 = vcmask 1042432   ;;  %v1728_v2 = vmov 0.0   ;;  %s1729_s26 = smov 32   ;;  %vm1731_vm1 = vmmov 0   ;;  %vm67_vm2 = vcmask 1040384   ;;  %s2112_s0 = inlined_call_operand.vmem [shape: f32[2,4,32], index: 0, kind: input, shape index: {}]   ;;  %s2113_s2 = inlined_call_operand.vmem [shape: bf16[96,32], index: 2, kind: input, shape index: {}]   ;;  %s2114_s6 = inlined_call_operand.vmem [shape: f32[32,8], index: 6, kind: input, shape index: {}]   ;;  %s2115_s3 = inlined_call_operand.vmem [shape: f32[1,32], index: 3, kind: input, shape index: {}]   ;;  %s2116_s7 = inlined_call_operand.vmem [shape: f32[8,32], index: 7, kind: input, shape index: {}]   ;;  %s2117_s8 = inlined_call_operand.vmem [shape: bf16[24,32], index: 8, kind: input, shape index: {}]   ;;  %s2118_s1 = inlined_call_operand.vmem [shape: f32[2,24], index: 1, kind: input, shape index: {}]   ;;  %s2119_s10 = inlined_call_operand.vmem [shape: bf16[24,32], index: 10, kind: input, shape index: {}]   ;;  %s2120_s12 = inlined_call_operand.vmem [shape: bf16[96,32], index: 12, kind: input, shape index: {}]   ;;  %s2121_s4 = inlined_call_operand.vmem [shape: f32[1,32], index: 4, kind: input, shape index: {}]   ;;  %s2122_s5 = inlined_call_operand.vmem [shape: f32[1,32], index: 5, kind: input, shape index: {}]   ;;  %s2123_s9 = inlined_call_operand.vmem [shape: f32[1,32], index: 9, kind: input, shape index: {}]   ;;  %s2124_s11 = inlined_call_operand.vmem [shape: f32[1,32], index: 11, kind: input, shape index: {}]   ;;  %s2125_s13 = inlined_call_operand.vmem [shape: f32[1,32], index: 13, kind: input, shape index: {}]   ;;  %s2126_s14 = inlined_call_operand.vmem [shape: f32[1,32], index: 14, kind: input, shape index: {}]   ;;  %s2127_s15 = inlined_call_operand.vmem [shape: f32[1,32], index: 15, kind: input, shape index: {}]   ;;  %s2128_s16 = inlined_call_operand.vmem [shape: f32[2,4,32], index: 16, kind: output, shape index: {}]  }
   0x1   :  { %2130 = sst [smem:[#allocation2_spill]] %s2112_s0  ;;  %1546 = vmatprep.subr.bf16.mxu0 %v1728_v2  ;;  %v1688_v5 = vld [vmem:[%s2113_s2] sm:$0xff]   ;;  %v1689_v7 = vld [vmem:[%s2113_s2 + $0x8] sm:$0xff]   ;;  %s1730_s0 = smov 64   ;;  %v1690_v9 = vld [vmem:[%s2113_s2 + $0x10] sm:$0xff]   ;;  %1558 = vmatprep.mubr.msk.bf16.mxu0 %vm1731_vm1, %v1728_v2  ;;  %vm91_vm3 = vcmask 261120  }
   0x2   :  { %s2131_s23 = sld [smem:[#allocation2_spill]]  ;;  %1547 = vmatpush3.bf16.msra.mxu0 %v1688_v5  ;;  %1570 = vmatprep.mubr.msk.f32.mxu1 %vm1731_vm1, %v1728_v2  ;;  %v1691_v10 = vld [vmem:[%s2113_s2 + $0x18] sm:$0xff]   ;;  %v1692_v11 = vld [vmem:[%s2113_s2 + $0x20] sm:$0xff]   ;;  %v1693_v12 = vld [vmem:[%s2113_s2 + $0x28] sm:$0xff]   ;;  %vm94_vm4 = vcmask 523264   ;;  %vm150_vm5 = vcmask 785408  }
   0x3   :  { %1548 = vmatprep.subr.bf16.mxu0 %v1728_v2  ;;  %v56_v27 = vld [vmem:[%s2114_s6] sm:$0xff]  ;;  %v57_v28 = vld [vmem:[%s2114_s6 + $0x8] sm:$0xff]  ;;  %v1732_v30 = vmov 0.0|0.0   ;;  %v58_v31 = vld [vmem:[%s2114_s6 + $0x10] sm:$0xff]  ;;  %vm208_vm6 = vcmask 257024   ;;  %vm241_vm7 = vcmask 1041409  }
   0x4   :  { %v1885_v29 = vpack.c.bf16 %v57_v28, %v56_v27  ;;  %1658 = vmatprep.subr.bf16.mxu1 %v1732_v30  ;;  %v59_v32 = vld [vmem:[%s2114_s6 + $0x18] sm:$0xff]  ;;  %v1465_v34 = vld [vmem:[%s2115_s3] ss:$0 sm:$0xff]  ;;  %vm315_vm8 = vcmask 64512   ;;  %vm681_vm9 = vcmask 1043456   ;;  %vm677_vm10 = vcmask 195584  }
   0x5   :  { %v1896_v33 = vpack.c.bf16 %v59_v32, %v58_v31  ;;  %v1914_v56 = vld [vmem:[%s2116_s7] sm:$0xff] }
   0x6   :  { %1549 = vmatpush3.bf16.msra.mxu0 %v1689_v7  ;;  %1660 = vmatpush3.bf16.msra.mxu1 %v1885_v29 }
   0x7   :  { %1550 = vmatprep.subr.bf16.mxu0 %v1728_v2  ;;  %1661 = vmatprep.subr.bf16.mxu1 %v1732_v30 }
   0x8   :  { %v1822_v0 = vld [vmem:[%s2131_s23] sm:$0xf]  ;;  %v1827_v1 = vld [vmem:[%s2131_s23 + $0x4] sm:$0xf] }
   0x9   :  { %77 = vrot.lane.b32.xlu0 %v1822_v0, %s1729_s26  ;;  %v70_v3 = vrot.slane %v1822_v0, 1  ;;  %v71_v4 = vrot.slane %v1827_v1, 1  ;;  %v63_v13 = vrot.slane %v1822_v0, 7  ;;  %v64_v14 = vrot.slane %v1827_v1, 7 }
   0xa   :  { %1551 = vmatpush3.bf16.msra.mxu0 %v1690_v9  ;;  %1663 = vmatpush3.bf16.msra.mxu1 %v1896_v33 }
   0xb   :  { %v75_v6 = vsel %vm74_vm0, %v70_v3, 0.0  ;;  %v76_v8 = vsel %vm74_vm0, %v71_v4, 0.0  ;;  %1552 = vmatprep.subr.bf16.mxu0 %v1728_v2  ;;  %v68_v16 = vsel %vm67_vm2, 0.0, %v63_v13  ;;  %v69_v17 = vsel %vm67_vm2, 0.0, %v64_v14  ;;  %1573 = vmatprep.subr.mxu1 %v1728_v2 }
   0xc   :  { %85 = vrot.lane.b32.xlu1 %v75_v6, %s1730_s0 }
   0xd   :  { %79 = vrot.lane.b32.xlu0 %v1827_v1, %s1729_s26 }
   0xe   :  { %1553 = vmatpush3.bf16.msra.mxu0 %v1691_v10 }
   0xf   :  { %1554 = vmatprep.subr.bf16.mxu0 %v1728_v2 }
  0x10   :  { %87 = vrot.lane.b32.xlu1 %v76_v8, %s1730_s0 }
  0x12   :  { %1555 = vmatpush3.bf16.msra.mxu0 %v1692_v11 }
  0x13   :  { %1556 = vmatprep.subr.bf16.mxu0 %v1728_v2 }
  0x16   :  { %1557 = vmatpush3.bf16.msra.mxu0 %v1693_v12 }
  0x17   :  { %1594 = vmatprep.subr.bf16.mxu0 %v1728_v2 }
  0x7b   :  { %v78_v15 = vpop.permute.xlu0 %77 }
  0x7c   :  { %v92_v20 = vsel %vm91_vm3, %v68_v16, %v78_v15  ;;  %v1694_v16 = vld [vmem:[%s2117_s8] sm:$0xff]  }
  0x7e   :  { %v86_v18 = vpop.permute.xlu1 %85 }
  0x7f   :  { %v80_v19 = vpop.permute.xlu0 %79  ;;  %v95_v23 = vsel %vm94_vm4, %v92_v20, %v86_v18  ;;  %v656_v18 = vld [vmem:[%s2118_s1] sm:$0x3]  ;;  %v1697_v20 = vld [vmem:[%s2119_s10 + $0x8] ss:$0 sps:$4 sm:$0xff]  }
  0x80   :  { %v93_v21 = vsel %vm91_vm3, %v69_v17, %v80_v19  ;;  %v1695_v17 = vld [vmem:[%s2117_s8 + $0x8] ss:$0 sps:$4 sm:$0xff]  }
  0x81   :  { %v683_v19 = vsel %vm681_vm9, %v1695_v17, 0 }
  0x82   :  { %v88_v22 = vpop.permute.xlu1 %87 }
  0x83   :  { %v96_v24 = vsel %vm94_vm4, %v93_v21, %v88_v22  ;;  %v657_v21 = vpack.c.bf16 %v656_v18, %v656_v18  ;;  %v745_v22 = vsel %vm681_vm9, %v1697_v20, 0  ;;  %v1471_v18 = vld [vmem:[%s2122_s5] ss:$0 sm:$0xff] }
  0x84   :  { %v99_v25 = vcombine.low %v95_v23, %v96_v24 }
  0x86   :  { %v101_v26 = vpack.c.bf16 %v99_v25, %v99_v25  ;;  %v1696_v25 = vld [vmem:[%s2119_s10] sm:$0xff]  }
  0x88   :  { %1559 = vmatmul.mubr.msk.bf16.vlgmr.msra.gmra.mrb[0].mxu0 %vm150_vm5, %v101_v26 }
  0x89   :  { %1598 = vmatprep.mubr.msk.bf16.mxu0 %vm1731_vm1, %v1728_v2  ;;  %1595 = vmatpush3.bf16.msra.mxu0 %v1694_v16 }
  0x8a   :  { %1596 = vmatprep.subr.bf16.mxu0 %v1728_v2 }
  0x8d   :  { %1597 = vmatpush3.bf16.msra.mxu0 %v683_v19 }
  0x8e   :  { %1610 = vmatprep.subr.bf16.mxu0 %v1728_v2 }
  0x90   :  { %1599 = vmatmul.mubr.msk.bf16.vlgmr.msra.gmra.mrb[4].mxu0 %vm677_vm10, %v657_v21 }
  0x91   :  { %1622 = vmatprep.mubr.msk.bf16.mxu0 %vm1731_vm1, %v1728_v2 }
 0x15b   :  { %v188_v35 = vpop.f32.mrb[0].mxu0 }
 0x15c   :  { %v195_v36 = vcombine.high %v188_v35, %v188_v35  ;;  %v1903_v37 = vadd.f32 %v1465_v34, %v188_v35  ;;  %v1560_v38 = vpop.f32.mrb[1].mxu0  ;;  %v1698_v35 = vld [vmem:[%s2120_s12] sm:$0xff]  }
 0x15d   :  { %v191_v39 = vpop.f32.mrb[2].mxu0  ;;  %1611 = vmatpush3.bf16.msra.mxu0 %v1698_v35  ;;  %v1700_v38 = vld [vmem:[%s2120_s12 + $0x10] sm:$0xff]  }
 0x15e   :  { %v1905_v40 = vadd.f32 %v1465_v34, %v195_v36  ;;  %v209_v41 = vsel %vm208_vm6, %v1903_v37, 0.0  ;;  %v1561_v42 = vpop.f32.mrb[3].mxu0  ;;  %v223_v59 = vmul.f32 %v1903_v37, %v1903_v37  ;;  %v1699_v36 = vld [vmem:[%s2120_s12 + $0x8] sm:$0xff]   ;;  %1612 = vmatprep.subr.bf16.mxu0 %v1728_v2 }
 0x15f   :  { %v210_v43 = vrot.slane %v209_v41, 4 }
 0x160   :  { %v216_v44 = vsel %vm208_vm6, %v1905_v40, 0.0  ;;  %v224_v58 = vmul.f32 %v1905_v40, %v1905_v40  ;;  %v225_v61 = vsel %vm208_vm6, %v223_v59, 0.0 }
 0x161   :  { %v211_v45 = vadd.f32 %v210_v43, %v209_v41  ;;  %v217_v46 = vrot.slane %v216_v44, 4  ;;  %v226_v63 = vrot.slane %v225_v61, 4  ;;  %1613 = vmatpush3.bf16.msra.mxu0 %v1699_v36  ;;  %v1733_v41 = vmov 1966171168  }
 0x162   :  { %v232_v60 = vsel %vm208_vm6, %v224_v58, 0.0  ;;  %1614 = vmatprep.subr.bf16.mxu0 %v1728_v2  ;;  %v544_v42 = vunpack.c.l.s4 %v1733_v41  ;;  %v546_v43 = vlaneseq }
 0x163   :  { %v212_v47 = vrot.slane %v211_v45, 2  ;;  %v218_v48 = vadd.f32 %v217_v46, %v216_v44  ;;  %v233_v62 = vrot.slane %v232_v60, 4  ;;  %v227_v4 = vadd.f32 %v226_v63, %v225_v61  ;;  %v1971_v28 = vpop.f32.mrb[4].mxu0 }
 0x164   :  { %v1600_v31 = vpop.f32.mrb[5].mxu0  ;;  %v545_v46 = vunpack.c.0.s8 %v544_v42 }
 0x165   :  { %v213_v49 = vadd.f32 %v212_v47, %v211_v45  ;;  %v219_v50 = vrot.slane %v218_v48, 2  ;;  %v234_v3 = vadd.f32 %v233_v62, %v232_v60  ;;  %v228_v6 = vrot.slane %v227_v4, 2  ;;  %v722_v32 = vpop.f32.mrb[6].mxu0  ;;  %1615 = vmatpush3.bf16.msra.mxu0 %v1700_v38 }
 0x166   :  { %v1601_v34 = vpop.f32.mrb[7].mxu0  ;;  %1616 = vmatprep.subr.bf16.mxu0 %v1728_v2  ;;  %v547_v47 = vshrl.u32 %v546_v43, 7  ;;  %v1478_v32 = vld [vmem:[%s2124_s11] ss:$0 sm:$0xff] }
 0x167   :  { %v214_v51 = vrot.slane %v213_v49, 1  ;;  %v220_v52 = vadd.f32 %v219_v50, %v218_v48  ;;  %v235_v5 = vrot.slane %v234_v3, 2  ;;  %v229_v8 = vadd.f32 %v228_v6, %v227_v4 }
 0x168   :  { %v1992_v6 = vsub.s32 0, %v547_v47 }
 0x169   :  { %v221_v53 = vrot.slane %v220_v52, 1  ;;  %v215_v54 = vadd.f32 %v214_v51, %v213_v49  ;;  %v236_v7 = vadd.f32 %v235_v5, %v234_v3  ;;  %v230_v12 = vrot.slane %v229_v8, 1 }
 0x16a   :  { %v1985_v51 = vsub.s32 %v545_v46, %v547_v47  ;;  %v1701_v47 = vld [vmem:[%s2120_s12 + $0x18] sm:$0xff]  }
 0x16b   :  { %v222_v55 = vadd.f32 %v221_v53, %v220_v52  ;;  %v237_v10 = vrot.slane %v236_v7, 1  ;;  %v231_v14 = vadd.f32 %v230_v12, %v229_v8  ;;  %1617 = vmatpush3.bf16.msra.mxu0 %v1701_v47 }
 0x16c   :  { %1618 = vmatprep.subr.bf16.mxu0 %v1728_v2 }
 0x16d   :  { %v242_v57 = vsel %vm241_vm7, %v222_v55, %v215_v54  ;;  %v238_v13 = vadd.f32 %v237_v10, %v236_v7 }
 0x16e   :  { %1571 = vmatmul.mubr.msk.f32.vlgmr.msra.gmra.mrb[0].mxu1 %vm91_vm3, %v242_v57 }
 0x16f   :  { %1574 = vmatpush3.msra.mxu1 %v1914_v56  ;;  %1575 = vmatprep.mubr.msk.f32.mxu1 %vm1731_vm1, %v1728_v2  ;;  %v392_v15 = vsel %vm241_vm7, %v238_v13, %v231_v14  ;;  %v1470_v14 = vld [vmem:[%s2121_s4] ss:$0 sm:$0xff] }
 0x170   :  { %1664 = vmatprep.subr.bf16.mxu1 %v1732_v30 }
 0x241   :  { %v311_v9 = vpop.f32.mrb[0].mxu1 }
 0x242   :  { %v1572_v11 = vpop.f32.mrb[1].mxu1  ;;  %1576 = vmatmul.mubr.msk.f32.vlgmr.msra.gmra.mrb[2].mxu1 %vm315_vm8, %v311_v9 }
 0x243   :  { %1666 = vmatpush3.bf16.msra.mxu1 %v1885_v29  ;;  %1586 = vmatprep.mubr.msk.f32.mxu1 %vm1731_vm1, %v1728_v2 }
 0x244   :  { %1667 = vmatprep.subr.bf16.mxu1 %v1732_v30 }
 0x247   :  { %1669 = vmatpush3.bf16.msra.mxu1 %v1896_v33 }
 0x248   :  { %1589 = vmatprep.subr.mxu1 %v1728_v2 }
 0x24a   :  { %1587 = vmatmul.mubr.msk.f32.vlgmr.msra.gmra.mrb[4].mxu1 %vm91_vm3, %v392_v15 }
 0x24b   :  { %1590 = vmatpush3.msra.mxu1 %v1914_v56  ;;  %1591 = vmatprep.mubr.msk.f32.mxu1 %vm1731_vm1, %v1728_v2 }
 0x24c   :  { %1602 = vmatprep.subr.bf16.mxu1 %v1728_v2 }
 0x315   :  { %v385_v23 = vpop.f32.mrb[2].mxu1 }
 0x316   :  { %v1577_v24 = vpop.f32.mrb[3].mxu1  ;;  %v389_v39 = vmul.f32 0.0625, %v385_v23 }
 0x318   :  { %v539_v45 = vmul.f32 %v389_v39, %v389_v39  ;;  %v549_v59 = vrot.slane %v389_v39, %v1985_v51 }
 0x31a   :  { %v550_v4 = vcombine.high %v549_v59, %v549_v59  ;;  %v557_v5 = vrot.slane %v549_v59, %v1985_v51 }
 0x31c   :  { %v564_v7 = vrot.slane %v550_v4, %v1985_v51  ;;  %v568_v8 = vrot.slane %v557_v5, %v1992_v6 }
 0x31d   :  { %v461_v26 = vpop.f32.mrb[4].mxu1 }
 0x31e   :  { %v1588_v27 = vpop.f32.mrb[5].mxu1  ;;  %1592 = vmatmul.mubr.msk.f32.vlgmr.msra.gmra.mrb[6].mxu1 %vm315_vm8, %v461_v26  ;;  %v572_v9 = vrot.slane %v564_v7, %v1992_v6  ;;  %v575_v11 = vsub.f32 %v1903_v37, %v568_v8 }
 0x31f   :  { %1603 = vmatpush3.bf16.msra.mxu1 %v1696_v25  ;;  %1606 = vmatprep.mubr.msk.bf16.mxu1 %vm1731_vm1, %v1728_v2 }
 0x320   :  { %1604 = vmatprep.subr.bf16.mxu1 %v1728_v2  ;;  %v576_v15 = vsub.f32 %v1905_v40, %v572_v9  ;;  %v1474_v40 = vld [vmem:[%s2123_s9] ss:$0 sm:$0xff] }
 0x321   :  { %v720_v27 = vadd.f32 %v1474_v40, %v1971_v28 }
 0x323   :  { %1605 = vmatpush3.bf16.msra.mxu1 %v745_v22  ;;  %v794_v36 = vrot.slane %v720_v27, %v1985_v51 }
 0x324   :  { %1670 = vmatprep.subr.bf16.mxu1 %v1732_v30 }
 0x325   :  { %v802_v46 = vrot.slane %v794_v36, %v1985_v51 }
 0x326   :  { %1607 = vmatmul.mubr.msk.bf16.vlgmr.msra.gmra.mrb[8].mxu1 %vm677_vm10, %v657_v21 }
 0x327   :  { %1672 = vmatpush3.bf16.msra.mxu1 %v1885_v29  ;;  %1634 = vmatprep.mubr.msk.f32.mxu1 %vm1731_vm1, %v1728_v2 }
 0x328   :  { %1673 = vmatprep.subr.bf16.mxu1 %v1732_v30 }
 0x32b   :  { %1675 = vmatpush3.bf16.msra.mxu1 %v1896_v33 }
 0x32c   :  { %1637 = vmatprep.subr.mxu1 %v1728_v2 }
 0x3f1   :  { %v534_v44 = vpop.f32.mrb[6].mxu1 }
 0x3f2   :  { %v538_v48 = vmul.f32 0.0625, %v534_v44  ;;  %v1593_v49 = vpop.f32.mrb[7].mxu1  ;;  %v795_v44 = vcombine.high %v794_v36, %v794_v36 }
 0x3f3   :  { %v812_v49 = vadd.f32 1.0, %v802_v46 }
 0x3f4   :  { %v540_v50 = vsub.f32 %v538_v48, %v539_v45  ;;  %v809_v48 = vrot.slane %v795_v44, %v1985_v51 }
 0x3f6   :  { %v541_v52 = vmax.f32 %v540_v50, 0.0 }
 0x3f8   :  { %v584_v53 = vrot.slane %v541_v52, %v1985_v51 }
 0x3f9   :  { %v781_v54 = vpop.f32.mrb[8].mxu1 }
 0x3fa   :  { %v585_v55 = vcombine.high %v584_v53, %v584_v53  ;;  %v592_v57 = vrot.slane %v584_v53, %v1985_v51  ;;  %v1608_v58 = vpop.f32.mrb[9].mxu1  ;;  %v782_v41 = vadd.f32 %v1478_v32, %v781_v54  ;;  %v1702_v53 = vld [vmem:[%s2120_s12 + $0x20] sm:$0xff]   ;;  %v813_v54 = vadd.f32 1.0, %v809_v48 }
 0x3fb   :  { %v784_v60 = vpop.f32.mrb[10].mxu1  ;;  %1619 = vmatpush3.bf16.msra.mxu0 %v1702_v53  ;;  %v819_v58 = vrot.slane %v812_v49, %v1992_v6 }
 0x3fc   :  { %v599_v61 = vrot.slane %v585_v55, %v1985_v51  ;;  %v602_v62 = vadd.f32 1e-05, %v592_v57  ;;  %v1609_v63 = vpop.f32.mrb[11].mxu1  ;;  %v835_v28 = vrot.slane %v782_v41, %v1985_v51  ;;  %1620 = vmatprep.subr.bf16.mxu0 %v1728_v2  ;;  %v823_v5 = vrot.slane %v813_v54, %v1992_v6 }
 0x3fe   :  { %v603_v3 = vadd.f32 1e-05, %v599_v61  ;;  %1704 = vrsqrt.f32 %v602_v62  ;;  %v836_v50 = vcombine.high %v835_v28, %v835_v28  ;;  %v843_v55 = vrot.slane %v835_v28, %v1985_v51  ;;  %v1703_v62 = vld [vmem:[%s2120_s12 + $0x28] sm:$0xff]  }
 0x3ff   :  { %1621 = vmatpush3.bf16.msra.mxu0 %v1703_v62 }
 0x400   :  { %1706 = vrsqrt.f32 %v603_v3  ;;  %v850_v59 = vrot.slane %v836_v50, %v1985_v51  ;;  %v854_v3 = vrot.slane %v843_v55, %v1992_v6 }
 0x408   :  { %v1705_v10 = vpop.eup %1704 }
 0x409   :  { %v611_v12 = vrot.slane %v1705_v10, %v1992_v6  ;;  %v858_v10 = vrot.slane %v850_v59, %v1992_v6 }
 0x40a   :  { %v1707_v13 = vpop.eup %1706 }
 0x40b   :  { %v618_v16 = vmul.f32 %v611_v12, %v575_v11  ;;  %v615_v17 = vrot.slane %v1707_v13, %v1992_v6 }
 0x40d   :  { %v626_v19 = vmul.f32 %v1470_v14, %v618_v16  ;;  %v619_v20 = vmul.f32 %v615_v17, %v576_v15 }
 0x40f   :  { %v634_v21 = vadd.f32 %v1471_v18, %v626_v19  ;;  %v627_v37 = vmul.f32 %v1470_v14, %v619_v20 }
 0x411   :  { %v636_v22 = vmin.f32 %v634_v21, 20.0  ;;  %v635_v23 = vadd.f32 %v1471_v18, %v627_v37 }
 0x413   :  { %v638_v24 = vmul.f32 1.442695, %v636_v22  ;;  %v637_v25 = vmin.f32 %v635_v23, 20.0 }
 0x415   :  { %1708 = vpow2.f32 %v638_v24  ;;  %v640_v26 = vmul.f32 1.442695, %v637_v25 }
 0x417   :  { %1710 = vpow2.f32 %v640_v26 }
 0x41f   :  { %v1709_v31 = vpop.eup %1708 }
 0x420   :  { %v642_v34 = vadd.f32 1.0, %v1709_v31 }
 0x421   :  { %v1711_v35 = vpop.eup %1710 }
 0x422   :  { %v644_v38 = vmul.f32 %v642_v34, %v642_v34  ;;  %v643_v39 = vadd.f32 1.0, %v1711_v35  ;;  %v1489_v34 = vld [vmem:[%s2125_s13] ss:$0 sm:$0xff] }
 0x424   :  { %v650_v42 = vadd.f32 1.0, %v644_v38  ;;  %v645_v43 = vmul.f32 %v643_v39, %v643_v39  ;;  %v1472_v52 = vadd.f32 -1.0, %v644_v38 }
 0x426   :  { %1712 = vrcp.f32 %v650_v42  ;;  %v651_v45 = vadd.f32 1.0, %v645_v43  ;;  %v1473_v57 = vadd.f32 -1.0, %v645_v43  ;;  %v648_v60 = vmul.f32 %v1472_v52, %v634_v21 }
 0x428   :  { %1714 = vrcp.f32 %v651_v45  ;;  %v649_v4 = vmul.f32 %v1473_v57, %v635_v23 }
 0x430   :  { %v1713_v61 = vpop.eup %1712 }
 0x431   :  { %v654_v63 = vmul.f32 %v1713_v61, %v648_v60 }
 0x432   :  { %v1715_v7 = vpop.eup %1714 }
 0x433   :  { %v826_v8 = vmul.f32 %v819_v58, %v654_v63  ;;  %v655_v9 = vmul.f32 %v1715_v7, %v649_v4 }
 0x435   :  { %v861_v11 = vadd.f32 %v854_v3, %v826_v8  ;;  %v827_v12 = vmul.f32 %v823_v5, %v655_v9 }
 0x437   :  { %877 = vrot.lane.b32.xlu0 %v861_v11, %s1729_s26  ;;  %v862_v13 = vadd.f32 %v858_v10, %v827_v12  ;;  %v871_v14 = vrot.slane %v861_v11, 1  ;;  %v865_v19 = vrot.slane %v861_v11, 7 }
 0x439   :  { %879 = vrot.lane.b32.xlu1 %v862_v13, %s1729_s26  ;;  %v875_v15 = vsel %vm74_vm0, %v871_v14, 0.0  ;;  %v872_v16 = vrot.slane %v862_v13, 1  ;;  %v866_v20 = vrot.slane %v862_v13, 7  ;;  %v869_v22 = vsel %vm67_vm2, 0.0, %v865_v19 }
 0x43b   :  { %885 = vrot.lane.b32.xlu0 %v875_v15, %s1730_s0  ;;  %v876_v17 = vsel %vm74_vm0, %v872_v16, 0.0  ;;  %v870_v23 = vsel %vm67_vm2, 0.0, %v866_v20 }
 0x43d   :  { %887 = vrot.lane.b32.xlu1 %v876_v17, %s1730_s0 }
 0x4a9   :  { %v878_v18 = vpop.permute.xlu0 %877 }
 0x4aa   :  { %v891_v24 = vsel %vm91_vm3, %v869_v22, %v878_v18 }
 0x4ab   :  { %v880_v21 = vpop.permute.xlu1 %879 }
 0x4ac   :  { %v892_v25 = vsel %vm91_vm3, %v870_v23, %v880_v21 }
 0x4ad   :  { %v886_v37 = vpop.permute.xlu0 %885 }
 0x4ae   :  { %v893_v40 = vsel %vm94_vm4, %v891_v24, %v886_v37 }
 0x4af   :  { %v888_v26 = vpop.permute.xlu1 %887 }
 0x4b0   :  { %v894_v27 = vsel %vm94_vm4, %v892_v25, %v888_v26 }
 0x4b1   :  { %v897_v31 = vcombine.low %v893_v40, %v894_v27 }
 0x4b3   :  { %v899_v32 = vpack.c.bf16 %v897_v31, %v897_v31 }
 0x4b5   :  { %1623 = vmatmul.mubr.msk.bf16.vlgmr.msra.gmra.mrb[8].mxu0 %vm150_vm5, %v899_v32 }
 0x588   :  { %v985_v35 = vpop.f32.mrb[8].mxu0 }
 0x589   :  { %v992_v36 = vcombine.high %v985_v35, %v985_v35  ;;  %v2051_v38 = vadd.f32 %v1489_v34, %v985_v35  ;;  %v1624_v39 = vpop.f32.mrb[9].mxu0 }
 0x58a   :  { %v988_v41 = vpop.f32.mrb[10].mxu0 }
 0x58b   :  { %v2053_v42 = vadd.f32 %v1489_v34, %v992_v36  ;;  %v1005_v43 = vsel %vm208_vm6, %v2051_v38, 0.0  ;;  %v1625_v44 = vpop.f32.mrb[11].mxu0  ;;  %v1019_v61 = vmul.f32 %v2051_v38, %v2051_v38 }
 0x58c   :  { %v1006_v45 = vrot.slane %v1005_v43, 4 }
 0x58d   :  { %v1012_v46 = vsel %vm208_vm6, %v2053_v42, 0.0  ;;  %v1020_v60 = vmul.f32 %v2053_v42, %v2053_v42  ;;  %v1021_v63 = vsel %vm208_vm6, %v1019_v61, 0.0 }
 0x58e   :  { %v1007_v28 = vadd.f32 %v1006_v45, %v1005_v43  ;;  %v1013_v47 = vrot.slane %v1012_v46, 4  ;;  %v1022_v4 = vrot.slane %v1021_v63, 4 }
 0x58f   :  { %v1028_v62 = vsel %vm208_vm6, %v1020_v60, 0.0 }
 0x590   :  { %v1008_v48 = vrot.slane %v1007_v28, 2  ;;  %v1014_v49 = vadd.f32 %v1013_v47, %v1012_v46  ;;  %v1029_v3 = vrot.slane %v1028_v62, 4  ;;  %v1023_v7 = vadd.f32 %v1022_v4, %v1021_v63 }
 0x592   :  { %v1009_v50 = vadd.f32 %v1008_v48, %v1007_v28  ;;  %v1015_v52 = vrot.slane %v1014_v49, 2  ;;  %v1030_v5 = vadd.f32 %v1029_v3, %v1028_v62  ;;  %v1024_v9 = vrot.slane %v1023_v7, 2  ;;  %v1494_v28 = vld [vmem:[%s2126_s14] ss:$0 sm:$0xff] }
 0x594   :  { %v1010_v53 = vrot.slane %v1009_v50, 1  ;;  %v1016_v54 = vadd.f32 %v1015_v52, %v1014_v49  ;;  %v1031_v8 = vrot.slane %v1030_v5, 2  ;;  %v1025_v11 = vadd.f32 %v1024_v9, %v1023_v7 }
 0x596   :  { %v1017_v55 = vrot.slane %v1016_v54, 1  ;;  %v1011_v57 = vadd.f32 %v1010_v53, %v1009_v50  ;;  %v1032_v10 = vadd.f32 %v1031_v8, %v1030_v5  ;;  %v1026_v15 = vrot.slane %v1025_v11, 1 }
 0x598   :  { %v1018_v58 = vadd.f32 %v1017_v55, %v1016_v54  ;;  %v1033_v13 = vrot.slane %v1032_v10, 1  ;;  %v1027_v17 = vadd.f32 %v1026_v15, %v1025_v11 }
 0x59a   :  { %v1037_v59 = vsel %vm241_vm7, %v1018_v58, %v1011_v57  ;;  %v1034_v16 = vadd.f32 %v1033_v13, %v1032_v10 }
 0x59b   :  { %1635 = vmatmul.mubr.msk.f32.vlgmr.msra.gmra.mrb[12].mxu1 %vm91_vm3, %v1037_v59 }
 0x59c   :  { %1638 = vmatpush3.msra.mxu1 %v1914_v56  ;;  %1639 = vmatprep.mubr.msk.f32.mxu1 %vm1731_vm1, %v1728_v2  ;;  %v1186_v18 = vsel %vm241_vm7, %v1034_v16, %v1027_v17 }
 0x59d   :  { %1676 = vmatprep.subr.bf16.mxu1 %v1732_v30 }
 0x66e   :  { %v1106_v12 = vpop.f32.mrb[12].mxu1 }
 0x66f   :  { %v1636_v14 = vpop.f32.mrb[13].mxu1  ;;  %1640 = vmatmul.mubr.msk.f32.vlgmr.msra.gmra.mrb[14].mxu1 %vm315_vm8, %v1106_v12 }
 0x670   :  { %1678 = vmatpush3.bf16.msra.mxu1 %v1885_v29  ;;  %1650 = vmatprep.mubr.msk.f32.mxu1 %vm1731_vm1, %v1728_v2 }
 0x671   :  { %1679 = vmatprep.subr.bf16.mxu1 %v1732_v30 }
 0x674   :  { %1681 = vmatpush3.bf16.msra.mxu1 %v1896_v33 }
 0x675   :  { %1653 = vmatprep.subr.mxu1 %v1728_v2 }
 0x677   :  { %1651 = vmatmul.mubr.msk.f32.vlgmr.msra.gmra.mrb[16].mxu1 %vm91_vm3, %v1186_v18 }
 0x678   :  { %1654 = vmatpush3.msra.mxu1 %v1914_v56  ;;  %1655 = vmatprep.mubr.msk.f32.mxu1 %vm1731_vm1, %v1728_v2 }
 0x742   :  { %v1179_v29 = vpop.f32.mrb[14].mxu1 }
 0x743   :  { %v1641_v19 = vpop.f32.mrb[15].mxu1  ;;  %v1183_v30 = vmul.f32 0.0625, %v1179_v29 }
 0x745   :  { %v1333_v37 = vmul.f32 %v1183_v30, %v1183_v30  ;;  %v1343_v2 = vrot.slane %v1183_v30, %v1985_v51 }
 0x747   :  { %v1344_v34 = vcombine.high %v1343_v2, %v1343_v2  ;;  %v1351_v35 = vrot.slane %v1343_v2, %v1985_v51 }
 0x749   :  { %v1358_v36 = vrot.slane %v1344_v34, %v1985_v51  ;;  %v1362_v39 = vrot.slane %v1351_v35, %v1992_v6 }
 0x74a   :  { %v1255_v20 = vpop.f32.mrb[16].mxu1 }
 0x74b   :  { %v1652_v21 = vpop.f32.mrb[17].mxu1  ;;  %1656 = vmatmul.mubr.msk.f32.vlgmr.msra.gmra.mrb[18].mxu1 %vm315_vm8, %v1255_v20  ;;  %v1366_v41 = vrot.slane %v1358_v36, %v1992_v6  ;;  %v1369_v44 = vsub.f32 %v2051_v38, %v1362_v39 }
 0x74d   :  { %v1370_v47 = vsub.f32 %v2053_v42, %v1366_v41 }
 0x81e   :  { %v1328_v33 = vpop.f32.mrb[18].mxu1 }
 0x81f   :  { %v1332_v22 = vmul.f32 0.0625, %v1328_v33  ;;  %v1657_v23 = vpop.f32.mrb[19].mxu1 }
 0x821   :  { %v1334_v24 = vsub.f32 %v1332_v22, %v1333_v37 }
 0x823   :  { %v1335_v25 = vmax.f32 %v1334_v24, 0.0 }
 0x825   :  { %v1378_v26 = vrot.slane %v1335_v25, %v1985_v51 }
 0x827   :  { %v1379_v40 = vcombine.high %v1378_v26, %v1378_v26  ;;  %v1386_v56 = vrot.slane %v1378_v26, %v1985_v51 }
 0x829   :  { %v1393_v27 = vrot.slane %v1379_v40, %v1985_v51  ;;  %v1396_v31 = vadd.f32 1e-05, %v1386_v56  ;;  %v1495_v51 = vld [vmem:[%s2127_s15] ss:$0 sm:$0xff] }
 0x82b   :  { %v1397_v32 = vadd.f32 1e-05, %v1393_v27  ;;  %1716 = vrsqrt.f32 %v1396_v31 }
 0x82d   :  { %1718 = vrsqrt.f32 %v1397_v32 }
 0x835   :  { %v1717_v43 = vpop.eup %1716 }
 0x836   :  { %v1405_v45 = vrot.slane %v1717_v43, %v1992_v6 }
 0x837   :  { %v1719_v46 = vpop.eup %1718 }
 0x838   :  { %v1409_v48 = vrot.slane %v1719_v46, %v1992_v6  ;;  %v1412_v49 = vmul.f32 %v1405_v45, %v1369_v44 }
 0x83a   :  { %v1413_v50 = vmul.f32 %v1409_v48, %v1370_v47  ;;  %v1420_v52 = vmul.f32 %v1494_v28, %v1412_v49 }
 0x83c   :  { %v1421_v53 = vmul.f32 %v1494_v28, %v1413_v50  ;;  %v1428_v38 = vadd.f32 %v1495_v51, %v1420_v52 }
 0x83e   :  { %v1429_v54 = vadd.f32 %v1495_v51, %v1421_v53  ;;  %v1430_v55 = vmin.f32 %v1428_v38, 20.0 }
 0x840   :  { %v1431_v57 = vmin.f32 %v1429_v54, 20.0  ;;  %v1432_v58 = vmul.f32 1.442695, %v1430_v55 }
 0x842   :  { %1720 = vpow2.f32 %v1432_v58  ;;  %v1434_v59 = vmul.f32 1.442695, %v1431_v57 }
 0x844   :  { %1722 = vpow2.f32 %v1434_v59 }
 0x84c   :  { %v1721_v60 = vpop.eup %1720 }
 0x84d   :  { %v1436_v42 = vadd.f32 1.0, %v1721_v60 }
 0x84e   :  { %v1723_v61 = vpop.eup %1722 }
 0x84f   :  { %v1437_v6 = vadd.f32 1.0, %v1723_v61  ;;  %v1438_v62 = vmul.f32 %v1436_v42, %v1436_v42 }
 0x851   :  { %v1439_v63 = vmul.f32 %v1437_v6, %v1437_v6  ;;  %v1444_v3 = vadd.f32 1.0, %v1438_v62  ;;  %v1496_v5 = vadd.f32 -1.0, %v1438_v62 }
 0x853   :  { %v1445_v4 = vadd.f32 1.0, %v1439_v63  ;;  %1724 = vrcp.f32 %v1444_v3  ;;  %v1497_v7 = vadd.f32 -1.0, %v1439_v63  ;;  %v1442_v8 = vmul.f32 %v1496_v5, %v1428_v38 }
 0x855   :  { %1726 = vrcp.f32 %v1445_v4  ;;  %v1443_v10 = vmul.f32 %v1497_v7, %v1429_v54 }
 0x85d   :  { %v1725_v9 = vpop.eup %1724 }
 0x85e   :  { %v1448_v11 = vmul.f32 %v1725_v9, %v1442_v8 }
 0x85f   :  { %v1727_v12 = vpop.eup %1726 }
 0x860   :  { %v1449_v13 = vmul.f32 %v1727_v12, %v1443_v10  ;;  %v1450_v14 = vadd.f32 %v1448_v11, %v1822_v0 }
 0x862   :  { %v1451_v15 = vadd.f32 %v1449_v13, %v1827_v1  ;;  %1452 = vst.msk [vmem:[%s2128_s16] sm:$0xf] %vm208_vm6, %v1450_v14 }
 0x864   :  { %1453 = vst.msk [vmem:[%s2128_s16 + $0x4] sm:$0xf] %vm208_vm6, %v1451_v15 }

// kernel: unet_forward.22
= control target key start
LH: loop header
LB: loop body
LE: loop exit
PB: predicated region body
PF: predicated region fallthrough
CT: control target
= control target key end

     0   :  { %v2016_v3 = vmov 0.0   ;;  %vm89_vm0 = vcmask 1042432   ;;  %s2018_s30 = smov 64   ;;  %vm2019_vm1 = vmmov 0   ;;  %vm82_vm2 = vcmask 1040384   ;;  %s2478_s1 = inlined_call_operand.vmem [shape: f32[2,4,32], index: 1, kind: input, shape index: {}]   ;;  %s2479_s0 = inlined_call_operand.vmem [shape: f32[2,4,32], index: 0, kind: input, shape index: {}]   ;;  %s2480_s3 = inlined_call_operand.vmem [shape: bf16[96,16], index: 3, kind: input, shape index: {}]   ;;  %s2481_s4 = inlined_call_operand.vmem [shape: bf16[96,16], index: 4, kind: input, shape index: {}]   ;;  %s2482_s8 = inlined_call_operand.vmem [shape: f32[16,8], index: 8, kind: input, shape index: {}]   ;;  %s2483_s9 = inlined_call_operand.vmem [shape: f32[8,16], index: 9, kind: input, shape index: {}]   ;;  %s2484_s5 = inlined_call_operand.vmem [shape: f32[1,16], index: 5, kind: input, shape index: {}]   ;;  %s2485_s10 = inlined_call_operand.vmem [shape: bf16[24,16], index: 10, kind: input, shape index: {}]   ;;  %s2486_s12 = inlined_call_operand.vmem [shape: bf16[24,16], index: 12, kind: input, shape index: {}]   ;;  %s2487_s2 = inlined_call_operand.vmem [shape: f32[2,24], index: 2, kind: input, shape index: {}]   ;;  %s2488_s6 = inlined_call_operand.vmem [shape: f32[1,16], index: 6, kind: input, shape index: {}]   ;;  %s2489_s7 = inlined_call_operand.vmem [shape: f32[1,16], index: 7, kind: input, shape index: {}]   ;;  %s2490_s11 = inlined_call_operand.vmem [shape: f32[1,16], index: 11, kind: input, shape index: {}]   ;;  %s2491_s13 = inlined_call_operand.vmem [shape: f32[1,16], index: 13, kind: input, shape index: {}]   ;;  %s2492_s14 = inlined_call_operand.vmem [shape: bf16[48,16], index: 14, kind: input, shape index: {}]   ;;  %s2493_s15 = inlined_call_operand.vmem [shape: f32[1,16], index: 15, kind: input, shape index: {}]   ;;  %s2494_s18 = inlined_call_operand.vmem [shape: bf16[32,16], index: 18, kind: input, shape index: {}]   ;;  %s2495_s19 = inlined_call_operand.vmem [shape: bf16[32,16], index: 19, kind: input, shape index: {}]   ;;  %s2496_s16 = inlined_call_operand.vmem [shape: f32[1,16], index: 16, kind: input, shape index: {}]   ;;  %s2497_s17 = inlined_call_operand.vmem [shape: f32[1,16], index: 17, kind: input, shape index: {}]   ;;  %s2498_s20 = inlined_call_operand.vmem [shape: f32[1,16], index: 20, kind: input, shape index: {}]   ;;  %s2499_s21 = inlined_call_operand.vmem [shape: f32[2,4,16], index: 21, kind: output, shape index: {}]  }
   0x1   :  { %2505 = sst [smem:[#allocation2_spill]] %s2478_s1  ;;  %1826 = vmatprep.subr.bf16.mxu0 %v2016_v3  ;;  %1842 = vmatprep.subr.bf16.mxu1 %v2016_v3  ;;  %vm106_vm3 = vcmask 261120   ;;  %vm109_vm4 = vcmask 523264   ;;  %vm165_vm5 = vcmask 785408   ;;  %v2020_v55 = vmov 0.0|0.0  }
   0x2   :  { %2506 = sst [smem:[#allocation3_spill]] %s2479_s0  ;;  %s2511_s26 = sld [smem:[#allocation2_spill]]  ;;  %1838 = vmatprep.mubr.msk.bf16.mxu0 %vm2019_vm1, %v2016_v3  ;;  %1854 = vmatprep.mubr.msk.bf16.mxu1 %vm2019_vm1, %v2016_v3  ;;  %vm356_vm6 = vcmask 125952   ;;  %vm389_vm7 = vcmask 1041409   ;;  %vm391_vm8 = vcmask 130048   ;;  %vm830_vm9 = vcmask 1043456  }
   0x3   :  { %2507 = sst [smem:[#allocation4_spill]] %s2480_s3  ;;  %s2512_s28 = sld [smem:[#allocation3_spill]]  ;;  %vm826_vm10 = vcmask 195584   ;;  %vm464_vm11 = vcmask 64512   ;;  %vm1073_vm12 = vcmask 392192  }
   0x4   :  { %2508 = sst [smem:[#allocation5_spill]] %s2481_s4  ;;  %s2513_s0 = sld [smem:[#allocation4_spill]] }
   0x5   :  { %2509 = sst [smem:[#allocation6_spill]] %s2482_s8  ;;  %s2017_s8 = smov 32  }
   0x6   :  { %2510 = sst [smem:[#allocation7_spill]] %s2483_s9  ;;  %s2514_s27 = sld [smem:[#allocation5_spill]] }
   0x7   :  { %s2515_s23 = sld [smem:[#allocation6_spill]]  ;;  %s2516_s4 = sld [smem:[#allocation7_spill]] }
   0x8   :  { %v2136_v0 = vld [vmem:[%s2511_s26] sm:$0xf]  ;;  %v2146_v2 = vld [vmem:[%s2511_s26 + $0x4] sm:$0xf] }
   0x9   :  { %v2141_v1 = vld [vmem:[%s2512_s28] sm:$0xf]  ;;  %226 = vrot.lane.b32.xlu1 %v2136_v0, %s2017_s8  ;;  %v2156_v4 = vcombine.low %v2136_v0, %v2146_v2  ;;  %v2161_v5 = vld [vmem:[%s2512_s28 + $0x4] sm:$0xf]  ;;  %v221_v12 = vrot.slane %v2146_v2, 1  ;;  %v220_v13 = vrot.slane %v2136_v0, 1 }
   0xa   :  { %92 = vrot.lane.b32.xlu0 %v2141_v1, %s2017_s8  ;;  %v85_v6 = vrot.slane %v2141_v1, 1  ;;  %v1969_v7 = vld [vmem:[%s2513_s0] sm:$0xff]   ;;  %v2169_v8 = vcombine.low %v2141_v1, %v2161_v5  ;;  %v86_v9 = vrot.slane %v2161_v5, 1  ;;  %v1970_v10 = vld [vmem:[%s2513_s0 + $0x8] sm:$0xff]   ;;  %v1972_v16 = vld [vmem:[%s2513_s0 + $0x10] sm:$0xff]   ;;  %v78_v29 = vrot.slane %v2141_v1, 7 }
   0xb   :  { %1827 = vmatpush3.bf16.msra.mxu0 %v1969_v7  ;;  %v225_v18 = vsel %vm89_vm0, %v221_v12, 0.0  ;;  %v224_v19 = vsel %vm89_vm0, %v220_v13, 0.0  ;;  %v1974_v21 = vld [vmem:[%s2513_s0 + $0x18] sm:$0xff]   ;;  %v1976_v23 = vld [vmem:[%s2513_s0 + $0x20] sm:$0xff]   ;;  %v1978_v25 = vld [vmem:[%s2513_s0 + $0x28] sm:$0xff]   ;;  %v79_v30 = vrot.slane %v2161_v5, 7 }
   0xc   :  { %v1971_v11 = vld [vmem:[%s2514_s27] sm:$0xff]   ;;  %1828 = vmatprep.subr.bf16.mxu0 %v2016_v3  ;;  %v91_v14 = vsel %vm89_vm0, %v86_v9, 0.0  ;;  %v90_v15 = vsel %vm89_vm0, %v85_v6, 0.0  ;;  %v1973_v17 = vld [vmem:[%s2514_s27 + $0x8] sm:$0xff]   ;;  %v1975_v20 = vld [vmem:[%s2514_s27 + $0x10] sm:$0xff]   ;;  %v214_v33 = vrot.slane %v2136_v0, 7 }
   0xd   :  { %228 = vrot.lane.b32.xlu1 %v2146_v2, %s2017_s8  ;;  %1843 = vmatpush3.bf16.msra.mxu1 %v1971_v11  ;;  %v1977_v22 = vld [vmem:[%s2514_s27 + $0x18] sm:$0xff]   ;;  %v1979_v24 = vld [vmem:[%s2514_s27 + $0x20] sm:$0xff]   ;;  %v1980_v26 = vld [vmem:[%s2514_s27 + $0x28] sm:$0xff]   ;;  %v83_v34 = vsel %vm82_vm2, 0.0, %v78_v29  ;;  %v215_v35 = vrot.slane %v2146_v2, 7  ;;  %v84_v36 = vsel %vm82_vm2, 0.0, %v79_v30 }
   0xe   :  { %94 = vrot.lane.b32.xlu0 %v2161_v5, %s2017_s8  ;;  %1844 = vmatprep.subr.bf16.mxu1 %v2016_v3  ;;  %v218_v41 = vsel %vm82_vm2, 0.0, %v214_v33  ;;  %v73_v56 = vld [vmem:[%s2515_s23] sm:$0xff]  ;;  %v74_v57 = vld [vmem:[%s2515_s23 + $0x8] sm:$0xff] }
   0xf   :  { %1829 = vmatpush3.bf16.msra.mxu0 %v1970_v10  ;;  %v219_v42 = vsel %vm82_vm2, 0.0, %v215_v35  ;;  %v2257_v58 = vpack.c.bf16 %v74_v57, %v73_v56  ;;  %v2264_v59 = vld [vmem:[%s2516_s4] sm:$0xff] }
  0x10   :  { %1830 = vmatprep.subr.bf16.mxu0 %v2016_v3  ;;  %v1739_v1 = vld [vmem:[%s2484_s5] ss:$0 sm:$0xff] }
  0x11   :  { %102 = vrot.lane.b32.xlu1 %v91_v14, %s2018_s30  ;;  %1845 = vmatpush3.bf16.msra.mxu1 %v1973_v17  ;;  %v1983_v56 = vld [vmem:[%s2486_s12] sm:$0xff]  }
  0x12   :  { %100 = vrot.lane.b32.xlu0 %v90_v15, %s2018_s30  ;;  %1846 = vmatprep.subr.bf16.mxu1 %v2016_v3 }
  0x13   :  { %1831 = vmatpush3.bf16.msra.mxu0 %v1972_v16 }
  0x14   :  { %1832 = vmatprep.subr.bf16.mxu0 %v2016_v3 }
  0x15   :  { %236 = vrot.lane.b32.xlu1 %v225_v18, %s2018_s30  ;;  %1847 = vmatpush3.bf16.msra.mxu1 %v1975_v20 }
  0x16   :  { %234 = vrot.lane.b32.xlu0 %v224_v19, %s2018_s30  ;;  %1848 = vmatprep.subr.bf16.mxu1 %v2016_v3  ;;  %s2022_s30 = smov 16  }
  0x17   :  { %1833 = vmatpush3.bf16.msra.mxu0 %v1974_v21 }
  0x18   :  { %1834 = vmatprep.subr.bf16.mxu0 %v2016_v3 }
  0x19   :  { %1849 = vmatpush3.bf16.msra.mxu1 %v1977_v22 }
  0x1a   :  { %1850 = vmatprep.subr.bf16.mxu1 %v2016_v3 }
  0x1b   :  { %1835 = vmatpush3.bf16.msra.mxu0 %v1976_v23 }
  0x1c   :  { %1836 = vmatprep.subr.bf16.mxu0 %v2016_v3 }
  0x1d   :  { %1851 = vmatpush3.bf16.msra.mxu1 %v1979_v24 }
  0x1e   :  { %1852 = vmatprep.subr.bf16.mxu1 %v2016_v3 }
  0x1f   :  { %1837 = vmatpush3.bf16.msra.mxu0 %v1978_v25 }
  0x20   :  { %1948 = vmatprep.subr.bf16.mxu0 %v2020_v55 }
  0x21   :  { %1853 = vmatpush3.bf16.msra.mxu1 %v1980_v26 }
  0x22   :  { %1865 = vmatprep.subr.mxu1 %v2016_v3 }
  0x7b   :  { %v227_v27 = vpop.permute.xlu1 %226 }
  0x7c   :  { %v93_v28 = vpop.permute.xlu0 %92  ;;  %v240_v46 = vsel %vm106_vm3, %v218_v41, %v227_v27 }
  0x7d   :  { %v107_v37 = vsel %vm106_vm3, %v83_v34, %v93_v28 }
  0x7f   :  { %v229_v31 = vpop.permute.xlu1 %228 }
  0x80   :  { %v95_v32 = vpop.permute.xlu0 %94  ;;  %v241_v47 = vsel %vm106_vm3, %v219_v42, %v229_v31 }
  0x81   :  { %v108_v38 = vsel %vm106_vm3, %v84_v36, %v95_v32 }
  0x83   :  { %v103_v39 = vpop.permute.xlu1 %102 }
  0x84   :  { %v101_v40 = vpop.permute.xlu0 %100  ;;  %v111_v43 = vsel %vm109_vm4, %v108_v38, %v103_v39 }
  0x85   :  { %v110_v44 = vsel %vm109_vm4, %v107_v37, %v101_v40 }
  0x86   :  { %v114_v45 = vcombine.low %v110_v44, %v111_v43 }
  0x87   :  { %v237_v49 = vpop.permute.xlu1 %236 }
  0x88   :  { %v116_v48 = vpack.c.bf16 %v114_v45, %v114_v45  ;;  %v235_v50 = vpop.permute.xlu0 %234  ;;  %v243_v51 = vsel %vm109_vm4, %v241_v47, %v237_v49  ;;  %v1982_v47 = vld [vmem:[%s2485_s10 + $0x8] ss:$0 sps:$4 sm:$0xff]  }
  0x89   :  { %v242_v52 = vsel %vm109_vm4, %v240_v46, %v235_v50  ;;  %v1981_v46 = vld [vmem:[%s2485_s10] sm:$0xff]   ;;  %v832_v49 = vsel %vm830_vm9, %v1982_v47, 0  ;;  %v1984_v50 = vld [vmem:[%s2486_s12 + $0x8] ss:$0 sps:$4 sm:$0xff]  }
  0x8a   :  { %v246_v53 = vcombine.low %v242_v52, %v243_v51  ;;  %1839 = vmatmul.mubr.msk.bf16.vlgmr.msra.gmra.mrb[0].mxu0 %vm165_vm5, %v116_v48  ;;  %v805_v48 = vld [vmem:[%s2487_s2] sm:$0x3]  ;;  %v894_v52 = vsel %vm830_vm9, %v1984_v50, 0 }
  0x8b   :  { %1862 = vmatprep.mubr.msk.f32.mxu0 %vm2019_vm1, %v2016_v3  ;;  %1950 = vmatpush3.bf16.msra.mxu0 %v2257_v58  ;;  %v806_v51 = vpack.c.bf16 %v805_v48, %v805_v48 }
  0x8c   :  { %v248_v54 = vpack.c.bf16 %v246_v53, %v246_v53  ;;  %1951 = vmatprep.subr.bf16.mxu0 %v2020_v55 }
  0x8e   :  { %1855 = vmatmul.mubr.msk.bf16.vlgmr.msra.gmra.mrb[0].mxu1 %vm165_vm5, %v248_v54 }
  0x8f   :  { %1867 = vmatprep.mubr.msk.f32.mxu1 %vm2019_vm1, %v2016_v3  ;;  %1866 = vmatpush3.msra.mxu1 %v2264_v59 }
  0x90   :  { %1877 = vmatprep.subr.mxu1 %v2016_v3 }
 0x15d   :  { %v203_v60 = vpop.f32.mrb[0].mxu0 }
 0x15e   :  { %v1840_v61 = vpop.f32.mrb[1].mxu0  ;;  %v210_v2 = vcombine.high %v203_v60, %v203_v60 }
 0x15f   :  { %v206_v62 = vpop.f32.mrb[2].mxu0 }
 0x160   :  { %v1841_v63 = vpop.f32.mrb[3].mxu0 }
 0x161   :  { %v334_v0 = vpop.f32.mrb[0].mxu1 }
 0x162   :  { %v341_v5 = vcombine.high %v334_v0, %v334_v0  ;;  %v343_v6 = vadd.f32 %v334_v0, %v203_v60  ;;  %v1856_v7 = vpop.f32.mrb[1].mxu1 }
 0x163   :  { %v337_v9 = vpop.f32.mrb[2].mxu1  ;;  %v695_v7 = vlaneseq }
 0x164   :  { %v344_v10 = vadd.f32 %v341_v5, %v210_v2  ;;  %v2271_v11 = vadd.f32 %v1739_v1, %v343_v6  ;;  %v1857_v12 = vpop.f32.mrb[3].mxu1  ;;  %v2021_v5 = vmov 1966171168  }
 0x165   :  { %v693_v6 = vunpack.c.l.s4 %v2021_v5 }
 0x166   :  { %v2273_v13 = vadd.f32 %v1739_v1, %v344_v10  ;;  %v357_v14 = vsel %vm356_vm6, %v2271_v11, 0.0  ;;  %v371_v15 = vmul.f32 %v2271_v11, %v2271_v11 }
 0x167   :  { %v358_v16 = vrot.slane %v357_v14, 4 }
 0x168   :  { %v364_v17 = vsel %vm356_vm6, %v2273_v13, 0.0  ;;  %v372_v18 = vmul.f32 %v2273_v13, %v2273_v13  ;;  %v373_v19 = vsel %vm356_vm6, %v371_v15, 0.0  ;;  %v696_v15 = vshrl.u32 %v695_v7, 7 }
 0x169   :  { %v359_v20 = vadd.f32 %v358_v16, %v357_v14  ;;  %v365_v21 = vrot.slane %v364_v17, 4  ;;  %v374_v22 = vrot.slane %v373_v19, 4  ;;  %v694_v14 = vunpack.c.0.s8 %v693_v6 }
 0x16a   :  { %v380_v23 = vsel %vm356_vm6, %v372_v18, 0.0 }
 0x16b   :  { %v360_v24 = vrot.slane %v359_v20, 2  ;;  %v366_v25 = vadd.f32 %v365_v21, %v364_v17  ;;  %v375_v26 = vadd.f32 %v374_v22, %v373_v19  ;;  %v381_v27 = vrot.slane %v380_v23, 4 }
 0x16c   :  { %v2330_v19 = vsub.s32 %v694_v14, %v696_v15  ;;  %v1985_v14 = vld [vmem:[%s2492_s14] sm:$0xff]  }
 0x16d   :  { %v361_v28 = vadd.f32 %v360_v24, %v359_v20  ;;  %v367_v29 = vrot.slane %v366_v25, 2  ;;  %v376_v30 = vrot.slane %v375_v26, 2  ;;  %v382_v31 = vadd.f32 %v381_v27, %v380_v23 }
 0x16f   :  { %v362_v32 = vrot.slane %v361_v28, 1  ;;  %v368_v33 = vadd.f32 %v367_v29, %v366_v25  ;;  %v377_v34 = vadd.f32 %v376_v30, %v375_v26  ;;  %v383_v35 = vrot.slane %v382_v31, 2 }
 0x171   :  { %v369_v36 = vrot.slane %v368_v33, 1  ;;  %v384_v37 = vadd.f32 %v383_v35, %v382_v31  ;;  %v363_v38 = vadd.f32 %v362_v32, %v361_v28  ;;  %v378_v40 = vrot.slane %v377_v34, 1 }
 0x173   :  { %v370_v39 = vadd.f32 %v369_v36, %v368_v33  ;;  %v385_v41 = vrot.slane %v384_v37, 1  ;;  %v379_v44 = vadd.f32 %v378_v40, %v377_v34  ;;  %v2337_v34 = vsub.s32 0, %v696_v15 }
 0x175   :  { %v390_v42 = vsel %vm389_vm7, %v370_v39, %v363_v38  ;;  %v386_v43 = vadd.f32 %v385_v41, %v384_v37 }
 0x176   :  { %1863 = vmatmul.mubr.msk.f32.vlgmr.msra.gmra.mrb[4].mxu0 %vm391_vm8, %v390_v42  ;;  %v1744_v42 = vld [vmem:[%s2488_s6] ss:$0 sm:$0xff] }
 0x177   :  { %1953 = vmatpush3.bf16.msra.mxu0 %v2257_v58  ;;  %1874 = vmatprep.mubr.msk.f32.mxu0 %vm2019_vm1, %v2016_v3  ;;  %v541_v45 = vsel %vm389_vm7, %v386_v43, %v379_v44 }
 0x178   :  { %1882 = vmatprep.subr.bf16.mxu0 %v2016_v3 }
 0x17a   :  { %1875 = vmatmul.mubr.msk.f32.vlgmr.msra.gmra.mrb[6].mxu0 %vm391_vm8, %v541_v45 }
 0x17b   :  { %1886 = vmatprep.mubr.msk.bf16.mxu0 %vm2019_vm1, %v2016_v3  ;;  %1883 = vmatpush3.bf16.msra.mxu0 %v1981_v46  ;;  %v1745_v46 = vld [vmem:[%s2489_s7] ss:$0 sm:$0xff] }
 0x17c   :  { %1884 = vmatprep.subr.bf16.mxu0 %v2016_v3 }
 0x17f   :  { %1885 = vmatpush3.bf16.msra.mxu0 %v832_v49 }
 0x180   :  { %1898 = vmatprep.subr.bf16.mxu0 %v2016_v3 }
 0x182   :  { %1887 = vmatmul.mubr.msk.bf16.vlgmr.msra.gmra.mrb[8].mxu0 %vm826_vm10, %v806_v51 }
 0x183   :  { %1904 = vmatprep.mubr.msk.bf16.mxu0 %vm2019_vm1, %v2016_v3  ;;  %1899 = vmatpush3.bf16.msra.mxu0 %v1985_v14 }
 0x184   :  { %1900 = vmatprep.subr.bf16.mxu0 %v2016_v3 }
 0x249   :  { %v460_v53 = vpop.f32.mrb[4].mxu0 }
 0x24a   :  { %v1864_v54 = vpop.f32.mrb[5].mxu0  ;;  %1868 = vmatmul.mubr.msk.f32.vlgmr.msra.gmra.mrb[4].mxu1 %vm464_vm11, %v460_v53 }
 0x24b   :  { %1878 = vmatpush3.msra.mxu1 %v2264_v59  ;;  %1879 = vmatprep.mubr.msk.f32.mxu1 %vm2019_vm1, %v2016_v3 }
 0x24c   :  { %1890 = vmatprep.subr.bf16.mxu1 %v2016_v3 }
 0x24d   :  { %v610_v57 = vpop.f32.mrb[6].mxu0 }
 0x24e   :  { %v1876_v60 = vpop.f32.mrb[7].mxu0  ;;  %1880 = vmatmul.mubr.msk.f32.vlgmr.msra.gmra.mrb[6].mxu1 %vm464_vm11, %v610_v57 }
 0x24f   :  { %1891 = vmatpush3.bf16.msra.mxu1 %v1983_v56  ;;  %1894 = vmatprep.mubr.msk.bf16.mxu1 %vm2019_vm1, %v2016_v3  ;;  %v1752_v60 = vld [vmem:[%s2491_s13] ss:$0 sm:$0xff] }
 0x250   :  { %1892 = vmatprep.subr.bf16.mxu1 %v2016_v3 }
 0x253   :  { %1893 = vmatpush3.bf16.msra.mxu1 %v894_v52 }
 0x254   :  { %1954 = vmatprep.subr.bf16.mxu1 %v2020_v55 }
 0x255   :  { %v868_v61 = vpop.f32.mrb[8].mxu0 }
 0x256   :  { %1895 = vmatmul.mubr.msk.bf16.vlgmr.msra.gmra.mrb[8].mxu1 %vm826_vm10, %v806_v51  ;;  %v1888_v62 = vpop.f32.mrb[9].mxu0 }
 0x257   :  { %1956 = vmatpush3.bf16.msra.mxu1 %v2257_v58  ;;  %1912 = vmatprep.mubr.msk.f32.mxu1 %vm2019_vm1, %v2016_v3  ;;  %v871_v63 = vpop.f32.mrb[10].mxu0 }
 0x258   :  { %1915 = vmatprep.subr.mxu1 %v2016_v3  ;;  %v1889_v0 = vpop.f32.mrb[11].mxu0 }
 0x31d   :  { %v534_v1 = vpop.f32.mrb[4].mxu1 }
 0x31e   :  { %v538_v2 = vmul.f32 0.125, %v534_v1  ;;  %v1869_v9 = vpop.f32.mrb[5].mxu1 }
 0x320   :  { %v688_v12 = vmul.f32 %v538_v2, %v538_v2  ;;  %v698_v26 = vrot.slane %v538_v2, %v2330_v19 }
 0x321   :  { %v683_v10 = vpop.f32.mrb[6].mxu1 }
 0x322   :  { %v687_v16 = vmul.f32 0.125, %v683_v10  ;;  %v1881_v17 = vpop.f32.mrb[7].mxu1  ;;  %v699_v32 = vcombine.high %v698_v26, %v698_v26  ;;  %v706_v33 = vrot.slane %v698_v26, %v2330_v19 }
 0x324   :  { %v689_v18 = vsub.f32 %v687_v16, %v688_v12  ;;  %v713_v35 = vrot.slane %v699_v32, %v2330_v19  ;;  %v717_v36 = vrot.slane %v706_v33, %v2337_v34 }
 0x326   :  { %v690_v20 = vmax.f32 %v689_v18, 0.0  ;;  %v721_v37 = vrot.slane %v713_v35, %v2337_v34  ;;  %v724_v39 = vsub.f32 %v2271_v11, %v717_v36 }
 0x328   :  { %v733_v21 = vrot.slane %v690_v20, %v2330_v19  ;;  %v725_v43 = vsub.f32 %v2273_v13, %v721_v37  ;;  %v1748_v13 = vld [vmem:[%s2490_s11] ss:$0 sm:$0xff]  ;;  %v1986_v20 = vld [vmem:[%s2492_s14 + $0x8] sm:$0xff]  }
 0x329   :  { %v930_v22 = vpop.f32.mrb[8].mxu1  ;;  %v869_v56 = vadd.f32 %v1748_v13, %v868_v61  ;;  %1901 = vmatpush3.bf16.msra.mxu0 %v1986_v20 }
 0x32a   :  { %v734_v23 = vcombine.high %v733_v21, %v733_v21  ;;  %v741_v24 = vrot.slane %v733_v21, %v2330_v19  ;;  %v1896_v25 = vpop.f32.mrb[9].mxu1  ;;  %v931_v5 = vadd.f32 %v1752_v60, %v930_v22  ;;  %1902 = vmatprep.subr.bf16.mxu0 %v2016_v3  ;;  %v1760_v60 = vld [vmem:[%s2493_s15] ss:$0 sm:$0xff] }
 0x32b   :  { %v933_v27 = vpop.f32.mrb[10].mxu1  ;;  %v943_v0 = vrot.slane %v869_v56, %v2330_v19 }
 0x32c   :  { %v748_v28 = vrot.slane %v734_v23, %v2330_v19  ;;  %v751_v29 = vadd.f32 1e-05, %v741_v24  ;;  %v1897_v30 = vpop.f32.mrb[11].mxu1  ;;  %v984_v61 = vrot.slane %v931_v5, %v2330_v19 }
 0x32d   :  { %v944_v9 = vcombine.high %v943_v0, %v943_v0  ;;  %v951_v12 = vrot.slane %v943_v0, %v2330_v19 }
 0x32e   :  { %v752_v31 = vadd.f32 1e-05, %v748_v28  ;;  %1992 = vrsqrt.f32 %v751_v29  ;;  %v985_v17 = vcombine.high %v984_v61, %v984_v61  ;;  %v992_v22 = vrot.slane %v984_v61, %v2330_v19  ;;  %v1987_v28 = vld [vmem:[%s2492_s14 + $0x10] sm:$0xff]  }
 0x32f   :  { %v958_v15 = vrot.slane %v944_v9, %v2330_v19  ;;  %v961_v16 = vadd.f32 1.0, %v951_v12  ;;  %1903 = vmatpush3.bf16.msra.mxu0 %v1987_v28 }
 0x330   :  { %1994 = vrsqrt.f32 %v752_v31  ;;  %v999_v25 = vrot.slane %v985_v17, %v2330_v19  ;;  %v1003_v30 = vrot.slane %v992_v22, %v2337_v34  ;;  %1927 = vmatprep.subr.mxu0 %v2016_v3 }
 0x331   :  { %v962_v21 = vadd.f32 1.0, %v958_v15  ;;  %v968_v24 = vrot.slane %v961_v16, %v2337_v34 }
 0x332   :  { %v1007_v37 = vrot.slane %v999_v25, %v2337_v34 }
 0x333   :  { %v972_v32 = vrot.slane %v962_v21, %v2337_v34 }
 0x338   :  { %v1993_v38 = vpop.eup %1992 }
 0x339   :  { %v760_v40 = vrot.slane %v1993_v38, %v2337_v34 }
 0x33a   :  { %v1995_v41 = vpop.eup %1994 }
 0x33b   :  { %v767_v44 = vmul.f32 %v760_v40, %v724_v39  ;;  %v764_v45 = vrot.slane %v1995_v41, %v2337_v34 }
 0x33d   :  { %v775_v47 = vmul.f32 %v1744_v42, %v767_v44  ;;  %v768_v48 = vmul.f32 %v764_v45, %v725_v43 }
 0x33f   :  { %v783_v49 = vadd.f32 %v1745_v46, %v775_v47  ;;  %v776_v11 = vmul.f32 %v1744_v42, %v768_v48 }
 0x341   :  { %v785_v50 = vmin.f32 %v783_v49, 20.0  ;;  %v784_v51 = vadd.f32 %v1745_v46, %v776_v11 }
 0x343   :  { %v787_v52 = vmul.f32 1.442695, %v785_v50  ;;  %v786_v53 = vmin.f32 %v784_v51, 20.0 }
 0x345   :  { %1996 = vpow2.f32 %v787_v52  ;;  %v789_v54 = vmul.f32 1.442695, %v786_v53 }
 0x347   :  { %1998 = vpow2.f32 %v789_v54 }
 0x34f   :  { %v1997_v57 = vpop.eup %1996 }
 0x350   :  { %v791_v62 = vadd.f32 1.0, %v1997_v57 }
 0x351   :  { %v1999_v63 = vpop.eup %1998 }
 0x352   :  { %v793_v1 = vmul.f32 %v791_v62, %v791_v62  ;;  %v792_v2 = vadd.f32 1.0, %v1999_v63 }
 0x354   :  { %v799_v6 = vadd.f32 1.0, %v793_v1  ;;  %v794_v7 = vmul.f32 %v792_v2, %v792_v2  ;;  %v1746_v18 = vadd.f32 -1.0, %v793_v1 }
 0x356   :  { %2000 = vrcp.f32 %v799_v6  ;;  %v800_v10 = vadd.f32 1.0, %v794_v7  ;;  %v1747_v23 = vadd.f32 -1.0, %v794_v7  ;;  %v797_v26 = vmul.f32 %v1746_v18, %v783_v49 }
 0x358   :  { %2002 = vrcp.f32 %v800_v10  ;;  %v798_v31 = vmul.f32 %v1747_v23, %v784_v51 }
 0x360   :  { %v2001_v27 = vpop.eup %2000 }
 0x361   :  { %v803_v29 = vmul.f32 %v2001_v27, %v797_v26 }
 0x362   :  { %v2003_v33 = vpop.eup %2002 }
 0x363   :  { %v975_v35 = vmul.f32 %v968_v24, %v803_v29  ;;  %v804_v36 = vmul.f32 %v2003_v33, %v798_v31 }
 0x365   :  { %v1010_v38 = vadd.f32 %v1003_v30, %v975_v35  ;;  %v976_v39 = vmul.f32 %v972_v32, %v804_v36 }
 0x367   :  { %1026 = vrot.lane.b32.xlu0 %v1010_v38, %s2022_s30  ;;  %v1011_v40 = vadd.f32 %v1007_v37, %v976_v39  ;;  %v1020_v41 = vrot.slane %v1010_v38, 1  ;;  %v1014_v46 = vrot.slane %v1010_v38, 7 }
 0x369   :  { %1028 = vrot.lane.b32.xlu1 %v1011_v40, %s2022_s30  ;;  %v1024_v42 = vsel %vm89_vm0, %v1020_v41, 0.0  ;;  %v1021_v43 = vrot.slane %v1011_v40, 1  ;;  %v1015_v47 = vrot.slane %v1011_v40, 7  ;;  %v1018_v11 = vsel %vm82_vm2, 0.0, %v1014_v46 }
 0x36b   :  { %1034 = vrot.lane.b32.xlu0 %v1024_v42, %s2017_s8  ;;  %v1025_v44 = vsel %vm89_vm0, %v1021_v43, 0.0  ;;  %v1019_v50 = vsel %vm82_vm2, 0.0, %v1015_v47  ;;  %v1988_v43 = vld [vmem:[%s2494_s18] sm:$0xff]  }
 0x36c   :  { %v1989_v47 = vld [vmem:[%s2495_s19] sm:$0xff]  }
 0x36d   :  { %1036 = vrot.lane.b32.xlu1 %v1025_v44, %s2017_s8  ;;  %v1578_v44 = vpack.c.bf16 %v2169_v8, %v2169_v8  ;;  %v1643_v8 = vpack.c.bf16 %v2156_v4, %v2156_v4 }
 0x3d9   :  { %v1027_v45 = vpop.permute.xlu0 %1026 }
 0x3da   :  { %v1040_v51 = vsel %vm391_vm8, %v1018_v11, %v1027_v45  ;;  %v1991_v11 = vld [vmem:[%s2495_s19 + $0x8] sm:$0xff]  }
 0x3db   :  { %v1029_v48 = vpop.permute.xlu1 %1028 }
 0x3dc   :  { %v1041_v52 = vsel %vm391_vm8, %v1019_v50, %v1029_v48 }
 0x3dd   :  { %v1035_v49 = vpop.permute.xlu0 %1034 }
 0x3de   :  { %v1042_v54 = vsel %vm106_vm3, %v1040_v51, %v1035_v49 }
 0x3df   :  { %v1037_v53 = vpop.permute.xlu1 %1036 }
 0x3e0   :  { %v1043_v13 = vsel %vm106_vm3, %v1041_v52, %v1037_v53 }
 0x3e1   :  { %v1046_v56 = vcombine.low %v1042_v54, %v1043_v13 }
 0x3e3   :  { %v1048_v57 = vpack.c.bf16 %v1046_v56, %v1046_v56 }
 0x3e5   :  { %1905 = vmatmul.mubr.msk.bf16.vlgmr.msra.gmra.mrb[12].mxu0 %vm1073_vm12, %v1048_v57 }
 0x3e6   :  { %1928 = vmatpush3.msra.mxu0 %v2264_v59  ;;  %1929 = vmatprep.mubr.msk.f32.mxu0 %vm2019_vm1, %v2016_v3 }
 0x3e7   :  { %1940 = vmatprep.subr.bf16.mxu0 %v2016_v3 }
 0x4b8   :  { %v1111_v62 = vpop.f32.mrb[12].mxu0 }
 0x4b9   :  { %v1118_v63 = vcombine.high %v1111_v62, %v1111_v62  ;;  %v2397_v0 = vadd.f32 %v1760_v60, %v1111_v62  ;;  %v1906_v1 = vpop.f32.mrb[13].mxu0 }
 0x4ba   :  { %v1114_v2 = vpop.f32.mrb[14].mxu0 }
 0x4bb   :  { %v2399_v5 = vadd.f32 %v1760_v60, %v1118_v63  ;;  %v1131_v6 = vsel %vm356_vm6, %v2397_v0, 0.0  ;;  %v1907_v7 = vpop.f32.mrb[15].mxu0  ;;  %v1145_v26 = vmul.f32 %v2397_v0, %v2397_v0 }
 0x4bc   :  { %v1132_v9 = vrot.slane %v1131_v6, 4 }
 0x4bd   :  { %v1138_v10 = vsel %vm356_vm6, %v2399_v5, 0.0  ;;  %v1146_v25 = vmul.f32 %v2399_v5, %v2399_v5  ;;  %v1147_v28 = vsel %vm356_vm6, %v1145_v26, 0.0 }
 0x4be   :  { %v1133_v12 = vadd.f32 %v1132_v9, %v1131_v6  ;;  %v1139_v61 = vrot.slane %v1138_v10, 4  ;;  %v1148_v30 = vrot.slane %v1147_v28, 4 }
 0x4bf   :  { %v1154_v27 = vsel %vm356_vm6, %v1146_v25, 0.0 }
 0x4c0   :  { %v1134_v14 = vrot.slane %v1133_v12, 2  ;;  %v1140_v15 = vadd.f32 %v1139_v61, %v1138_v10  ;;  %v1155_v29 = vrot.slane %v1154_v27, 4  ;;  %v1149_v32 = vadd.f32 %v1148_v30, %v1147_v28 }
 0x4c2   :  { %v1135_v16 = vadd.f32 %v1134_v14, %v1133_v12  ;;  %v1141_v17 = vrot.slane %v1140_v15, 2  ;;  %v1156_v31 = vadd.f32 %v1155_v29, %v1154_v27  ;;  %v1150_v33 = vrot.slane %v1149_v32, 2  ;;  %v1765_v29 = vld [vmem:[%s2496_s16] ss:$0 sm:$0xff] }
 0x4c4   :  { %v1136_v18 = vrot.slane %v1135_v16, 1  ;;  %v1142_v20 = vadd.f32 %v1141_v17, %v1140_v15  ;;  %v1151_v36 = vadd.f32 %v1150_v33, %v1149_v32 }
 0x4c6   :  { %v1143_v21 = vrot.slane %v1142_v20, 1  ;;  %v1137_v22 = vadd.f32 %v1136_v18, %v1135_v16 }
 0x4c8   :  { %v1144_v23 = vadd.f32 %v1143_v21, %v1142_v20 }
 0x4ca   :  { %v1163_v24 = vsel %vm389_vm7, %v1144_v23, %v1137_v22 }
 0x4cb   :  { %1913 = vmatmul.mubr.msk.f32.vlgmr.msra.gmra.mrb[12].mxu1 %vm391_vm8, %v1163_v24 }
 0x4cc   :  { %1916 = vmatpush3.msra.mxu1 %v2264_v59  ;;  %1917 = vmatprep.mubr.msk.f32.mxu1 %vm2019_vm1, %v2016_v3  ;;  %v1157_v59 = vrot.slane %v1156_v31, 2 }
 0x4cd   :  { %1957 = vmatprep.subr.bf16.mxu1 %v2020_v55  ;;  %v1152_v55 = vrot.slane %v1151_v36, 1 }
 0x4ce   :  { %v1158_v35 = vadd.f32 %v1157_v59, %v1156_v31 }
 0x4cf   :  { %v1153_v41 = vadd.f32 %v1152_v55, %v1151_v36 }
 0x4d0   :  { %v1159_v37 = vrot.slane %v1158_v35, 1 }
 0x4d2   :  { %v1160_v39 = vadd.f32 %v1159_v37, %v1158_v35 }
 0x4d4   :  { %v1312_v42 = vsel %vm389_vm7, %v1160_v39, %v1153_v41 }
 0x59e   :  { %v1232_v38 = vpop.f32.mrb[12].mxu1 }
 0x59f   :  { %v1914_v40 = vpop.f32.mrb[13].mxu1  ;;  %1918 = vmatmul.mubr.msk.f32.vlgmr.msra.gmra.mrb[14].mxu1 %vm464_vm11, %v1232_v38 }
 0x5a0   :  { %1959 = vmatpush3.bf16.msra.mxu1 %v2257_v58  ;;  %1924 = vmatprep.mubr.msk.f32.mxu1 %vm2019_vm1, %v2016_v3  ;;  %v1990_v58 = vld [vmem:[%s2494_s18 + $0x8] sm:$0xff]  }
 0x5a1   :  { %1932 = vmatprep.subr.bf16.mxu1 %v2016_v3 }
 0x5a3   :  { %1925 = vmatmul.mubr.msk.f32.vlgmr.msra.gmra.mrb[16].mxu1 %vm391_vm8, %v1312_v42 }
 0x5a4   :  { %1936 = vmatprep.mubr.msk.bf16.mxu1 %vm2019_vm1, %v2016_v3  ;;  %1933 = vmatpush3.bf16.msra.mxu1 %v1988_v43 }
 0x5a5   :  { %1934 = vmatprep.subr.bf16.mxu1 %v2016_v3 }
 0x5a8   :  { %1935 = vmatpush3.bf16.msra.mxu1 %v1990_v58 }
 0x5ab   :  { %1937 = vmatmul.mubr.msk.bf16.vlgmr.msra.gmra.mrb[20].mxu1 %vm106_vm3, %v1578_v44 }
 0x672   :  { %v1305_v45 = vpop.f32.mrb[14].mxu1 }
 0x673   :  { %v1919_v46 = vpop.f32.mrb[15].mxu1  ;;  %v1309_v54 = vmul.f32 0.125, %v1305_v45 }
 0x674   :  { %v1775_v46 = vld [vmem:[%s2498_s20] ss:$0 sm:$0xff] }
 0x675   :  { %v1459_v56 = vmul.f32 %v1309_v54, %v1309_v54  ;;  %v1469_v12 = vrot.slane %v1309_v54, %v2330_v19 }
 0x676   :  { %v1381_v48 = vpop.f32.mrb[16].mxu1 }
 0x677   :  { %v1926_v49 = vpop.f32.mrb[17].mxu1  ;;  %1930 = vmatmul.mubr.msk.f32.vlgmr.msra.gmra.mrb[16].mxu0 %vm464_vm11, %v1381_v48  ;;  %v1470_v20 = vcombine.high %v1469_v12, %v1469_v12  ;;  %v1477_v21 = vrot.slane %v1469_v12, %v2330_v19 }
 0x678   :  { %1941 = vmatpush3.bf16.msra.mxu0 %v1989_v47  ;;  %1944 = vmatprep.mubr.msk.bf16.mxu0 %vm2019_vm1, %v2016_v3 }
 0x679   :  { %1942 = vmatprep.subr.bf16.mxu0 %v2016_v3  ;;  %v1484_v22 = vrot.slane %v1470_v20, %v2330_v19  ;;  %v1488_v23 = vrot.slane %v1477_v21, %v2337_v34 }
 0x67b   :  { %v1492_v24 = vrot.slane %v1484_v22, %v2337_v34  ;;  %v1495_v26 = vsub.f32 %v2397_v0, %v1488_v23 }
 0x67c   :  { %1943 = vmatpush3.bf16.msra.mxu0 %v1991_v11 }
 0x67d   :  { %v1496_v30 = vsub.f32 %v2399_v5, %v1492_v24 }
 0x67e   :  { %v1632_v50 = vpop.f32.mrb[20].mxu1 }
 0x67f   :  { %1945 = vmatmul.mubr.msk.bf16.vlgmr.msra.gmra.mrb[20].mxu0 %vm106_vm3, %v1643_v8  ;;  %v1938_v51 = vpop.f32.mrb[21].mxu1  ;;  %v1639_v3 = vcombine.high %v1632_v50, %v1632_v50 }
 0x680   :  { %v1635_v52 = vpop.f32.mrb[22].mxu1 }
 0x681   :  { %v1939_v53 = vpop.f32.mrb[23].mxu1 }
 0x74a   :  { %v1454_v13 = vpop.f32.mrb[16].mxu0 }
 0x74b   :  { %v1458_v57 = vmul.f32 0.125, %v1454_v13  ;;  %v1931_v60 = vpop.f32.mrb[17].mxu0 }
 0x74d   :  { %v1460_v62 = vsub.f32 %v1458_v57, %v1459_v56 }
 0x74f   :  { %v1461_v63 = vmax.f32 %v1460_v62, 0.0 }
 0x751   :  { %v1504_v1 = vrot.slane %v1461_v63, %v2330_v19 }
 0x752   :  { %v1697_v2 = vpop.f32.mrb[20].mxu0 }
 0x753   :  { %v1505_v6 = vcombine.high %v1504_v1, %v1504_v1  ;;  %v1512_v4 = vrot.slane %v1504_v1, %v2330_v19  ;;  %v1704_v7 = vcombine.high %v1697_v2, %v1697_v2  ;;  %v1706_v9 = vadd.f32 %v1697_v2, %v1632_v50  ;;  %v1946_v10 = vpop.f32.mrb[21].mxu0 }
 0x754   :  { %v1700_v61 = vpop.f32.mrb[22].mxu0 }
 0x755   :  { %v1519_v14 = vrot.slane %v1505_v6, %v2330_v19  ;;  %v1522_v15 = vadd.f32 1e-05, %v1512_v4  ;;  %v1707_v16 = vadd.f32 %v1704_v7, %v1639_v3  ;;  %v1947_v17 = vpop.f32.mrb[23].mxu0  ;;  %v1766_v19 = vld [vmem:[%s2497_s17] ss:$0 sm:$0xff]  ;;  %v1715_v49 = vadd.f32 %v1775_v46, %v1706_v9 }
 0x757   :  { %v1523_v18 = vadd.f32 1e-05, %v1519_v14  ;;  %2004 = vrsqrt.f32 %v1522_v15  ;;  %v1716_v51 = vadd.f32 %v1775_v46, %v1707_v16 }
 0x759   :  { %2006 = vrsqrt.f32 %v1523_v18 }
 0x761   :  { %v2005_v25 = vpop.eup %2004 }
 0x762   :  { %v1531_v27 = vrot.slane %v2005_v25, %v2337_v34 }
 0x763   :  { %v2007_v28 = vpop.eup %2006 }
 0x764   :  { %v1535_v31 = vrot.slane %v2007_v28, %v2337_v34  ;;  %v1538_v32 = vmul.f32 %v1531_v27, %v1495_v26 }
 0x766   :  { %v1539_v59 = vmul.f32 %v1535_v31, %v1496_v30  ;;  %v1546_v33 = vmul.f32 %v1765_v29, %v1538_v32 }
 0x768   :  { %v1547_v35 = vmul.f32 %v1765_v29, %v1539_v59  ;;  %v1554_v0 = vadd.f32 %v1766_v19, %v1546_v33 }
 0x76a   :  { %v1555_v36 = vadd.f32 %v1766_v19, %v1547_v35  ;;  %v1556_v37 = vmin.f32 %v1554_v0, 20.0 }
 0x76c   :  { %v1557_v55 = vmin.f32 %v1555_v36, 20.0  ;;  %v1558_v38 = vmul.f32 1.442695, %v1556_v37 }
 0x76e   :  { %2008 = vpow2.f32 %v1558_v38  ;;  %v1560_v39 = vmul.f32 1.442695, %v1557_v55 }
 0x770   :  { %2010 = vpow2.f32 %v1560_v39 }
 0x778   :  { %v2009_v40 = vpop.eup %2008 }
 0x779   :  { %v1562_v5 = vadd.f32 1.0, %v2009_v40 }
 0x77a   :  { %v2011_v41 = vpop.eup %2010 }
 0x77b   :  { %v1563_v34 = vadd.f32 1.0, %v2011_v41  ;;  %v1564_v42 = vmul.f32 %v1562_v5, %v1562_v5 }
 0x77d   :  { %v1565_v43 = vmul.f32 %v1563_v34, %v1563_v34  ;;  %v1570_v58 = vadd.f32 1.0, %v1564_v42  ;;  %v1767_v45 = vadd.f32 -1.0, %v1564_v42 }
 0x77f   :  { %v1571_v44 = vadd.f32 1.0, %v1565_v43  ;;  %2012 = vrcp.f32 %v1570_v58  ;;  %v1768_v47 = vadd.f32 -1.0, %v1565_v43  ;;  %v1568_v48 = vmul.f32 %v1767_v45, %v1554_v0 }
 0x781   :  { %2014 = vrcp.f32 %v1571_v44  ;;  %v1569_v8 = vmul.f32 %v1768_v47, %v1555_v36 }
 0x789   :  { %v2013_v11 = vpop.eup %2012 }
 0x78a   :  { %v1574_v50 = vmul.f32 %v2013_v11, %v1568_v48 }
 0x78b   :  { %v2015_v52 = vpop.eup %2014 }
 0x78c   :  { %v1575_v53 = vmul.f32 %v2015_v52, %v1569_v8  ;;  %v1717_v54 = vadd.f32 %v1715_v49, %v1574_v50 }
 0x78e   :  { %v1718_v13 = vadd.f32 %v1716_v51, %v1575_v53  ;;  %1719 = vst.msk [vmem:[%s2499_s21] sm:$0xf] %vm356_vm6, %v1717_v54 }
 0x790   :  { %1720 = vst.msk [vmem:[%s2499_s21 + $0x4] sm:$0xf] %vm356_vm6, %v1718_v13 }

// kernel: unet_forward.24
= control target key start
LH: loop header
LB: loop body
LE: loop exit
PB: predicated region body
PF: predicated region fallthrough
CT: control target
= control target key end

     0   :  { %vm30_vm0 = vcmask 1042432   ;;  %v169_v2 = vmov 0.0   ;;  %s170_s16 = smov 16   ;;  %s171_s19 = smov 32   ;;  %vm172_vm1 = vmmov 0   ;;  %vm23_vm2 = vcmask 1040384   ;;  %s219_s0 = inlined_call_operand.vmem [shape: f32[2,4,16], index: 0, kind: input, shape index: {}]   ;;  %s220_s1 = inlined_call_operand.vmem [shape: bf16[48,32], index: 1, kind: input, shape index: {}]   ;;  %s221_s2 = inlined_call_operand.vmem [shape: f32[1,32], index: 2, kind: input, shape index: {}]   ;;  %s222_s3 = inlined_call_operand.vmem [shape: f32[2,4,32], index: 3, kind: output, shape index: {}]  }
   0x1   :  { %v15_v0 = vld [vmem:[%s219_s0] sm:$0xf]  ;;  %v16_v1 = vld [vmem:[%s219_s0 + $0x4] sm:$0xf]  ;;  %152 = vmatprep.subr.bf16.mxu0 %v169_v2  ;;  %v167_v7 = vld [vmem:[%s220_s1 + $0x8] sm:$0xff]   ;;  %158 = vmatprep.mubr.msk.bf16.mxu0 %vm172_vm1, %v169_v2  ;;  %vm47_vm3 = vcmask 130048  }
   0x2   :  { %33 = vrot.lane.b32.xlu0 %v15_v0, %s170_s16  ;;  %v26_v3 = vrot.slane %v15_v0, 1  ;;  %v27_v4 = vrot.slane %v16_v1, 1  ;;  %v166_v5 = vld [vmem:[%s220_s1] sm:$0xff]   ;;  %v168_v9 = vld [vmem:[%s220_s1 + $0x10] sm:$0xff]   ;;  %v19_v10 = vrot.slane %v15_v0, 7  ;;  %v20_v11 = vrot.slane %v16_v1, 7 }
   0x3   :  { %153 = vmatpush3.bf16.msra.mxu0 %v166_v5  ;;  %vm50_vm4 = vcmask 261120   ;;  %vm89_vm5 = vcmask 392192   ;;  %v143_v24 = vld [vmem:[%s221_s2] ss:$0 sm:$0xff]  ;;  %vm136_vm6 = vcmask 257024  }
   0x4   :  { %v31_v6 = vsel %vm30_vm0, %v26_v3, 0.0  ;;  %v32_v8 = vsel %vm30_vm0, %v27_v4, 0.0  ;;  %154 = vmatprep.subr.bf16.mxu0 %v169_v2  ;;  %v24_v13 = vsel %vm23_vm2, 0.0, %v19_v10  ;;  %v25_v14 = vsel %vm23_vm2, 0.0, %v20_v11 }
   0x5   :  { %41 = vrot.lane.b32.xlu1 %v31_v6, %s171_s19 }
   0x6   :  { %35 = vrot.lane.b32.xlu0 %v16_v1, %s170_s16 }
   0x7   :  { %155 = vmatpush3.bf16.msra.mxu0 %v167_v7 }
   0x8   :  { %156 = vmatprep.subr.bf16.mxu0 %v169_v2 }
   0x9   :  { %43 = vrot.lane.b32.xlu1 %v32_v8, %s171_s19 }
   0xb   :  { %157 = vmatpush3.bf16.msra.mxu0 %v168_v9 }
  0x74   :  { %v34_v12 = vpop.permute.xlu0 %33 }
  0x75   :  { %v48_v17 = vsel %vm47_vm3, %v24_v13, %v34_v12 }
  0x77   :  { %v42_v15 = vpop.permute.xlu1 %41 }
  0x78   :  { %v36_v16 = vpop.permute.xlu0 %35  ;;  %v51_v20 = vsel %vm50_vm4, %v48_v17, %v42_v15 }
  0x79   :  { %v49_v18 = vsel %vm47_vm3, %v25_v14, %v36_v16 }
  0x7b   :  { %v44_v19 = vpop.permute.xlu1 %43 }
  0x7c   :  { %v52_v21 = vsel %vm50_vm4, %v49_v18, %v44_v19 }
  0x7d   :  { %v55_v22 = vcombine.low %v51_v20, %v52_v21 }
  0x7f   :  { %v57_v23 = vpack.c.bf16 %v55_v22, %v55_v22 }
  0x81   :  { %159 = vmatmul.mubr.msk.bf16.vlgmr.msra.gmra.mrb[0].mxu0 %vm89_vm5, %v57_v23 }
 0x154   :  { %v127_v25 = vpop.f32.mrb[0].mxu0 }
 0x155   :  { %v128_v26 = vadd.f32 %v143_v24, %v127_v25  ;;  %v160_v27 = vpop.f32.mrb[1].mxu0 }
 0x156   :  { %v130_v28 = vpop.f32.mrb[2].mxu0 }
 0x157   :  { %v134_v29 = vcombine.high %v128_v26, %v128_v26  ;;  %137 = vst.msk [vmem:[%s222_s3] sm:$0xf] %vm136_vm6, %v128_v26  ;;  %v161_v30 = vpop.f32.mrb[3].mxu0 }
 0x159   :  { %138 = vst.msk [vmem:[%s222_s3 + $0x4] sm:$0xf] %vm136_vm6, %v134_v29 }

// kernel: unet_forward.23
= control target key start
LH: loop header
LB: loop body
LE: loop exit
PB: predicated region body
PF: predicated region fallthrough
CT: control target
= control target key end

     0   :  { %vm72_vm0 = vcmask 1042432   ;;  %v1612_v2 = vmov 0.0   ;;  %s1613_s26 = smov 16   ;;  %vm1615_vm1 = vmmov 0   ;;  %vm65_vm2 = vcmask 1040384   ;;  %s1953_s0 = inlined_call_operand.vmem [shape: f32[2,4,16], index: 0, kind: input, shape index: {}]   ;;  %s1954_s2 = inlined_call_operand.vmem [shape: bf16[48,16], index: 2, kind: input, shape index: {}]   ;;  %s1955_s6 = inlined_call_operand.vmem [shape: f32[16,8], index: 6, kind: input, shape index: {}]   ;;  %s1956_s3 = inlined_call_operand.vmem [shape: f32[1,16], index: 3, kind: input, shape index: {}]   ;;  %s1957_s7 = inlined_call_operand.vmem [shape: f32[8,16], index: 7, kind: input, shape index: {}]   ;;  %s1958_s8 = inlined_call_operand.vmem [shape: bf16[24,16], index: 8, kind: input, shape index: {}]   ;;  %s1959_s1 = inlined_call_operand.vmem [shape: f32[2,24], index: 1, kind: input, shape index: {}]   ;;  %s1960_s10 = inlined_call_operand.vmem [shape: bf16[24,16], index: 10, kind: input, shape index: {}]   ;;  %s1961_s4 = inlined_call_operand.vmem [shape: f32[1,16], index: 4, kind: input, shape index: {}]   ;;  %s1962_s5 = inlined_call_operand.vmem [shape: f32[1,16], index: 5, kind: input, shape index: {}]   ;;  %s1963_s9 = inlined_call_operand.vmem [shape: f32[1,16], index: 9, kind: input, shape index: {}]   ;;  %s1964_s11 = inlined_call_operand.vmem [shape: f32[1,16], index: 11, kind: input, shape index: {}]   ;;  %s1965_s12 = inlined_call_operand.vmem [shape: bf16[48,16], index: 12, kind: input, shape index: {}]   ;;  %s1966_s13 = inlined_call_operand.vmem [shape: f32[1,16], index: 13, kind: input, shape index: {}]   ;;  %s1967_s14 = inlined_call_operand.vmem [shape: f32[1,16], index: 14, kind: input, shape index: {}]   ;;  %s1968_s15 = inlined_call_operand.vmem [shape: f32[1,16], index: 15, kind: input, shape index: {}]   ;;  %s1969_s16 = inlined_call_operand.vmem [shape: f32[2,4,16], index: 16, kind: output, shape index: {}]  }
   0x1   :  { %1971 = sst [smem:[#allocation2_spill]] %s1953_s0  ;;  %1476 = vmatprep.subr.bf16.mxu0 %v1612_v2  ;;  %v1578_v5 = vld [vmem:[%s1954_s2] sm:$0xff]   ;;  %v1579_v7 = vld [vmem:[%s1954_s2 + $0x8] sm:$0xff]   ;;  %s1614_s0 = smov 32   ;;  %1482 = vmatprep.mubr.msk.bf16.mxu0 %vm1615_vm1, %v1612_v2  ;;  %v1580_v9 = vld [vmem:[%s1954_s2 + $0x10] sm:$0xff]   ;;  %vm89_vm3 = vcmask 130048  }
   0x2   :  { %s1972_s23 = sld [smem:[#allocation2_spill]]  ;;  %1477 = vmatpush3.bf16.msra.mxu0 %v1578_v5  ;;  %1490 = vmatprep.mubr.msk.f32.mxu1 %vm1615_vm1, %v1612_v2  ;;  %vm92_vm4 = vcmask 261120   ;;  %vm124_vm5 = vcmask 392192   ;;  %v1616_v24 = vmov 0.0|0.0   ;;  %v56_v25 = vld [vmem:[%s1955_s6] sm:$0xff]  ;;  %v57_v26 = vld [vmem:[%s1955_s6 + $0x8] sm:$0xff] }
   0x3   :  { %1478 = vmatprep.subr.bf16.mxu0 %v1612_v2  ;;  %1560 = vmatprep.subr.bf16.mxu1 %v1616_v24  ;;  %v1758_v27 = vpack.c.bf16 %v57_v26, %v56_v25  ;;  %v1412_v28 = vld [vmem:[%s1956_s3] ss:$0 sm:$0xff]  ;;  %vm182_vm6 = vcmask 125952   ;;  %vm215_vm7 = vcmask 1041409   ;;  %vm289_vm8 = vcmask 64512  }
   0x4   :  { %v1776_v50 = vld [vmem:[%s1957_s7] sm:$0xff]  ;;  %vm655_vm9 = vcmask 1043456   ;;  %vm651_vm10 = vcmask 195584  }
   0x5   :  { %1562 = vmatpush3.bf16.msra.mxu1 %v1758_v27 }
   0x6   :  { %1479 = vmatpush3.bf16.msra.mxu0 %v1579_v7  ;;  %1493 = vmatprep.subr.mxu1 %v1612_v2 }
   0x7   :  { %1480 = vmatprep.subr.bf16.mxu0 %v1612_v2 }
   0x8   :  { %v1706_v0 = vld [vmem:[%s1972_s23] sm:$0xf]  ;;  %v1711_v1 = vld [vmem:[%s1972_s23 + $0x4] sm:$0xf] }
   0x9   :  { %75 = vrot.lane.b32.xlu0 %v1706_v0, %s1613_s26  ;;  %v68_v3 = vrot.slane %v1706_v0, 1  ;;  %v69_v4 = vrot.slane %v1711_v1, 1  ;;  %v61_v10 = vrot.slane %v1706_v0, 7  ;;  %v62_v11 = vrot.slane %v1711_v1, 7 }
   0xa   :  { %1481 = vmatpush3.bf16.msra.mxu0 %v1580_v9 }
   0xb   :  { %v73_v6 = vsel %vm72_vm0, %v68_v3, 0.0  ;;  %v74_v8 = vsel %vm72_vm0, %v69_v4, 0.0  ;;  %1510 = vmatprep.subr.bf16.mxu0 %v1612_v2  ;;  %v66_v13 = vsel %vm65_vm2, 0.0, %v61_v10  ;;  %v67_v14 = vsel %vm65_vm2, 0.0, %v62_v11  ;;  %v1581_v10 = vld [vmem:[%s1958_s8] sm:$0xff]  }
   0xc   :  { %83 = vrot.lane.b32.xlu1 %v73_v6, %s1614_s0  ;;  %v1582_v11 = vld [vmem:[%s1958_s8 + $0x8] ss:$0 sps:$4 sm:$0xff]  }
   0xd   :  { %77 = vrot.lane.b32.xlu0 %v1711_v1, %s1613_s26 }
  0x10   :  { %85 = vrot.lane.b32.xlu1 %v74_v8, %s1614_s0 }
  0x7b   :  { %v76_v12 = vpop.permute.xlu0 %75 }
  0x7c   :  { %v90_v17 = vsel %vm89_vm3, %v66_v13, %v76_v12  ;;  %v630_v12 = vld [vmem:[%s1959_s1] sm:$0x3]  ;;  %v657_v13 = vsel %vm655_vm9, %v1582_v11, 0 }
  0x7e   :  { %v84_v15 = vpop.permute.xlu1 %83 }
  0x7f   :  { %v78_v16 = vpop.permute.xlu0 %77  ;;  %v93_v20 = vsel %vm92_vm4, %v90_v17, %v84_v15  ;;  %v631_v15 = vpack.c.bf16 %v630_v12, %v630_v12 }
  0x80   :  { %v91_v18 = vsel %vm89_vm3, %v67_v14, %v78_v16  ;;  %v1584_v14 = vld [vmem:[%s1960_s10 + $0x8] ss:$0 sps:$4 sm:$0xff]  }
  0x81   :  { %v719_v16 = vsel %vm655_vm9, %v1584_v14, 0 }
  0x82   :  { %v86_v19 = vpop.permute.xlu1 %85 }
  0x83   :  { %v94_v21 = vsel %vm92_vm4, %v91_v18, %v86_v19  ;;  %v1583_v19 = vld [vmem:[%s1960_s10] sm:$0xff]  }
  0x84   :  { %v97_v22 = vcombine.low %v93_v20, %v94_v21 }
  0x86   :  { %v99_v23 = vpack.c.bf16 %v97_v22, %v97_v22 }
  0x88   :  { %1483 = vmatmul.mubr.msk.bf16.vlgmr.msra.gmra.mrb[0].mxu0 %vm124_vm5, %v99_v23 }
  0x89   :  { %1514 = vmatprep.mubr.msk.bf16.mxu0 %vm1615_vm1, %v1612_v2  ;;  %1511 = vmatpush3.bf16.msra.mxu0 %v1581_v10 }
  0x8a   :  { %1512 = vmatprep.subr.bf16.mxu0 %v1612_v2 }
  0x8d   :  { %1513 = vmatpush3.bf16.msra.mxu0 %v657_v13 }
  0x8e   :  { %1526 = vmatprep.subr.bf16.mxu0 %v1612_v2 }
  0x90   :  { %1515 = vmatmul.mubr.msk.bf16.vlgmr.msra.gmra.mrb[4].mxu0 %vm651_vm10, %v631_v15 }
  0x91   :  { %1532 = vmatprep.mubr.msk.bf16.mxu0 %vm1615_vm1, %v1612_v2 }
 0x15b   :  { %v162_v29 = vpop.f32.mrb[0].mxu0 }
 0x15c   :  { %v169_v30 = vcombine.high %v162_v29, %v162_v29  ;;  %v1765_v31 = vadd.f32 %v1412_v28, %v162_v29  ;;  %v1484_v32 = vpop.f32.mrb[1].mxu0  ;;  %v1617_v29 = vmov 1966171168  }
 0x15d   :  { %v165_v33 = vpop.f32.mrb[2].mxu0  ;;  %v520_v32 = vlaneseq }
 0x15e   :  { %v1767_v34 = vadd.f32 %v1412_v28, %v169_v30  ;;  %v183_v35 = vsel %vm182_vm6, %v1765_v31, 0.0  ;;  %v1485_v36 = vpop.f32.mrb[3].mxu0  ;;  %v197_v53 = vmul.f32 %v1765_v31, %v1765_v31  ;;  %v518_v30 = vunpack.c.l.s4 %v1617_v29 }
 0x15f   :  { %v184_v37 = vrot.slane %v183_v35, 4 }
 0x160   :  { %v190_v38 = vsel %vm182_vm6, %v1767_v34, 0.0  ;;  %v198_v52 = vmul.f32 %v1767_v34, %v1767_v34  ;;  %v199_v55 = vsel %vm182_vm6, %v197_v53, 0.0  ;;  %v519_v36 = vunpack.c.0.s8 %v518_v30 }
 0x161   :  { %v185_v39 = vadd.f32 %v184_v37, %v183_v35  ;;  %v191_v40 = vrot.slane %v190_v38, 4  ;;  %v200_v57 = vrot.slane %v199_v55, 4  ;;  %v521_v37 = vshrl.u32 %v520_v32, 7 }
 0x162   :  { %v206_v54 = vsel %vm182_vm6, %v198_v52, 0.0 }
 0x163   :  { %v186_v41 = vrot.slane %v185_v39, 2  ;;  %v192_v42 = vadd.f32 %v191_v40, %v190_v38  ;;  %v207_v56 = vrot.slane %v206_v54, 4  ;;  %v201_v59 = vadd.f32 %v200_v57, %v199_v55  ;;  %v693_v22 = vpop.f32.mrb[4].mxu0 }
 0x164   :  { %v1516_v23 = vpop.f32.mrb[5].mxu0  ;;  %v1836_v57 = vsub.s32 0, %v521_v37 }
 0x165   :  { %v187_v43 = vadd.f32 %v186_v41, %v185_v39  ;;  %v193_v44 = vrot.slane %v192_v42, 2  ;;  %v208_v58 = vadd.f32 %v207_v56, %v206_v54  ;;  %v202_v61 = vrot.slane %v201_v59, 2  ;;  %v696_v25 = vpop.f32.mrb[6].mxu0 }
 0x166   :  { %v1517_v26 = vpop.f32.mrb[7].mxu0  ;;  %v1829_v41 = vsub.s32 %v519_v36, %v521_v37  ;;  %v1585_v36 = vld [vmem:[%s1965_s12] sm:$0xff]  }
 0x167   :  { %v188_v45 = vrot.slane %v187_v43, 1  ;;  %v194_v46 = vadd.f32 %v193_v44, %v192_v42  ;;  %v209_v60 = vrot.slane %v208_v58, 2  ;;  %v203_v63 = vadd.f32 %v202_v61, %v201_v59  ;;  %1527 = vmatpush3.bf16.msra.mxu0 %v1585_v36 }
 0x168   :  { %1528 = vmatprep.subr.bf16.mxu0 %v1612_v2 }
 0x169   :  { %v195_v47 = vrot.slane %v194_v46, 1  ;;  %v189_v48 = vadd.f32 %v188_v45, %v187_v43  ;;  %v210_v62 = vadd.f32 %v209_v60, %v208_v58  ;;  %v204_v4 = vrot.slane %v203_v63, 1 }
 0x16b   :  { %v196_v49 = vadd.f32 %v195_v47, %v194_v46  ;;  %v211_v3 = vrot.slane %v210_v62, 1  ;;  %v205_v8 = vadd.f32 %v204_v4, %v203_v63  ;;  %v1417_v4 = vld [vmem:[%s1961_s4] ss:$0 sm:$0xff] }
 0x16d   :  { %v216_v51 = vsel %vm215_vm7, %v196_v49, %v189_v48  ;;  %v212_v6 = vadd.f32 %v211_v3, %v210_v62 }
 0x16e   :  { %1491 = vmatmul.mubr.msk.f32.vlgmr.msra.gmra.mrb[0].mxu1 %vm89_vm3, %v216_v51 }
 0x16f   :  { %1494 = vmatpush3.msra.mxu1 %v1776_v50  ;;  %1495 = vmatprep.mubr.msk.f32.mxu1 %vm1615_vm1, %v1612_v2  ;;  %v366_v9 = vsel %vm215_vm7, %v212_v6, %v205_v8  ;;  %v1418_v8 = vld [vmem:[%s1962_s5] ss:$0 sm:$0xff] }
 0x170   :  { %1563 = vmatprep.subr.bf16.mxu1 %v1616_v24 }
 0x241   :  { %v285_v5 = vpop.f32.mrb[0].mxu1 }
 0x242   :  { %v1492_v7 = vpop.f32.mrb[1].mxu1  ;;  %1496 = vmatmul.mubr.msk.f32.vlgmr.msra.gmra.mrb[2].mxu1 %vm289_vm8, %v285_v5 }
 0x243   :  { %1565 = vmatpush3.bf16.msra.mxu1 %v1758_v27  ;;  %1502 = vmatprep.mubr.msk.f32.mxu1 %vm1615_vm1, %v1612_v2 }
 0x244   :  { %1505 = vmatprep.subr.mxu1 %v1612_v2 }
 0x246   :  { %1503 = vmatmul.mubr.msk.f32.vlgmr.msra.gmra.mrb[4].mxu1 %vm89_vm3, %v366_v9 }
 0x247   :  { %1506 = vmatpush3.msra.mxu1 %v1776_v50  ;;  %1507 = vmatprep.mubr.msk.f32.mxu1 %vm1615_vm1, %v1612_v2 }
 0x248   :  { %1518 = vmatprep.subr.bf16.mxu1 %v1612_v2 }
 0x315   :  { %v359_v17 = vpop.f32.mrb[2].mxu1 }
 0x316   :  { %v1497_v18 = vpop.f32.mrb[3].mxu1  ;;  %v363_v28 = vmul.f32 0.125, %v359_v17 }
 0x318   :  { %v513_v35 = vmul.f32 %v363_v28, %v363_v28  ;;  %v523_v48 = vrot.slane %v363_v28, %v1829_v41 }
 0x319   :  { %v435_v20 = vpop.f32.mrb[4].mxu1 }
 0x31a   :  { %v1504_v21 = vpop.f32.mrb[5].mxu1  ;;  %1508 = vmatmul.mubr.msk.f32.vlgmr.msra.gmra.mrb[6].mxu1 %vm289_vm8, %v435_v20  ;;  %v524_v55 = vcombine.high %v523_v48, %v523_v48  ;;  %v531_v56 = vrot.slane %v523_v48, %v1829_v41 }
 0x31b   :  { %1519 = vmatpush3.bf16.msra.mxu1 %v1583_v19  ;;  %1522 = vmatprep.mubr.msk.bf16.mxu1 %vm1615_vm1, %v1612_v2  ;;  %v1425_v19 = vld [vmem:[%s1964_s11] ss:$0 sm:$0xff] }
 0x31c   :  { %1520 = vmatprep.subr.bf16.mxu1 %v1612_v2  ;;  %v538_v58 = vrot.slane %v524_v55, %v1829_v41  ;;  %v542_v59 = vrot.slane %v531_v56, %v1836_v57 }
 0x31e   :  { %v546_v60 = vrot.slane %v538_v58, %v1836_v57  ;;  %v549_v62 = vsub.f32 %v1765_v31, %v542_v59 }
 0x31f   :  { %1521 = vmatpush3.bf16.msra.mxu1 %v719_v16 }
 0x320   :  { %1566 = vmatprep.subr.bf16.mxu1 %v1616_v24  ;;  %v550_v5 = vsub.f32 %v1767_v34, %v546_v60  ;;  %v1421_v34 = vld [vmem:[%s1963_s9] ss:$0 sm:$0xff] }
 0x321   :  { %v694_v17 = vadd.f32 %v1421_v34, %v693_v22 }
 0x322   :  { %1523 = vmatmul.mubr.msk.bf16.vlgmr.msra.gmra.mrb[8].mxu1 %vm651_vm10, %v631_v15 }
 0x323   :  { %1568 = vmatpush3.bf16.msra.mxu1 %v1758_v27  ;;  %1540 = vmatprep.mubr.msk.f32.mxu1 %vm1615_vm1, %v1612_v2  ;;  %v768_v23 = vrot.slane %v694_v17, %v1829_v41 }
 0x324   :  { %1543 = vmatprep.subr.mxu1 %v1612_v2 }
 0x325   :  { %v769_v32 = vcombine.high %v768_v23, %v768_v23 }
 0x327   :  { %v783_v37 = vrot.slane %v769_v32, %v1829_v41 }
 0x3ed   :  { %v508_v33 = vpop.f32.mrb[6].mxu1 }
 0x3ee   :  { %v512_v38 = vmul.f32 0.125, %v508_v33  ;;  %v1509_v39 = vpop.f32.mrb[7].mxu1 }
 0x3f0   :  { %v514_v40 = vsub.f32 %v512_v38, %v513_v35  ;;  %v776_v35 = vrot.slane %v768_v23, %v1829_v41 }
 0x3f2   :  { %v515_v42 = vmax.f32 %v514_v40, 0.0  ;;  %v786_v38 = vadd.f32 1.0, %v776_v35 }
 0x3f4   :  { %v558_v43 = vrot.slane %v515_v42, %v1829_v41  ;;  %v1586_v42 = vld [vmem:[%s1965_s12 + $0x8] sm:$0xff]  }
 0x3f5   :  { %v755_v44 = vpop.f32.mrb[8].mxu1  ;;  %1529 = vmatpush3.bf16.msra.mxu0 %v1586_v42 }
 0x3f6   :  { %v559_v45 = vcombine.high %v558_v43, %v558_v43  ;;  %v566_v46 = vrot.slane %v558_v43, %v1829_v41  ;;  %v1524_v47 = vpop.f32.mrb[9].mxu1  ;;  %v756_v28 = vadd.f32 %v1425_v19, %v755_v44  ;;  %v787_v43 = vadd.f32 1.0, %v783_v37  ;;  %1530 = vmatprep.subr.bf16.mxu0 %v1612_v2 }
 0x3f7   :  { %v758_v49 = vpop.f32.mrb[10].mxu1 }
 0x3f8   :  { %v573_v51 = vrot.slane %v559_v45, %v1829_v41  ;;  %v576_v52 = vadd.f32 1e-05, %v566_v46  ;;  %v1525_v53 = vpop.f32.mrb[11].mxu1  ;;  %v809_v22 = vrot.slane %v756_v28, %v1829_v41  ;;  %v793_v46 = vrot.slane %v786_v38, %v1836_v57 }
 0x3f9   :  { %v797_v55 = vrot.slane %v787_v43, %v1836_v57 }
 0x3fa   :  { %v577_v54 = vadd.f32 1e-05, %v573_v51  ;;  %1588 = vrsqrt.f32 %v576_v52  ;;  %v810_v39 = vcombine.high %v809_v22, %v809_v22  ;;  %v817_v44 = vrot.slane %v809_v22, %v1829_v41  ;;  %v1587_v51 = vld [vmem:[%s1965_s12 + $0x10] sm:$0xff]  }
 0x3fb   :  { %1531 = vmatpush3.bf16.msra.mxu0 %v1587_v51 }
 0x3fc   :  { %1590 = vrsqrt.f32 %v577_v54  ;;  %v824_v47 = vrot.slane %v810_v39, %v1829_v41  ;;  %v828_v53 = vrot.slane %v817_v44, %v1836_v57  ;;  %1569 = vmatprep.subr.bf16.mxu0 %v1616_v24 }
 0x3fe   :  { %v832_v60 = vrot.slane %v824_v47, %v1836_v57 }
 0x404   :  { %v1589_v61 = vpop.eup %1588 }
 0x405   :  { %v585_v63 = vrot.slane %v1589_v61, %v1836_v57 }
 0x406   :  { %v1591_v3 = vpop.eup %1590 }
 0x407   :  { %v592_v6 = vmul.f32 %v585_v63, %v549_v62  ;;  %v589_v7 = vrot.slane %v1591_v3, %v1836_v57 }
 0x409   :  { %v600_v9 = vmul.f32 %v1417_v4, %v592_v6  ;;  %v593_v10 = vmul.f32 %v589_v7, %v550_v5 }
 0x40b   :  { %v608_v11 = vadd.f32 %v1418_v8, %v600_v9  ;;  %v601_v31 = vmul.f32 %v1417_v4, %v593_v10 }
 0x40d   :  { %v610_v12 = vmin.f32 %v608_v11, 20.0  ;;  %v609_v13 = vadd.f32 %v1418_v8, %v601_v31 }
 0x40f   :  { %v612_v14 = vmul.f32 1.442695, %v610_v12  ;;  %v611_v15 = vmin.f32 %v609_v13, 20.0 }
 0x411   :  { %1592 = vpow2.f32 %v612_v14  ;;  %v614_v16 = vmul.f32 1.442695, %v611_v15 }
 0x413   :  { %1594 = vpow2.f32 %v614_v16 }
 0x41b   :  { %v1593_v18 = vpop.eup %1592 }
 0x41c   :  { %v616_v20 = vadd.f32 1.0, %v1593_v18  ;;  %v1433_v18 = vld [vmem:[%s1966_s13] ss:$0 sm:$0xff] }
 0x41d   :  { %v1595_v21 = vpop.eup %1594 }
 0x41e   :  { %v618_v25 = vmul.f32 %v616_v20, %v616_v20  ;;  %v617_v26 = vadd.f32 1.0, %v1595_v21 }
 0x420   :  { %v624_v29 = vadd.f32 1.0, %v618_v25  ;;  %v619_v30 = vmul.f32 %v617_v26, %v617_v26  ;;  %v1419_v40 = vadd.f32 -1.0, %v618_v25 }
 0x422   :  { %1596 = vrcp.f32 %v624_v29  ;;  %v625_v33 = vadd.f32 1.0, %v619_v30  ;;  %v1420_v45 = vadd.f32 -1.0, %v619_v30  ;;  %v622_v48 = vmul.f32 %v1419_v40, %v608_v11 }
 0x424   :  { %1598 = vrcp.f32 %v625_v33  ;;  %v623_v54 = vmul.f32 %v1420_v45, %v609_v13 }
 0x42c   :  { %v1597_v49 = vpop.eup %1596 }
 0x42d   :  { %v628_v52 = vmul.f32 %v1597_v49, %v622_v48 }
 0x42e   :  { %v1599_v56 = vpop.eup %1598 }
 0x42f   :  { %v800_v58 = vmul.f32 %v793_v46, %v628_v52  ;;  %v629_v59 = vmul.f32 %v1599_v56, %v623_v54 }
 0x431   :  { %v835_v61 = vadd.f32 %v828_v53, %v800_v58  ;;  %v801_v62 = vmul.f32 %v797_v55, %v629_v59 }
 0x433   :  { %851 = vrot.lane.b32.xlu0 %v835_v61, %s1613_s26  ;;  %v836_v63 = vadd.f32 %v832_v60, %v801_v62  ;;  %v845_v3 = vrot.slane %v835_v61, 1  ;;  %v839_v8 = vrot.slane %v835_v61, 7 }
 0x435   :  { %853 = vrot.lane.b32.xlu1 %v836_v63, %s1613_s26  ;;  %v849_v4 = vsel %vm72_vm0, %v845_v3, 0.0  ;;  %v846_v5 = vrot.slane %v836_v63, 1  ;;  %v840_v24 = vrot.slane %v836_v63, 7  ;;  %v843_v11 = vsel %vm65_vm2, 0.0, %v839_v8 }
 0x437   :  { %859 = vrot.lane.b32.xlu0 %v849_v4, %s1614_s0  ;;  %v850_v6 = vsel %vm72_vm0, %v846_v5, 0.0  ;;  %v844_v31 = vsel %vm65_vm2, 0.0, %v840_v24 }
 0x439   :  { %861 = vrot.lane.b32.xlu1 %v850_v6, %s1614_s0 }
 0x4a5   :  { %v852_v7 = vpop.permute.xlu0 %851 }
 0x4a6   :  { %v865_v12 = vsel %vm89_vm3, %v843_v11, %v852_v7 }
 0x4a7   :  { %v854_v9 = vpop.permute.xlu1 %853 }
 0x4a8   :  { %v866_v13 = vsel %vm89_vm3, %v844_v31, %v854_v9 }
 0x4a9   :  { %v860_v10 = vpop.permute.xlu0 %859 }
 0x4aa   :  { %v867_v15 = vsel %vm92_vm4, %v865_v12, %v860_v10 }
 0x4ab   :  { %v862_v14 = vpop.permute.xlu1 %861 }
 0x4ac   :  { %v868_v16 = vsel %vm92_vm4, %v866_v13, %v862_v14 }
 0x4ad   :  { %v871_v34 = vcombine.low %v867_v15, %v868_v16 }
 0x4af   :  { %v873_v17 = vpack.c.bf16 %v871_v34, %v871_v34 }
 0x4b1   :  { %1533 = vmatmul.mubr.msk.bf16.vlgmr.msra.gmra.mrb[8].mxu0 %vm124_vm5, %v873_v17 }
 0x4b2   :  { %1571 = vmatpush3.bf16.msra.mxu0 %v1758_v27  ;;  %1552 = vmatprep.mubr.msk.f32.mxu0 %vm1615_vm1, %v1612_v2 }
 0x584   :  { %v935_v19 = vpop.f32.mrb[8].mxu0 }
 0x585   :  { %v942_v20 = vcombine.high %v935_v19, %v935_v19  ;;  %v1898_v21 = vadd.f32 %v1433_v18, %v935_v19  ;;  %v1534_v23 = vpop.f32.mrb[9].mxu0 }
 0x586   :  { %v938_v25 = vpop.f32.mrb[10].mxu0 }
 0x587   :  { %v1900_v26 = vadd.f32 %v1433_v18, %v942_v20  ;;  %v955_v28 = vsel %vm182_vm6, %v1898_v21, 0.0  ;;  %v969_v27 = vmul.f32 %v1898_v21, %v1898_v21  ;;  %v1535_v29 = vpop.f32.mrb[11].mxu0 }
 0x588   :  { %v956_v30 = vrot.slane %v955_v28, 4 }
 0x589   :  { %v962_v32 = vsel %vm182_vm6, %v1900_v26, 0.0  ;;  %v970_v33 = vmul.f32 %v1900_v26, %v1900_v26  ;;  %v971_v35 = vsel %vm182_vm6, %v969_v27, 0.0 }
 0x58a   :  { %v957_v22 = vadd.f32 %v956_v30, %v955_v28  ;;  %v963_v36 = vrot.slane %v962_v32, 4  ;;  %v972_v37 = vrot.slane %v971_v35, 4 }
 0x58b   :  { %v978_v38 = vsel %vm182_vm6, %v970_v33, 0.0 }
 0x58c   :  { %v958_v39 = vrot.slane %v957_v22, 2  ;;  %v964_v40 = vadd.f32 %v963_v36, %v962_v32  ;;  %v973_v42 = vadd.f32 %v972_v37, %v971_v35  ;;  %v979_v43 = vrot.slane %v978_v38, 4  ;;  %v1438_v32 = vld [vmem:[%s1967_s14] ss:$0 sm:$0xff] }
 0x58e   :  { %v959_v44 = vadd.f32 %v958_v39, %v957_v22  ;;  %v965_v45 = vrot.slane %v964_v40, 2  ;;  %v974_v46 = vrot.slane %v973_v42, 2  ;;  %v980_v47 = vadd.f32 %v979_v43, %v978_v38 }
 0x590   :  { %v960_v48 = vrot.slane %v959_v44, 1  ;;  %v966_v49 = vadd.f32 %v965_v45, %v964_v40  ;;  %v975_v51 = vadd.f32 %v974_v46, %v973_v42  ;;  %v981_v52 = vrot.slane %v980_v47, 2 }
 0x592   :  { %v967_v53 = vrot.slane %v966_v49, 1  ;;  %v976_v54 = vrot.slane %v975_v51, 1  ;;  %v982_v55 = vadd.f32 %v981_v52, %v980_v47  ;;  %v961_v56 = vadd.f32 %v960_v48, %v959_v44 }
 0x594   :  { %v968_v58 = vadd.f32 %v967_v53, %v966_v49  ;;  %v983_v59 = vrot.slane %v982_v55, 1  ;;  %v977_v61 = vadd.f32 %v976_v54, %v975_v51 }
 0x596   :  { %v987_v60 = vsel %vm215_vm7, %v968_v58, %v961_v56  ;;  %v984_v62 = vadd.f32 %v983_v59, %v982_v55 }
 0x597   :  { %1541 = vmatmul.mubr.msk.f32.vlgmr.msra.gmra.mrb[12].mxu1 %vm89_vm3, %v987_v60 }
 0x598   :  { %v1136_v63 = vsel %vm215_vm7, %v984_v62, %v977_v61  ;;  %1544 = vmatpush3.msra.mxu1 %v1776_v50  ;;  %1545 = vmatprep.mubr.msk.f32.mxu1 %vm1615_vm1, %v1612_v2 }
 0x599   :  { %1553 = vmatmul.mubr.msk.f32.vlgmr.msra.gmra.mrb[12].mxu0 %vm89_vm3, %v1136_v63  ;;  %1555 = vmatprep.subr.mxu1 %v1612_v2 }
 0x66a   :  { %v1056_v3 = vpop.f32.mrb[12].mxu1 }
 0x66b   :  { %v1542_v4 = vpop.f32.mrb[13].mxu1  ;;  %1546 = vmatmul.mubr.msk.f32.vlgmr.msra.gmra.mrb[14].mxu1 %vm289_vm8, %v1056_v3 }
 0x66c   :  { %1556 = vmatpush3.msra.mxu1 %v1776_v50  ;;  %v1205_v5 = vpop.f32.mrb[12].mxu0  ;;  %1557 = vmatprep.mubr.msk.f32.mxu1 %vm1615_vm1, %v1612_v2 }
 0x66d   :  { %v1554_v6 = vpop.f32.mrb[13].mxu0 }
 0x66f   :  { %1558 = vmatmul.mubr.msk.f32.vlgmr.msra.gmra.mrb[16].mxu1 %vm289_vm8, %v1205_v5 }
 0x73e   :  { %v1129_v7 = vpop.f32.mrb[14].mxu1 }
 0x73f   :  { %v1133_v8 = vmul.f32 0.125, %v1129_v7  ;;  %v1547_v24 = vpop.f32.mrb[15].mxu1 }
 0x741   :  { %v1283_v10 = vmul.f32 %v1133_v8, %v1133_v8  ;;  %v1293_v16 = vrot.slane %v1133_v8, %v1829_v41 }
 0x742   :  { %v1278_v9 = vpop.f32.mrb[16].mxu1 }
 0x743   :  { %v1282_v11 = vmul.f32 0.125, %v1278_v9  ;;  %v1559_v31 = vpop.f32.mrb[17].mxu1  ;;  %v1294_v18 = vcombine.high %v1293_v16, %v1293_v16  ;;  %v1301_v19 = vrot.slane %v1293_v16, %v1829_v41 }
 0x745   :  { %v1284_v12 = vsub.f32 %v1282_v11, %v1283_v10  ;;  %v1308_v20 = vrot.slane %v1294_v18, %v1829_v41  ;;  %v1312_v23 = vrot.slane %v1301_v19, %v1836_v57 }
 0x747   :  { %v1285_v13 = vmax.f32 %v1284_v12, 0.0  ;;  %v1316_v25 = vrot.slane %v1308_v20, %v1836_v57  ;;  %v1319_v27 = vsub.f32 %v1898_v21, %v1312_v23 }
 0x749   :  { %v1328_v14 = vrot.slane %v1285_v13, %v1829_v41  ;;  %v1320_v33 = vsub.f32 %v1900_v26, %v1316_v25 }
 0x74b   :  { %v1329_v15 = vcombine.high %v1328_v14, %v1328_v14  ;;  %v1336_v50 = vrot.slane %v1328_v14, %v1829_v41 }
 0x74d   :  { %v1343_v2 = vrot.slane %v1329_v15, %v1829_v41  ;;  %v1346_v34 = vadd.f32 1e-05, %v1336_v50  ;;  %v1439_v41 = vld [vmem:[%s1968_s15] ss:$0 sm:$0xff] }
 0x74f   :  { %v1347_v17 = vadd.f32 1e-05, %v1343_v2  ;;  %1600 = vrsqrt.f32 %v1346_v34 }
 0x751   :  { %1602 = vrsqrt.f32 %v1347_v17 }
 0x759   :  { %v1601_v28 = vpop.eup %1600 }
 0x75a   :  { %v1355_v29 = vrot.slane %v1601_v28, %v1836_v57 }
 0x75b   :  { %v1603_v30 = vpop.eup %1602 }
 0x75c   :  { %v1359_v35 = vrot.slane %v1603_v30, %v1836_v57  ;;  %v1362_v22 = vmul.f32 %v1355_v29, %v1319_v27 }
 0x75e   :  { %v1363_v36 = vmul.f32 %v1359_v35, %v1320_v33  ;;  %v1370_v37 = vmul.f32 %v1438_v32, %v1362_v22 }
 0x760   :  { %v1371_v38 = vmul.f32 %v1438_v32, %v1363_v36  ;;  %v1378_v21 = vadd.f32 %v1439_v41, %v1370_v37 }
 0x762   :  { %v1379_v39 = vadd.f32 %v1439_v41, %v1371_v38  ;;  %v1380_v40 = vmin.f32 %v1378_v21, 20.0 }
 0x764   :  { %v1381_v42 = vmin.f32 %v1379_v39, 20.0  ;;  %v1382_v43 = vmul.f32 1.442695, %v1380_v40 }
 0x766   :  { %1604 = vpow2.f32 %v1382_v43  ;;  %v1384_v44 = vmul.f32 1.442695, %v1381_v42 }
 0x768   :  { %1606 = vpow2.f32 %v1384_v44 }
 0x770   :  { %v1605_v45 = vpop.eup %1604 }
 0x771   :  { %v1386_v26 = vadd.f32 1.0, %v1605_v45 }
 0x772   :  { %v1607_v46 = vpop.eup %1606 }
 0x773   :  { %v1387_v57 = vadd.f32 1.0, %v1607_v46  ;;  %v1388_v47 = vmul.f32 %v1386_v26, %v1386_v26 }
 0x775   :  { %v1389_v48 = vmul.f32 %v1387_v57, %v1387_v57  ;;  %v1394_v49 = vadd.f32 1.0, %v1388_v47  ;;  %v1440_v52 = vadd.f32 -1.0, %v1388_v47 }
 0x777   :  { %v1395_v51 = vadd.f32 1.0, %v1389_v48  ;;  %1608 = vrcp.f32 %v1394_v49  ;;  %v1441_v53 = vadd.f32 -1.0, %v1389_v48  ;;  %v1392_v54 = vmul.f32 %v1440_v52, %v1378_v21 }
 0x779   :  { %1610 = vrcp.f32 %v1395_v51  ;;  %v1393_v56 = vmul.f32 %v1441_v53, %v1379_v39 }
 0x781   :  { %v1609_v55 = vpop.eup %1608 }
 0x782   :  { %v1398_v58 = vmul.f32 %v1609_v55, %v1392_v54 }
 0x783   :  { %v1611_v59 = vpop.eup %1610 }
 0x784   :  { %v1399_v60 = vmul.f32 %v1611_v59, %v1393_v56  ;;  %v1400_v61 = vadd.f32 %v1398_v58, %v1706_v0 }
 0x786   :  { %v1401_v62 = vadd.f32 %v1399_v60, %v1711_v1  ;;  %1402 = vst.msk [vmem:[%s1969_s16] sm:$0xf] %vm182_vm6, %v1400_v61 }
 0x788   :  { %1403 = vst.msk [vmem:[%s1969_s16 + $0x4] sm:$0xf] %vm182_vm6, %v1401_v62 }

// kernel: unet_forward.27
= control target key start
LH: loop header
LB: loop body
LE: loop exit
PB: predicated region body
PF: predicated region fallthrough
CT: control target
= control target key end

     0   :  { %vm49_vm0 = vcmask 1046528   ;;  %s820_s15 = smov 16   ;;  %v821_v7 = vmov 0.0   ;;  %vm822_vm1 = vmmov 0   ;;  %s975_s0 = inlined_call_operand.vmem [shape: f32[2,8,16], index: 0, kind: input, shape index: {}]   ;;  %s976_s1 = inlined_call_operand.vmem [shape: bf16[48,16], index: 1, kind: input, shape index: {}]   ;;  %s977_s2 = inlined_call_operand.vmem [shape: f32[1,16], index: 2, kind: input, shape index: {}]   ;;  %s978_s3 = inlined_call_operand.vmem [shape: f32[1,16], index: 3, kind: input, shape index: {}]   ;;  %s979_s4 = inlined_call_operand.vmem [shape: f32[1,16], index: 4, kind: input, shape index: {}]   ;;  %s980_s5 = inlined_call_operand.vmem [shape: f32[16,8], index: 5, kind: input, shape index: {}]   ;;  %s981_s6 = inlined_call_operand.vmem [shape: f32[8,16], index: 6, kind: input, shape index: {}]   ;;  %s982_s7 = inlined_call_operand.vmem [shape: bf16[16,16], index: 7, kind: input, shape index: {}]   ;;  %s983_s8 = inlined_call_operand.vmem [shape: f32[1,16], index: 8, kind: input, shape index: {}]   ;;  %s984_s9 = inlined_call_operand.hbm [shape: f32[2,8,16], index: 9, kind: output, shape index: {}]  }
   0x1   :  { %v34_v0 = vld [vmem:[%s975_s0] sm:$0xff]  ;;  %v35_v1 = vld [vmem:[%s975_s0 + $0x8] sm:$0xff]  ;;  %715 = vmatprep.subr.bf16.mxu0 %v821_v7  ;;  %721 = vmatprep.mubr.msk.bf16.mxu0 %vm822_vm1, %v821_v7 }
   0x2   :  { %v46_v2 = vrot.slane %v35_v1, 1  ;;  %v770_v3 = vpack.i.bf16 %v35_v1, %v34_v0  ;;  %v780_v4 = vld [vmem:[%s976_s1] sm:$0xff]   ;;  %v45_v5 = vrot.slane %v34_v0, 1  ;;  %v781_v9 = vld [vmem:[%s976_s1 + $0x8] sm:$0xff]   ;;  %729 = vmatprep.mubr.msk.f32.mxu1 %vm822_vm1, %v821_v7 }
   0x3   :  { %716 = vmatpush3.bf16.msra.mxu0 %v780_v4 }
   0x4   :  { %771 = vrot.lane.b32.xlu0 %v770_v3, %s820_s15  ;;  %v51_v6 = vsel %vm49_vm0, %v46_v2, 0.0  ;;  %v50_v8 = vsel %vm49_vm0, %v45_v5, 0.0  ;;  %717 = vmatprep.subr.bf16.mxu0 %v821_v7 }
   0x5   :  { %v775_v10 = vpack.i.bf16 %v51_v6, %v50_v8 }
   0x6   :  { %14 = vsyncpa [#allocation3], 0  ;;  %s823_s0 = smov 32   ;;  %v782_v11 = vld [vmem:[%s976_s1 + $0x10] sm:$0xff]   ;;  %v39_v12 = vrot.slane %v35_v1, 7  ;;  %v38_v13 = vrot.slane %v34_v0, 7 }
   0x7   :  { %718 = vmatpush3.bf16.msra.mxu0 %v781_v9  ;;  %vm42_vm2 = vcmask 1040384   ;;  %vm66_vm3 = vcmask 130048   ;;  %vm69_vm4 = vcmask 261120   ;;  %vm97_vm5 = vcmask 392192   ;;  %v151_v27 = vld [vmem:[%s980_s5] sm:$0xff]  ;;  %v152_v28 = vld [vmem:[%s980_s5 + $0x8] sm:$0xff] }
   0x8   :  { %776 = vrot.lane.b32.xlu0 %v775_v10, %s823_s0  ;;  %719 = vmatprep.subr.bf16.mxu0 %v821_v7  ;;  %v44_v17 = vsel %vm42_vm2, 0.0, %v39_v12  ;;  %v43_v18 = vsel %vm42_vm2, 0.0, %v38_v13  ;;  %v756_v29 = vpack.c.bf16 %v152_v28, %v151_v27  ;;  %v824_v30 = vmov 0.0|0.0   ;;  %v687_v31 = vld [vmem:[%s977_s2] ss:$0 sm:$0xff]  ;;  %s826_s29 = smov [#allocation2]  }
   0x9   :  { %755 = vmatprep.subr.bf16.mxu1 %v824_v30  ;;  %vm188_vm6 = vcmask 1041409   ;;  %v153_v52 = vld [vmem:[%s981_s6] sm:$0xff]  ;;  %vm262_vm7 = vcmask 64512   ;;  %s672_s30 = sshll.u32 %s826_s29, 4  ;;  %s673_s30 = int_to_ptr.vmem [resolvable:$true] %s672_s30 }
   0xa   :  { %757 = vmatpush3.bf16.msra.mxu1 %v756_v29  ;;  %s796_s10 = scalar_lea.vmem %s673_s30, 256  ;;  %p801_p1 = scmp.lt.s32.totalorder %s673_s30, %s673_s30 }
   0xb   :  { %720 = vmatpush3.bf16.msra.mxu0 %v782_v11  ;;  %732 = vmatprep.subr.mxu1 %v821_v7  ;;  %p797_p0 = scmp.ne.s32.totalorder %s673_s30, %s796_s10  ;;  %p802_p2 = scmp.lt.s32.totalorder %s796_s10, %s796_s10 }
   0xc   :  { %749 = vmatprep.subr.bf16.mxu0 %v821_v7 }
   0xd   :  { %p803_p3 = por %p802_p2, %p801_p1 }
   0xf   :  { %p804_p4 = pnand %p803_p3, %p797_p0 }
  0x76   :  { %v772_v14 = vpop.permute.xlu0 %771 }
  0x77   :  { %v774_v15 = vunpack.i.h.bf16 %v772_v14  ;;  %v773_v16 = vunpack.i.l.bf16 %v772_v14  ;;  %v783_v14 = vld [vmem:[%s982_s7] sm:$0xff]  }
  0x79   :  { %v68_v22 = vsel %vm66_vm3, %v44_v17, %v774_v15  ;;  %v67_v23 = vsel %vm66_vm3, %v43_v18, %v773_v16  ;;  %v825_v16 = vmov 1966171168   ;;  %v493_v18 = vlaneseq }
  0x7a   :  { %v777_v19 = vpop.permute.xlu0 %776  ;;  %v491_v17 = vunpack.c.l.s4 %v825_v16 }
  0x7b   :  { %v779_v20 = vunpack.i.h.bf16 %v777_v19  ;;  %v778_v21 = vunpack.i.l.bf16 %v777_v19 }
  0x7d   :  { %v71_v24 = vsel %vm69_vm4, %v68_v22, %v779_v20  ;;  %v70_v25 = vsel %vm69_vm4, %v67_v23, %v778_v21  ;;  %v492_v21 = vunpack.c.0.s8 %v491_v17  ;;  %v494_v22 = vshrl.u32 %v493_v18, 7 }
  0x7e   :  { %v72_v26 = vpack.c.bf16 %v71_v24, %v70_v25 }
  0x7f   :  { %v495_v25 = vsub.s32 %v492_v21, %v494_v22 }
  0x80   :  { %722 = vmatmul.mubr.msk.bf16.vlgmr.msra.gmra.mrb[0].mxu0 %vm97_vm5, %v72_v26 }
  0x81   :  { %751 = vmatprep.mubr.msk.bf16.mxu0 %vm822_vm1, %v821_v7  ;;  %750 = vmatpush3.bf16.msra.mxu0 %v783_v14 }
 0x153   :  { %v135_v32 = vpop.f32.mrb[0].mxu0 }
 0x154   :  { %v916_v33 = vadd.f32 %v687_v31, %v135_v32  ;;  %v723_v34 = vpop.f32.mrb[1].mxu0 }
 0x155   :  { %v138_v35 = vpop.f32.mrb[2].mxu0 }
 0x156   :  { %v156_v36 = vsel %vm66_vm3, %v916_v33, 0.0  ;;  %v920_v37 = vadd.f32 %v687_v31, %v138_v35  ;;  %v724_v38 = vpop.f32.mrb[3].mxu0  ;;  %v170_v55 = vmul.f32 %v916_v33, %v916_v33 }
 0x157   :  { %v157_v39 = vrot.slane %v156_v36, 4  ;;  %v514_v38 = vsub.s32 0, %v494_v22 }
 0x158   :  { %v163_v40 = vsel %vm66_vm3, %v920_v37, 0.0  ;;  %v171_v54 = vmul.f32 %v920_v37, %v920_v37  ;;  %v172_v57 = vsel %vm66_vm3, %v170_v55, 0.0 }
 0x159   :  { %v158_v41 = vadd.f32 %v157_v39, %v156_v36  ;;  %v164_v42 = vrot.slane %v163_v40, 4  ;;  %v173_v59 = vrot.slane %v172_v57, 4 }
 0x15a   :  { %v179_v56 = vsel %vm66_vm3, %v171_v54, 0.0 }
 0x15b   :  { %v159_v43 = vrot.slane %v158_v41, 2  ;;  %v165_v44 = vadd.f32 %v164_v42, %v163_v40  ;;  %v180_v58 = vrot.slane %v179_v56, 4  ;;  %v174_v61 = vadd.f32 %v173_v59, %v172_v57 }
 0x15d   :  { %v160_v45 = vadd.f32 %v159_v43, %v158_v41  ;;  %v166_v46 = vrot.slane %v165_v44, 2  ;;  %v181_v60 = vadd.f32 %v180_v58, %v179_v56  ;;  %v175_v63 = vrot.slane %v174_v61, 2 }
 0x15f   :  { %v167_v47 = vadd.f32 %v166_v46, %v165_v44  ;;  %v161_v48 = vrot.slane %v160_v45, 1  ;;  %v182_v62 = vrot.slane %v181_v60, 2  ;;  %v176_v1 = vadd.f32 %v175_v63, %v174_v61  ;;  %v692_v46 = vld [vmem:[%s978_s3] ss:$0 sm:$0xff] }
 0x161   :  { %v168_v49 = vrot.slane %v167_v47, 1  ;;  %v162_v50 = vadd.f32 %v161_v48, %v160_v45  ;;  %v183_v0 = vadd.f32 %v182_v62, %v181_v60  ;;  %v177_v3 = vrot.slane %v176_v1, 1 }
 0x163   :  { %v169_v51 = vadd.f32 %v168_v49, %v167_v47  ;;  %v184_v2 = vrot.slane %v183_v0, 1  ;;  %v178_v8 = vadd.f32 %v177_v3, %v176_v1 }
 0x165   :  { %v189_v53 = vsel %vm188_vm6, %v169_v51, %v162_v50  ;;  %v185_v5 = vadd.f32 %v184_v2, %v183_v0  ;;  %v693_v50 = vld [vmem:[%s979_s4] ss:$0 sm:$0xff] }
 0x166   :  { %730 = vmatmul.mubr.msk.f32.vlgmr.msra.gmra.mrb[0].mxu1 %vm66_vm3, %v189_v53 }
 0x167   :  { %733 = vmatpush3.msra.mxu1 %v153_v52  ;;  %734 = vmatprep.mubr.msk.f32.mxu1 %vm822_vm1, %v821_v7  ;;  %v339_v9 = vsel %vm188_vm6, %v185_v5, %v178_v8 }
 0x168   :  { %758 = vmatprep.subr.bf16.mxu1 %v824_v30 }
 0x239   :  { %v258_v4 = vpop.f32.mrb[0].mxu1 }
 0x23a   :  { %v731_v6 = vpop.f32.mrb[1].mxu1  ;;  %735 = vmatmul.mubr.msk.f32.vlgmr.msra.gmra.mrb[2].mxu1 %vm262_vm7, %v258_v4 }
 0x23b   :  { %760 = vmatpush3.bf16.msra.mxu1 %v756_v29  ;;  %741 = vmatprep.mubr.msk.f32.mxu1 %vm822_vm1, %v821_v7 }
 0x23c   :  { %744 = vmatprep.subr.mxu1 %v821_v7 }
 0x23e   :  { %742 = vmatmul.mubr.msk.f32.vlgmr.msra.gmra.mrb[4].mxu1 %vm66_vm3, %v339_v9 }
 0x23f   :  { %745 = vmatpush3.msra.mxu1 %v153_v52  ;;  %746 = vmatprep.mubr.msk.f32.mxu1 %vm822_vm1, %v821_v7 }
 0x30d   :  { %v332_v10 = vpop.f32.mrb[2].mxu1 }
 0x30e   :  { %v736_v11 = vpop.f32.mrb[3].mxu1  ;;  %v336_v15 = vmul.f32 0.0625, %v332_v10 }
 0x310   :  { %v486_v20 = vmul.f32 %v336_v15, %v336_v15  ;;  %v496_v30 = vrot.slane %v336_v15, %v495_v25 }
 0x311   :  { %v408_v12 = vpop.f32.mrb[4].mxu1 }
 0x312   :  { %v743_v13 = vpop.f32.mrb[5].mxu1  ;;  %747 = vmatmul.mubr.msk.f32.vlgmr.msra.gmra.mrb[6].mxu1 %vm262_vm7, %v408_v12  ;;  %v497_v35 = vcombine.high %v496_v30, %v496_v30  ;;  %v504_v36 = vrot.slane %v496_v30, %v495_v25  ;;  %v698_v12 = vld [vmem:[%s983_s8] ss:$0 sm:$0xff] }
 0x314   :  { %v511_v39 = vrot.slane %v497_v35, %v495_v25  ;;  %v515_v40 = vrot.slane %v504_v36, %v514_v38 }
 0x316   :  { %v519_v41 = vrot.slane %v511_v39, %v514_v38  ;;  %v522_v43 = vsub.f32 %v916_v33, %v515_v40 }
 0x318   :  { %v523_v47 = vsub.f32 %v920_v37, %v519_v41 }
 0x3e5   :  { %v481_v19 = vpop.f32.mrb[6].mxu1 }
 0x3e6   :  { %v485_v7 = vmul.f32 0.0625, %v481_v19  ;;  %v748_v23 = vpop.f32.mrb[7].mxu1 }
 0x3e8   :  { %v487_v24 = vsub.f32 %v485_v7, %v486_v20 }
 0x3ea   :  { %v488_v26 = vmax.f32 %v487_v24, 0.0 }
 0x3ec   :  { %v531_v27 = vrot.slane %v488_v26, %v495_v25 }
 0x3ee   :  { %v532_v28 = vcombine.high %v531_v27, %v531_v27  ;;  %v539_v29 = vrot.slane %v531_v27, %v495_v25 }
 0x3f0   :  { %v546_v31 = vrot.slane %v532_v28, %v495_v25  ;;  %v549_v32 = vadd.f32 1e-05, %v539_v29 }
 0x3f2   :  { %v550_v34 = vadd.f32 1e-05, %v546_v31  ;;  %784 = vrsqrt.f32 %v549_v32 }
 0x3f4   :  { %786 = vrsqrt.f32 %v550_v34 }
 0x3fc   :  { %v785_v42 = vpop.eup %784 }
 0x3fd   :  { %v558_v44 = vrot.slane %v785_v42, %v514_v38 }
 0x3fe   :  { %v787_v45 = vpop.eup %786 }
 0x3ff   :  { %v562_v48 = vrot.slane %v787_v45, %v514_v38  ;;  %v565_v49 = vmul.f32 %v558_v44, %v522_v43 }
 0x401   :  { %v566_v51 = vmul.f32 %v562_v48, %v523_v47  ;;  %v573_v52 = vmul.f32 %v692_v46, %v565_v49 }
 0x403   :  { %v574_v53 = vmul.f32 %v692_v46, %v566_v51  ;;  %v581_v54 = vadd.f32 %v693_v50, %v573_v52 }
 0x405   :  { %v582_v55 = vadd.f32 %v693_v50, %v574_v53  ;;  %v583_v33 = vmin.f32 %v581_v54, 20.0 }
 0x407   :  { %v584_v56 = vmin.f32 %v582_v55, 20.0  ;;  %v585_v57 = vmul.f32 1.442695, %v583_v33 }
 0x409   :  { %788 = vpow2.f32 %v585_v57  ;;  %v587_v58 = vmul.f32 1.442695, %v584_v56 }
 0x40b   :  { %790 = vpow2.f32 %v587_v58 }
 0x413   :  { %v789_v59 = vpop.eup %788 }
 0x414   :  { %v589_v60 = vadd.f32 1.0, %v789_v59 }
 0x415   :  { %v791_v37 = vpop.eup %790 }
 0x416   :  { %v590_v61 = vadd.f32 1.0, %v791_v37  ;;  %v591_v62 = vmul.f32 %v589_v60, %v589_v60 }
 0x418   :  { %v592_v63 = vmul.f32 %v590_v61, %v590_v61  ;;  %v597_v0 = vadd.f32 1.0, %v591_v62  ;;  %v694_v2 = vadd.f32 -1.0, %v591_v62 }
 0x41a   :  { %v598_v1 = vadd.f32 1.0, %v592_v63  ;;  %792 = vrcp.f32 %v597_v0  ;;  %v695_v3 = vadd.f32 -1.0, %v592_v63  ;;  %v595_v5 = vmul.f32 %v694_v2, %v581_v54 }
 0x41c   :  { %794 = vrcp.f32 %v598_v1  ;;  %v596_v6 = vmul.f32 %v695_v3, %v582_v55 }
 0x424   :  { %v793_v4 = vpop.eup %792 }
 0x425   :  { %v601_v9 = vmul.f32 %v793_v4, %v595_v5 }
 0x426   :  { %v795_v8 = vpop.eup %794 }
 0x427   :  { %v602_v10 = vmul.f32 %v795_v8, %v596_v6 }
 0x429   :  { %v603_v11 = vpack.c.bf16 %v602_v10, %v601_v9 }
 0x42b   :  { %752 = vmatmul.mubr.msk.bf16.vlgmr.msra.gmra.mrb[4].mxu0 %vm66_vm3, %v603_v11 }
 0x4fe   :  { %v649_v13 = vpop.f32.mrb[4].mxu0 }
 0x4ff   :  { %v663_v14 = vadd.f32 %v698_v12, %v649_v13  ;;  %v753_v15 = vpop.f32.mrb[5].mxu0 }
 0x500   :  { %v652_v16 = vpop.f32.mrb[6].mxu0 }
 0x501   :  { %665 = vst.msk [vmem:[#allocation2] sm:$0xff] %vm66_vm3, %v663_v14  ;;  %v664_v17 = vadd.f32 %v698_v12, %v652_v16  ;;  %v754_v18 = vpop.f32.mrb[7].mxu0 }
 0x503   :  { %666 = vst.msk [vmem:[#allocation2 + $0x8] sm:$0xff] %vm66_vm3, %v664_v17 }
 0x504   :  { %807 = shalt.err (!%p804_p4)
}
 0x505   :  { %s808_s12 = scalar_lea.hbm %s984_s9, 256 }
 0x506   :  { %p809_p5 = scmp.ne.s32.totalorder %s984_s9, %s808_s12  ;;  %p812_p6 = scmp.lt.u32.totalorder %s808_s12, %s984_s9 }
 0x508   :  { %p814_p7 = pnand %p812_p6, %p809_p5 }
 0x50a   :  { %817 = shalt.err (!%p814_p7)
}
 0x50b   :  { %s827_s17 = smov 128   ;;  %s828_s0 = smov 8  }
 0x50c   :  { %678 = dma.vmem_to_hbm [thread:$0]  %s673_s30, 256, %s984_s9, [#allocation3], %s827_s17, %s827_s17, %s828_s0  }
 0x50d   :  { %818 = dma.done.wait [#allocation3], 256  }
 0x50e   :  { %819 = vsyncadd [#allocation3], 4294967040 }
 0x50f   :  { %682 = vsyncpa [#allocation3], 1 }

// kernel: unet_forward.25
= control target key start
LH: loop header
LB: loop body
LE: loop exit
PB: predicated region body
PF: predicated region fallthrough
CT: control target
= control target key end

     0   :  { %v1910_v3 = vmov 0.0   ;;  %vm89_vm0 = vcmask 1046528   ;;  %vm1911_vm1 = vmmov 0   ;;  %vm82_vm2 = vcmask 1040384   ;;  %s2340_s0 = inlined_call_operand.vmem [shape: f32[2,8,16], index: 0, kind: input, shape index: {}]   ;;  %s2341_s1 = inlined_call_operand.vmem [shape: f32[2,8,16], index: 1, kind: input, shape index: {}]   ;;  %s2342_s3 = inlined_call_operand.vmem [shape: bf16[48,16], index: 3, kind: input, shape index: {}]   ;;  %s2343_s4 = inlined_call_operand.vmem [shape: bf16[48,16], index: 4, kind: input, shape index: {}]   ;;  %s2344_s8 = inlined_call_operand.vmem [shape: f32[16,8], index: 8, kind: input, shape index: {}]   ;;  %s2345_s9 = inlined_call_operand.vmem [shape: f32[8,16], index: 9, kind: input, shape index: {}]   ;;  %s2346_s5 = inlined_call_operand.vmem [shape: f32[1,16], index: 5, kind: input, shape index: {}]   ;;  %s2347_s10 = inlined_call_operand.vmem [shape: bf16[24,16], index: 10, kind: input, shape index: {}]   ;;  %s2348_s12 = inlined_call_operand.vmem [shape: bf16[24,16], index: 12, kind: input, shape index: {}]   ;;  %s2349_s2 = inlined_call_operand.vmem [shape: f32[2,24], index: 2, kind: input, shape index: {}]   ;;  %s2350_s14 = inlined_call_operand.vmem [shape: bf16[48,16], index: 14, kind: input, shape index: {}]   ;;  %s2351_s6 = inlined_call_operand.vmem [shape: f32[1,16], index: 6, kind: input, shape index: {}]   ;;  %s2352_s7 = inlined_call_operand.vmem [shape: f32[1,16], index: 7, kind: input, shape index: {}]   ;;  %s2353_s11 = inlined_call_operand.vmem [shape: f32[1,16], index: 11, kind: input, shape index: {}]   ;;  %s2354_s13 = inlined_call_operand.vmem [shape: f32[1,16], index: 13, kind: input, shape index: {}]   ;;  %s2355_s15 = inlined_call_operand.vmem [shape: f32[1,16], index: 15, kind: input, shape index: {}]   ;;  %s2356_s18 = inlined_call_operand.vmem [shape: bf16[16,16], index: 18, kind: input, shape index: {}]   ;;  %s2357_s19 = inlined_call_operand.vmem [shape: bf16[16,16], index: 19, kind: input, shape index: {}]   ;;  %s2358_s16 = inlined_call_operand.vmem [shape: f32[1,16], index: 16, kind: input, shape index: {}]   ;;  %s2359_s17 = inlined_call_operand.vmem [shape: f32[1,16], index: 17, kind: input, shape index: {}]   ;;  %s2360_s20 = inlined_call_operand.vmem [shape: f32[1,16], index: 20, kind: input, shape index: {}]   ;;  %s2361_s21 = inlined_call_operand.vmem [shape: f32[2,8,16], index: 21, kind: output, shape index: {}]  }
   0x1   :  { %2367 = sst [smem:[#allocation2_spill]] %s2340_s0  ;;  %1717 = vmatprep.subr.bf16.mxu0 %v1910_v3  ;;  %1727 = vmatprep.subr.bf16.mxu1 %v1910_v3  ;;  %vm106_vm3 = vcmask 130048   ;;  %vm109_vm4 = vcmask 261120   ;;  %vm137_vm5 = vcmask 392192   ;;  %v1914_v57 = vmov 0.0|0.0  }
   0x2   :  { %2368 = sst [smem:[#allocation3_spill]] %s2341_s1  ;;  %s2373_s26 = sld [smem:[#allocation2_spill]]  ;;  %1723 = vmatprep.mubr.msk.bf16.mxu0 %vm1911_vm1, %v1910_v3  ;;  %1733 = vmatprep.mubr.msk.bf16.mxu1 %vm1911_vm1, %v1910_v3  ;;  %vm328_vm6 = vcmask 1041409   ;;  %vm768_vm7 = vcmask 1043456   ;;  %vm764_vm8 = vcmask 195584   ;;  %vm402_vm9 = vcmask 64512  }
   0x3   :  { %2369 = sst [smem:[#allocation4_spill]] %s2342_s3  ;;  %s2374_s0 = sld [smem:[#allocation3_spill]] }
   0x4   :  { %2370 = sst [smem:[#allocation5_spill]] %s2343_s4  ;;  %s2375_s23 = sld [smem:[#allocation4_spill]] }
   0x5   :  { %2371 = sst [smem:[#allocation6_spill]] %s2344_s8  ;;  %s1912_s1 = smov 16  }
   0x6   :  { %2372 = sst [smem:[#allocation7_spill]] %s2345_s9  ;;  %s2376_s25 = sld [smem:[#allocation5_spill]] }
   0x7   :  { %s1913_s4 = smov 32   ;;  %s2377_s24 = sld [smem:[#allocation6_spill]] }
   0x8   :  { %v2029_v0 = vld [vmem:[%s2373_s26] sm:$0xff]  ;;  %v2034_v1 = vld [vmem:[%s2373_s26 + $0x8] sm:$0xff]  ;;  %s2378_s28 = sld [smem:[#allocation7_spill]] }
   0x9   :  { %v2039_v2 = vld [vmem:[%s2374_s0] sm:$0xff]  ;;  %v1841_v4 = vpack.i.bf16 %v2034_v1, %v2029_v0  ;;  %v1507_v5 = vpack.c.bf16 %v2034_v1, %v2029_v0  ;;  %v2050_v6 = vld [vmem:[%s2374_s0 + $0x8] sm:$0xff]  ;;  %v85_v8 = vrot.slane %v2029_v0, 1  ;;  %v86_v9 = vrot.slane %v2034_v1, 1 }
   0xa   :  { %v1871_v7 = vld [vmem:[%s2375_s23] sm:$0xff]   ;;  %v190_v10 = vrot.slane %v2039_v2, 1  ;;  %v1846_v11 = vpack.i.bf16 %v2050_v6, %v2039_v2  ;;  %v191_v12 = vrot.slane %v2050_v6, 1  ;;  %v1872_v17 = vld [vmem:[%s2375_s23 + $0x8] sm:$0xff]   ;;  %v1874_v22 = vld [vmem:[%s2375_s23 + $0x10] sm:$0xff]   ;;  %v79_v24 = vrot.slane %v2034_v1, 7 }
   0xb   :  { %1842 = vrot.lane.b32.xlu0 %v1841_v4, %s1912_s1  ;;  %1718 = vmatpush3.bf16.msra.mxu0 %v1871_v7  ;;  %v90_v14 = vsel %vm89_vm0, %v85_v8, 0.0  ;;  %v91_v15 = vsel %vm89_vm0, %v86_v9, 0.0  ;;  %v78_v25 = vrot.slane %v2029_v0, 7  ;;  %v184_v27 = vrot.slane %v2039_v2, 7  ;;  %v1640_v4 = vld [vmem:[%s2346_s5] ss:$0 sm:$0xff] }
   0xc   :  { %v1873_v13 = vld [vmem:[%s2376_s25] sm:$0xff]   ;;  %v194_v16 = vsel %vm89_vm0, %v190_v10, 0.0  ;;  %1719 = vmatprep.subr.bf16.mxu0 %v1910_v3  ;;  %v1851_v18 = vpack.i.bf16 %v91_v15, %v90_v14  ;;  %v195_v19 = vsel %vm89_vm0, %v191_v12, 0.0  ;;  %v1875_v21 = vld [vmem:[%s2376_s25 + $0x8] sm:$0xff]   ;;  %v1876_v23 = vld [vmem:[%s2376_s25 + $0x10] sm:$0xff]   ;;  %v185_v28 = vrot.slane %v2050_v6, 7 }
   0xd   :  { %1728 = vmatpush3.bf16.msra.mxu1 %v1873_v13  ;;  %v1856_v20 = vpack.i.bf16 %v195_v19, %v194_v16  ;;  %v84_v29 = vsel %vm82_vm2, 0.0, %v79_v24  ;;  %v83_v32 = vsel %vm82_vm2, 0.0, %v78_v25  ;;  %v188_v36 = vsel %vm82_vm2, 0.0, %v184_v27  ;;  %v73_v54 = vld [vmem:[%s2377_s24] sm:$0xff]  ;;  %v74_v55 = vld [vmem:[%s2377_s24 + $0x8] sm:$0xff] }
   0xe   :  { %1729 = vmatprep.subr.bf16.mxu1 %v1910_v3  ;;  %1852 = vrot.lane.b32.xlu1 %v1851_v18, %s1913_s4  ;;  %v189_v37 = vsel %vm82_vm2, 0.0, %v185_v28  ;;  %v2121_v56 = vpack.c.bf16 %v74_v55, %v73_v54  ;;  %v2129_v58 = vld [vmem:[%s2378_s28] sm:$0xff] }
   0xf   :  { %1847 = vrot.lane.b32.xlu0 %v1846_v11, %s1912_s1  ;;  %1720 = vmatpush3.bf16.msra.mxu0 %v1872_v17  ;;  %v1879_v55 = vld [vmem:[%s2348_s12] sm:$0xff]  }
  0x10   :  { %1721 = vmatprep.subr.bf16.mxu0 %v1910_v3 }
  0x11   :  { %1730 = vmatpush3.bf16.msra.mxu1 %v1875_v21 }
  0x12   :  { %1731 = vmatprep.subr.bf16.mxu1 %v1910_v3  ;;  %1857 = vrot.lane.b32.xlu1 %v1856_v20, %s1913_s4 }
  0x13   :  { %1722 = vmatpush3.bf16.msra.mxu0 %v1874_v22 }
  0x14   :  { %1823 = vmatprep.subr.bf16.mxu0 %v1914_v57 }
  0x15   :  { %1732 = vmatpush3.bf16.msra.mxu1 %v1876_v23 }
  0x16   :  { %1744 = vmatprep.subr.mxu1 %v1910_v3 }
  0x7d   :  { %v1843_v26 = vpop.permute.xlu0 %1842 }
  0x7e   :  { %v1845_v30 = vunpack.i.h.bf16 %v1843_v26  ;;  %v1844_v31 = vunpack.i.l.bf16 %v1843_v26 }
  0x80   :  { %v108_v33 = vsel %vm106_vm3, %v84_v29, %v1845_v30  ;;  %v107_v34 = vsel %vm106_vm3, %v83_v32, %v1844_v31  ;;  %v1853_v35 = vpop.permute.xlu1 %1852 }
  0x81   :  { %v1848_v38 = vpop.permute.xlu0 %1847  ;;  %v1855_v39 = vunpack.i.h.bf16 %v1853_v35  ;;  %v1854_v40 = vunpack.i.l.bf16 %v1853_v35 }
  0x82   :  { %v1850_v41 = vunpack.i.h.bf16 %v1848_v38  ;;  %v1849_v42 = vunpack.i.l.bf16 %v1848_v38 }
  0x83   :  { %v111_v43 = vsel %vm109_vm4, %v108_v33, %v1855_v39  ;;  %v110_v44 = vsel %vm109_vm4, %v107_v34, %v1854_v40 }
  0x84   :  { %v112_v45 = vpack.c.bf16 %v111_v43, %v110_v44  ;;  %v211_v46 = vsel %vm106_vm3, %v189_v37, %v1850_v41  ;;  %v210_v47 = vsel %vm106_vm3, %v188_v36, %v1849_v42  ;;  %v1858_v48 = vpop.permute.xlu1 %1857 }
  0x85   :  { %v1860_v49 = vunpack.i.h.bf16 %v1858_v48  ;;  %v1859_v50 = vunpack.i.l.bf16 %v1858_v48  ;;  %v743_v48 = vld [vmem:[%s2349_s2] sm:$0x3] }
  0x86   :  { %1724 = vmatmul.mubr.msk.bf16.vlgmr.msra.gmra.mrb[0].mxu0 %vm137_vm5, %v112_v45 }
  0x87   :  { %v213_v51 = vsel %vm109_vm4, %v211_v46, %v1860_v49  ;;  %v212_v52 = vsel %vm109_vm4, %v210_v47, %v1859_v50  ;;  %1741 = vmatprep.mubr.msk.f32.mxu0 %vm1911_vm1, %v1910_v3  ;;  %1825 = vmatpush3.bf16.msra.mxu0 %v2121_v56  ;;  %v1877_v46 = vld [vmem:[%s2347_s10] sm:$0xff]   ;;  %v1878_v47 = vld [vmem:[%s2347_s10 + $0x8] ss:$0 sps:$4 sm:$0xff]  }
  0x88   :  { %v214_v53 = vpack.c.bf16 %v213_v51, %v212_v52  ;;  %1826 = vmatprep.subr.bf16.mxu0 %v1914_v57  ;;  %v770_v49 = vsel %vm768_vm7, %v1878_v47, 0  ;;  %v1880_v50 = vld [vmem:[%s2348_s12 + $0x8] ss:$0 sps:$4 sm:$0xff]   ;;  %v744_v51 = vpack.c.bf16 %v743_v48, %v743_v48 }
  0x89   :  { %v832_v52 = vsel %vm768_vm7, %v1880_v50, 0  ;;  %v1646_v50 = vld [vmem:[%s2352_s7] ss:$0 sm:$0xff] }
  0x8a   :  { %1734 = vmatmul.mubr.msk.bf16.vlgmr.msra.gmra.mrb[0].mxu1 %vm137_vm5, %v214_v53 }
  0x8b   :  { %1746 = vmatprep.mubr.msk.f32.mxu1 %vm1911_vm1, %v1910_v3  ;;  %1745 = vmatpush3.msra.mxu1 %v2129_v58 }
  0x8c   :  { %1756 = vmatprep.subr.mxu1 %v1910_v3 }
 0x159   :  { %v175_v59 = vpop.f32.mrb[0].mxu0 }
 0x15a   :  { %v1725_v60 = vpop.f32.mrb[1].mxu0 }
 0x15b   :  { %v178_v61 = vpop.f32.mrb[2].mxu0 }
 0x15c   :  { %v1726_v62 = vpop.f32.mrb[3].mxu0 }
 0x15d   :  { %v276_v63 = vpop.f32.mrb[0].mxu1 }
 0x15e   :  { %v283_v7 = vadd.f32 %v276_v63, %v175_v59  ;;  %v1735_v8 = vpop.f32.mrb[1].mxu1 }
 0x15f   :  { %v279_v9 = vpop.f32.mrb[2].mxu1 }
 0x160   :  { %v2136_v10 = vadd.f32 %v1640_v4, %v283_v7  ;;  %v284_v11 = vadd.f32 %v279_v9, %v178_v61  ;;  %v1736_v12 = vpop.f32.mrb[3].mxu1  ;;  %v1881_v7 = vld [vmem:[%s2350_s14] sm:$0xff]  }
 0x162   :  { %v296_v13 = vsel %vm106_vm3, %v2136_v10, 0.0  ;;  %v310_v14 = vmul.f32 %v2136_v10, %v2136_v10  ;;  %v2142_v15 = vadd.f32 %v1640_v4, %v284_v11  ;;  %v1915_v11 = vmov 1966171168  }
 0x163   :  { %v297_v16 = vrot.slane %v296_v13, 4  ;;  %v631_v12 = vunpack.c.l.s4 %v1915_v11 }
 0x164   :  { %v312_v17 = vsel %vm106_vm3, %v310_v14, 0.0  ;;  %v303_v18 = vsel %vm106_vm3, %v2142_v15, 0.0  ;;  %v311_v19 = vmul.f32 %v2142_v15, %v2142_v15 }
 0x165   :  { %v298_v20 = vadd.f32 %v297_v16, %v296_v13  ;;  %v313_v21 = vrot.slane %v312_v17, 4  ;;  %v304_v22 = vrot.slane %v303_v18, 4  ;;  %v633_v13 = vlaneseq }
 0x166   :  { %v319_v23 = vsel %vm106_vm3, %v311_v19, 0.0 }
 0x167   :  { %v299_v24 = vrot.slane %v298_v20, 2  ;;  %v314_v25 = vadd.f32 %v313_v21, %v312_v17  ;;  %v305_v26 = vadd.f32 %v304_v22, %v303_v18  ;;  %v320_v27 = vrot.slane %v319_v23, 4 }
 0x168   :  { %v632_v18 = vunpack.c.0.s8 %v631_v12  ;;  %v634_v19 = vshrl.u32 %v633_v13, 7 }
 0x169   :  { %v300_v28 = vadd.f32 %v299_v24, %v298_v20  ;;  %v315_v29 = vrot.slane %v314_v25, 2  ;;  %v306_v30 = vrot.slane %v305_v26, 2  ;;  %v321_v31 = vadd.f32 %v320_v27, %v319_v23 }
 0x16a   :  { %v2201_v23 = vsub.s32 %v632_v18, %v634_v19 }
 0x16b   :  { %v301_v32 = vrot.slane %v300_v28, 1  ;;  %v316_v33 = vadd.f32 %v315_v29, %v314_v25  ;;  %v307_v34 = vadd.f32 %v306_v30, %v305_v26  ;;  %v322_v35 = vrot.slane %v321_v31, 2 }
 0x16d   :  { %v308_v36 = vrot.slane %v307_v34, 1  ;;  %v323_v37 = vadd.f32 %v322_v35, %v321_v31  ;;  %v302_v38 = vadd.f32 %v301_v32, %v300_v28  ;;  %v317_v40 = vrot.slane %v316_v33, 1 }
 0x16f   :  { %v309_v39 = vadd.f32 %v308_v36, %v307_v34  ;;  %v324_v41 = vrot.slane %v323_v37, 1  ;;  %v318_v44 = vadd.f32 %v317_v40, %v316_v33 }
 0x171   :  { %v329_v42 = vsel %vm328_vm6, %v309_v39, %v302_v38  ;;  %v325_v43 = vadd.f32 %v324_v41, %v323_v37  ;;  %v2208_v38 = vsub.s32 0, %v634_v19 }
 0x172   :  { %1742 = vmatmul.mubr.msk.f32.vlgmr.msra.gmra.mrb[4].mxu0 %vm106_vm3, %v329_v42 }
 0x173   :  { %1828 = vmatpush3.bf16.msra.mxu0 %v2121_v56  ;;  %1753 = vmatprep.mubr.msk.f32.mxu0 %vm1911_vm1, %v1910_v3  ;;  %v479_v45 = vsel %vm328_vm6, %v325_v43, %v318_v44 }
 0x174   :  { %1761 = vmatprep.subr.bf16.mxu0 %v1910_v3 }
 0x176   :  { %1754 = vmatmul.mubr.msk.f32.vlgmr.msra.gmra.mrb[6].mxu0 %vm106_vm3, %v479_v45 }
 0x177   :  { %1765 = vmatprep.mubr.msk.bf16.mxu0 %vm1911_vm1, %v1910_v3  ;;  %1762 = vmatpush3.bf16.msra.mxu0 %v1877_v46  ;;  %v1645_v46 = vld [vmem:[%s2351_s6] ss:$0 sm:$0xff] }
 0x178   :  { %1763 = vmatprep.subr.bf16.mxu0 %v1910_v3 }
 0x17b   :  { %1764 = vmatpush3.bf16.msra.mxu0 %v770_v49 }
 0x17c   :  { %1777 = vmatprep.subr.bf16.mxu0 %v1910_v3 }
 0x17e   :  { %1766 = vmatmul.mubr.msk.bf16.vlgmr.msra.gmra.mrb[8].mxu0 %vm764_vm8, %v744_v51 }
 0x17f   :  { %1783 = vmatprep.mubr.msk.bf16.mxu0 %vm1911_vm1, %v1910_v3  ;;  %1778 = vmatpush3.bf16.msra.mxu0 %v1881_v7 }
 0x180   :  { %1779 = vmatprep.subr.bf16.mxu0 %v1910_v3 }
 0x245   :  { %v398_v53 = vpop.f32.mrb[4].mxu0 }
 0x246   :  { %v1743_v54 = vpop.f32.mrb[5].mxu0  ;;  %1747 = vmatmul.mubr.msk.f32.vlgmr.msra.gmra.mrb[4].mxu1 %vm402_vm9, %v398_v53 }
 0x247   :  { %1757 = vmatpush3.msra.mxu1 %v2129_v58  ;;  %1758 = vmatprep.mubr.msk.f32.mxu1 %vm1911_vm1, %v1910_v3 }
 0x248   :  { %1769 = vmatprep.subr.bf16.mxu1 %v1910_v3 }
 0x249   :  { %v548_v59 = vpop.f32.mrb[6].mxu0 }
 0x24a   :  { %v1755_v60 = vpop.f32.mrb[7].mxu0  ;;  %1759 = vmatmul.mubr.msk.f32.vlgmr.msra.gmra.mrb[6].mxu1 %vm402_vm9, %v548_v59 }
 0x24b   :  { %1770 = vmatpush3.bf16.msra.mxu1 %v1879_v55  ;;  %1773 = vmatprep.mubr.msk.bf16.mxu1 %vm1911_vm1, %v1910_v3 }
 0x24c   :  { %1771 = vmatprep.subr.bf16.mxu1 %v1910_v3 }
 0x24f   :  { %1772 = vmatpush3.bf16.msra.mxu1 %v832_v52 }
 0x250   :  { %1829 = vmatprep.subr.bf16.mxu1 %v1914_v57 }
 0x251   :  { %v2195_v61 = vpop.f32.mrb[8].mxu0 }
 0x252   :  { %1774 = vmatmul.mubr.msk.bf16.vlgmr.msra.gmra.mrb[8].mxu1 %vm764_vm8, %v744_v51  ;;  %v1767_v62 = vpop.f32.mrb[9].mxu0 }
 0x253   :  { %1831 = vmatpush3.bf16.msra.mxu1 %v2121_v56  ;;  %1791 = vmatprep.mubr.msk.f32.mxu1 %vm1911_vm1, %v1910_v3  ;;  %v809_v63 = vpop.f32.mrb[10].mxu0 }
 0x254   :  { %1794 = vmatprep.subr.mxu1 %v1910_v3  ;;  %v1768_v4 = vpop.f32.mrb[11].mxu0 }
 0x319   :  { %v472_v8 = vpop.f32.mrb[4].mxu1 }
 0x31a   :  { %v476_v9 = vmul.f32 0.0625, %v472_v8  ;;  %v1748_v14 = vpop.f32.mrb[5].mxu1  ;;  %v1653_v8 = vld [vmem:[%s2354_s13] ss:$0 sm:$0xff] }
 0x31c   :  { %v626_v17 = vmul.f32 %v476_v9, %v476_v9  ;;  %v636_v30 = vrot.slane %v476_v9, %v2201_v23 }
 0x31d   :  { %v621_v16 = vpop.f32.mrb[6].mxu1 }
 0x31e   :  { %v625_v20 = vmul.f32 0.0625, %v621_v16  ;;  %v1760_v21 = vpop.f32.mrb[7].mxu1  ;;  %v637_v36 = vcombine.high %v636_v30, %v636_v30  ;;  %v644_v37 = vrot.slane %v636_v30, %v2201_v23 }
 0x320   :  { %v627_v22 = vsub.f32 %v625_v20, %v626_v17  ;;  %v651_v39 = vrot.slane %v637_v36, %v2201_v23  ;;  %v655_v40 = vrot.slane %v644_v37, %v2208_v38 }
 0x322   :  { %v628_v24 = vmax.f32 %v627_v22, 0.0  ;;  %v659_v41 = vrot.slane %v651_v39, %v2208_v38  ;;  %v662_v43 = vsub.f32 %v2136_v10, %v655_v40  ;;  %v1883_v40 = vld [vmem:[%s2350_s14 + $0x10] sm:$0xff]  }
 0x324   :  { %v671_v25 = vrot.slane %v628_v24, %v2201_v23  ;;  %v663_v47 = vsub.f32 %v2142_v15, %v659_v41  ;;  %v1649_v15 = vld [vmem:[%s2353_s11] ss:$0 sm:$0xff] }
 0x325   :  { %v868_v26 = vpop.f32.mrb[8].mxu1  ;;  %v807_v63 = vadd.f32 %v1649_v15, %v2195_v61 }
 0x326   :  { %v672_v27 = vcombine.high %v671_v25, %v671_v25  ;;  %v679_v28 = vrot.slane %v671_v25, %v2201_v23  ;;  %v1775_v29 = vpop.f32.mrb[9].mxu1  ;;  %v869_v14 = vadd.f32 %v1653_v8, %v868_v26  ;;  %v1882_v26 = vld [vmem:[%s2350_s14 + $0x8] sm:$0xff]  }
 0x327   :  { %v871_v31 = vpop.f32.mrb[10].mxu1  ;;  %v881_v11 = vrot.slane %v807_v63, %v2201_v23  ;;  %1780 = vmatpush3.bf16.msra.mxu0 %v1882_v26 }
 0x328   :  { %v686_v32 = vrot.slane %v672_v27, %v2201_v23  ;;  %v689_v33 = vadd.f32 1e-05, %v679_v28  ;;  %v1776_v34 = vpop.f32.mrb[11].mxu1  ;;  %v922_v61 = vrot.slane %v869_v14, %v2201_v23  ;;  %1781 = vmatprep.subr.bf16.mxu0 %v1910_v3 }
 0x329   :  { %v882_v18 = vcombine.high %v881_v11, %v881_v11  ;;  %v889_v20 = vrot.slane %v881_v11, %v2201_v23 }
 0x32a   :  { %v690_v35 = vadd.f32 1e-05, %v686_v32  ;;  %1886 = vrsqrt.f32 %v689_v33  ;;  %v923_v25 = vcombine.high %v922_v61, %v922_v61  ;;  %v930_v28 = vrot.slane %v922_v61, %v2201_v23 }
 0x32b   :  { %v896_v21 = vrot.slane %v882_v18, %v2201_v23  ;;  %v899_v24 = vadd.f32 1.0, %v889_v20  ;;  %1782 = vmatpush3.bf16.msra.mxu0 %v1883_v40 }
 0x32c   :  { %1888 = vrsqrt.f32 %v690_v35  ;;  %v937_v32 = vrot.slane %v923_v25, %v2201_v23  ;;  %v941_v36 = vrot.slane %v930_v28, %v2208_v38  ;;  %1806 = vmatprep.subr.mxu0 %v1910_v3 }
 0x32d   :  { %v900_v27 = vadd.f32 1.0, %v896_v21  ;;  %v906_v31 = vrot.slane %v899_v24, %v2208_v38 }
 0x32f   :  { %v910_v35 = vrot.slane %v900_v27, %v2208_v38 }
 0x334   :  { %v1887_v42 = vpop.eup %1886 }
 0x335   :  { %v698_v44 = vrot.slane %v1887_v42, %v2208_v38  ;;  %v945_v42 = vrot.slane %v937_v32, %v2208_v38 }
 0x336   :  { %v1889_v45 = vpop.eup %1888 }
 0x337   :  { %v702_v48 = vrot.slane %v1889_v45, %v2208_v38  ;;  %v705_v49 = vmul.f32 %v698_v44, %v662_v43 }
 0x339   :  { %v713_v51 = vmul.f32 %v1645_v46, %v705_v49  ;;  %v706_v52 = vmul.f32 %v702_v48, %v663_v47 }
 0x33b   :  { %v721_v53 = vadd.f32 %v1646_v50, %v713_v51  ;;  %v714_v10 = vmul.f32 %v1645_v46, %v706_v52 }
 0x33d   :  { %v723_v54 = vmin.f32 %v721_v53, 20.0  ;;  %v722_v55 = vadd.f32 %v1646_v50, %v714_v10 }
 0x33f   :  { %v725_v59 = vmul.f32 1.442695, %v723_v54  ;;  %v724_v60 = vmin.f32 %v722_v55, 20.0 }
 0x341   :  { %1890 = vpow2.f32 %v725_v59  ;;  %v727_v62 = vmul.f32 1.442695, %v724_v60 }
 0x343   :  { %1892 = vpow2.f32 %v727_v62 }
 0x34b   :  { %v1891_v4 = vpop.eup %1890 }
 0x34c   :  { %v729_v7 = vadd.f32 1.0, %v1891_v4 }
 0x34d   :  { %v1893_v9 = vpop.eup %1892 }
 0x34e   :  { %v731_v12 = vmul.f32 %v729_v7, %v729_v7  ;;  %v730_v13 = vadd.f32 1.0, %v1893_v9 }
 0x350   :  { %v737_v16 = vadd.f32 1.0, %v731_v12  ;;  %v732_v17 = vmul.f32 %v730_v13, %v730_v13  ;;  %v1647_v22 = vadd.f32 -1.0, %v731_v12  ;;  %v1661_v13 = vld [vmem:[%s2355_s15] ss:$0 sm:$0xff] }
 0x352   :  { %1894 = vrcp.f32 %v737_v16  ;;  %v738_v19 = vadd.f32 1.0, %v732_v17  ;;  %v1648_v29 = vadd.f32 -1.0, %v732_v17  ;;  %v735_v30 = vmul.f32 %v1647_v22, %v721_v53 }
 0x354   :  { %1896 = vrcp.f32 %v738_v19  ;;  %v736_v37 = vmul.f32 %v1648_v29, %v722_v55 }
 0x35c   :  { %v1895_v33 = vpop.eup %1894 }
 0x35d   :  { %v741_v34 = vmul.f32 %v1895_v33, %v735_v30 }
 0x35e   :  { %v1897_v39 = vpop.eup %1896 }
 0x35f   :  { %v913_v41 = vmul.f32 %v906_v31, %v741_v34  ;;  %v742_v43 = vmul.f32 %v1897_v39, %v736_v37 }
 0x361   :  { %v914_v44 = vmul.f32 %v910_v35, %v742_v43  ;;  %v948_v45 = vadd.f32 %v941_v36, %v913_v41 }
 0x363   :  { %v949_v46 = vadd.f32 %v945_v42, %v914_v44  ;;  %v958_v47 = vrot.slane %v948_v45, 1  ;;  %v952_v53 = vrot.slane %v948_v45, 7 }
 0x365   :  { %v1861_v48 = vpack.i.bf16 %v949_v46, %v948_v45  ;;  %v959_v49 = vrot.slane %v949_v46, 1  ;;  %v962_v50 = vsel %vm89_vm0, %v958_v47, 0.0  ;;  %v953_v54 = vrot.slane %v949_v46, 7 }
 0x366   :  { %v956_v62 = vsel %vm82_vm2, 0.0, %v952_v53 }
 0x367   :  { %1862 = vrot.lane.b32.xlu0 %v1861_v48, %s1912_s1  ;;  %v963_v51 = vsel %vm89_vm0, %v959_v49, 0.0  ;;  %v957_v15 = vsel %vm82_vm2, 0.0, %v953_v54 }
 0x368   :  { %v1866_v52 = vpack.i.bf16 %v963_v51, %v962_v50 }
 0x36a   :  { %1867 = vrot.lane.b32.xlu1 %v1866_v52, %s1913_s4 }
 0x3d9   :  { %v1863_v10 = vpop.permute.xlu0 %1862 }
 0x3da   :  { %v1865_v55 = vunpack.i.h.bf16 %v1863_v10  ;;  %v1864_v59 = vunpack.i.l.bf16 %v1863_v10  ;;  %v1884_v10 = vld [vmem:[%s2356_s18] sm:$0xff]  }
 0x3dc   :  { %v1868_v60 = vpop.permute.xlu1 %1867  ;;  %v978_v7 = vsel %vm106_vm3, %v956_v62, %v1864_v59  ;;  %v979_v8 = vsel %vm106_vm3, %v957_v15, %v1865_v55  ;;  %v1885_v55 = vld [vmem:[%s2357_s19] sm:$0xff]   ;;  %v1560_v62 = vpack.c.bf16 %v2050_v6, %v2039_v2 }
 0x3dd   :  { %v1870_v63 = vunpack.i.h.bf16 %v1868_v60  ;;  %v1869_v4 = vunpack.i.l.bf16 %v1868_v60 }
 0x3df   :  { %v980_v9 = vsel %vm109_vm4, %v978_v7, %v1869_v4  ;;  %v981_v11 = vsel %vm109_vm4, %v979_v8, %v1870_v63 }
 0x3e0   :  { %v982_v12 = vpack.c.bf16 %v981_v11, %v980_v9 }
 0x3e2   :  { %1784 = vmatmul.mubr.msk.bf16.vlgmr.msra.gmra.mrb[12].mxu0 %vm137_vm5, %v982_v12 }
 0x3e3   :  { %1807 = vmatpush3.msra.mxu0 %v2129_v58  ;;  %1808 = vmatprep.mubr.msk.f32.mxu0 %vm1911_vm1, %v1910_v3 }
 0x3e4   :  { %1817 = vmatprep.subr.bf16.mxu0 %v1910_v3 }
 0x4b5   :  { %v1044_v14 = vpop.f32.mrb[12].mxu0 }
 0x4b6   :  { %v2266_v16 = vadd.f32 %v1661_v13, %v1044_v14  ;;  %v1785_v17 = vpop.f32.mrb[13].mxu0 }
 0x4b7   :  { %v1047_v18 = vpop.f32.mrb[14].mxu0 }
 0x4b8   :  { %v1062_v19 = vsel %vm106_vm3, %v2266_v16, 0.0  ;;  %v2270_v20 = vadd.f32 %v1661_v13, %v1047_v18  ;;  %v1786_v61 = vpop.f32.mrb[15].mxu0  ;;  %v1076_v37 = vmul.f32 %v2266_v16, %v2266_v16 }
 0x4b9   :  { %v1063_v21 = vrot.slane %v1062_v19, 4 }
 0x4ba   :  { %v1069_v22 = vsel %vm106_vm3, %v2270_v20, 0.0  ;;  %v1077_v36 = vmul.f32 %v2270_v20, %v2270_v20  ;;  %v1078_v40 = vsel %vm106_vm3, %v1076_v37, 0.0 }
 0x4bb   :  { %v1064_v24 = vadd.f32 %v1063_v21, %v1062_v19  ;;  %v1070_v25 = vrot.slane %v1069_v22, 4  ;;  %v1079_v42 = vrot.slane %v1078_v40, 4 }
 0x4bc   :  { %v1085_v39 = vsel %vm106_vm3, %v1077_v36, 0.0 }
 0x4bd   :  { %v1065_v27 = vrot.slane %v1064_v24, 2  ;;  %v1071_v28 = vadd.f32 %v1070_v25, %v1069_v22  ;;  %v1086_v41 = vrot.slane %v1085_v39, 4  ;;  %v1080_v44 = vadd.f32 %v1079_v42, %v1078_v40 }
 0x4bf   :  { %v1066_v29 = vadd.f32 %v1065_v27, %v1064_v24  ;;  %v1072_v26 = vrot.slane %v1071_v28, 2  ;;  %v1087_v43 = vadd.f32 %v1086_v41, %v1085_v39  ;;  %v1081_v45 = vrot.slane %v1080_v44, 2 }
 0x4c1   :  { %v1067_v30 = vrot.slane %v1066_v29, 1  ;;  %v1073_v31 = vadd.f32 %v1072_v26, %v1071_v28  ;;  %v1082_v47 = vadd.f32 %v1081_v45, %v1080_v44 }
 0x4c3   :  { %v1074_v32 = vrot.slane %v1073_v31, 1  ;;  %v1068_v33 = vadd.f32 %v1067_v30, %v1066_v29 }
 0x4c5   :  { %v1075_v34 = vadd.f32 %v1074_v32, %v1073_v31 }
 0x4c7   :  { %v1094_v35 = vsel %vm328_vm6, %v1075_v34, %v1068_v33 }
 0x4c8   :  { %1792 = vmatmul.mubr.msk.f32.vlgmr.msra.gmra.mrb[12].mxu1 %vm106_vm3, %v1094_v35  ;;  %v1666_v35 = vld [vmem:[%s2358_s16] ss:$0 sm:$0xff] }
 0x4c9   :  { %1795 = vmatpush3.msra.mxu1 %v2129_v58  ;;  %1796 = vmatprep.mubr.msk.f32.mxu1 %vm1911_vm1, %v1910_v3  ;;  %v1088_v58 = vrot.slane %v1087_v43, 2 }
 0x4ca   :  { %1832 = vmatprep.subr.bf16.mxu1 %v1914_v57  ;;  %v1083_v57 = vrot.slane %v1082_v47, 1 }
 0x4cb   :  { %v1089_v46 = vadd.f32 %v1088_v58, %v1087_v43 }
 0x4cc   :  { %v1084_v52 = vadd.f32 %v1083_v57, %v1082_v47 }
 0x4cd   :  { %v1090_v48 = vrot.slane %v1089_v46, 1 }
 0x4cf   :  { %v1091_v50 = vadd.f32 %v1090_v48, %v1089_v46 }
 0x4d1   :  { %v1243_v53 = vsel %vm328_vm6, %v1091_v50, %v1084_v52 }
 0x59b   :  { %v1163_v49 = vpop.f32.mrb[12].mxu1 }
 0x59c   :  { %v1793_v51 = vpop.f32.mrb[13].mxu1  ;;  %1797 = vmatmul.mubr.msk.f32.vlgmr.msra.gmra.mrb[14].mxu1 %vm402_vm9, %v1163_v49 }
 0x59d   :  { %1834 = vmatpush3.bf16.msra.mxu1 %v2121_v56  ;;  %1803 = vmatprep.mubr.msk.f32.mxu1 %vm1911_vm1, %v1910_v3 }
 0x59e   :  { %1811 = vmatprep.subr.bf16.mxu1 %v1910_v3 }
 0x5a0   :  { %1804 = vmatmul.mubr.msk.f32.vlgmr.msra.gmra.mrb[16].mxu1 %vm106_vm3, %v1243_v53  ;;  %v1674_v53 = vld [vmem:[%s2360_s20] ss:$0 sm:$0xff] }
 0x5a1   :  { %1813 = vmatprep.mubr.msk.bf16.mxu1 %vm1911_vm1, %v1910_v3  ;;  %1812 = vmatpush3.bf16.msra.mxu1 %v1884_v10 }
 0x5a4   :  { %1814 = vmatmul.mubr.msk.bf16.vlgmr.msra.gmra.mrb[20].mxu1 %vm106_vm3, %v1507_v5 }
 0x66f   :  { %v1236_v56 = vpop.f32.mrb[14].mxu1 }
 0x670   :  { %v1798_v54 = vpop.f32.mrb[15].mxu1  ;;  %v1240_v63 = vmul.f32 0.0625, %v1236_v56 }
 0x672   :  { %v1390_v7 = vmul.f32 %v1240_v63, %v1240_v63  ;;  %v1400_v21 = vrot.slane %v1240_v63, %v2201_v23 }
 0x673   :  { %v1312_v59 = vpop.f32.mrb[16].mxu1 }
 0x674   :  { %v1805_v60 = vpop.f32.mrb[17].mxu1  ;;  %1809 = vmatmul.mubr.msk.f32.vlgmr.msra.gmra.mrb[16].mxu0 %vm402_vm9, %v1312_v59  ;;  %v1401_v27 = vcombine.high %v1400_v21, %v1400_v21  ;;  %v1408_v28 = vrot.slane %v1400_v21, %v2201_v23 }
 0x675   :  { %1818 = vmatpush3.bf16.msra.mxu0 %v1885_v55  ;;  %1819 = vmatprep.mubr.msk.bf16.mxu0 %vm1911_vm1, %v1910_v3 }
 0x676   :  { %v1415_v29 = vrot.slane %v1401_v27, %v2201_v23  ;;  %v1419_v26 = vrot.slane %v1408_v28, %v2208_v38 }
 0x677   :  { %v1553_v0 = vpop.f32.mrb[20].mxu1 }
 0x678   :  { %1820 = vmatmul.mubr.msk.bf16.vlgmr.msra.gmra.mrb[20].mxu0 %vm106_vm3, %v1560_v62  ;;  %v1815_v1 = vpop.f32.mrb[21].mxu1  ;;  %v1423_v30 = vrot.slane %v1415_v29, %v2208_v38  ;;  %v1426_v32 = vsub.f32 %v2266_v16, %v1419_v26 }
 0x679   :  { %v1556_v5 = vpop.f32.mrb[22].mxu1 }
 0x67a   :  { %v1816_v15 = vpop.f32.mrb[23].mxu1  ;;  %v1427_v36 = vsub.f32 %v2270_v20, %v1423_v30 }
 0x747   :  { %v1385_v4 = vpop.f32.mrb[16].mxu0 }
 0x748   :  { %v1389_v8 = vmul.f32 0.0625, %v1385_v4  ;;  %v1810_v9 = vpop.f32.mrb[17].mxu0 }
 0x74a   :  { %v1391_v11 = vsub.f32 %v1389_v8, %v1390_v7 }
 0x74b   :  { %v1606_v12 = vpop.f32.mrb[20].mxu0 }
 0x74c   :  { %v1392_v13 = vmax.f32 %v1391_v11, 0.0  ;;  %v1613_v14 = vadd.f32 %v1606_v12, %v1553_v0  ;;  %v1821_v2 = vpop.f32.mrb[21].mxu0 }
 0x74d   :  { %v1609_v6 = vpop.f32.mrb[22].mxu0 }
 0x74e   :  { %v1435_v17 = vrot.slane %v1392_v13, %v2201_v23  ;;  %v1614_v3 = vadd.f32 %v1609_v6, %v1556_v5  ;;  %v1822_v18 = vpop.f32.mrb[23].mxu0  ;;  %v1622_v54 = vadd.f32 %v1674_v53, %v1613_v14 }
 0x750   :  { %v1436_v19 = vcombine.high %v1435_v17, %v1435_v17  ;;  %v1443_v61 = vrot.slane %v1435_v17, %v2201_v23  ;;  %v1623_v5 = vadd.f32 %v1674_v53, %v1614_v3 }
 0x752   :  { %v1450_v22 = vrot.slane %v1436_v19, %v2201_v23  ;;  %v1453_v24 = vadd.f32 1e-05, %v1443_v61  ;;  %v1667_v23 = vld [vmem:[%s2359_s17] ss:$0 sm:$0xff] }
 0x754   :  { %v1454_v25 = vadd.f32 1e-05, %v1450_v22  ;;  %1898 = vrsqrt.f32 %v1453_v24 }
 0x756   :  { %1900 = vrsqrt.f32 %v1454_v25 }
 0x75e   :  { %v1899_v31 = vpop.eup %1898 }
 0x75f   :  { %v1462_v33 = vrot.slane %v1899_v31, %v2208_v38 }
 0x760   :  { %v1901_v34 = vpop.eup %1900 }
 0x761   :  { %v1469_v37 = vmul.f32 %v1462_v33, %v1426_v32  ;;  %v1466_v39 = vrot.slane %v1901_v34, %v2208_v38 }
 0x763   :  { %v1477_v40 = vmul.f32 %v1666_v35, %v1469_v37  ;;  %v1470_v41 = vmul.f32 %v1466_v39, %v1427_v36 }
 0x765   :  { %v1485_v42 = vadd.f32 %v1667_v23, %v1477_v40  ;;  %v1478_v16 = vmul.f32 %v1666_v35, %v1470_v41 }
 0x767   :  { %v1487_v43 = vmin.f32 %v1485_v42, 20.0  ;;  %v1486_v44 = vadd.f32 %v1667_v23, %v1478_v16 }
 0x769   :  { %v1489_v58 = vmul.f32 1.442695, %v1487_v43  ;;  %v1488_v45 = vmin.f32 %v1486_v44, 20.0 }
 0x76b   :  { %1902 = vpow2.f32 %v1489_v58  ;;  %v1491_v46 = vmul.f32 1.442695, %v1488_v45 }
 0x76d   :  { %1904 = vpow2.f32 %v1491_v46 }
 0x775   :  { %v1903_v47 = vpop.eup %1902 }
 0x776   :  { %v1493_v20 = vadd.f32 1.0, %v1903_v47 }
 0x777   :  { %v1905_v48 = vpop.eup %1904 }
 0x778   :  { %v1495_v57 = vmul.f32 %v1493_v20, %v1493_v20  ;;  %v1494_v38 = vadd.f32 1.0, %v1905_v48 }
 0x77a   :  { %v1501_v49 = vadd.f32 1.0, %v1495_v57  ;;  %v1496_v50 = vmul.f32 %v1494_v38, %v1494_v38  ;;  %v1668_v52 = vadd.f32 -1.0, %v1495_v57 }
 0x77c   :  { %1906 = vrcp.f32 %v1501_v49  ;;  %v1502_v51 = vadd.f32 1.0, %v1496_v50  ;;  %v1669_v10 = vadd.f32 -1.0, %v1496_v50  ;;  %v1499_v56 = vmul.f32 %v1668_v52, %v1485_v42 }
 0x77e   :  { %1908 = vrcp.f32 %v1502_v51  ;;  %v1500_v60 = vmul.f32 %v1669_v10, %v1486_v44 }
 0x786   :  { %v1907_v55 = vpop.eup %1906 }
 0x787   :  { %v1505_v59 = vmul.f32 %v1907_v55, %v1499_v56 }
 0x788   :  { %v1909_v62 = vpop.eup %1908 }
 0x789   :  { %v1624_v0 = vadd.f32 %v1622_v54, %v1505_v59  ;;  %v1506_v1 = vmul.f32 %v1909_v62, %v1500_v60 }
 0x78b   :  { %1626 = vst.msk [vmem:[%s2361_s21] sm:$0xff] %vm106_vm3, %v1624_v0  ;;  %v1625_v15 = vadd.f32 %v1623_v5, %v1506_v1 }
 0x78d   :  { %1627 = vst.msk [vmem:[%s2361_s21 + $0x8] sm:$0xff] %vm106_vm3, %v1625_v15 }

</bundles_post_ra>
